<compile_context>
chip_gen: v7x
topology: tpu7x:2x2x1
jax: 0.10.0
libtpu: 0.0.40
codegen_flags: <defaults>
</compile_context>

<pallas_src>
import functools

import jax
import jax.numpy as jnp
from jax.experimental import pallas as pl
from jax.experimental.pallas import tpu as pltpu


# Sizes implied by the SimpleCNN classifier (128 * 4 * 4 input features -> 32x32 images).
H0, W0, C0 = 32, 32, 3          # network input (NHWC)
C1, C2, C3 = 32, 64, 128        # conv output channels
K1 = 32                         # 9*3 = 27 padded to 32 (layer-1 im2col depth)
K2 = 9 * C1                     # 288
K3 = 9 * C2                     # 576
FC_IN = C3 * 4 * 4              # 2048
FC_HID = 256
OUT_PAD = 128                   # lane-dense padded logits width


# ----------------------------------------------------------------------------
# Kernel helpers (operate on values, all static shapes)
# ----------------------------------------------------------------------------
def _bias_relu_bn(acc, bss_ref):
    """Conv epilogue: (+bias) -> ReLU -> eval-BatchNorm affine. acc: (M, C) f32."""
    bias = bss_ref[0:1, :]
    scale = bss_ref[1:2, :]
    shift = bss_ref[2:3, :]
    return jnp.maximum(acc + bias, 0.0) * scale + shift


def _maxpool2x2(y, H, W, C):
    """MaxPool2d(2) on a (H*W, C) conv output (rows are row-major (h, w)).

    Returns (H//2, W//2, C). Uses only reshapes + static slices + maxima
    (no strided loads, no scratch round trips).
    """
    y = y.reshape(H // 2, 2 * W, C)                    # group row pairs (layout-preserving)
    y = jnp.maximum(y[:, :W, :], y[:, W:, :])          # pool along H -> (H//2, W, C)
    y = y.reshape(H // 2, W // 2, 2, C)
    y = jnp.maximum(y[:, :, 0, :], y[:, :, 1, :])      # pool along W -> (H//2, W//2, C)
    return y


# ----------------------------------------------------------------------------
# Fused kernel: one image per grid step
# ----------------------------------------------------------------------------
def simple_cnn_kernel(col1_ref, w1_ref, bss1_ref, w2_ref, bss2_ref,
                      w3_ref, bss3_ref, fc1w_ref, fc1b_ref, fc2w_ref, fc2b_ref,
                      out_ref, pad2_scr, col2_scr, pad3_scr, col3_scr):
    """One image: conv-block x3 + classifier, everything resident in VMEM.

    col1_ref: (1, 1024, 32)  bf16  pre-packed im2col of the 32x32x3 input
    wN_ref:   (K, Cout)      bf16  packed conv weights, K = 9*Cin (padded)
    bssN_ref: (3, Cout)      f32   rows = (conv bias, bn scale, bn shift)
    fc1w/fc2w: (2048,256)/(256,128) bf16; fc1b/fc2b: (1,256)/(1,128) f32
    out_ref:  (1, 1, 128)    f32   padded logits (lane-dense store)
    pad2_scr: (18, 18, 32) bf16 | col2_scr: (16, 16, 288) bf16
    pad3_scr: (10, 10, 64) bf16 | col3_scr: (8, 8, 576)  bf16
    """
    # ----- block 1: Conv(3->32) + ReLU + BN + MaxPool -----------------------
    y1 = jnp.dot(col1_ref[0], w1_ref[...], preferred_element_type=jnp.float32)   # (1024, 32)
    y1 = _bias_relu_bn(y1, bss1_ref)
    p1 = _maxpool2x2(y1.astype(jnp.bfloat16), H0, W0, C1)                        # (16,16,32)

    # ----- block 2: Conv(32->64) + ReLU + BN + MaxPool -----------------------
    pad2_scr[...] = jnp.zeros_like(pad2_scr)               # zero-padded conv input
    pad2_scr[pl.ds(1, 16), pl.ds(1, 16), :] = p1
    for t in range(9):                                      # pack im2col: K = 9*32 = 288
        dy, dx = divmod(t, 3)
        col2_scr[:, :, pl.ds(t * C1, C1)] = pad2_scr[pl.ds(dy, 16), pl.ds(dx, 16), :]
    y2 = jnp.dot(col2_scr[...].reshape(16 * 16, K2), w2_ref[...],
                 preferred_element_type=jnp.float32)                             # (256, 64)
    y2 = _bias_relu_bn(y2, bss2_ref)
    p2 = _maxpool2x2(y2.astype(jnp.bfloat16), 16, 16, C2)                        # (8,8,64)

    # ----- block 3: Conv(64->128) + ReLU + BN + MaxPool ----------------------
    pad3_scr[...] = jnp.zeros_like(pad3_scr)
    pad3_scr[pl.ds(1, 8), pl.ds(1, 8), :] = p2
    for t in range(9):                                      # pack im2col: K = 9*64 = 576
        dy, dx = divmod(t, 3)
        col3_scr[:, :, pl.ds(t * C2, C2)] = pad3_scr[pl.ds(dy, 8), pl.ds(dx, 8), :]
    y3 = jnp.dot(col3_scr[...].reshape(8 * 8, K3), w3_ref[...],
                 preferred_element_type=jnp.float32)                             # (64, 128)
    y3 = _bias_relu_bn(y3, bss3_ref)
    p3 = _maxpool2x2(y3.astype(jnp.bfloat16), 8, 8, C3)                          # (4,4,128)

    # ----- classifier: Dropout(eval=id) -> Linear -> ReLU -> Dropout -> Linear
    feat = p3.reshape(1, FC_IN)                                                  # HWC flatten, bf16
    h = jnp.dot(feat, fc1w_ref[...], preferred_element_type=jnp.float32)         # (1, 256)
    h = jnp.maximum(h + fc1b_ref[...], 0.0)
    logits = jnp.dot(h.astype(jnp.bfloat16), fc2w_ref[...],
                     preferred_element_type=jnp.float32) + fc2b_ref[...]          # (1, 128)
    out_ref[0] = logits.astype(out_ref.dtype)


# ----------------------------------------------------------------------------
# Wrapper
# ----------------------------------------------------------------------------
def _im2col_layer1(x_nhwc):
    """3x3 / pad=1 im2col of the raw input: (B,32,32,3) f32 -> (B,1024,32) bf16.

    K = 9*3 = 27 zero-padded to 32 so the contraction depth and lanes are dense.
    """
    B, H, W, C = x_nhwc.shape
    xp = jnp.pad(x_nhwc, ((0, 0), (1, 1), (1, 1), (0, 0)))
    taps = [xp[:, dy:dy + H, dx:dx + W, :] for dy in range(3) for dx in range(3)]
    col = jnp.concatenate(taps, axis=-1)                    # (B, H, W, 27)
    col = jnp.pad(col, ((0, 0), (0, 0), (0, 0), (0, K1 - 9 * C)))
    return col.reshape(B, H * W, K1).astype(jnp.bfloat16)


@functools.partial(jax.jit, static_argnames=("num_classes",))
def simple_cnn_forward(x_nchw, params, *, num_classes=10):
    """Matches SimpleCNN.forward (eval mode). x_nchw: (B, 3, 32, 32)."""
    B = x_nchw.shape[0]
    x = jnp.transpose(x_nchw, (0, 2, 3, 1)).astype(jnp.float32)   # NCHW -> NHWC once
    col1 = _im2col_layer1(x)                                       # (B, 1024, 32) bf16

    w1, bss1 = params["conv0"]
    w2, bss2 = params["conv1"]
    w3, bss3 = params["conv2"]
    fc1w, fc1b = params["fc1"]
    fc2w, fc2b = params["fc2"]

    out = pl.pallas_call(
        simple_cnn_kernel,
        out_shape=jax.ShapeDtypeStruct((B, 1, OUT_PAD), jnp.float32),
        grid=(B,),
        in_specs=[
            pl.BlockSpec((1, H0 * W0, K1), lambda i: (i, 0, 0)),   # per-image im2col
            pl.BlockSpec((K1, C1), lambda i: (0, 0)),              # weights: resident
            pl.BlockSpec((3, C1), lambda i: (0, 0)),
            pl.BlockSpec((K2, C2), lambda i: (0, 0)),
            pl.BlockSpec((3, C2), lambda i: (0, 0)),
            pl.BlockSpec((K3, C3), lambda i: (0, 0)),
            pl.BlockSpec((3, C3), lambda i: (0, 0)),
            pl.BlockSpec((FC_IN, FC_HID), lambda i: (0, 0)),
            pl.BlockSpec((1, FC_HID), lambda i: (0, 0)),
            pl.BlockSpec((FC_HID, OUT_PAD), lambda i: (0, 0)),
            pl.BlockSpec((1, OUT_PAD), lambda i: (0, 0)),
        ],
        out_specs=pl.BlockSpec((1, 1, OUT_PAD), lambda i: (i, 0, 0)),
        scratch_shapes=[
            pltpu.VMEM((18, 18, C1), jnp.bfloat16),    # padded input of conv2
            pltpu.VMEM((16, 16, K2), jnp.bfloat16),    # packed im2col for conv2
            pltpu.VMEM((10, 10, C2), jnp.bfloat16),    # padded input of conv3
            pltpu.VMEM((8, 8, K3), jnp.bfloat16),      # packed im2col for conv3
        ],
        compiler_params=pltpu.CompilerParams(dimension_semantics=("parallel",)),
    )(col1, w1, bss1, w2, bss2, w3, bss3, fc1w, fc1b, fc2w, fc2b)

    return out.reshape(B, OUT_PAD)[:, :num_classes]


# ----------------------------------------------------------------------------
# Parameters (deterministic, synthetic)
# ----------------------------------------------------------------------------
def init_params(key, num_classes=10):
    assert num_classes <= OUT_PAD
    keys = iter(jax.random.split(key, 24))
    params = {}

    cins, couts, kpads = [3, 32, 64], [C1, C2, C3], [K1, K2, K3]
    for i, (cin, cout, kp) in enumerate(zip(cins, couts, kpads)):
        fan_in = 9 * cin
        # Native layout (3,3,Cin,Cout). Real PyTorch Conv2d weights (Cout,Cin,kh,kw)
        # would need w.transpose(2,3,1,0) before this packing.
        w = jax.random.normal(next(keys), (3, 3, cin, cout), jnp.float32) / jnp.sqrt(fan_in)
        b = 0.01 * jax.random.normal(next(keys), (cout,), jnp.float32)
        gamma = 1.0 + 0.1 * jax.random.normal(next(keys), (cout,), jnp.float32)
        beta = 0.1 * jax.random.normal(next(keys), (cout,), jnp.float32)
        rmean = 0.05 * jax.random.normal(next(keys), (cout,), jnp.float32)
        rvar = 1.0 + 0.1 * jnp.abs(jax.random.normal(next(keys), (cout,), jnp.float32))
        scale = gamma / jnp.sqrt(rvar + 1e-5)          # eval-mode BN folded affine
        shift = beta - rmean * scale
        wk = w.reshape(9 * cin, cout)                  # K index = (dy*3+dx)*Cin + cin
        if kp > 9 * cin:
            wk = jnp.pad(wk, ((0, kp - 9 * cin), (0, 0)))
        params[f"conv{i}"] = (wk.astype(jnp.bfloat16),
                              jnp.stack([b, scale, shift]).astype(jnp.float32))

    # fc1 rows are in HWC order so the in-kernel flatten needs no transpose.
    # A real PyTorch fc1 weight Wp (256, 2048) over CHW-flattened inputs would be
    # converted as: Wp.T.reshape(128,4,4,256).transpose(1,2,0,3).reshape(2048,256).
    w1 = jax.random.normal(next(keys), (FC_IN, FC_HID), jnp.float32) / jnp.sqrt(FC_IN)
    b1 = 0.01 * jax.random.normal(next(keys), (FC_HID,), jnp.float32)
    w2 = jax.random.normal(next(keys), (FC_HID, num_classes), jnp.float32) / jnp.sqrt(FC_HID)
    b2 = 0.01 * jax.random.normal(next(keys), (num_classes,), jnp.float32)
    # Pad the classifier output to 128 lanes for a lane-dense final store.
    w2p = jnp.pad(w2, ((0, 0), (0, OUT_PAD - num_classes)))
    b2p = jnp.pad(b2, ((0, OUT_PAD - num_classes),))
    params["fc1"] = (w1.astype(jnp.bfloat16), b1.reshape(1, FC_HID).astype(jnp.float32))
    params["fc2"] = (w2p.astype(jnp.bfloat16), b2p.reshape(1, OUT_PAD).astype(jnp.float32))
    return params


if __name__ == "__main__":
    key = jax.random.PRNGKey(0)
    k_x, k_p = jax.random.split(key)
    # The module's classifier requires 128*4*4 features => 32x32 spatial input.
    x = jax.random.normal(k_x, (2, 3, 32, 32), jnp.float32)
    params = init_params(k_p, num_classes=10)

    out = simple_cnn_forward(x, params, num_classes=10)
    out = jax.block_until_ready(out)
    assert out.shape == (2, 10), out.shape
    assert out.dtype == jnp.float32
    print("KERNEL_OK")
</pallas_src>

<mosaic_0001>
module attributes {stable_mosaic.version = 11 : i64} {
  func.func @simple_cnn_kernel(%arg0: i32, %arg1: memref<1x1024x32xbf16, #tpu.memory_space<vmem>>, %arg2: memref<32x32xbf16, #tpu.memory_space<vmem>>, %arg3: memref<3x32xf32, #tpu.memory_space<vmem>>, %arg4: memref<288x64xbf16, #tpu.memory_space<vmem>>, %arg5: memref<3x64xf32, #tpu.memory_space<vmem>>, %arg6: memref<576x128xbf16, #tpu.memory_space<vmem>>, %arg7: memref<3x128xf32, #tpu.memory_space<vmem>>, %arg8: memref<2048x256xbf16, #tpu.memory_space<vmem>>, %arg9: memref<1x256xf32, #tpu.memory_space<vmem>>, %arg10: memref<256x128xbf16, #tpu.memory_space<vmem>>, %arg11: memref<1x128xf32, #tpu.memory_space<vmem>>, %arg12: memref<1x1x128xf32, #tpu.memory_space<vmem>>, %arg13: memref<18x18x32xbf16, #tpu.memory_space<vmem>>, %arg14: memref<16x16x288xbf16, #tpu.memory_space<vmem>>, %arg15: memref<10x10x64xbf16, #tpu.memory_space<vmem>>, %arg16: memref<8x8x576xbf16, #tpu.memory_space<vmem>>) attributes {dimension_semantics = [#tpu.dimension_semantics<parallel>], iteration_bounds = array<i64: 2>, scalar_prefetch = 0 : i64, scratch_operands = 4 : i64, tpu.core_type = #tpu.core_type<tc>, window_params = [{transform_indices = @transform_0, window_bounds = array<i64: 1, 1024, 32>}, {pipeline_mode = #tpu.pipeline_mode<synchronous>, transform_indices = @transform_1, window_bounds = array<i64: 32, 32>}, {pipeline_mode = #tpu.pipeline_mode<synchronous>, transform_indices = @transform_2, window_bounds = array<i64: 3, 32>}, {pipeline_mode = #tpu.pipeline_mode<synchronous>, transform_indices = @transform_3, window_bounds = array<i64: 288, 64>}, {pipeline_mode = #tpu.pipeline_mode<synchronous>, transform_indices = @transform_4, window_bounds = array<i64: 3, 64>}, {pipeline_mode = #tpu.pipeline_mode<synchronous>, transform_indices = @transform_5, window_bounds = array<i64: 576, 128>}, {pipeline_mode = #tpu.pipeline_mode<synchronous>, transform_indices = @transform_6, window_bounds = array<i64: 3, 128>}, {pipeline_mode = #tpu.pipeline_mode<synchronous>, transform_indices = @transform_7, window_bounds = array<i64: 2048, 256>}, {pipeline_mode = #tpu.pipeline_mode<synchronous>, transform_indices = @transform_8, window_bounds = array<i64: 1, 256>}, {pipeline_mode = #tpu.pipeline_mode<synchronous>, transform_indices = @transform_9, window_bounds = array<i64: 256, 128>}, {pipeline_mode = #tpu.pipeline_mode<synchronous>, transform_indices = @transform_10, window_bounds = array<i64: 1, 128>}, {transform_indices = @transform_11, window_bounds = array<i64: 1, 1, 128>}]} {
    %c0 = arith.constant 0 : index
    %c0_0 = arith.constant 0 : index
    %c0_1 = arith.constant 0 : index
    %0 = vector.load %arg1[%c0, %c0_0, %c0_1] : memref<1x1024x32xbf16, #tpu.memory_space<vmem>>, vector<1x1024x32xbf16>
    %1 = vector.shape_cast %0 : vector<1x1024x32xbf16> to vector<1024x32xbf16>
    %c0_2 = arith.constant 0 : index
    %c0_3 = arith.constant 0 : index
    %2 = vector.load %arg2[%c0_2, %c0_3] : memref<32x32xbf16, #tpu.memory_space<vmem>>, vector<32x32xbf16>
    %cst = arith.constant dense<0.000000e+00> : vector<1024x32xf32>
    %3 = tpu.matmul %1, %2, %cst {dimension_numbers = #tpu.dot_dimension_numbers<[1], [0], [0], [1], [0, 0, 1, 1], [], []>} : vector<1024x32xbf16>, vector<32x32xbf16>, vector<1024x32xf32> -> vector<1024x32xf32>
    %c0_4 = arith.constant 0 : index
    %c0_5 = arith.constant 0 : index
    %4 = vector.load %arg3[%c0_4, %c0_5] : memref<3x32xf32, #tpu.memory_space<vmem>>, vector<1x32xf32>
    %c1 = arith.constant 1 : index
    %c0_6 = arith.constant 0 : index
    %5 = vector.load %arg3[%c1, %c0_6] : memref<3x32xf32, #tpu.memory_space<vmem>>, vector<1x32xf32>
    %c2 = arith.constant 2 : index
    %c0_7 = arith.constant 0 : index
    %6 = vector.load %arg3[%c2, %c0_7] : memref<3x32xf32, #tpu.memory_space<vmem>>, vector<1x32xf32>
    %7 = vector.broadcast %4 : vector<1x32xf32> to vector<1024x32xf32>
    %8 = arith.addf %3, %7 : vector<1024x32xf32>
    %cst_8 = arith.constant 0.000000e+00 : f32
    %9 = vector.broadcast %cst_8 : f32 to vector<1024x32xf32>
    %10 = arith.maximumf %8, %9 : vector<1024x32xf32>
    %11 = vector.broadcast %5 : vector<1x32xf32> to vector<1024x32xf32>
    %12 = arith.mulf %10, %11 : vector<1024x32xf32>
    %13 = vector.broadcast %6 : vector<1x32xf32> to vector<1024x32xf32>
    %14 = arith.addf %12, %13 : vector<1024x32xf32>
    %15 = arith.truncf %14 : vector<1024x32xf32> to vector<1024x32xbf16>
    %16 = vector.shape_cast %15 : vector<1024x32xbf16> to vector<16x64x32xbf16>
    %17 = vector.extract_strided_slice %16 {offsets = [0, 0, 0], sizes = [16, 32, 32], strides = [1, 1, 1]} : vector<16x64x32xbf16> to vector<16x32x32xbf16>
    %18 = vector.extract_strided_slice %16 {offsets = [0, 32, 0], sizes = [16, 32, 32], strides = [1, 1, 1]} : vector<16x64x32xbf16> to vector<16x32x32xbf16>
    %19 = arith.maximumf %17, %18 : vector<16x32x32xbf16>
    %20 = vector.shape_cast %19 : vector<16x32x32xbf16> to vector<16x16x2x32xbf16>
    %21 = vector.extract_strided_slice %20 {offsets = [0, 0, 0, 0], sizes = [16, 16, 1, 32], strides = [1, 1, 1, 1]} : vector<16x16x2x32xbf16> to vector<16x16x1x32xbf16>
    %22 = vector.shape_cast %21 : vector<16x16x1x32xbf16> to vector<16x16x32xbf16>
    %23 = vector.extract_strided_slice %20 {offsets = [0, 0, 1, 0], sizes = [16, 16, 1, 32], strides = [1, 1, 1, 1]} : vector<16x16x2x32xbf16> to vector<16x16x1x32xbf16>
    %24 = vector.shape_cast %23 : vector<16x16x1x32xbf16> to vector<16x16x32xbf16>
    %25 = arith.maximumf %22, %24 : vector<16x16x32xbf16>
    %cst_9 = arith.constant 0.000000e+00 : bf16
    %26 = vector.broadcast %cst_9 : bf16 to vector<18x18x32xbf16>
    %c0_10 = arith.constant 0 : index
    %c0_11 = arith.constant 0 : index
    %c0_12 = arith.constant 0 : index
    %27 = vector.load %arg13[%c0_10, %c0_11, %c0_12] : memref<18x18x32xbf16, #tpu.memory_space<vmem>>, vector<18x18x32xbf16>
    tpu.vector_store %arg13[%c0_10, %c0_11, %c0_12], %26 {strides = array<i32>} : memref<18x18x32xbf16, #tpu.memory_space<vmem>>, vector<18x18x32xbf16>,
    %c1_13 = arith.constant 1 : index
    %c1_14 = arith.constant 1 : index
    %c0_15 = arith.constant 0 : index
    %28 = vector.load %arg13[%c1_13, %c1_14, %c0_15] : memref<18x18x32xbf16, #tpu.memory_space<vmem>>, vector<16x16x32xbf16>
    tpu.vector_store %arg13[%c1_13, %c1_14, %c0_15], %25 {strides = array<i32>} : memref<18x18x32xbf16, #tpu.memory_space<vmem>>, vector<16x16x32xbf16>,
    %c0_16 = arith.constant 0 : index
    %c0_17 = arith.constant 0 : index
    %c0_18 = arith.constant 0 : index
    %29 = vector.load %arg13[%c0_16, %c0_17, %c0_18] : memref<18x18x32xbf16, #tpu.memory_space<vmem>>, vector<16x16x32xbf16>
    %c0_19 = arith.constant 0 : index
    %c0_20 = arith.constant 0 : index
    %c0_21 = arith.constant 0 : index
    %30 = vector.load %arg14[%c0_19, %c0_20, %c0_21] : memref<16x16x288xbf16, #tpu.memory_space<vmem>>, vector<16x16x32xbf16>
    tpu.vector_store %arg14[%c0_19, %c0_20, %c0_21], %29 {strides = array<i32>} : memref<16x16x288xbf16, #tpu.memory_space<vmem>>, vector<16x16x32xbf16>,
    %c0_22 = arith.constant 0 : index
    %c1_23 = arith.constant 1 : index
    %c0_24 = arith.constant 0 : index
    %31 = vector.load %arg13[%c0_22, %c1_23, %c0_24] : memref<18x18x32xbf16, #tpu.memory_space<vmem>>, vector<16x16x32xbf16>
    %c0_25 = arith.constant 0 : index
    %c0_26 = arith.constant 0 : index
    %c32 = arith.constant 32 : index
    %32 = vector.load %arg14[%c0_25, %c0_26, %c32] : memref<16x16x288xbf16, #tpu.memory_space<vmem>>, vector<16x16x32xbf16>
    tpu.vector_store %arg14[%c0_25, %c0_26, %c32], %31 {strides = array<i32>} : memref<16x16x288xbf16, #tpu.memory_space<vmem>>, vector<16x16x32xbf16>,
    %c0_27 = arith.constant 0 : index
    %c2_28 = arith.constant 2 : index
    %c0_29 = arith.constant 0 : index
    %33 = vector.load %arg13[%c0_27, %c2_28, %c0_29] : memref<18x18x32xbf16, #tpu.memory_space<vmem>>, vector<16x16x32xbf16>
    %c0_30 = arith.constant 0 : index
    %c0_31 = arith.constant 0 : index
    %c64 = arith.constant 64 : index
    %34 = vector.load %arg14[%c0_30, %c0_31, %c64] : memref<16x16x288xbf16, #tpu.memory_space<vmem>>, vector<16x16x32xbf16>
    tpu.vector_store %arg14[%c0_30, %c0_31, %c64], %33 {strides = array<i32>} : memref<16x16x288xbf16, #tpu.memory_space<vmem>>, vector<16x16x32xbf16>,
    %c1_32 = arith.constant 1 : index
    %c0_33 = arith.constant 0 : index
    %c0_34 = arith.constant 0 : index
    %35 = vector.load %arg13[%c1_32, %c0_33, %c0_34] : memref<18x18x32xbf16, #tpu.memory_space<vmem>>, vector<16x16x32xbf16>
    %c0_35 = arith.constant 0 : index
    %c0_36 = arith.constant 0 : index
    %c96 = arith.constant 96 : index
    %36 = vector.load %arg14[%c0_35, %c0_36, %c96] : memref<16x16x288xbf16, #tpu.memory_space<vmem>>, vector<16x16x32xbf16>
    tpu.vector_store %arg14[%c0_35, %c0_36, %c96], %35 {strides = array<i32>} : memref<16x16x288xbf16, #tpu.memory_space<vmem>>, vector<16x16x32xbf16>,
    %c1_37 = arith.constant 1 : index
    %c1_38 = arith.constant 1 : index
    %c0_39 = arith.constant 0 : index
    %37 = vector.load %arg13[%c1_37, %c1_38, %c0_39] : memref<18x18x32xbf16, #tpu.memory_space<vmem>>, vector<16x16x32xbf16>
    %c0_40 = arith.constant 0 : index
    %c0_41 = arith.constant 0 : index
    %c128 = arith.constant 128 : index
    %38 = vector.load %arg14[%c0_40, %c0_41, %c128] : memref<16x16x288xbf16, #tpu.memory_space<vmem>>, vector<16x16x32xbf16>
    tpu.vector_store %arg14[%c0_40, %c0_41, %c128], %37 {strides = array<i32>} : memref<16x16x288xbf16, #tpu.memory_space<vmem>>, vector<16x16x32xbf16>,
    %c1_42 = arith.constant 1 : index
    %c2_43 = arith.constant 2 : index
    %c0_44 = arith.constant 0 : index
    %39 = vector.load %arg13[%c1_42, %c2_43, %c0_44] : memref<18x18x32xbf16, #tpu.memory_space<vmem>>, vector<16x16x32xbf16>
    %c0_45 = arith.constant 0 : index
    %c0_46 = arith.constant 0 : index
    %c160 = arith.constant 160 : index
    %40 = vector.load %arg14[%c0_45, %c0_46, %c160] : memref<16x16x288xbf16, #tpu.memory_space<vmem>>, vector<16x16x32xbf16>
    tpu.vector_store %arg14[%c0_45, %c0_46, %c160], %39 {strides = array<i32>} : memref<16x16x288xbf16, #tpu.memory_space<vmem>>, vector<16x16x32xbf16>,
    %c2_47 = arith.constant 2 : index
    %c0_48 = arith.constant 0 : index
    %c0_49 = arith.constant 0 : index
    %41 = vector.load %arg13[%c2_47, %c0_48, %c0_49] : memref<18x18x32xbf16, #tpu.memory_space<vmem>>, vector<16x16x32xbf16>
    %c0_50 = arith.constant 0 : index
    %c0_51 = arith.constant 0 : index
    %c192 = arith.constant 192 : index
    %42 = vector.load %arg14[%c0_50, %c0_51, %c192] : memref<16x16x288xbf16, #tpu.memory_space<vmem>>, vector<16x16x32xbf16>
    tpu.vector_store %arg14[%c0_50, %c0_51, %c192], %41 {strides = array<i32>} : memref<16x16x288xbf16, #tpu.memory_space<vmem>>, vector<16x16x32xbf16>,
    %c2_52 = arith.constant 2 : index
    %c1_53 = arith.constant 1 : index
    %c0_54 = arith.constant 0 : index
    %43 = vector.load %arg13[%c2_52, %c1_53, %c0_54] : memref<18x18x32xbf16, #tpu.memory_space<vmem>>, vector<16x16x32xbf16>
    %c0_55 = arith.constant 0 : index
    %c0_56 = arith.constant 0 : index
    %c224 = arith.constant 224 : index
    %44 = vector.load %arg14[%c0_55, %c0_56, %c224] : memref<16x16x288xbf16, #tpu.memory_space<vmem>>, vector<16x16x32xbf16>
    tpu.vector_store %arg14[%c0_55, %c0_56, %c224], %43 {strides = array<i32>} : memref<16x16x288xbf16, #tpu.memory_space<vmem>>, vector<16x16x32xbf16>,
    %c2_57 = arith.constant 2 : index
    %c2_58 = arith.constant 2 : index
    %c0_59 = arith.constant 0 : index
    %45 = vector.load %arg13[%c2_57, %c2_58, %c0_59] : memref<18x18x32xbf16, #tpu.memory_space<vmem>>, vector<16x16x32xbf16>
    %c0_60 = arith.constant 0 : index
    %c0_61 = arith.constant 0 : index
    %c256 = arith.constant 256 : index
    %46 = vector.load %arg14[%c0_60, %c0_61, %c256] : memref<16x16x288xbf16, #tpu.memory_space<vmem>>, vector<16x16x32xbf16>
    tpu.vector_store %arg14[%c0_60, %c0_61, %c256], %45 {strides = array<i32>} : memref<16x16x288xbf16, #tpu.memory_space<vmem>>, vector<16x16x32xbf16>,
    %c0_62 = arith.constant 0 : index
    %c0_63 = arith.constant 0 : index
    %c0_64 = arith.constant 0 : index
    %47 = vector.load %arg14[%c0_62, %c0_63, %c0_64] : memref<16x16x288xbf16, #tpu.memory_space<vmem>>, vector<16x16x288xbf16>
    %48 = vector.shape_cast %47 : vector<16x16x288xbf16> to vector<256x288xbf16>
    %c0_65 = arith.constant 0 : index
    %c0_66 = arith.constant 0 : index
    %49 = vector.load %arg4[%c0_65, %c0_66] : memref<288x64xbf16, #tpu.memory_space<vmem>>, vector<288x64xbf16>
    %cst_67 = arith.constant dense<0.000000e+00> : vector<256x64xf32>
    %50 = tpu.matmul %48, %49, %cst_67 {dimension_numbers = #tpu.dot_dimension_numbers<[1], [0], [0], [1], [0, 0, 1, 1], [], []>} : vector<256x288xbf16>, vector<288x64xbf16>, vector<256x64xf32> -> vector<256x64xf32>
    %c0_68 = arith.constant 0 : index
    %c0_69 = arith.constant 0 : index
    %51 = vector.load %arg5[%c0_68, %c0_69] : memref<3x64xf32, #tpu.memory_space<vmem>>, vector<1x64xf32>
    %c1_70 = arith.constant 1 : index
    %c0_71 = arith.constant 0 : index
    %52 = vector.load %arg5[%c1_70, %c0_71] : memref<3x64xf32, #tpu.memory_space<vmem>>, vector<1x64xf32>
    %c2_72 = arith.constant 2 : index
    %c0_73 = arith.constant 0 : index
    %53 = vector.load %arg5[%c2_72, %c0_73] : memref<3x64xf32, #tpu.memory_space<vmem>>, vector<1x64xf32>
    %54 = vector.broadcast %51 : vector<1x64xf32> to vector<256x64xf32>
    %55 = arith.addf %50, %54 : vector<256x64xf32>
    %cst_74 = arith.constant 0.000000e+00 : f32
    %56 = vector.broadcast %cst_74 : f32 to vector<256x64xf32>
    %57 = arith.maximumf %55, %56 : vector<256x64xf32>
    %58 = vector.broadcast %52 : vector<1x64xf32> to vector<256x64xf32>
    %59 = arith.mulf %57, %58 : vector<256x64xf32>
    %60 = vector.broadcast %53 : vector<1x64xf32> to vector<256x64xf32>
    %61 = arith.addf %59, %60 : vector<256x64xf32>
    %62 = arith.truncf %61 : vector<256x64xf32> to vector<256x64xbf16>
    %63 = vector.shape_cast %62 : vector<256x64xbf16> to vector<8x32x64xbf16>
    %64 = vector.extract_strided_slice %63 {offsets = [0, 0, 0], sizes = [8, 16, 64], strides = [1, 1, 1]} : vector<8x32x64xbf16> to vector<8x16x64xbf16>
    %65 = vector.extract_strided_slice %63 {offsets = [0, 16, 0], sizes = [8, 16, 64], strides = [1, 1, 1]} : vector<8x32x64xbf16> to vector<8x16x64xbf16>
    %66 = arith.maximumf %64, %65 : vector<8x16x64xbf16>
    %67 = vector.shape_cast %66 : vector<8x16x64xbf16> to vector<8x8x2x64xbf16>
    %68 = vector.extract_strided_slice %67 {offsets = [0, 0, 0, 0], sizes = [8, 8, 1, 64], strides = [1, 1, 1, 1]} : vector<8x8x2x64xbf16> to vector<8x8x1x64xbf16>
    %69 = vector.shape_cast %68 : vector<8x8x1x64xbf16> to vector<8x8x64xbf16>
    %70 = vector.extract_strided_slice %67 {offsets = [0, 0, 1, 0], sizes = [8, 8, 1, 64], strides = [1, 1, 1, 1]} : vector<8x8x2x64xbf16> to vector<8x8x1x64xbf16>
    %71 = vector.shape_cast %70 : vector<8x8x1x64xbf16> to vector<8x8x64xbf16>
    %72 = arith.maximumf %69, %71 : vector<8x8x64xbf16>
    %cst_75 = arith.constant 0.000000e+00 : bf16
    %73 = vector.broadcast %cst_75 : bf16 to vector<10x10x64xbf16>
    %c0_76 = arith.constant 0 : index
    %c0_77 = arith.constant 0 : index
    %c0_78 = arith.constant 0 : index
    %74 = vector.load %arg15[%c0_76, %c0_77, %c0_78] : memref<10x10x64xbf16, #tpu.memory_space<vmem>>, vector<10x10x64xbf16>
    tpu.vector_store %arg15[%c0_76, %c0_77, %c0_78], %73 {strides = array<i32>} : memref<10x10x64xbf16, #tpu.memory_space<vmem>>, vector<10x10x64xbf16>,
    %c1_79 = arith.constant 1 : index
    %c1_80 = arith.constant 1 : index
    %c0_81 = arith.constant 0 : index
    %75 = vector.load %arg15[%c1_79, %c1_80, %c0_81] : memref<10x10x64xbf16, #tpu.memory_space<vmem>>, vector<8x8x64xbf16>
    tpu.vector_store %arg15[%c1_79, %c1_80, %c0_81], %72 {strides = array<i32>} : memref<10x10x64xbf16, #tpu.memory_space<vmem>>, vector<8x8x64xbf16>,
    %c0_82 = arith.constant 0 : index
    %c0_83 = arith.constant 0 : index
    %c0_84 = arith.constant 0 : index
    %76 = vector.load %arg15[%c0_82, %c0_83, %c0_84] : memref<10x10x64xbf16, #tpu.memory_space<vmem>>, vector<8x8x64xbf16>
    %c0_85 = arith.constant 0 : index
    %c0_86 = arith.constant 0 : index
    %c0_87 = arith.constant 0 : index
    %77 = vector.load %arg16[%c0_85, %c0_86, %c0_87] : memref<8x8x576xbf16, #tpu.memory_space<vmem>>, vector<8x8x64xbf16>
    tpu.vector_store %arg16[%c0_85, %c0_86, %c0_87], %76 {strides = array<i32>} : memref<8x8x576xbf16, #tpu.memory_space<vmem>>, vector<8x8x64xbf16>,
    %c0_88 = arith.constant 0 : index
    %c1_89 = arith.constant 1 : index
    %c0_90 = arith.constant 0 : index
    %78 = vector.load %arg15[%c0_88, %c1_89, %c0_90] : memref<10x10x64xbf16, #tpu.memory_space<vmem>>, vector<8x8x64xbf16>
    %c0_91 = arith.constant 0 : index
    %c0_92 = arith.constant 0 : index
    %c64_93 = arith.constant 64 : index
    %79 = vector.load %arg16[%c0_91, %c0_92, %c64_93] : memref<8x8x576xbf16, #tpu.memory_space<vmem>>, vector<8x8x64xbf16>
    tpu.vector_store %arg16[%c0_91, %c0_92, %c64_93], %78 {strides = array<i32>} : memref<8x8x576xbf16, #tpu.memory_space<vmem>>, vector<8x8x64xbf16>,
    %c0_94 = arith.constant 0 : index
    %c2_95 = arith.constant 2 : index
    %c0_96 = arith.constant 0 : index
    %80 = vector.load %arg15[%c0_94, %c2_95, %c0_96] : memref<10x10x64xbf16, #tpu.memory_space<vmem>>, vector<8x8x64xbf16>
    %c0_97 = arith.constant 0 : index
    %c0_98 = arith.constant 0 : index
    %c128_99 = arith.constant 128 : index
    %81 = vector.load %arg16[%c0_97, %c0_98, %c128_99] : memref<8x8x576xbf16, #tpu.memory_space<vmem>>, vector<8x8x64xbf16>
    tpu.vector_store %arg16[%c0_97, %c0_98, %c128_99], %80 {strides = array<i32>} : memref<8x8x576xbf16, #tpu.memory_space<vmem>>, vector<8x8x64xbf16>,
    %c1_100 = arith.constant 1 : index
    %c0_101 = arith.constant 0 : index
    %c0_102 = arith.constant 0 : index
    %82 = vector.load %arg15[%c1_100, %c0_101, %c0_102] : memref<10x10x64xbf16, #tpu.memory_space<vmem>>, vector<8x8x64xbf16>
    %c0_103 = arith.constant 0 : index
    %c0_104 = arith.constant 0 : index
    %c192_105 = arith.constant 192 : index
    %83 = vector.load %arg16[%c0_103, %c0_104, %c192_105] : memref<8x8x576xbf16, #tpu.memory_space<vmem>>, vector<8x8x64xbf16>
    tpu.vector_store %arg16[%c0_103, %c0_104, %c192_105], %82 {strides = array<i32>} : memref<8x8x576xbf16, #tpu.memory_space<vmem>>, vector<8x8x64xbf16>,
    %c1_106 = arith.constant 1 : index
    %c1_107 = arith.constant 1 : index
    %c0_108 = arith.constant 0 : index
    %84 = vector.load %arg15[%c1_106, %c1_107, %c0_108] : memref<10x10x64xbf16, #tpu.memory_space<vmem>>, vector<8x8x64xbf16>
    %c0_109 = arith.constant 0 : index
    %c0_110 = arith.constant 0 : index
    %c256_111 = arith.constant 256 : index
    %85 = vector.load %arg16[%c0_109, %c0_110, %c256_111] : memref<8x8x576xbf16, #tpu.memory_space<vmem>>, vector<8x8x64xbf16>
    tpu.vector_store %arg16[%c0_109, %c0_110, %c256_111], %84 {strides = array<i32>} : memref<8x8x576xbf16, #tpu.memory_space<vmem>>, vector<8x8x64xbf16>,
    %c1_112 = arith.constant 1 : index
    %c2_113 = arith.constant 2 : index
    %c0_114 = arith.constant 0 : index
    %86 = vector.load %arg15[%c1_112, %c2_113, %c0_114] : memref<10x10x64xbf16, #tpu.memory_space<vmem>>, vector<8x8x64xbf16>
    %c0_115 = arith.constant 0 : index
    %c0_116 = arith.constant 0 : index
    %c320 = arith.constant 320 : index
    %87 = vector.load %arg16[%c0_115, %c0_116, %c320] : memref<8x8x576xbf16, #tpu.memory_space<vmem>>, vector<8x8x64xbf16>
    tpu.vector_store %arg16[%c0_115, %c0_116, %c320], %86 {strides = array<i32>} : memref<8x8x576xbf16, #tpu.memory_space<vmem>>, vector<8x8x64xbf16>,
    %c2_117 = arith.constant 2 : index
    %c0_118 = arith.constant 0 : index
    %c0_119 = arith.constant 0 : index
    %88 = vector.load %arg15[%c2_117, %c0_118, %c0_119] : memref<10x10x64xbf16, #tpu.memory_space<vmem>>, vector<8x8x64xbf16>
    %c0_120 = arith.constant 0 : index
    %c0_121 = arith.constant 0 : index
    %c384 = arith.constant 384 : index
    %89 = vector.load %arg16[%c0_120, %c0_121, %c384] : memref<8x8x576xbf16, #tpu.memory_space<vmem>>, vector<8x8x64xbf16>
    tpu.vector_store %arg16[%c0_120, %c0_121, %c384], %88 {strides = array<i32>} : memref<8x8x576xbf16, #tpu.memory_space<vmem>>, vector<8x8x64xbf16>,
    %c2_122 = arith.constant 2 : index
    %c1_123 = arith.constant 1 : index
    %c0_124 = arith.constant 0 : index
    %90 = vector.load %arg15[%c2_122, %c1_123, %c0_124] : memref<10x10x64xbf16, #tpu.memory_space<vmem>>, vector<8x8x64xbf16>
    %c0_125 = arith.constant 0 : index
    %c0_126 = arith.constant 0 : index
    %c448 = arith.constant 448 : index
    %91 = vector.load %arg16[%c0_125, %c0_126, %c448] : memref<8x8x576xbf16, #tpu.memory_space<vmem>>, vector<8x8x64xbf16>
    tpu.vector_store %arg16[%c0_125, %c0_126, %c448], %90 {strides = array<i32>} : memref<8x8x576xbf16, #tpu.memory_space<vmem>>, vector<8x8x64xbf16>,
    %c2_127 = arith.constant 2 : index
    %c2_128 = arith.constant 2 : index
    %c0_129 = arith.constant 0 : index
    %92 = vector.load %arg15[%c2_127, %c2_128, %c0_129] : memref<10x10x64xbf16, #tpu.memory_space<vmem>>, vector<8x8x64xbf16>
    %c0_130 = arith.constant 0 : index
    %c0_131 = arith.constant 0 : index
    %c512 = arith.constant 512 : index
    %93 = vector.load %arg16[%c0_130, %c0_131, %c512] : memref<8x8x576xbf16, #tpu.memory_space<vmem>>, vector<8x8x64xbf16>
    tpu.vector_store %arg16[%c0_130, %c0_131, %c512], %92 {strides = array<i32>} : memref<8x8x576xbf16, #tpu.memory_space<vmem>>, vector<8x8x64xbf16>,
    %c0_132 = arith.constant 0 : index
    %c0_133 = arith.constant 0 : index
    %c0_134 = arith.constant 0 : index
    %94 = vector.load %arg16[%c0_132, %c0_133, %c0_134] : memref<8x8x576xbf16, #tpu.memory_space<vmem>>, vector<8x8x576xbf16>
    %95 = vector.shape_cast %94 : vector<8x8x576xbf16> to vector<64x576xbf16>
    %c0_135 = arith.constant 0 : index
    %c0_136 = arith.constant 0 : index
    %96 = vector.load %arg6[%c0_135, %c0_136] : memref<576x128xbf16, #tpu.memory_space<vmem>>, vector<576x128xbf16>
    %cst_137 = arith.constant dense<0.000000e+00> : vector<64x128xf32>
    %97 = tpu.matmul %95, %96, %cst_137 {dimension_numbers = #tpu.dot_dimension_numbers<[1], [0], [0], [1], [0, 0, 1, 1], [], []>} : vector<64x576xbf16>, vector<576x128xbf16>, vector<64x128xf32> -> vector<64x128xf32>
    %c0_138 = arith.constant 0 : index
    %c0_139 = arith.constant 0 : index
    %98 = vector.load %arg7[%c0_138, %c0_139] : memref<3x128xf32, #tpu.memory_space<vmem>>, vector<1x128xf32>
    %c1_140 = arith.constant 1 : index
    %c0_141 = arith.constant 0 : index
    %99 = vector.load %arg7[%c1_140, %c0_141] : memref<3x128xf32, #tpu.memory_space<vmem>>, vector<1x128xf32>
    %c2_142 = arith.constant 2 : index
    %c0_143 = arith.constant 0 : index
    %100 = vector.load %arg7[%c2_142, %c0_143] : memref<3x128xf32, #tpu.memory_space<vmem>>, vector<1x128xf32>
    %101 = vector.broadcast %98 : vector<1x128xf32> to vector<64x128xf32>
    %102 = arith.addf %97, %101 : vector<64x128xf32>
    %cst_144 = arith.constant 0.000000e+00 : f32
    %103 = vector.broadcast %cst_144 : f32 to vector<64x128xf32>
    %104 = arith.maximumf %102, %103 : vector<64x128xf32>
    %105 = vector.broadcast %99 : vector<1x128xf32> to vector<64x128xf32>
    %106 = arith.mulf %104, %105 : vector<64x128xf32>
    %107 = vector.broadcast %100 : vector<1x128xf32> to vector<64x128xf32>
    %108 = arith.addf %106, %107 : vector<64x128xf32>
    %109 = arith.truncf %108 : vector<64x128xf32> to vector<64x128xbf16>
    %110 = vector.shape_cast %109 : vector<64x128xbf16> to vector<4x16x128xbf16>
    %111 = vector.extract_strided_slice %110 {offsets = [0, 0, 0], sizes = [4, 8, 128], strides = [1, 1, 1]} : vector<4x16x128xbf16> to vector<4x8x128xbf16>
    %112 = vector.extract_strided_slice %110 {offsets = [0, 8, 0], sizes = [4, 8, 128], strides = [1, 1, 1]} : vector<4x16x128xbf16> to vector<4x8x128xbf16>
    %113 = arith.maximumf %111, %112 : vector<4x8x128xbf16>
    %114 = vector.shape_cast %113 : vector<4x8x128xbf16> to vector<4x4x2x128xbf16>
    %115 = vector.extract_strided_slice %114 {offsets = [0, 0, 0, 0], sizes = [4, 4, 1, 128], strides = [1, 1, 1, 1]} : vector<4x4x2x128xbf16> to vector<4x4x1x128xbf16>
    %116 = vector.shape_cast %115 : vector<4x4x1x128xbf16> to vector<4x4x128xbf16>
    %117 = vector.extract_strided_slice %114 {offsets = [0, 0, 1, 0], sizes = [4, 4, 1, 128], strides = [1, 1, 1, 1]} : vector<4x4x2x128xbf16> to vector<4x4x1x128xbf16>
    %118 = vector.shape_cast %117 : vector<4x4x1x128xbf16> to vector<4x4x128xbf16>
    %119 = arith.maximumf %116, %118 : vector<4x4x128xbf16>
    %120 = vector.shape_cast %119 : vector<4x4x128xbf16> to vector<1x2048xbf16>
    %c0_145 = arith.constant 0 : index
    %c0_146 = arith.constant 0 : index
    %121 = vector.load %arg8[%c0_145, %c0_146] : memref<2048x256xbf16, #tpu.memory_space<vmem>>, vector<2048x256xbf16>
    %cst_147 = arith.constant dense<0.000000e+00> : vector<1x256xf32>
    %122 = tpu.matmul %120, %121, %cst_147 {dimension_numbers = #tpu.dot_dimension_numbers<[1], [0], [0], [1], [0, 0, 1, 1], [], []>} : vector<1x2048xbf16>, vector<2048x256xbf16>, vector<1x256xf32> -> vector<1x256xf32>
    %c0_148 = arith.constant 0 : index
    %c0_149 = arith.constant 0 : index
    %123 = vector.load %arg9[%c0_148, %c0_149] : memref<1x256xf32, #tpu.memory_space<vmem>>, vector<1x256xf32>
    %124 = arith.addf %122, %123 : vector<1x256xf32>
    %cst_150 = arith.constant 0.000000e+00 : f32
    %125 = vector.broadcast %cst_150 : f32 to vector<1x256xf32>
    %126 = arith.maximumf %124, %125 : vector<1x256xf32>
    %127 = arith.truncf %126 : vector<1x256xf32> to vector<1x256xbf16>
    %c0_151 = arith.constant 0 : index
    %c0_152 = arith.constant 0 : index
    %128 = vector.load %arg10[%c0_151, %c0_152] : memref<256x128xbf16, #tpu.memory_space<vmem>>, vector<256x128xbf16>
    %cst_153 = arith.constant dense<0.000000e+00> : vector<1x128xf32>
    %129 = tpu.matmul %127, %128, %cst_153 {dimension_numbers = #tpu.dot_dimension_numbers<[1], [0], [0], [1], [0, 0, 1, 1], [], []>} : vector<1x256xbf16>, vector<256x128xbf16>, vector<1x128xf32> -> vector<1x128xf32>
    %c0_154 = arith.constant 0 : index
    %c0_155 = arith.constant 0 : index
    %130 = vector.load %arg11[%c0_154, %c0_155] : memref<1x128xf32, #tpu.memory_space<vmem>>, vector<1x128xf32>
    %131 = arith.addf %129, %130 : vector<1x128xf32>
    %c0_156 = arith.constant 0 : index
    %c0_157 = arith.constant 0 : index
    %c0_158 = arith.constant 0 : index
    %132 = vector.load %arg12[%c0_156, %c0_157, %c0_158] : memref<1x1x128xf32, #tpu.memory_space<vmem>>, vector<1x1x128xf32>
    %133 = vector.shape_cast %132 : vector<1x1x128xf32> to vector<1x128xf32>
    %134 = vector.shape_cast %131 : vector<1x128xf32> to vector<1x1x128xf32>
    tpu.vector_store %arg12[%c0_156, %c0_157, %c0_158], %134 {strides = array<i32>} : memref<1x1x128xf32, #tpu.memory_space<vmem>>, vector<1x1x128xf32>,
    return
  }
  func.func @transform_0(%arg0: i32) -> (i32, i32, i32) {
    %c0_i32 = arith.constant 0 : i32
    %c0_i32_0 = arith.constant 0 : i32
    %c0_i32_1 = arith.constant 0 : i32
    return %arg0, %c0_i32, %c0_i32_0 : i32, i32, i32
  }
  func.func @transform_1(%arg0: i32) -> (i32, i32) {
    %c0_i32 = arith.constant 0 : i32
    %c0_i32_0 = arith.constant 0 : i32
    %c0_i32_1 = arith.constant 0 : i32
    return %c0_i32, %c0_i32_0 : i32, i32
  }
  func.func @transform_2(%arg0: i32) -> (i32, i32) {
    %c0_i32 = arith.constant 0 : i32
    %c0_i32_0 = arith.constant 0 : i32
    %c0_i32_1 = arith.constant 0 : i32
    return %c0_i32, %c0_i32_0 : i32, i32
  }
  func.func @transform_3(%arg0: i32) -> (i32, i32) {
    %c0_i32 = arith.constant 0 : i32
    %c0_i32_0 = arith.constant 0 : i32
    %c0_i32_1 = arith.constant 0 : i32
    return %c0_i32, %c0_i32_0 : i32, i32
  }
  func.func @transform_4(%arg0: i32) -> (i32, i32) {
    %c0_i32 = arith.constant 0 : i32
    %c0_i32_0 = arith.constant 0 : i32
    %c0_i32_1 = arith.constant 0 : i32
    return %c0_i32, %c0_i32_0 : i32, i32
  }
  func.func @transform_5(%arg0: i32) -> (i32, i32) {
    %c0_i32 = arith.constant 0 : i32
    %c0_i32_0 = arith.constant 0 : i32
    %c0_i32_1 = arith.constant 0 : i32
    return %c0_i32, %c0_i32_0 : i32, i32
  }
  func.func @transform_6(%arg0: i32) -> (i32, i32) {
    %c0_i32 = arith.constant 0 : i32
    %c0_i32_0 = arith.constant 0 : i32
    %c0_i32_1 = arith.constant 0 : i32
    return %c0_i32, %c0_i32_0 : i32, i32
  }
  func.func @transform_7(%arg0: i32) -> (i32, i32) {
    %c0_i32 = arith.constant 0 : i32
    %c0_i32_0 = arith.constant 0 : i32
    %c0_i32_1 = arith.constant 0 : i32
    return %c0_i32, %c0_i32_0 : i32, i32
  }
  func.func @transform_8(%arg0: i32) -> (i32, i32) {
    %c0_i32 = arith.constant 0 : i32
    %c0_i32_0 = arith.constant 0 : i32
    %c0_i32_1 = arith.constant 0 : i32
    return %c0_i32, %c0_i32_0 : i32, i32
  }
  func.func @transform_9(%arg0: i32) -> (i32, i32) {
    %c0_i32 = arith.constant 0 : i32
    %c0_i32_0 = arith.constant 0 : i32
    %c0_i32_1 = arith.constant 0 : i32
    return %c0_i32, %c0_i32_0 : i32, i32
  }
  func.func @transform_10(%arg0: i32) -> (i32, i32) {
    %c0_i32 = arith.constant 0 : i32
    %c0_i32_0 = arith.constant 0 : i32
    %c0_i32_1 = arith.constant 0 : i32
    return %c0_i32, %c0_i32_0 : i32, i32
  }
  func.func @transform_11(%arg0: i32) -> (i32, i32, i32) {
    %c0_i32 = arith.constant 0 : i32
    %c0_i32_0 = arith.constant 0 : i32
    %c0_i32_1 = arith.constant 0 : i32
    return %arg0, %c0_i32, %c0_i32_0 : i32, i32, i32
  }
}

</mosaic_0001>

<bundles_post_ra>
// kernel: simple_cnn_forward.1
= control target key start
LH: loop header
LB: loop body
LE: loop exit
PB: predicated region body
PF: predicated region fallthrough
CT: control target
= control target key end

     0   :  { %s28996_s0 = inlined_call_operand.vmem [shape: bf16[2,1024,32], index: 0, kind: input, shape index: {}]   ;;  %s28997_s1 = inlined_call_operand.vmem [shape: bf16[32,32], index: 1, kind: input, shape index: {}]   ;;  %s28998_s2 = inlined_call_operand.vmem [shape: f32[3,32], index: 2, kind: input, shape index: {}]   ;;  %s28999_s3 = inlined_call_operand.vmem [shape: bf16[288,64], index: 3, kind: input, shape index: {}]   ;;  %s29000_s4 = inlined_call_operand.vmem [shape: f32[3,64], index: 4, kind: input, shape index: {}]   ;;  %s29001_s5 = inlined_call_operand.vmem [shape: bf16[576,128], index: 5, kind: input, shape index: {}]   ;;  %s29002_s6 = inlined_call_operand.vmem [shape: f32[3,128], index: 6, kind: input, shape index: {}]   ;;  %s29003_s7 = inlined_call_operand.vmem [shape: bf16[2048,256], index: 7, kind: input, shape index: {}]   ;;  %s29004_s8 = inlined_call_operand.vmem [shape: f32[1,256], index: 8, kind: input, shape index: {}]   ;;  %s29005_s9 = inlined_call_operand.vmem [shape: bf16[256,128], index: 9, kind: input, shape index: {}]   ;;  %s29006_s10 = inlined_call_operand.vmem [shape: f32[1,128], index: 10, kind: input, shape index: {}]   ;;  %s29007_s11 = inlined_call_operand.hbm [shape: f32[2,1,128], index: 11, kind: output, shape index: {}]  }
   0x1   :  { %29016 = sst [smem:[#allocation25_spill]] %s28996_s0 }
   0x2   :  { %16 = vsyncpa [#allocation7], 0 }
   0x3   :  { %18 = vsyncpa [#allocation7 + $0x1], 0  ;;  %s22791_s17 = smov 0   ;;  %s22793_s18 = smov 0  }
   0x4   :  { %s22795_s19 = smov 0   ;;  %s22797_s20 = smov 0  }
   0x5 LB: > { %s22812_s21 = sadd.s32 4294967295, %s22722_s20   ;;  %s20143_s22 = sadd.s32 4294967294, %s22722_s20   ;;  %s22722_s20 = sphi %s22797_s20, %s29214_s20   ;;  %s22718_s19 = sphi %s22795_s19, %s29213_s19   ;;  %s22714_s18 = sphi %s22793_s18, %s29212_s18   ;;  %s22710_s17 = sphi %s22791_s17, %s29211_s17  }
   0x6   : > { %s22816_s23 = sadd.s32 1, %s22722_s20   ;;  %s267_s24 = sadd.s32 1, %s22718_s19 }
   0x7   : > { %s264_s25 = ssub.s32 %s22722_s20, %s22816_s23  ;;  %p277_p0 = scmp.ne.s32.totalorder %s22718_s19, %s22714_s18 }
   0x8   : > { %p265_p1 = scmp.eq.s32.totalorder %s264_s25, 0  ;;  %p278_p2 = scmp.eq.s32.totalorder %s22812_s21, 1 }
   0x9   : > { %p283_p3 = scmp.ne.s32.totalorder %s22714_s18, %s22710_s17  ;;  %p284_p4 = scmp.eq.s32.totalorder %s20143_s22, 1 }
   0xa   : > { %s22827_s26 = scalar_select %p265_p1, %s22718_s19, %s267_s24  }
   0xb   : > { %p22829_p5 = por %p278_p2, %p277_p0  ;;  %p22833_p6 = por %p284_p4, %p283_p3 }
   0xc   : > { %p20146_p7 = scmp.ge.s32.totalorder %s22722_s20, 1  ;;  %p340_p8 = scmp.lt.s32.totalorder %s22722_s20, 3 }
   0xe   : > { %p341_p9 = pnand %p20146_p7, %p340_p8 }
  0x10   : > { %344 = sbr.rel (%p341_p9) target bundleno = 2842 (0xb1a), region = 64 }
  0x17   : > { %v21849_v0 = vld [vmem:[%s28997_s1] sm:$0xff]   ;;  %p379_p10 = scmp.lt.s32.totalorder %s22812_s21, 1  ;;  %v21850_v1 = vld [vmem:[%s28997_s1 + $0x8] sm:$0xff]   ;;  %vm856_vm0 = vcmask 261120   ;;  %s29019_s0 = sld [smem:[#allocation25_spill]]  ;;  %vm5733_vm1 = vcmask 253952  }
  0x18   : > { %21588 = vmatprep.subr.bf16.mxu0 %v21849_v0  ;;  %v29008_v35 = vmov 0   ;;  %vm5730_vm2 = vcmask 257024   ;;  %v23072_v58 = vld [vmem:[%s28998_s2] ss:$0 sm:$0xff]  ;;  %v23080_v63 = vld [vmem:[%s28998_s2 + $0x1] ss:$0 sm:$0xff] }
  0x19   : > { %s380_s14 = scalar_select %p379_p10, %s22812_s21, 1  ;;  %21589 = vmatpush3.bf16.msra.mxu0 %v21849_v0  ;;  %5737 = vst.msk [vmem:[#allocation2 + $0x14] sm:$0x1] %vm5733_vm1, %v29008_v35  ;;  %5734 = vst.msk [vmem:[#allocation2 + $0x8] sm:$0x1] %vm5733_vm1, %v29008_v35  ;;  %vm11290_vm3 = vcmask 1046528  }
  0x1a   : > { %21590 = vmatprep.subr.bf16.mxu0 %v21850_v1  ;;  %5740 = vst.msk [vmem:[#allocation2 + $0x20] sm:$0x1] %vm5733_vm1, %v29008_v35  ;;  %5743 = vst.msk [vmem:[#allocation2 + $0x2c] sm:$0x1] %vm5733_vm1, %v29008_v35  ;;  %vm29013_vm4 = vsmask.f32 256 }
  0x1b   : > { %s21281_s15 = sshll.u32 %s380_s14, 9  ;;  %5746 = vst.msk [vmem:[#allocation2 + $0x38] sm:$0x1] %vm5733_vm1, %v29008_v35  ;;  %5749 = vst.msk [vmem:[#allocation2 + $0x44] sm:$0x1] %vm5733_vm1, %v29008_v35  ;;  %vm9902_vm6 = vcmask 1041409  }
  0x1c   : > { %5752 = vst.msk [vmem:[#allocation2 + $0x50] sm:$0x1] %vm5733_vm1, %v29008_v35  ;;  %5755 = vst.msk [vmem:[#allocation2 + $0x5c] sm:$0x1] %vm5733_vm1, %v29008_v35  ;;  %vm9884_vm7 = vcmask 1042434   ;;  %vm9887_vm8 = vcmask 1043459  }
  0x1d   : > { %s22850_s24 = scalar_lea.vmem %s29019_s0, %s21281_s15  ;;  %21591 = vmatpush3.bf16.msra.mxu0 %v21850_v1  ;;  %5758 = vst.msk [vmem:[#allocation2 + $0x68] sm:$0x1] %vm5733_vm1, %v29008_v35  ;;  %5761 = vst.msk [vmem:[#allocation2 + $0x74] sm:$0x1] %vm5733_vm1, %v29008_v35  ;;  %s22726_s15 = smov 64   ;;  %vm9890_vm9 = vcmask 1044484  }
  0x1e   : > { %v21851_v2 = vld [vmem:[%s22850_s24] sm:$0xff]   ;;  %v21852_v3 = vld [vmem:[%s22850_s24 + $0x8] sm:$0xff]   ;;  %v21853_v4 = vld [vmem:[%s22850_s24 + $0x10] sm:$0xff]   ;;  %5764 = vst.msk [vmem:[#allocation2 + $0x80] sm:$0x1] %vm5733_vm1, %v29008_v35  ;;  %vm9893_vm10 = vcmask 1045509  }
  0x1f   : > { %21592 = vmatprep.mubr.msk.bf16.mxu0 %vm856_vm0, %v21851_v2  ;;  %v21854_v5 = vld [vmem:[%s22850_s24 + $0x18] sm:$0xff]   ;;  %v21855_v6 = vld [vmem:[%s22850_s24 + $0x20] sm:$0xff]   ;;  %v21856_v7 = vld [vmem:[%s22850_s24 + $0x28] sm:$0xff]   ;;  %5767 = vst.msk [vmem:[#allocation2 + $0x8c] sm:$0x1] %vm5733_vm1, %v29008_v35  ;;  %vm9896_vm11 = vcmask 1046534  }
  0x20   : > { %21593 = vmatmul.mubr.msk.bf16.vlgmr.msra.gmra.mrb[0].mxu0 %vm856_vm0, %v21852_v3  ;;  %v21857_v8 = vld [vmem:[%s22850_s24 + $0x30] sm:$0xff]   ;;  %v21858_v9 = vld [vmem:[%s22850_s24 + $0x38] sm:$0xff]   ;;  %v21859_v10 = vld [vmem:[%s22850_s24 + $0x40] sm:$0xff]   ;;  %5770 = vst.msk [vmem:[#allocation2 + $0x98] sm:$0x1] %vm5733_vm1, %v29008_v35  ;;  %vm9899_vm12 = vcmask 1047559  }
  0x21   : > { %21596 = vmatprep.mubr.msk.bf16.mxu0 %vm856_vm0, %v21853_v4  ;;  %v21860_v11 = vld [vmem:[%s22850_s24 + $0x48] sm:$0xff]   ;;  %v21861_v12 = vld [vmem:[%s22850_s24 + $0x50] sm:$0xff]   ;;  %v21862_v13 = vld [vmem:[%s22850_s24 + $0x58] sm:$0xff]   ;;  %5773 = vst.msk [vmem:[#allocation2 + $0xa4] sm:$0x1] %vm5733_vm1, %v29008_v35  ;;  %s22728_s22 = smov 32  }
  0x22   : > { %v21863_v14 = vld [vmem:[%s22850_s24 + $0x60] sm:$0xff]   ;;  %v21864_v15 = vld [vmem:[%s22850_s24 + $0x68] sm:$0xff]   ;;  %v21865_v16 = vld [vmem:[%s22850_s24 + $0x70] sm:$0xff]   ;;  %5776 = vst.msk [vmem:[#allocation2 + $0xb0] sm:$0x1] %vm5733_vm1, %v29008_v35  ;;  %s377_s16 = sand.u32 1, %s22714_s18  }
  0x23   : > { %v21866_v17 = vld [vmem:[%s22850_s24 + $0x78] sm:$0xff]   ;;  %v21867_v18 = vld [vmem:[%s22850_s24 + $0x80] sm:$0xff]   ;;  %v21868_v19 = vld [vmem:[%s22850_s24 + $0x88] sm:$0xff]   ;;  %5779 = vst.msk [vmem:[#allocation2 + $0xbc] sm:$0x1] %vm5733_vm1, %v29008_v35  ;;  %s21278_s29 = sshll.u32 %s22812_s21, 4 }
  0x24   : > { %v21869_v20 = vld [vmem:[%s22850_s24 + $0x90] sm:$0xff]   ;;  %v21870_v21 = vld [vmem:[%s22850_s24 + $0x98] sm:$0xff]   ;;  %v21871_v22 = vld [vmem:[%s22850_s24 + $0xa0] sm:$0xff]   ;;  %5782 = vst.msk [vmem:[#allocation2 + $0xc8] sm:$0x1] %vm5733_vm1, %v29008_v35  ;;  %s378_s30 = scalar_lea.vmem [#allocation6], %s377_s16 }
  0x25   : > { %v21872_v23 = vld [vmem:[%s22850_s24 + $0xa8] sm:$0xff]   ;;  %v21873_v24 = vld [vmem:[%s22850_s24 + $0xb0] sm:$0xff]   ;;  %v21874_v25 = vld [vmem:[%s22850_s24 + $0xb8] sm:$0xff]   ;;  %5785 = vst.msk [vmem:[#allocation2 + $0xd4] sm:$0x1] %vm5733_vm1, %v29008_v35  ;;  %s22730_s21 = smov [#allocation6]  }
  0x26   : > { %v21875_v26 = vld [vmem:[%s22850_s24 + $0xc0] sm:$0xff]   ;;  %v21876_v27 = vld [vmem:[%s22850_s24 + $0xc8] sm:$0xff]   ;;  %v21877_v28 = vld [vmem:[%s22850_s24 + $0xd0] sm:$0xff]   ;;  %5735 = vst.msk [vmem:[#allocation2 + $0xc] sm:$0xf] %vm5730_vm2, %v29008_v35  ;;  %s22664_s0 = sshll.u32 %s22730_s21, 4  ;;  %s22665_s0 = int_to_ptr.vmem [resolvable:$false] %s22664_s0 }
  0x27   : > { %v21878_v29 = vld [vmem:[%s22850_s24 + $0xd8] sm:$0xff]   ;;  %v21879_v30 = vld [vmem:[%s22850_s24 + $0xe0] sm:$0xff]   ;;  %v21880_v31 = vld [vmem:[%s22850_s24 + $0xe8] sm:$0xff]   ;;  %5731 = vst.msk [vmem:[#allocation2] sm:$0xf] %vm5730_vm2, %v29008_v35  ;;  %s22666_s25 = scalar_lea.vmem %s22665_s0, 32 }
  0x28   : > { %21597 = vmatmul.mubr.msk.bf16.gmra.mrb[4].mxu0 %vm856_vm0, %v21854_v5  ;;  %v21881_v32 = vld [vmem:[%s22850_s24 + $0xf0] sm:$0xff]   ;;  %v21882_v33 = vld [vmem:[%s22850_s24 + $0xf8] sm:$0xff]   ;;  %v21883_v34 = vld [vmem:[%s22850_s24 + $0x100] sm:$0xff]   ;;  %5732 = vst.msk [vmem:[#allocation2 + $0x4] sm:$0xf] %vm5730_vm2, %v29008_v35 }
  0x29   : > { %21600 = vmatprep.mubr.msk.bf16.mxu0 %vm856_vm0, %v21855_v6  ;;  %v21884_v36 = vld [vmem:[%s22850_s24 + $0x108] sm:$0xff]   ;;  %v21885_v37 = vld [vmem:[%s22850_s24 + $0x110] sm:$0xff]   ;;  %v21886_v38 = vld [vmem:[%s22850_s24 + $0x118] sm:$0xff]   ;;  %5736 = vst.msk [vmem:[#allocation2 + $0x10] sm:$0xf] %vm5730_vm2, %v29008_v35 }
  0x2a   : > { %5738 = vst.msk [vmem:[#allocation2 + $0x18] sm:$0xf] %vm5730_vm2, %v29008_v35  ;;  %5739 = vst.msk [vmem:[#allocation2 + $0x1c] sm:$0xf] %vm5730_vm2, %v29008_v35  ;;  %v21887_v39 = vld [vmem:[%s22850_s24 + $0x120] sm:$0xff]   ;;  %v21888_v40 = vld [vmem:[%s22850_s24 + $0x128] sm:$0xff]  }
  0x2b   : > { %5741 = vst.msk [vmem:[#allocation2 + $0x24] sm:$0xf] %vm5730_vm2, %v29008_v35  ;;  %5742 = vst.msk [vmem:[#allocation2 + $0x28] sm:$0xf] %vm5730_vm2, %v29008_v35  ;;  %v21889_v41 = vld [vmem:[%s22850_s24 + $0x130] sm:$0xff]   ;;  %v21890_v42 = vld [vmem:[%s22850_s24 + $0x138] sm:$0xff]  }
  0x2c   : > { %5744 = vst.msk [vmem:[#allocation2 + $0x30] sm:$0xf] %vm5730_vm2, %v29008_v35  ;;  %5745 = vst.msk [vmem:[#allocation2 + $0x34] sm:$0xf] %vm5730_vm2, %v29008_v35  ;;  %v21891_v43 = vld [vmem:[%s22850_s24 + $0x140] sm:$0xff]   ;;  %v21892_v44 = vld [vmem:[%s22850_s24 + $0x148] sm:$0xff]  }
  0x2d   : > { %5747 = vst.msk [vmem:[#allocation2 + $0x3c] sm:$0xf] %vm5730_vm2, %v29008_v35  ;;  %5748 = vst.msk [vmem:[#allocation2 + $0x40] sm:$0xf] %vm5730_vm2, %v29008_v35  ;;  %v21893_v45 = vld [vmem:[%s22850_s24 + $0x150] sm:$0xff]   ;;  %v21894_v46 = vld [vmem:[%s22850_s24 + $0x158] sm:$0xff]  }
  0x2e   : > { %5750 = vst.msk [vmem:[#allocation2 + $0x48] sm:$0xf] %vm5730_vm2, %v29008_v35  ;;  %5751 = vst.msk [vmem:[#allocation2 + $0x4c] sm:$0xf] %vm5730_vm2, %v29008_v35  ;;  %v21895_v47 = vld [vmem:[%s22850_s24 + $0x160] sm:$0xff]   ;;  %v21896_v48 = vld [vmem:[%s22850_s24 + $0x168] sm:$0xff]  }
  0x2f   : > { %5753 = vst.msk [vmem:[#allocation2 + $0x54] sm:$0xf] %vm5730_vm2, %v29008_v35  ;;  %5754 = vst.msk [vmem:[#allocation2 + $0x58] sm:$0xf] %vm5730_vm2, %v29008_v35  ;;  %v21897_v49 = vld [vmem:[%s22850_s24 + $0x170] sm:$0xff]   ;;  %v21898_v50 = vld [vmem:[%s22850_s24 + $0x178] sm:$0xff]  }
  0x30   : > { %21601 = vmatmul.mubr.msk.bf16.gmra.mrb[8].mxu0 %vm856_vm0, %v21856_v7  ;;  %5756 = vst.msk [vmem:[#allocation2 + $0x60] sm:$0xf] %vm5730_vm2, %v29008_v35  ;;  %5757 = vst.msk [vmem:[#allocation2 + $0x64] sm:$0xf] %vm5730_vm2, %v29008_v35  ;;  %v21899_v51 = vld [vmem:[%s22850_s24 + $0x180] sm:$0xff]   ;;  %v21900_v52 = vld [vmem:[%s22850_s24 + $0x188] sm:$0xff]  }
  0x31   : > { %21604 = vmatprep.mubr.msk.bf16.mxu0 %vm856_vm0, %v21857_v8  ;;  %5759 = vst.msk [vmem:[#allocation2 + $0x6c] sm:$0xf] %vm5730_vm2, %v29008_v35  ;;  %5760 = vst.msk [vmem:[#allocation2 + $0x70] sm:$0xf] %vm5730_vm2, %v29008_v35  ;;  %v21901_v53 = vld [vmem:[%s22850_s24 + $0x190] sm:$0xff]   ;;  %v21902_v54 = vld [vmem:[%s22850_s24 + $0x198] sm:$0xff]  }
  0x32   : > { %5762 = vst.msk [vmem:[#allocation2 + $0x78] sm:$0xf] %vm5730_vm2, %v29008_v35  ;;  %5763 = vst.msk [vmem:[#allocation2 + $0x7c] sm:$0xf] %vm5730_vm2, %v29008_v35  ;;  %v21903_v55 = vld [vmem:[%s22850_s24 + $0x1a0] sm:$0xff]   ;;  %v21904_v56 = vld [vmem:[%s22850_s24 + $0x1a8] sm:$0xff]  }
  0x33   : > { %5765 = vst.msk [vmem:[#allocation2 + $0x84] sm:$0xf] %vm5730_vm2, %v29008_v35  ;;  %5766 = vst.msk [vmem:[#allocation2 + $0x88] sm:$0xf] %vm5730_vm2, %v29008_v35  ;;  %v21905_v57 = vld [vmem:[%s22850_s24 + $0x1b0] sm:$0xff]   ;;  %v21906_v62 = vld [vmem:[%s22850_s24 + $0x1b8] sm:$0xff]  }
  0x34   : > { %5768 = vst.msk [vmem:[#allocation2 + $0x90] sm:$0xf] %vm5730_vm2, %v29008_v35  ;;  %5769 = vst.msk [vmem:[#allocation2 + $0x94] sm:$0xf] %vm5730_vm2, %v29008_v35  ;;  %v21907_v2 = vld [vmem:[%s22850_s24 + $0x1c0] sm:$0xff]  }
  0x35   : > { %5771 = vst.msk [vmem:[#allocation2 + $0x9c] sm:$0xf] %vm5730_vm2, %v29008_v35  ;;  %5772 = vst.msk [vmem:[#allocation2 + $0xa0] sm:$0xf] %vm5730_vm2, %v29008_v35  ;;  %v23089_v8 = vld [vmem:[%s28998_s2 + $0x2] ss:$0 sm:$0xff] }
  0x36   : > { %5774 = vst.msk [vmem:[#allocation2 + $0xa8] sm:$0xf] %vm5730_vm2, %v29008_v35  ;;  %5775 = vst.msk [vmem:[#allocation2 + $0xac] sm:$0xf] %vm5730_vm2, %v29008_v35  ;;  %vm29012_vm13 = vsmask.f32 7938 }
  0x37   : > { %5777 = vst.msk [vmem:[#allocation2 + $0xb4] sm:$0xf] %vm5730_vm2, %v29008_v35  ;;  %5778 = vst.msk [vmem:[#allocation2 + $0xb8] sm:$0xf] %vm5730_vm2, %v29008_v35  ;;  %vm10856_vm15 = vsmask.f32 7424 }
  0x38   : > { %21605 = vmatmul.mubr.msk.bf16.gmra.mrb[12].mxu0 %vm856_vm0, %v21858_v9  ;;  %5780 = vst.msk [vmem:[#allocation2 + $0xc0] sm:$0xf] %vm5730_vm2, %v29008_v35  ;;  %5781 = vst.msk [vmem:[#allocation2 + $0xc4] sm:$0xf] %vm5730_vm2, %v29008_v35 }
  0x39   : > { %21608 = vmatprep.mubr.msk.bf16.mxu0 %vm856_vm0, %v21859_v10  ;;  %5783 = vst.msk [vmem:[#allocation2 + $0xcc] sm:$0xf] %vm5730_vm2, %v29008_v35  ;;  %5784 = vst.msk [vmem:[#allocation2 + $0xd0] sm:$0xf] %vm5730_vm2, %v29008_v35 }
  0x3a   : > { %vm23219_vm5 = vmand %vm5733_vm1, %vm29013_vm4  ;;  %vm11097_vm1 = vcmask 523520   ;;  %vm11564_vm4 = vcmask 1048320  }
  0x3b   : > { %vm23321_vm14 = vmand %vm5730_vm2, %vm29012_vm13  ;;  %vm11387_vm13 = vcmask 785920  }
  0x40   : > { %21609 = vmatmul.mubr.msk.bf16.gmra.mrb[16].mxu0 %vm856_vm0, %v21860_v11 }
  0x41   : > { %21612 = vmatprep.mubr.msk.bf16.mxu0 %vm856_vm0, %v21861_v12 }
  0x48   : > { %21613 = vmatmul.mubr.msk.bf16.gmra.mrb[20].mxu0 %vm856_vm0, %v21862_v13  ;;  %v21915_v13 = vld [vmem:[#allocation2] sm:$0xfe]  }
  0x49   : > { %21616 = vmatprep.mubr.msk.bf16.mxu0 %vm856_vm0, %v21863_v14  ;;  %v21916_v14 = vld [vmem:[#allocation2 + $0x8] ss:$0 sps:$4 sm:$0x11]  }
  0x50   : > { %21617 = vmatmul.mubr.msk.bf16.gmra.mrb[24].mxu0 %vm856_vm0, %v21864_v15 }
  0x51   : > { %21620 = vmatprep.mubr.msk.bf16.mxu0 %vm856_vm0, %v21865_v16  ;;  %v22725_v16 = vmov 1966171168  }
  0x58   : > { %21621 = vmatmul.mubr.msk.bf16.gmra.mrb[28].mxu0 %vm856_vm0, %v21866_v17  ;;  %v2116_v17 = vunpack.c.l.s4 %v22725_v16 }
  0x59   : > { %21624 = vmatprep.mubr.msk.bf16.mxu0 %vm856_vm0, %v21867_v18 }
  0x60   : > { %21625 = vmatmul.mubr.msk.bf16.gmra.mrb[32].mxu0 %vm856_vm0, %v21868_v19 }
  0x61   : > { %21628 = vmatprep.mubr.msk.bf16.mxu0 %vm856_vm0, %v21869_v20  ;;  %v2118_v20 = vlaneseq }
  0x68   : > { %21629 = vmatmul.mubr.msk.bf16.gmra.mrb[36].mxu0 %vm856_vm0, %v21870_v21  ;;  %v11291_v21 = vrot.slane %v21915_v13, 1 }
  0x69   : > { %21632 = vmatprep.mubr.msk.bf16.mxu0 %vm856_vm0, %v21871_v22  ;;  %v11292_v22 = vrot.slane %v21916_v14, 1 }
  0x70   : > { %21633 = vmatmul.mubr.msk.bf16.gmra.mrb[40].mxu0 %vm856_vm0, %v21872_v23 }
  0x71   : > { %21636 = vmatprep.mubr.msk.bf16.mxu0 %vm856_vm0, %v21873_v24 }
  0x78   : > { %21637 = vmatmul.mubr.msk.bf16.gmra.mrb[44].mxu0 %vm856_vm0, %v21874_v25 }
  0x79   : > { %21640 = vmatprep.mubr.msk.bf16.mxu0 %vm856_vm0, %v21875_v26 }
  0x80   : > { %21641 = vmatmul.mubr.msk.bf16.gmra.mrb[48].mxu0 %vm856_vm0, %v21876_v27  ;;  %v21908_v27 = vld [vmem:[%s22850_s24 + $0x1c8] sm:$0xff]  }
  0x81   : > { %21644 = vmatprep.mubr.msk.bf16.mxu0 %vm856_vm0, %v21877_v28 }
  0x88   : > { %21645 = vmatmul.mubr.msk.bf16.gmra.mrb[52].mxu0 %vm856_vm0, %v21878_v29 }
  0x89   : > { %21648 = vmatprep.mubr.msk.bf16.mxu0 %vm856_vm0, %v21879_v30 }
  0x90   : > { %21649 = vmatmul.mubr.msk.bf16.gmra.mrb[56].mxu0 %vm856_vm0, %v21880_v31 }
  0x91   : > { %21652 = vmatprep.mubr.msk.bf16.mxu0 %vm856_vm0, %v21881_v32  ;;  %v21909_v32 = vld [vmem:[%s22850_s24 + $0x1d0] sm:$0xff]  }
  0x98   : > { %21653 = vmatmul.mubr.msk.bf16.gmra.mrb[60].mxu0 %vm856_vm0, %v21882_v33  ;;  %v11293_v33 = vsel %vm11290_vm3, %v11291_v21, %v11292_v22 }
  0x99   : > { %21656 = vmatprep.mubr.msk.bf16.mxu0 %vm856_vm0, %v21883_v34  ;;  %11339 = vrot.lane.b32.xlu1 %v11293_v33, %s22726_s15 }
  0xa0   : > { %21657 = vmatmul.mubr.msk.bf16.gmra.mrb[64].mxu0 %vm856_vm0, %v21884_v36 }
  0xa1   : > { %21660 = vmatprep.mubr.msk.bf16.mxu0 %vm856_vm0, %v21885_v37 }
  0xa8   : > { %21661 = vmatmul.mubr.msk.bf16.gmra.mrb[68].mxu0 %vm856_vm0, %v21886_v38 }
  0xa9   : > { %21664 = vmatprep.mubr.msk.bf16.mxu0 %vm856_vm0, %v21887_v39 }
  0xb0   : > { %21665 = vmatmul.mubr.msk.bf16.gmra.mrb[72].mxu0 %vm856_vm0, %v21888_v40 }
  0xb1   : > { %21668 = vmatprep.mubr.msk.bf16.mxu0 %vm856_vm0, %v21889_v41 }
  0xb8   : > { %21669 = vmatmul.mubr.msk.bf16.gmra.mrb[76].mxu0 %vm856_vm0, %v21890_v42 }
  0xb9   : > { %21672 = vmatprep.mubr.msk.bf16.mxu0 %vm856_vm0, %v21891_v43 }
  0xc0   : > { %21673 = vmatmul.mubr.msk.bf16.gmra.mrb[80].mxu0 %vm856_vm0, %v21892_v44 }
  0xc1   : > { %21676 = vmatprep.mubr.msk.bf16.mxu0 %vm856_vm0, %v21893_v45  ;;  %v22727_v45 = vmov 1935823168  }
  0xc8   : > { %21677 = vmatmul.mubr.msk.bf16.gmra.mrb[84].mxu0 %vm856_vm0, %v21894_v46  ;;  %v6043_v46 = vunpack.c.l.s4 %v22727_v45 }
  0xc9   : > { %21680 = vmatprep.mubr.msk.bf16.mxu0 %vm856_vm0, %v21895_v47 }
  0xd0   : > { %21681 = vmatmul.mubr.msk.bf16.gmra.mrb[88].mxu0 %vm856_vm0, %v21896_v48 }
  0xd1   : > { %21684 = vmatprep.mubr.msk.bf16.mxu0 %vm856_vm0, %v21897_v49  ;;  %v2117_v49 = vunpack.c.0.s8 %v2116_v17 }
  0xd8   : > { %21685 = vmatmul.mubr.msk.bf16.gmra.mrb[92].mxu0 %vm856_vm0, %v21898_v50  ;;  %v23114_v50 = vshrl.u32 %v2118_v20, 7 }
  0xd9   : > { %21688 = vmatprep.mubr.msk.bf16.mxu0 %vm856_vm0, %v21899_v51 }
  0xda   : > { %29020 = vst [vmem:[#allocation9_spill] sm:$0xff] %v23114_v50 }
  0xe0   : > { %21689 = vmatmul.mubr.msk.bf16.gmra.mrb[96].mxu0 %vm856_vm0, %v21900_v52 }
  0xe1   : > { %21692 = vmatprep.mubr.msk.bf16.mxu0 %vm856_vm0, %v21901_v53 }
  0xe8   : > { %21693 = vmatmul.mubr.msk.bf16.gmra.mrb[100].mxu0 %vm856_vm0, %v21902_v54 }
  0xe9   : > { %21696 = vmatprep.mubr.msk.bf16.mxu0 %vm856_vm0, %v21903_v55 }
  0xf0   : > { %21697 = vmatmul.mubr.msk.bf16.gmra.mrb[104].mxu0 %vm856_vm0, %v21904_v56 }
  0xf1   : > { %21700 = vmatprep.mubr.msk.bf16.mxu0 %vm856_vm0, %v21905_v57  ;;  %v21910_v57 = vld [vmem:[%s22850_s24 + $0x1d8] sm:$0xff]  }
  0xf3   : > { %v21594_v59 = vpop.f32.mrb[0].mxu0 }
  0xf4   : > { %v1092_v60 = vadd.f32 %v21594_v59, %v23072_v58  ;;  %v1083_v61 = vpop.f32.mrb[1].mxu0 }
  0xf5   : > { %v1084_v0 = vadd.f32 %v23072_v58, %v1083_v61  ;;  %v21595_v1 = vpop.f32.mrb[2].mxu0 }
  0xf6   : > { %v1596_v3 = vmax.f32 %v1092_v60, 0.0  ;;  %v1095_v4 = vadd.f32 %v21595_v1, %v23072_v58  ;;  %v1086_v5 = vpop.f32.mrb[3].mxu0  ;;  %v6044_v60 = vunpack.c.0.s8 %v6043_v46  ;;  %v21911_v1 = vld [vmem:[%s22850_s24 + $0x1e0] sm:$0xff]  }
  0xf7   : > { %v1594_v6 = vmax.f32 %v1084_v0, 0.0  ;;  %v1087_v7 = vadd.f32 %v23072_v58, %v1086_v5 }
  0xf8   : > { %v1728_v9 = vmul.f32 %v23080_v63, %v1596_v3  ;;  %v1597_v10 = vmax.f32 %v1095_v4, 0.0  ;;  %21701 = vmatmul.mubr.msk.bf16.gmra.mrb[108].mxu0 %vm856_vm0, %v21906_v62  ;;  %v23126_v3 = vsub.s32 %v2117_v49, %v23114_v50  ;;  %v23133_v14 = vsub.s32 %v6044_v60, %v23114_v50 }
  0xf9   : > { %v1726_v11 = vmul.f32 %v23080_v63, %v1594_v6  ;;  %v1595_v12 = vmax.f32 %v1087_v7, 0.0  ;;  %21704 = vmatprep.mubr.msk.bf16.mxu0 %vm856_vm0, %v21907_v2 }
  0xfa   : > { %v1729_v15 = vmul.f32 %v23080_v63, %v1597_v10  ;;  %v1860_v23 = vadd.f32 %v23089_v8, %v1728_v9 }
  0xfb   : > { %v1727_v18 = vmul.f32 %v23080_v63, %v1595_v12  ;;  %v21598_v19 = vpop.f32.mrb[4].mxu0  ;;  %v1858_v28 = vadd.f32 %v23089_v8, %v1726_v11 }
  0xfc   : > { %v1861_v24 = vadd.f32 %v23089_v8, %v1729_v15  ;;  %v1108_v25 = vadd.f32 %v21598_v19, %v23072_v58  ;;  %v1099_v26 = vpop.f32.mrb[5].mxu0 }
  0xfd   : > { %v1859_v29 = vadd.f32 %v23089_v8, %v1727_v18  ;;  %v1100_v30 = vadd.f32 %v23072_v58, %v1099_v26  ;;  %v21599_v31 = vpop.f32.mrb[6].mxu0 }
  0xfe   : > { %v1987_v34 = vpack.c.bf16 %v1861_v24, %v1860_v23  ;;  %v1600_v36 = vmax.f32 %v1108_v25, 0.0  ;;  %v1111_v37 = vadd.f32 %v21599_v31, %v23072_v58  ;;  %v1102_v38 = vpop.f32.mrb[7].mxu0 }
  0xff   : > { %v1986_v39 = vpack.c.bf16 %v1859_v29, %v1858_v28  ;;  %v1598_v40 = vmax.f32 %v1100_v30, 0.0  ;;  %v1103_v41 = vadd.f32 %v23072_v58, %v1102_v38 }
 0x100   : > { %v1732_v42 = vmul.f32 %v23080_v63, %v1600_v36  ;;  %v1601_v43 = vmax.f32 %v1111_v37, 0.0  ;;  %21705 = vmatmul.mubr.msk.bf16.gmra.mrb[112].mxu0 %vm856_vm0, %v21908_v27 }
 0x101   : > { %v1730_v44 = vmul.f32 %v23080_v63, %v1598_v40  ;;  %v1599_v47 = vmax.f32 %v1103_v41, 0.0  ;;  %21708 = vmatprep.mubr.msk.bf16.mxu0 %vm856_vm0, %v21909_v32  ;;  %v21912_v32 = vld [vmem:[%s22850_s24 + $0x1e8] sm:$0xff]  }
 0x102   : > { %v1733_v48 = vmul.f32 %v23080_v63, %v1601_v43  ;;  %v1864_v53 = vadd.f32 %v23089_v8, %v1732_v42 }
 0x103   : > { %v1731_v51 = vmul.f32 %v23080_v63, %v1599_v47  ;;  %v21602_v52 = vpop.f32.mrb[8].mxu0  ;;  %v1862_v59 = vadd.f32 %v23089_v8, %v1730_v44 }
 0x104   : > { %v1865_v54 = vadd.f32 %v23089_v8, %v1733_v48  ;;  %v1124_v55 = vadd.f32 %v21602_v52, %v23072_v58  ;;  %v1115_v56 = vpop.f32.mrb[9].mxu0 }
 0x105   : > { %v1863_v61 = vadd.f32 %v23089_v8, %v1731_v51  ;;  %v1116_v62 = vadd.f32 %v23072_v58, %v1115_v56  ;;  %v21603_v0 = vpop.f32.mrb[10].mxu0 }
 0x106   : > { %v1989_v2 = vpack.c.bf16 %v1865_v54, %v1864_v53  ;;  %v1604_v4 = vmax.f32 %v1124_v55, 0.0  ;;  %v1127_v5 = vadd.f32 %v21603_v0, %v23072_v58  ;;  %v1118_v6 = vpop.f32.mrb[11].mxu0 }
 0x107   : > { %v1988_v7 = vpack.c.bf16 %v1863_v61, %v1862_v59  ;;  %v1602_v9 = vmax.f32 %v1116_v62, 0.0  ;;  %v1119_v10 = vadd.f32 %v23072_v58, %v1118_v6 }
 0x108   : > { %v2051_v11 = vmax.bf16 %v1989_v2, %v1987_v34  ;;  %v1736_v12 = vmul.f32 %v23080_v63, %v1604_v4  ;;  %v1605_v13 = vmax.f32 %v1127_v5, 0.0  ;;  %21709 = vmatmul.mubr.msk.bf16.gmra.mrb[116].mxu0 %vm856_vm0, %v21910_v57 }
 0x109   : > { %v2050_v15 = vmax.bf16 %v1988_v7, %v1986_v39  ;;  %v1734_v16 = vmul.f32 %v23080_v63, %v1602_v9  ;;  %v1603_v17 = vmax.f32 %v1119_v10, 0.0  ;;  %21712 = vmatprep.mubr.msk.bf16.mxu0 %vm856_vm0, %v21911_v1  ;;  %v21913_v39 = vld [vmem:[%s22850_s24 + $0x1f0] sm:$0xff]  }
 0x10a   : > { %v2163_v18 = vcombine.high %v2051_v11, %v2051_v11  ;;  %v2170_v19 = vrot.slane %v2051_v11, %v23126_v3  ;;  %v23139_v20 = vadd.f32 %v23089_v8, %v1736_v12  ;;  %v1737_v21 = vmul.f32 %v23080_v63, %v1605_v13  ;;  %v21914_v12 = vld [vmem:[%s22850_s24 + $0x1f8] sm:$0xff]   ;;  %s22729_s24 = smov 96  }
 0x10b   : > { %v2114_v22 = vcombine.high %v2050_v15, %v2050_v15  ;;  %v2121_v23 = vrot.slane %v2050_v15, %v23126_v3  ;;  %v23144_v24 = vadd.f32 %v23089_v8, %v1734_v16  ;;  %v1735_v25 = vmul.f32 %v23080_v63, %v1603_v17  ;;  %v23147_v26 = vpop.f32.mrb[12].mxu0 }
 0x10c   : > { %v2177_v27 = vrot.slane %v2163_v18, %v23126_v3  ;;  %v2178_v28 = vcombine.high %v2170_v19, %v2170_v19  ;;  %v2186_v29 = vrot.slane %v2170_v19, %v23126_v3  ;;  %v23152_v30 = vadd.f32 %v23089_v8, %v1737_v21  ;;  %v23154_v31 = vpop.f32.mrb[13].mxu0 }
 0x10d   : > { %v2128_v33 = vrot.slane %v2114_v22, %v23126_v3  ;;  %v2129_v34 = vcombine.high %v2121_v23, %v2121_v23  ;;  %v23159_v36 = vrot.slane %v2121_v23, %v23126_v3  ;;  %v23162_v37 = vadd.f32 %v23089_v8, %v1735_v25  ;;  %v23164_v38 = vpop.f32.mrb[14].mxu0 }
 0x10e   : > { %v2179_v40 = vcombine.high %v2177_v27, %v2177_v27  ;;  %v2193_v41 = vrot.slane %v2177_v27, %v23126_v3  ;;  %v2200_v42 = vrot.slane %v2178_v28, %v23126_v3  ;;  %v2208_v43 = vcombine.high %v2186_v29, %v2186_v29  ;;  %v23169_v44 = vpop.f32.mrb[15].mxu0 }
 0x10f   : > { %v3979_v45 = vshrl.u32 %v2186_v29, 16  ;;  %v2130_v46 = vcombine.high %v2128_v33, %v2128_v33  ;;  %v23172_v47 = vrot.slane %v2128_v33, %v23126_v3  ;;  %v23175_v48 = vrot.slane %v2129_v34, %v23126_v3 }
 0x110   : > { %v2207_v49 = vrot.slane %v2179_v40, %v23126_v3  ;;  %v2209_v51 = vcombine.high %v2193_v41, %v2193_v41  ;;  %v2210_v52 = vcombine.high %v2200_v42, %v2200_v42  ;;  %v3984_v53 = vshrl.u32 %v2200_v42, 16  ;;  %21713 = vmatmul.mubr.msk.bf16.gmra.mrb[120].mxu0 %vm856_vm0, %v21912_v32 }
 0x111   : > { %v3989_v54 = vshrl.u32 %v2208_v43, 16  ;;  %v3999_v55 = vshrl.u32 %v2193_v41, 16  ;;  %v5482_v56 = vmax.bf16 %v3979_v45, %v2186_v29  ;;  %v23180_v57 = vrot.slane %v2130_v46, %v23126_v3  ;;  %21716 = vmatprep.mubr.msk.bf16.mxu0 %vm856_vm0, %v21913_v39 }
 0x112   : > { %v2211_v59 = vcombine.high %v2207_v49, %v2207_v49  ;;  %v3994_v60 = vshrl.u32 %v2210_v52, 16  ;;  %v4004_v61 = vshrl.u32 %v2207_v49, 16  ;;  %v4009_v62 = vshrl.u32 %v2209_v51, 16 }
 0x113   : > { %v5483_v0 = vmax.bf16 %v3984_v53, %v2200_v42  ;;  %v5484_v1 = vmax.bf16 %v3989_v54, %v2208_v43  ;;  %v5486_v2 = vmax.bf16 %v3999_v55, %v2193_v41  ;;  %v6160_v4 = vrot.slane %v5482_v56, %v23133_v14  ;;  %v23184_v5 = vpop.f32.mrb[16].mxu0 }
 0x114   : > { %v4014_v6 = vshrl.u32 %v2211_v59, 16  ;;  %v5485_v7 = vmax.bf16 %v3994_v60, %v2210_v52  ;;  %v5487_v9 = vmax.bf16 %v4004_v61, %v2207_v49  ;;  %v5488_v10 = vmax.bf16 %v4009_v62, %v2209_v51  ;;  %v23186_v11 = vpop.f32.mrb[17].mxu0 }
 0x115   : > { %v6167_v13 = vrot.slane %v6160_v4, %v23133_v14  ;;  %v6174_v15 = vrot.slane %v5483_v0, %v23133_v14  ;;  %v6188_v16 = vrot.slane %v5484_v1, %v23133_v14  ;;  %v6216_v17 = vrot.slane %v5486_v2, %v23133_v14  ;;  %v23193_v18 = vpop.f32.mrb[18].mxu0 }
 0x116   : > { %v5489_v19 = vmax.bf16 %v4014_v6, %v2211_v59  ;;  %v6202_v21 = vrot.slane %v5485_v7, %v23133_v14  ;;  %v6230_v22 = vrot.slane %v5487_v9, %v23133_v14  ;;  %v6244_v23 = vrot.slane %v5488_v10, %v23133_v14  ;;  %v23198_v25 = vpop.f32.mrb[19].mxu0  ;;  %v10428_v59 = vld [vmem:[#allocation2 + $0x14] sm:$0x1] }
 0x117   : > { %v6181_v27 = vrot.slane %v6174_v15, %v23133_v14  ;;  %v6195_v28 = vrot.slane %v6188_v16, %v23133_v14  ;;  %v6223_v29 = vrot.slane %v6216_v17, %v23133_v14  ;;  %v9634_v32 = vunpack.c.l.b16 %v6167_v13 }
 0x118   : > { %v6209_v33 = vrot.slane %v6202_v21, %v23133_v14  ;;  %v6237_v34 = vrot.slane %v6230_v22, %v23133_v14  ;;  %v6251_v39 = vrot.slane %v6244_v23, %v23133_v14  ;;  %v6258_v40 = vrot.slane %v5489_v19, %v23133_v14  ;;  %21717 = vmatmul.mubr.msk.bf16.gmra.mrb[124].mxu0 %vm856_vm0, %v21914_v12 }
 0x119   : > { %v9635_v41 = vunpack.c.l.b16 %v6181_v27  ;;  %v9636_v42 = vunpack.c.l.b16 %v6195_v28  ;;  %v9638_v43 = vunpack.c.l.b16 %v6223_v29  ;;  %v23208_v45 = vrot.slane %v9634_v32, 7 }
 0x11a   : > { %v6265_v46 = vrot.slane %v6258_v40, %v23133_v14  ;;  %v9637_v49 = vunpack.c.l.b16 %v6209_v33  ;;  %v9639_v51 = vunpack.c.l.b16 %v6237_v34  ;;  %v9640_v52 = vunpack.c.l.b16 %v6251_v39 }
 0x11b   : > { %v23211_v53 = vrot.slane %v9635_v41, 6  ;;  %v23213_v54 = vrot.slane %v9636_v42, 5  ;;  %v23215_v55 = vrot.slane %v9638_v43, 3  ;;  %v2159_v60 = vcombine.high %v23159_v36, %v23159_v36  ;;  %v23225_v61 = vpop.f32.mrb[20].mxu0 }
 0x11c   : > { %v23227_v62 = vrot.slane %v9637_v49, 4  ;;  %v23229_v0 = vrot.slane %v9639_v51, 2  ;;  %v23231_v1 = vrot.slane %v9640_v52, 1  ;;  %v20538_v2 = vcombine.low %v6265_v46, %v6265_v46  ;;  %v23233_v4 = vpop.f32.mrb[21].mxu0 }
 0x11d   : > { %v2160_v6 = vcombine.high %v23172_v47, %v23172_v47  ;;  %v2161_v7 = vcombine.high %v23175_v48, %v23175_v48  ;;  %v2162_v9 = vcombine.high %v23180_v57, %v23180_v57  ;;  %v3939_v10 = vshrl.u32 %v23159_v36, 16  ;;  %v23242_v12 = vpop.f32.mrb[22].mxu0 }
 0x11e   : > { %v10429_v13 = vsel %vm23219_vm5, %v20538_v2, %v10428_v59  ;;  %v3944_v15 = vshrl.u32 %v23175_v48, 16  ;;  %v3949_v16 = vshrl.u32 %v2159_v60, 16  ;;  %v3959_v17 = vshrl.u32 %v23172_v47, 16  ;;  %v23248_v19 = vpop.f32.mrb[23].mxu0 }
 0x11f   : > { %10430 = vst [vmem:[#allocation2 + $0x14] sm:$0x1] %v10429_v13  ;;  %v3954_v21 = vshrl.u32 %v2161_v7, 16  ;;  %v3964_v22 = vshrl.u32 %v23180_v57, 16  ;;  %v3969_v23 = vshrl.u32 %v2160_v6, 16  ;;  %v3974_v27 = vshrl.u32 %v2162_v9, 16 }
 0x120   : > { %v5474_v28 = vmax.bf16 %v3939_v10, %v23159_v36  ;;  %v5475_v29 = vmax.bf16 %v3944_v15, %v23175_v48  ;;  %v5476_v32 = vmax.bf16 %v3949_v16, %v2159_v60  ;;  %v5478_v33 = vmax.bf16 %v3959_v17, %v23172_v47 }
 0x121   : > { %v5477_v34 = vmax.bf16 %v3954_v21, %v2161_v7  ;;  %v5479_v39 = vmax.bf16 %v3964_v22, %v23180_v57  ;;  %v5480_v40 = vmax.bf16 %v3969_v23, %v2160_v6  ;;  %v5481_v41 = vmax.bf16 %v3974_v27, %v2162_v9 }
 0x122   : > { %v6048_v42 = vrot.slane %v5474_v28, %v23133_v14  ;;  %v6062_v43 = vrot.slane %v5475_v29, %v23133_v14  ;;  %v6076_v46 = vrot.slane %v5476_v32, %v23133_v14  ;;  %v6104_v36 = vrot.slane %v5478_v33, %v23133_v14 }
 0x123   : > { %v6090_v48 = vrot.slane %v5477_v34, %v23133_v14  ;;  %v6118_v47 = vrot.slane %v5479_v39, %v23133_v14  ;;  %v6132_v49 = vrot.slane %v5480_v40, %v23133_v14  ;;  %v6146_v57 = vrot.slane %v5481_v41, %v23133_v14  ;;  %v23263_v51 = vpop.f32.mrb[24].mxu0 }
 0x124   : > { %v6055_v52 = vrot.slane %v6048_v42, %v23133_v14  ;;  %v6069_v59 = vrot.slane %v6062_v43, %v23133_v14  ;;  %v6083_v60 = vrot.slane %v6076_v46, %v23133_v14  ;;  %v6111_v2 = vrot.slane %v6104_v36, %v23133_v14  ;;  %v23269_v6 = vpop.f32.mrb[25].mxu0 }
 0x125   : > { %v6097_v7 = vrot.slane %v6090_v48, %v23133_v14  ;;  %v6125_v9 = vrot.slane %v6118_v47, %v23133_v14  ;;  %v6139_v10 = vrot.slane %v6132_v49, %v23133_v14  ;;  %v6153_v13 = vrot.slane %v6146_v57, %v23133_v14  ;;  %v23275_v15 = vpop.f32.mrb[26].mxu0 }
 0x126   : > { %v9626_v16 = vunpack.c.l.b16 %v6055_v52  ;;  %v9627_v17 = vunpack.c.l.b16 %v6069_v59  ;;  %v9628_v21 = vunpack.c.l.b16 %v6083_v60  ;;  %v9630_v22 = vunpack.c.l.b16 %v6111_v2  ;;  %v23277_v23 = vpop.f32.mrb[27].mxu0 }
 0x127   : > { %v9629_v27 = vunpack.c.l.b16 %v6097_v7  ;;  %v9631_v28 = vunpack.c.l.b16 %v6125_v9  ;;  %v9632_v29 = vunpack.c.l.b16 %v6139_v10  ;;  %v9633_v32 = vunpack.c.l.b16 %v6153_v13 }
 0x128   : > { %v9882_v33 = vrot.slane %v9626_v16, 7  ;;  %v9883_v34 = vrot.slane %v9627_v17, 6  ;;  %v9886_v39 = vrot.slane %v9628_v21, 5  ;;  %v9892_v40 = vrot.slane %v9630_v22, 3  ;;  %v10421_v16 = vld [vmem:[#allocation2 + $0xc] sm:$0xf] }
 0x129   : > { %v9889_v41 = vrot.slane %v9629_v27, 4  ;;  %v9895_v42 = vrot.slane %v9631_v28, 2  ;;  %v9898_v43 = vrot.slane %v9632_v29, 1  ;;  %v9903_v46 = vsel %vm9902_vm6, %v23208_v45, %v9633_v32 }
 0x12a   : > { %v9885_v36 = vsel %vm9884_vm7, %v9883_v34, %v9882_v33  ;;  %v9905_v48 = vsel %vm9884_vm7, %v23211_v53, %v9903_v46  ;;  %v1991_v47 = vpack.c.bf16 %v23152_v30, %v23139_v20  ;;  %v1990_v49 = vpack.c.bf16 %v23162_v37, %v23144_v24 }
 0x12b   : > { %v9888_v57 = vsel %vm9887_vm8, %v9886_v39, %v9885_v36  ;;  %v9907_v52 = vsel %vm9887_vm8, %v23213_v54, %v9905_v48  ;;  %v1140_v59 = vadd.f32 %v23147_v26, %v23072_v58  ;;  %v1132_v45 = vadd.f32 %v23072_v58, %v23154_v31  ;;  %v23295_v60 = vpop.f32.mrb[28].mxu0 }
 0x12c   : > { %v9891_v53 = vsel %vm9890_vm9, %v9889_v41, %v9888_v57  ;;  %v9909_v20 = vsel %vm9890_vm9, %v23227_v62, %v9907_v52  ;;  %v1143_v24 = vadd.f32 %v23164_v38, %v23072_v58  ;;  %v1135_v30 = vadd.f32 %v23072_v58, %v23169_v44  ;;  %v23304_v37 = vpop.f32.mrb[29].mxu0 }
 0x12d   : > { %v9894_v26 = vsel %vm9893_vm10, %v9892_v40, %v9891_v53  ;;  %v9911_v31 = vsel %vm9893_vm10, %v23215_v55, %v9909_v20  ;;  %v1608_v54 = vmax.f32 %v1140_v59, 0.0  ;;  %v1606_v2 = vmax.f32 %v1132_v45, 0.0  ;;  %v23309_v7 = vpop.f32.mrb[30].mxu0 }
 0x12e   : > { %v9897_v9 = vsel %vm9896_vm11, %v9895_v42, %v9894_v26  ;;  %v23314_v62 = vsel %vm9896_vm11, %v23229_v0, %v9911_v31  ;;  %v1609_v38 = vmax.f32 %v1143_v24, 0.0  ;;  %v1607_v10 = vmax.f32 %v1135_v30, 0.0  ;;  %v23316_v44 = vpop.f32.mrb[31].mxu0 }
 0x12f   : > { %v9900_v13 = vsel %vm9899_vm12, %v9898_v43, %v9897_v9  ;;  %v1740_v17 = vmul.f32 %v23080_v63, %v1608_v54  ;;  %v1738_v21 = vmul.f32 %v23080_v63, %v1606_v2  ;;  %v1156_v0 = vadd.f32 %v23184_v5, %v23072_v58  ;;  %v21923_v9 = vld [vmem:[%s28999_s3] sm:$0xff]  }
 0x130   : > { %v10321_v22 = vpack.c.b16 %v9900_v13, %v9900_v13  ;;  %v1741_v27 = vmul.f32 %v23080_v63, %v1609_v38  ;;  %v1739_v28 = vmul.f32 %v23080_v63, %v1607_v10  ;;  %v1148_v29 = vadd.f32 %v23072_v58, %v23186_v11 }
 0x131   : > { %v1872_v32 = vadd.f32 %v23089_v8, %v1740_v17  ;;  %v1870_v33 = vadd.f32 %v23089_v8, %v1738_v21  ;;  %v1612_v34 = vmax.f32 %v1156_v0, 0.0  ;;  %v1159_v39 = vadd.f32 %v23193_v18, %v23072_v58 }
 0x132   : > { %v10422_v40 = vsel %vm23321_vm14, %v10321_v22, %v10421_v16  ;;  %v1873_v5 = vadd.f32 %v23089_v8, %v1741_v27  ;;  %v1871_v41 = vadd.f32 %v23089_v8, %v1739_v28  ;;  %v1610_v42 = vmax.f32 %v1148_v29, 0.0 }
 0x133   : > { %10423 = vst [vmem:[#allocation2 + $0xc] sm:$0xf] %v10422_v40  ;;  %v1744_v43 = vmul.f32 %v23080_v63, %v1612_v34  ;;  %v1613_v11 = vmax.f32 %v1159_v39, 0.0  ;;  %v1151_v46 = vadd.f32 %v23072_v58, %v23198_v25  ;;  %v1172_v36 = vadd.f32 %v23225_v61, %v23072_v58  ;;  %v23346_v48 = vpop.f32.mrb[32].mxu0  ;;  %v21920_v61 = vld [vmem:[%s28999_s3 + $0x40] sm:$0xff]  }
 0x134   : > { %v1993_v18 = vpack.c.bf16 %v1873_v5, %v1872_v32  ;;  %v1992_v57 = vpack.c.bf16 %v1871_v41, %v1870_v33  ;;  %v1742_v52 = vmul.f32 %v23080_v63, %v1610_v42  ;;  %v1164_v59 = vadd.f32 %v23072_v58, %v23233_v4  ;;  %v23351_v45 = vpop.f32.mrb[33].mxu0  ;;  %21348 = vmatprep.subr.bf16.mxu0 %v21920_v61 }
 0x135   : > { %v23354_v53 = vadd.f32 %v23089_v8, %v1744_v43  ;;  %v1745_v20 = vmul.f32 %v23080_v63, %v1613_v11  ;;  %v1611_v25 = vmax.f32 %v1151_v46, 0.0  ;;  %v1616_v24 = vmax.f32 %v1172_v36, 0.0  ;;  %v23357_v30 = vpop.f32.mrb[34].mxu0  ;;  %21349 = vmatpush3.bf16.msra.mxu0 %v21923_v9 }
 0x136   : > { %v2053_v26 = vmax.bf16 %v1993_v18, %v1991_v47  ;;  %v2052_v31 = vmax.bf16 %v1992_v57, %v1990_v49  ;;  %v23363_v54 = vadd.f32 %v23089_v8, %v1742_v52  ;;  %v1614_v4 = vmax.f32 %v1164_v59, 0.0  ;;  %v23365_v2 = vpop.f32.mrb[35].mxu0 }
 0x137   : > { %v23371_v38 = vadd.f32 %v23089_v8, %v1745_v20  ;;  %v1743_v10 = vmul.f32 %v23080_v63, %v1611_v25  ;;  %v1748_v13 = vmul.f32 %v23080_v63, %v1616_v24  ;;  %v23377_v47 = vadd.f32 %v23242_v12, %v23072_v58 }
 0x138   : > { %v2261_v49 = vcombine.high %v2053_v26, %v2053_v26  ;;  %v2268_v16 = vrot.slane %v2053_v26, %v23126_v3  ;;  %v2212_v17 = vcombine.high %v2052_v31, %v2052_v31  ;;  %v2219_v21 = vrot.slane %v2052_v31, %v23126_v3 }
 0x139   : > { %v23384_v22 = vadd.f32 %v23089_v8, %v1743_v10  ;;  %v23387_v27 = vadd.f32 %v23089_v8, %v1748_v13  ;;  %v1746_v12 = vmul.f32 %v23080_v63, %v1614_v4 }
 0x13a   : > { %v2275_v28 = vrot.slane %v2261_v49, %v23126_v3  ;;  %v2276_v29 = vcombine.high %v2268_v16, %v2268_v16  ;;  %v2284_v32 = vrot.slane %v2268_v16, %v23126_v3  ;;  %v2226_v33 = vrot.slane %v2212_v17, %v23126_v3 }
 0x13b   : > { %v2227_v34 = vcombine.high %v2219_v21, %v2219_v21  ;;  %v23394_v39 = vrot.slane %v2219_v21, %v23126_v3  ;;  %v23399_v5 = vadd.f32 %v23089_v8, %v1746_v12  ;;  %v23401_v41 = vpop.f32.mrb[36].mxu0 }
 0x13c   : > { %v2277_v42 = vcombine.high %v2275_v28, %v2275_v28  ;;  %v2291_v43 = vrot.slane %v2275_v28, %v23126_v3  ;;  %v2298_v11 = vrot.slane %v2276_v29, %v23126_v3  ;;  %v2306_v46 = vcombine.high %v2284_v32, %v2284_v32  ;;  %v23405_v36 = vpop.f32.mrb[37].mxu0 }
 0x13d   : > { %29025 = vst [vmem:[#allocation10_spill] sm:$0xff] %v23405_v36  ;;  %v4059_v18 = vshrl.u32 %v2284_v32, 16  ;;  %v2228_v57 = vcombine.high %v2226_v33, %v2226_v33  ;;  %v23408_v52 = vrot.slane %v2226_v33, %v23126_v3  ;;  %v23411_v59 = vrot.slane %v2227_v34, %v23126_v3  ;;  %v23413_v20 = vpop.f32.mrb[38].mxu0 }
 0x13e   : > { %29026 = vst [vmem:[#allocation11_spill] sm:$0xff] %v23413_v20  ;;  %v2305_v25 = vrot.slane %v2277_v42, %v23126_v3  ;;  %v2307_v24 = vcombine.high %v2291_v43, %v2291_v43  ;;  %v2308_v61 = vcombine.high %v2298_v11, %v2298_v11  ;;  %v4064_v26 = vshrl.u32 %v2298_v11, 16 }
 0x13f   : > { %v4069_v31 = vshrl.u32 %v2306_v46, 16  ;;  %v4079_v4 = vshrl.u32 %v2291_v43, 16  ;;  %v5498_v9 = vmax.bf16 %v4059_v18, %v2284_v32  ;;  %v23417_v10 = vrot.slane %v2228_v57, %v23126_v3 }
 0x140   : > { %v2309_v13 = vcombine.high %v2305_v25, %v2305_v25  ;;  %v4074_v49 = vshrl.u32 %v2308_v61, 16  ;;  %v4084_v16 = vshrl.u32 %v2305_v25, 16  ;;  %v4089_v17 = vshrl.u32 %v2307_v24, 16 }
 0x141   : > { %v5499_v21 = vmax.bf16 %v4064_v26, %v2298_v11  ;;  %v5500_v12 = vmax.bf16 %v4069_v31, %v2306_v46  ;;  %v5502_v28 = vmax.bf16 %v4079_v4, %v2291_v43  ;;  %v6384_v29 = vrot.slane %v5498_v9, %v23133_v14 }
 0x142   : > { %v4094_v33 = vshrl.u32 %v2309_v13, 16  ;;  %v5501_v34 = vmax.bf16 %v4074_v49, %v2308_v61  ;;  %v5503_v42 = vmax.bf16 %v4084_v16, %v2305_v25  ;;  %v5504_v35 = vmax.bf16 %v4089_v17, %v2307_v24 }
 0x143   : > { %v6391_v40 = vrot.slane %v6384_v29, %v23133_v14  ;;  %v6398_v32 = vrot.slane %v5499_v21, %v23133_v14  ;;  %v6412_v18 = vrot.slane %v5500_v12, %v23133_v14  ;;  %v6440_v57 = vrot.slane %v5502_v28, %v23133_v14 }
 0x144   : > { %v5505_v0 = vmax.bf16 %v4094_v33, %v2309_v13  ;;  %v6426_v50 = vrot.slane %v5501_v34, %v23133_v14  ;;  %v6454_v11 = vrot.slane %v5503_v42, %v23133_v14  ;;  %v6468_v43 = vrot.slane %v5504_v35, %v23133_v14  ;;  %v10435_v33 = vld [vmem:[#allocation2 + $0x20] sm:$0x1]  ;;  %v23445_v34 = vpop.f32.mrb[39].mxu0 }
 0x145   : > { %v6405_v46 = vrot.slane %v6398_v32, %v23133_v14  ;;  %v6419_v25 = vrot.slane %v6412_v18, %v23133_v14  ;;  %v6447_v24 = vrot.slane %v6440_v57, %v23133_v14  ;;  %v9650_v61 = vunpack.c.l.b16 %v6391_v40  ;;  %29027 = vst [vmem:[#allocation12_spill] sm:$0xff] %v23445_v34 }
 0x146   : > { %v6433_v26 = vrot.slane %v6426_v50, %v23133_v14  ;;  %v6461_v31 = vrot.slane %v6454_v11, %v23133_v14  ;;  %v6475_v4 = vrot.slane %v6468_v43, %v23133_v14  ;;  %v6482_v9 = vrot.slane %v5505_v0, %v23133_v14 }
 0x147   : > { %v9651_v13 = vunpack.c.l.b16 %v6405_v46  ;;  %v9652_v49 = vunpack.c.l.b16 %v6419_v25  ;;  %v9654_v16 = vunpack.c.l.b16 %v6447_v24  ;;  %v23434_v17 = vrot.slane %v9650_v61, 7 }
 0x148   : > { %v6489_v35 = vrot.slane %v6482_v9, %v23133_v14  ;;  %v9653_v21 = vunpack.c.l.b16 %v6433_v26  ;;  %v9655_v12 = vunpack.c.l.b16 %v6461_v31  ;;  %v9656_v28 = vunpack.c.l.b16 %v6475_v4 }
 0x149   : > { %v23437_v29 = vrot.slane %v9651_v13, 6  ;;  %v23439_v40 = vrot.slane %v9652_v49, 5  ;;  %v23441_v50 = vrot.slane %v9654_v16, 3  ;;  %v2257_v0 = vcombine.high %v23394_v39, %v23394_v39 }
 0x14a   : > { %v23447_v42 = vrot.slane %v9653_v21, 4  ;;  %v23449_v32 = vrot.slane %v9655_v12, 2  ;;  %v23451_v18 = vrot.slane %v9656_v28, 1  ;;  %v20539_v57 = vcombine.low %v6489_v35, %v6489_v35  ;;  %v23468_v28 = vpop.f32.mrb[40].mxu0 }
 0x14b   : > { %v2258_v11 = vcombine.high %v23408_v52, %v23408_v52  ;;  %v2259_v43 = vcombine.high %v23411_v59, %v23411_v59  ;;  %v2260_v46 = vcombine.high %v23417_v10, %v23417_v10  ;;  %v4019_v25 = vshrl.u32 %v23394_v39, 16 }
 0x14c   : > { %29028 = vst [vmem:[#allocation13_spill] sm:$0xff] %v23451_v18  ;;  %v10436_v24 = vsel %vm23219_vm5, %v20539_v57, %v10435_v33  ;;  %v4024_v61 = vshrl.u32 %v23411_v59, 16  ;;  %v4029_v26 = vshrl.u32 %v2257_v0, 16  ;;  %v4039_v31 = vshrl.u32 %v23408_v52, 16 }
 0x14d   : > { %10437 = vst [vmem:[#allocation2 + $0x20] sm:$0x1] %v10436_v24  ;;  %v4034_v4 = vshrl.u32 %v2259_v43, 16  ;;  %v4044_v9 = vshrl.u32 %v23417_v10, 16  ;;  %v4049_v13 = vshrl.u32 %v2258_v11, 16  ;;  %v4054_v49 = vshrl.u32 %v2260_v46, 16 }
 0x14e   : > { %v5490_v16 = vmax.bf16 %v4019_v25, %v23394_v39  ;;  %v5491_v35 = vmax.bf16 %v4024_v61, %v23411_v59  ;;  %v5492_v21 = vmax.bf16 %v4029_v26, %v2257_v0  ;;  %v5494_v12 = vmax.bf16 %v4039_v31, %v23408_v52  ;;  %v23471_v24 = vpop.f32.mrb[41].mxu0 }
 0x14f   : > { %v5493_v33 = vmax.bf16 %v4034_v4, %v2259_v43  ;;  %v5495_v57 = vmax.bf16 %v4044_v9, %v23417_v10  ;;  %v5496_v18 = vmax.bf16 %v4049_v13, %v2258_v11  ;;  %v5497_v34 = vmax.bf16 %v4054_v49, %v2260_v46  ;;  %v23477_v0 = vpop.f32.mrb[42].mxu0 }
 0x150   : > { %v6272_v20 = vrot.slane %v5490_v16, %v23133_v14  ;;  %v6286_v36 = vrot.slane %v5491_v35, %v23133_v14  ;;  %v6300_v39 = vrot.slane %v5492_v21, %v23133_v14  ;;  %v6328_v59 = vrot.slane %v5494_v12, %v23133_v14  ;;  %29029 = vst [vmem:[#allocation14_spill] sm:$0xff] %v23477_v0 }
 0x151   : > { %v6314_v52 = vrot.slane %v5493_v33, %v23133_v14  ;;  %v6342_v43 = vrot.slane %v5495_v57, %v23133_v14  ;;  %v6356_v10 = vrot.slane %v5496_v18, %v23133_v14  ;;  %v6370_v11 = vrot.slane %v5497_v34, %v23133_v14 }
 0x152   : > { %v6279_v46 = vrot.slane %v6272_v20, %v23133_v14  ;;  %v6293_v25 = vrot.slane %v6286_v36, %v23133_v14  ;;  %v6307_v61 = vrot.slane %v6300_v39, %v23133_v14  ;;  %v6335_v26 = vrot.slane %v6328_v59, %v23133_v14 }
 0x153   : > { %v6321_v31 = vrot.slane %v6314_v52, %v23133_v14  ;;  %v6349_v4 = vrot.slane %v6342_v43, %v23133_v14  ;;  %v6363_v9 = vrot.slane %v6356_v10, %v23133_v14  ;;  %v6377_v13 = vrot.slane %v6370_v11, %v23133_v14 }
 0x154   : > { %v9642_v49 = vunpack.c.l.b16 %v6279_v46  ;;  %v9643_v18 = vunpack.c.l.b16 %v6293_v25  ;;  %v9644_v16 = vunpack.c.l.b16 %v6307_v61  ;;  %v9646_v34 = vunpack.c.l.b16 %v6335_v26 }
 0x155   : > { %v9645_v35 = vunpack.c.l.b16 %v6321_v31  ;;  %v9647_v20 = vunpack.c.l.b16 %v6349_v4  ;;  %v9648_v21 = vunpack.c.l.b16 %v6363_v9  ;;  %v9649_v36 = vunpack.c.l.b16 %v6377_v13 }
 0x156   : > { %v9916_v12 = vrot.slane %v9642_v49, 7  ;;  %v9917_v33 = vrot.slane %v9643_v18, 6  ;;  %v9919_v57 = vrot.slane %v9644_v16, 5  ;;  %v9923_v39 = vrot.slane %v9646_v34, 3  ;;  %v10431_v34 = vld [vmem:[#allocation2 + $0x18] sm:$0xf] }
 0x157   : > { %v9921_v59 = vrot.slane %v9645_v35, 4  ;;  %v9925_v52 = vrot.slane %v9647_v20, 2  ;;  %v9927_v0 = vrot.slane %v9648_v21, 1  ;;  %v9930_v43 = vsel %vm9902_vm6, %v23434_v17, %v9649_v36 }
 0x158   : > { %v9918_v10 = vsel %vm9884_vm7, %v9917_v33, %v9916_v12  ;;  %v9932_v11 = vsel %vm9884_vm7, %v23437_v29, %v9930_v43  ;;  %v1617_v46 = vmax.f32 %v23377_v47, 0.0  ;;  %v1167_v25 = vadd.f32 %v23072_v58, %v23248_v19 }
 0x159   : > { %v9920_v61 = vsel %vm9887_vm8, %v9919_v57, %v9918_v10  ;;  %v9934_v26 = vsel %vm9887_vm8, %v23439_v40, %v9932_v11  ;;  %v1188_v31 = vadd.f32 %v23263_v51, %v23072_v58  ;;  %v1180_v17 = vadd.f32 %v23072_v58, %v23269_v6 }
 0x15a   : > { %v9922_v4 = vsel %vm9890_vm9, %v9921_v59, %v9920_v61  ;;  %v9936_v29 = vsel %vm9890_vm9, %v23447_v42, %v9934_v26  ;;  %v1749_v47 = vmul.f32 %v23080_v63, %v1617_v46  ;;  %v1615_v9 = vmax.f32 %v1167_v25, 0.0 }
 0x15b   : > { %v9924_v19 = vsel %vm9893_vm10, %v9923_v39, %v9922_v4  ;;  %v9938_v13 = vsel %vm9893_vm10, %v23441_v50, %v9936_v29  ;;  %v1620_v40 = vmax.f32 %v1188_v31, 0.0  ;;  %v1618_v49 = vmax.f32 %v1180_v17, 0.0 }
 0x15c   : > { %v9926_v51 = vsel %vm9896_vm11, %v9925_v52, %v9924_v19  ;;  %v23516_v6 = vsel %vm9896_vm11, %v23449_v32, %v9938_v13  ;;  %v1881_v18 = vadd.f32 %v23089_v8, %v1749_v47  ;;  %v1747_v42 = vmul.f32 %v23080_v63, %v1615_v9  ;;  %v23551_v52 = vld [vmem:[%s28998_s2 + $0x1] ss:$0 sm:$0xff]  ;;  %v23585_v47 = vld [vmem:[%s28998_s2 + $0x2] ss:$0 sm:$0xff] }
 0x15d   : > { %v9928_v16 = vsel %vm9899_vm12, %v9927_v0, %v9926_v51  ;;  %v1752_v35 = vmul.f32 %v23080_v63, %v1620_v40  ;;  %v1750_v20 = vmul.f32 %v23080_v63, %v1618_v49  ;;  %v1191_v50 = vadd.f32 %v23275_v15, %v23072_v58  ;;  %v23538_v63 = vld [vmem:[%s28998_s2] ss:$0 sm:$0xff] }
 0x15e   : > { %v10324_v21 = vpack.c.b16 %v9928_v16, %v9928_v16  ;;  %v1997_v36 = vpack.c.bf16 %v1881_v18, %v23387_v27  ;;  %v1879_v32 = vadd.f32 %v23089_v8, %v1747_v42  ;;  %v1183_v12 = vadd.f32 %v23072_v58, %v23277_v23 }
 0x15f   : > { %v23530_v33 = vadd.f32 %v23089_v8, %v1752_v35  ;;  %v23533_v0 = vadd.f32 %v23089_v8, %v1750_v20  ;;  %v1621_v57 = vmax.f32 %v1191_v50, 0.0  ;;  %v1204_v15 = vadd.f32 %v23538_v63, %v23295_v60 }
 0x160   : > { %v10432_v27 = vsel %vm23321_vm14, %v10324_v21, %v10431_v34  ;;  %v29030_v58 = vpack.c.bf16 %v23371_v38, %v23354_v53  ;;  %v1996_v39 = vpack.c.bf16 %v1879_v32, %v23399_v5  ;;  %v1619_v59 = vmax.f32 %v1183_v12, 0.0 }
 0x161   : > { %10433 = vst [vmem:[#allocation2 + $0x18] sm:$0xf] %v10432_v27  ;;  %v1753_v43 = vmul.f32 %v23551_v52, %v1621_v57  ;;  %v1624_v10 = vmax.f32 %v1204_v15, 0.0  ;;  %v23556_v60 = vadd.f32 %v23538_v63, %v23304_v37  ;;  %v23560_v53 = vadd.f32 %v23538_v63, %v23309_v7  ;;  %v23573_v7 = vpop.f32.mrb[43].mxu0 }
 0x162   : > { %v2055_v23 = vmax.bf16 %v1997_v36, %v29030_v58  ;;  %v29031_v11 = vpack.c.bf16 %v23384_v22, %v23363_v54  ;;  %v1751_v25 = vmul.f32 %v23551_v52, %v1619_v59 }
 0x163   : > { %v23568_v61 = vadd.f32 %v23089_v8, %v1753_v43  ;;  %v1756_v26 = vmul.f32 %v23551_v52, %v1624_v10 }
 0x164   : > { %v2359_v38 = vcombine.high %v2055_v23, %v2055_v23  ;;  %v2366_v5 = vrot.slane %v2055_v23, %v23126_v3  ;;  %v2054_v46 = vmax.bf16 %v1996_v39, %v29031_v11  ;;  %v23588_v9 = vadd.f32 %v23585_v47, %v1751_v25  ;;  %v23603_v39 = vpop.f32.mrb[44].mxu0 }
 0x165   : > { %v23591_v19 = vadd.f32 %v23585_v47, %v1756_v26 }
 0x166   : > { %v2373_v17 = vrot.slane %v2359_v38, %v23126_v3  ;;  %v2374_v4 = vcombine.high %v2366_v5, %v2366_v5  ;;  %v2382_v29 = vrot.slane %v2366_v5, %v23126_v3  ;;  %v2310_v54 = vcombine.high %v2054_v46, %v2054_v46  ;;  %v23606_v5 = vpop.f32.mrb[45].mxu0 }
 0x167   : > { %v23578_v22 = vrot.slane %v2054_v46, %v23126_v3 }
 0x168   : > { %v2375_v13 = vcombine.high %v2373_v17, %v2373_v17  ;;  %v2389_v40 = vrot.slane %v2373_v17, %v23126_v3  ;;  %v2396_v49 = vrot.slane %v2374_v4, %v23126_v3  ;;  %v2404_v51 = vcombine.high %v2382_v29, %v2382_v29  ;;  %v23608_v17 = vpop.f32.mrb[46].mxu0 }
 0x169   : > { %v4139_v18 = vshrl.u32 %v2382_v29, 16  ;;  %v2324_v42 = vrot.slane %v2310_v54, %v23126_v3  ;;  %v2325_v16 = vcombine.high %v23578_v22, %v23578_v22  ;;  %v23600_v34 = vrot.slane %v23578_v22, %v23126_v3 }
 0x16a   : > { %v2403_v35 = vrot.slane %v2375_v13, %v23126_v3  ;;  %v2405_v20 = vcombine.high %v2389_v40, %v2389_v40  ;;  %v2406_v50 = vcombine.high %v2396_v49, %v2396_v49  ;;  %v4144_v21 = vshrl.u32 %v2396_v49, 16 }
 0x16b   : > { %v4149_v36 = vshrl.u32 %v2404_v51, 16  ;;  %v4159_v32 = vshrl.u32 %v2389_v40, 16  ;;  %v5514_v12 = vmax.bf16 %v4139_v18, %v2382_v29  ;;  %v2326_v57 = vcombine.high %v2324_v42, %v2324_v42 }
 0x16c   : > { %v2407_v15 = vcombine.high %v2403_v35, %v2403_v35  ;;  %v4154_v27 = vshrl.u32 %v2406_v50, 16  ;;  %v4164_v58 = vshrl.u32 %v2403_v35, 16  ;;  %v4169_v23 = vshrl.u32 %v2405_v20, 16 }
 0x16d   : > { %v5515_v59 = vmax.bf16 %v4144_v21, %v2396_v49  ;;  %v5516_v43 = vmax.bf16 %v4149_v36, %v2404_v51  ;;  %v5518_v10 = vmax.bf16 %v4159_v32, %v2389_v40  ;;  %v6608_v38 = vrot.slane %v5514_v12, %v23133_v14  ;;  %v23620_v21 = vpop.f32.mrb[47].mxu0 }
 0x16e   : > { %v4174_v11 = vshrl.u32 %v2407_v15, 16  ;;  %v5517_v46 = vmax.bf16 %v4154_v27, %v2406_v50  ;;  %v5519_v25 = vmax.bf16 %v4164_v58, %v2403_v35  ;;  %v5520_v26 = vmax.bf16 %v4169_v23, %v2405_v20  ;;  %29032 = vst [vmem:[#allocation15_spill] sm:$0xff] %v23620_v21 }
 0x16f   : > { %v6615_v4 = vrot.slane %v6608_v38, %v23133_v14  ;;  %v6622_v29 = vrot.slane %v5515_v59, %v23133_v14  ;;  %v6636_v54 = vrot.slane %v5516_v43, %v23133_v14  ;;  %v6664_v22 = vrot.slane %v5518_v10, %v23133_v14 }
 0x170   : > { %v5521_v13 = vmax.bf16 %v4174_v11, %v2407_v15  ;;  %v6650_v40 = vrot.slane %v5517_v46, %v23133_v14  ;;  %v6678_v49 = vrot.slane %v5519_v25, %v23133_v14  ;;  %v6692_v51 = vrot.slane %v5520_v26, %v23133_v14 }
 0x171   : > { %v6629_v18 = vrot.slane %v6622_v29, %v23133_v14  ;;  %v6643_v35 = vrot.slane %v6636_v54, %v23133_v14  ;;  %v6671_v20 = vrot.slane %v6664_v22, %v23133_v14  ;;  %v9666_v50 = vunpack.c.l.b16 %v6615_v4  ;;  %v10442_v4 = vld [vmem:[#allocation2 + $0x2c] sm:$0x1] }
 0x172   : > { %v6657_v36 = vrot.slane %v6650_v40, %v23133_v14  ;;  %v6685_v32 = vrot.slane %v6678_v49, %v23133_v14  ;;  %v6699_v12 = vrot.slane %v6692_v51, %v23133_v14  ;;  %v6706_v15 = vrot.slane %v5521_v13, %v23133_v14 }
 0x173   : > { %v9667_v27 = vunpack.c.l.b16 %v6629_v18  ;;  %v9668_v58 = vunpack.c.l.b16 %v6643_v35  ;;  %v9670_v23 = vunpack.c.l.b16 %v6671_v20  ;;  %v23626_v59 = vrot.slane %v9666_v50, 7 }
 0x174   : > { %v6713_v43 = vrot.slane %v6706_v15, %v23133_v14  ;;  %v9669_v10 = vunpack.c.l.b16 %v6657_v36  ;;  %v9671_v38 = vunpack.c.l.b16 %v6685_v32  ;;  %v9672_v11 = vunpack.c.l.b16 %v6699_v12 }
 0x175   : > { %v23629_v46 = vrot.slane %v9667_v27, 6  ;;  %v23631_v25 = vrot.slane %v9668_v58, 5  ;;  %v23633_v26 = vrot.slane %v9670_v23, 3  ;;  %v2340_v29 = vrot.slane %v2324_v42, %v23126_v3 }
 0x176   : > { %v23636_v54 = vrot.slane %v9669_v10, 4  ;;  %v23638_v22 = vrot.slane %v9671_v38, 2  ;;  %v23640_v13 = vrot.slane %v9672_v11, 1  ;;  %v20540_v40 = vcombine.low %v6713_v43, %v6713_v43 }
 0x177   : > { %v2347_v49 = vrot.slane %v2325_v16, %v23126_v3  ;;  %v2354_v51 = vrot.slane %v2326_v57, %v23126_v3  ;;  %v2355_v18 = vcombine.high %v23600_v34, %v23600_v34  ;;  %v2356_v35 = vcombine.high %v2340_v29, %v2340_v29 }
 0x178   : > { %29033 = vst [vmem:[#allocation16_spill] sm:$0xff] %v23640_v13  ;;  %v10443_v20 = vsel %vm23219_vm5, %v20540_v40, %v10442_v4  ;;  %v4099_v42 = vshrl.u32 %v23600_v34, 16  ;;  %v4119_v50 = vshrl.u32 %v2340_v29, 16 }
 0x179   : > { %10444 = vst [vmem:[#allocation2 + $0x2c] sm:$0x1] %v10443_v20  ;;  %v2357_v32 = vcombine.high %v2347_v49, %v2347_v49  ;;  %v2358_v12 = vcombine.high %v2354_v51, %v2354_v51  ;;  %v4104_v15 = vshrl.u32 %v2347_v49, 16  ;;  %v4109_v16 = vshrl.u32 %v2355_v18, 16 }
 0x17a   : > { %v4124_v27 = vshrl.u32 %v2354_v51, 16  ;;  %v4129_v57 = vshrl.u32 %v2356_v35, 16  ;;  %v5506_v58 = vmax.bf16 %v4099_v42, %v23600_v34  ;;  %v5510_v23 = vmax.bf16 %v4119_v50, %v2340_v29 }
 0x17b   : > { %v4114_v43 = vshrl.u32 %v2357_v32, 16  ;;  %v4134_v10 = vshrl.u32 %v2358_v12, 16  ;;  %v5507_v38 = vmax.bf16 %v4104_v15, %v2347_v49  ;;  %v5508_v11 = vmax.bf16 %v4109_v16, %v2355_v18 }
 0x17c   : > { %v5511_v4 = vmax.bf16 %v4124_v27, %v2354_v51  ;;  %v5512_v40 = vmax.bf16 %v4129_v57, %v2356_v35  ;;  %v6496_v8 = vrot.slane %v5506_v58, %v23133_v14  ;;  %v6552_v36 = vrot.slane %v5510_v23, %v23133_v14 }
 0x17d   : > { %v5509_v20 = vmax.bf16 %v4114_v43, %v2357_v32  ;;  %v5513_v31 = vmax.bf16 %v4134_v10, %v2358_v12  ;;  %v6510_v37 = vrot.slane %v5507_v38, %v23133_v14  ;;  %v6524_v13 = vrot.slane %v5508_v11, %v23133_v14 }
 0x17e   : > { %v6503_v21 = vrot.slane %v6496_v8, %v23133_v14  ;;  %v6559_v34 = vrot.slane %v6552_v36, %v23133_v14  ;;  %v6566_v29 = vrot.slane %v5511_v4, %v23133_v14  ;;  %v6580_v49 = vrot.slane %v5512_v40, %v23133_v14 }
 0x17f   : > { %v6517_v51 = vrot.slane %v6510_v37, %v23133_v14  ;;  %v6531_v18 = vrot.slane %v6524_v13, %v23133_v14  ;;  %v6538_v35 = vrot.slane %v5509_v20, %v23133_v14  ;;  %v6594_v42 = vrot.slane %v5513_v31, %v23133_v14 }
 0x180   : > { %v6573_v50 = vrot.slane %v6566_v29, %v23133_v14  ;;  %v6587_v32 = vrot.slane %v6580_v49, %v23133_v14  ;;  %v9658_v12 = vunpack.c.l.b16 %v6503_v21  ;;  %v9662_v8 = vunpack.c.l.b16 %v6559_v34  ;;  %v23674_v34 = vpop.f32.mrb[48].mxu0 }
 0x181   : > { %v6545_v36 = vrot.slane %v6538_v35, %v23133_v14  ;;  %v6601_v15 = vrot.slane %v6594_v42, %v23133_v14  ;;  %v9659_v16 = vunpack.c.l.b16 %v6517_v51  ;;  %v9660_v27 = vunpack.c.l.b16 %v6531_v18  ;;  %v21917_v35 = vld [vmem:[#allocation2] sm:$0xff]   ;;  %v23681_v42 = vpop.f32.mrb[49].mxu0 }
 0x182   : > { %v9663_v57 = vunpack.c.l.b16 %v6573_v50  ;;  %v9664_v37 = vunpack.c.l.b16 %v6587_v32  ;;  %v9943_v58 = vrot.slane %v9658_v12, 7  ;;  %v9950_v13 = vrot.slane %v9662_v8, 3  ;;  %v21918_v12 = vld [vmem:[#allocation2 + $0x8] ss:$0 sps:$4 sm:$0x11]   ;;  %v23688_v8 = vpop.f32.mrb[50].mxu0 }
 0x183   : > { %v9661_v23 = vunpack.c.l.b16 %v6545_v36  ;;  %v9665_v43 = vunpack.c.l.b16 %v6601_v15  ;;  %v9944_v10 = vrot.slane %v9659_v16, 6  ;;  %v9946_v31 = vrot.slane %v9660_v27, 5  ;;  %v23693_v15 = vpop.f32.mrb[51].mxu0 }
 0x184   : > { %v9952_v38 = vrot.slane %v9663_v57, 2  ;;  %v9954_v11 = vrot.slane %v9664_v37, 1  ;;  %v29034_v4 = vmax.f32 %v23556_v60, 0.0  ;;  %v29035_v40 = vmax.f32 %v23560_v53, 0.0 }
 0x185   : > { %v9945_v29 = vsel %vm9884_vm7, %v9944_v10, %v9943_v58  ;;  %v9948_v49 = vrot.slane %v9661_v23, 4  ;;  %v9957_v51 = vsel %vm9902_vm6, %v23626_v59, %v9665_v43  ;;  %v1199_v18 = vadd.f32 %v23538_v63, %v23316_v44 }
 0x186   : > { %v1754_v21 = vmul.f32 %v23551_v52, %v29034_v4  ;;  %v1757_v20 = vmul.f32 %v23551_v52, %v29035_v40  ;;  %v9947_v60 = vsel %vm9887_vm8, %v9946_v31, %v9945_v29  ;;  %v9959_v53 = vsel %vm9884_vm7, %v23629_v46, %v9957_v51 }
 0x187   : > { %v9949_v59 = vsel %vm9890_vm9, %v9948_v49, %v9947_v60  ;;  %v9961_v44 = vsel %vm9887_vm8, %v23631_v25, %v9959_v53  ;;  %v1623_v36 = vmax.f32 %v1199_v18, 0.0  ;;  %v10858_v57 = vshrl.u32 %v21917_v35, 16 }
 0x188   : > { %v1886_v50 = vadd.f32 %v23585_v47, %v1754_v21  ;;  %v1889_v32 = vadd.f32 %v23585_v47, %v1757_v20  ;;  %v9951_v16 = vsel %vm9893_vm10, %v9950_v13, %v9949_v59  ;;  %v9963_v46 = vsel %vm9890_vm9, %v23636_v54, %v9961_v44  ;;  %v10438_v13 = vld [vmem:[#allocation2 + $0x24] sm:$0xf] }
 0x189   : > { %v9953_v37 = vsel %vm9896_vm11, %v9952_v38, %v9951_v16  ;;  %v9965_v58 = vsel %vm9893_vm10, %v23633_v26, %v9963_v46  ;;  %v1755_v23 = vmul.f32 %v23551_v52, %v1623_v36  ;;  %v10860_v25 = vshll.u32 %v21917_v35, 16 }
 0x18a   : > { %v2001_v27 = vpack.c.bf16 %v1889_v32, %v23591_v19  ;;  %v9955_v43 = vsel %vm9899_vm12, %v9954_v11, %v9953_v37  ;;  %v23706_v10 = vsel %vm9896_vm11, %v23638_v22, %v9965_v58  ;;  %v29036_v54 = vpack.c.bf16 %v23568_v61, %v23530_v33 }
 0x18b   : > { %v10865_v31 = vshll.u32 %v21918_v12, 16  ;;  %v10327_v4 = vpack.c.b16 %v9955_v43, %v9955_v43  ;;  %v1887_v38 = vadd.f32 %v23585_v47, %v1755_v23  ;;  %v10862_v21 = vrot.slane %v10860_v25, 1 }
 0x18c   : > { %v2057_v19 = vmax.bf16 %v2001_v27, %v29036_v54  ;;  %v9915_v26 = vsel %vm9899_vm12, %v23231_v1, %v23314_v62  ;;  %v1220_v61 = vadd.f32 %v23538_v63, %v23346_v48  ;;  %v23725_v1 = vadd.f32 %v23538_v63, %v23351_v45 }
 0x18d   : > { %v10867_v20 = vrot.slane %v10865_v31, 1  ;;  %v10322_v22 = vpack.c.b16 %v9915_v26, %v9915_v26  ;;  %v10439_v29 = vsel %vm23321_vm14, %v10327_v4, %v10438_v13  ;;  %v2000_v49 = vpack.c.bf16 %v1887_v38, %v1886_v50 }
 0x18e   : > { %v2457_v40 = vcombine.high %v2057_v19, %v2057_v19  ;;  %v2464_v11 = vrot.slane %v2057_v19, %v23126_v3  ;;  %v10863_v33 = vor.u32 %v10862_v21, %v10858_v57  ;;  %10440 = vst [vmem:[#allocation2 + $0x24] sm:$0xf] %v10439_v29  ;;  %v29037_v62 = vpack.c.bf16 %v23588_v9, %v23533_v0 }
 0x18f   : > { %10424 = vst.msk [vmem:[#allocation2 + $0x10] sm:$0xf] %vm5730_vm2, %v10322_v22  ;;  %v1628_v50 = vmax.f32 %v1220_v61, 0.0  ;;  %v23733_v48 = vadd.f32 %v23538_v63, %v23357_v30 }
 0x190   : > { %v2471_v51 = vrot.slane %v2457_v40, %v23126_v3  ;;  %v2472_v18 = vcombine.high %v2464_v11, %v2464_v11  ;;  %v2480_v35 = vrot.slane %v2464_v11, %v23126_v3  ;;  %v2056_v60 = vmax.bf16 %v2000_v49, %v29037_v62 }
 0x191   : > { %v10868_v53 = vsel %vm10856_vm15, %v10863_v33, %v10867_v20  ;;  %v23742_v9 = vmul.f32 %v23551_v52, %v1628_v50 }
 0x192   : > { %v2473_v32 = vcombine.high %v2471_v51, %v2471_v51  ;;  %v2487_v12 = vrot.slane %v2471_v51, %v23126_v3  ;;  %v2494_v59 = vrot.slane %v2472_v18, %v23126_v3  ;;  %v2502_v44 = vcombine.high %v2480_v35, %v2480_v35  ;;  %11049 = vrot.lane.b32.xlu0 %v10868_v53, %s22728_s22 }
 0x193   : > { %v4219_v45 = vshrl.u32 %v2480_v35, 16  ;;  %v2408_v36 = vcombine.high %v2056_v60, %v2056_v60  ;;  %v23739_v0 = vrot.slane %v2056_v60, %v23126_v3 }
 0x194   : > { %v2501_v30 = vrot.slane %v2473_v32, %v23126_v3  ;;  %v2503_v16 = vcombine.high %v2487_v12, %v2487_v12  ;;  %v2504_v46 = vcombine.high %v2494_v59, %v2494_v59  ;;  %v4224_v27 = vshrl.u32 %v2494_v59, 16 }
 0x195   : > { %v4229_v57 = vshrl.u32 %v2502_v44, 16  ;;  %v4239_v37 = vshrl.u32 %v2487_v12, 16  ;;  %v5530_v58 = vmax.bf16 %v4219_v45, %v2480_v35  ;;  %v23746_v23 = vrot.slane %v2408_v36, %v23126_v3  ;;  %v21940_v45 = vld [vmem:[%s28999_s3 + $0x48] sm:$0xff]  }
 0x196   : > { %v2505_v25 = vcombine.high %v2501_v30, %v2501_v30  ;;  %v4234_v43 = vshrl.u32 %v2504_v46, 16  ;;  %v4244_v13 = vshrl.u32 %v2501_v30, 16  ;;  %v4249_v54 = vshrl.u32 %v2503_v16, 16  ;;  %v21919_v21 = vld [vmem:[#allocation2 + $0xc] sm:$0xff]   ;;  %21350 = vmatprep.subr.bf16.mxu0 %v21940_v45 }
 0x197   : > { %v5531_v19 = vmax.bf16 %v4224_v27, %v2494_v59  ;;  %v5532_v31 = vmax.bf16 %v4229_v57, %v2502_v44  ;;  %v5534_v4 = vmax.bf16 %v4239_v37, %v2487_v12  ;;  %v6832_v38 = vrot.slane %v5530_v58, %v23133_v14  ;;  %11516 = vrot.lane.b32.xlu1 %v21919_v21, %s22729_s24  ;;  %v21941_v36 = vld [vmem:[%s28999_s3 + $0x8] sm:$0xff]  }
 0x198   : > { %v4254_v26 = vshrl.u32 %v2505_v25, 16  ;;  %v5533_v40 = vmax.bf16 %v4234_v43, %v2504_v46  ;;  %v5535_v11 = vmax.bf16 %v4244_v13, %v2501_v30  ;;  %v5536_v20 = vmax.bf16 %v4249_v54, %v2503_v16  ;;  %v23773_v43 = vpop.f32.mrb[52].mxu0  ;;  %21351 = vmatpush3.bf16.msra.mxu0 %v21941_v36 }
 0x199   : > { %v6839_v22 = vrot.slane %v6832_v38, %v23133_v14  ;;  %v6846_v29 = vrot.slane %v5531_v19, %v23133_v14  ;;  %v6860_v49 = vrot.slane %v5532_v31, %v23133_v14  ;;  %v6888_v33 = vrot.slane %v5534_v4, %v23133_v14  ;;  %v10449_v31 = vld [vmem:[#allocation2 + $0x38] sm:$0x1]  ;;  %v23783_v38 = vpop.f32.mrb[53].mxu0 }
 0x19a   : > { %v5537_v61 = vmax.bf16 %v4254_v26, %v2505_v25  ;;  %v6874_v51 = vrot.slane %v5533_v40, %v23133_v14  ;;  %v6902_v18 = vrot.slane %v5535_v11, %v23133_v14  ;;  %v6916_v35 = vrot.slane %v5536_v20, %v23133_v14  ;;  %v23791_v20 = vpop.f32.mrb[54].mxu0 }
 0x19b   : > { %v6853_v62 = vrot.slane %v6846_v29, %v23133_v14  ;;  %v6867_v60 = vrot.slane %v6860_v49, %v23133_v14  ;;  %v6895_v53 = vrot.slane %v6888_v33, %v23133_v14  ;;  %v9682_v50 = vunpack.c.l.b16 %v6839_v22 }
 0x19c   : > { %v6881_v32 = vrot.slane %v6874_v51, %v23133_v14  ;;  %v6909_v12 = vrot.slane %v6902_v18, %v23133_v14  ;;  %v6923_v59 = vrot.slane %v6916_v35, %v23133_v14  ;;  %v6930_v44 = vrot.slane %v5537_v61, %v23133_v14 }
 0x19d   : > { %v9683_v30 = vunpack.c.l.b16 %v6853_v62  ;;  %v9684_v16 = vunpack.c.l.b16 %v6867_v60  ;;  %v9686_v46 = vunpack.c.l.b16 %v6895_v53  ;;  %v23770_v27 = vrot.slane %v9682_v50, 7 }
 0x19e   : > { %v6937_v57 = vrot.slane %v6930_v44, %v23133_v14  ;;  %v9685_v37 = vunpack.c.l.b16 %v6881_v32  ;;  %v9687_v58 = vunpack.c.l.b16 %v6909_v12  ;;  %v9688_v25 = vunpack.c.l.b16 %v6923_v59 }
 0x19f   : > { %v23775_v13 = vrot.slane %v9683_v30, 6  ;;  %v23777_v54 = vrot.slane %v9684_v16, 5  ;;  %v23779_v19 = vrot.slane %v9686_v46, 3  ;;  %v2423_v4 = vcombine.high %v23739_v0, %v23739_v0 }
 0x1a0   : > { %v23785_v21 = vrot.slane %v9685_v37, 4  ;;  %v23787_v26 = vrot.slane %v9687_v58, 2  ;;  %v23789_v40 = vrot.slane %v9688_v25, 1  ;;  %v20541_v11 = vcombine.low %v6937_v57, %v6937_v57 }
 0x1a1   : > { %v2424_v22 = vcombine.high %v23746_v23, %v23746_v23  ;;  %v2431_v29 = vrot.slane %v23739_v0, %v23126_v3  ;;  %v2438_v49 = vrot.slane %v23746_v23, %v23126_v3  ;;  %v2445_v33 = vrot.slane %v2423_v4, %v23126_v3 }
 0x1a2   : > { %v10450_v61 = vsel %vm23219_vm5, %v20541_v11, %v10449_v31  ;;  %v23804_v51 = vadd.f32 %v23585_v47, %v23742_v9  ;;  %v1626_v18 = vmax.f32 %v23725_v1, 0.0  ;;  %v1629_v35 = vmax.f32 %v23733_v48, 0.0 }
 0x1a3   : > { %10451 = vst [vmem:[#allocation2 + $0x38] sm:$0x1] %v10450_v61  ;;  %v2452_v62 = vrot.slane %v2424_v22, %v23126_v3  ;;  %v2453_v0 = vcombine.high %v2431_v29, %v2431_v29  ;;  %v2454_v60 = vcombine.high %v2438_v49, %v2438_v49  ;;  %v2455_v53 = vcombine.high %v2445_v33, %v2445_v33 }
 0x1a4   : > { %v4179_v23 = vshrl.u32 %v2431_v29, 16  ;;  %v4184_v50 = vshrl.u32 %v2445_v33, 16  ;;  %v4199_v32 = vshrl.u32 %v2438_v49, 16  ;;  %v1758_v12 = vmul.f32 %v23551_v52, %v1626_v18 }
 0x1a5   : > { %v2456_v59 = vcombine.high %v2452_v62, %v2452_v62  ;;  %v4189_v44 = vshrl.u32 %v2453_v0, 16  ;;  %v4194_v45 = vshrl.u32 %v2455_v53, 16  ;;  %v4204_v9 = vshrl.u32 %v2452_v62, 16 }
 0x1a6   : > { %v4209_v36 = vshrl.u32 %v2454_v60, 16  ;;  %v5522_v30 = vmax.bf16 %v4179_v23, %v2431_v29  ;;  %v5523_v1 = vmax.bf16 %v4184_v50, %v2445_v33  ;;  %v5526_v16 = vmax.bf16 %v4199_v32, %v2438_v49 }
 0x1a7   : > { %v4214_v48 = vshrl.u32 %v2456_v59, 16  ;;  %v5524_v46 = vmax.bf16 %v4189_v44, %v2453_v0  ;;  %v5525_v57 = vmax.bf16 %v4194_v45, %v2455_v53  ;;  %v5527_v37 = vmax.bf16 %v4204_v9, %v2452_v62 }
 0x1a8   : > { %v5528_v58 = vmax.bf16 %v4209_v36, %v2454_v60  ;;  %v6720_v25 = vrot.slane %v5522_v30, %v23133_v14  ;;  %v6734_v31 = vrot.slane %v5523_v1, %v23133_v14  ;;  %v6776_v4 = vrot.slane %v5526_v16, %v23133_v14  ;;  %v21921_v1 = vld [vmem:[#allocation2 + $0xc] sm:$0xfe]   ;;  %v21922_v16 = vld [vmem:[#allocation2 + $0x14] ss:$0 sps:$4 sm:$0x11]  }
 0x1a9   : > { %v5529_v11 = vmax.bf16 %v4214_v48, %v2456_v59  ;;  %v6748_v22 = vrot.slane %v5524_v46, %v23133_v14  ;;  %v6762_v61 = vrot.slane %v5525_v57, %v23133_v14  ;;  %v6790_v29 = vrot.slane %v5527_v37, %v23133_v14 }
 0x1aa   : > { %v6727_v49 = vrot.slane %v6720_v25, %v23133_v14  ;;  %v6741_v33 = vrot.slane %v6734_v31, %v23133_v14  ;;  %v6783_v18 = vrot.slane %v6776_v4, %v23133_v14  ;;  %v6804_v62 = vrot.slane %v5528_v58, %v23133_v14  ;;  %v23826_v58 = vpop.f32.mrb[55].mxu0 }
 0x1ab   : > { %v6755_v0 = vrot.slane %v6748_v22, %v23133_v14  ;;  %v6769_v60 = vrot.slane %v6762_v61, %v23133_v14  ;;  %v6797_v53 = vrot.slane %v6790_v29, %v23133_v14  ;;  %v6818_v23 = vrot.slane %v5529_v11, %v23133_v14  ;;  %v21924_v22 = vld [vmem:[#allocation2 + $0xc] sm:$0xfe]  }
 0x1ac   : > { %v6811_v50 = vrot.slane %v6804_v62, %v23133_v14  ;;  %v9674_v32 = vunpack.c.l.b16 %v6727_v49  ;;  %v9675_v59 = vunpack.c.l.b16 %v6741_v33  ;;  %v9678_v44 = vunpack.c.l.b16 %v6783_v18 }
 0x1ad   : > { %v6825_v45 = vrot.slane %v6818_v23, %v23133_v14  ;;  %v9676_v9 = vunpack.c.l.b16 %v6755_v0  ;;  %v9677_v36 = vunpack.c.l.b16 %v6769_v60  ;;  %v9679_v30 = vunpack.c.l.b16 %v6797_v53  ;;  %v21925_v53 = vld [vmem:[#allocation2 + $0x14] ss:$0 sps:$4 sm:$0x11]   ;;  %v21926_v23 = vld [vmem:[#allocation2 + $0xc] sm:$0xff]  }
 0x1ae   : > { %v9680_v48 = vunpack.c.l.b16 %v6811_v50  ;;  %v9970_v46 = vrot.slane %v9674_v32, 7  ;;  %v9971_v57 = vrot.slane %v9675_v59, 6  ;;  %v9977_v37 = vrot.slane %v9678_v44, 3 }
 0x1af   : > { %v9681_v25 = vunpack.c.l.b16 %v6825_v45  ;;  %v9973_v31 = vrot.slane %v9676_v9, 5  ;;  %v9975_v4 = vrot.slane %v9677_v36, 4  ;;  %v9979_v11 = vrot.slane %v9679_v30, 2  ;;  %v21927_v9 = vld [vmem:[#allocation2 + $0x14] ss:$0 sps:$4 sm:$0x11]  }
 0x1b0   : > { %v9972_v61 = vsel %vm9884_vm7, %v9971_v57, %v9970_v46  ;;  %v9981_v29 = vrot.slane %v9680_v48, 1  ;;  %v23830_v49 = vadd.f32 %v23585_v47, %v1758_v12  ;;  %v1761_v33 = vmul.f32 %v23551_v52, %v1629_v35  ;;  %v23848_v36 = vpop.f32.mrb[56].mxu0  ;;  %v10445_v46 = vld [vmem:[#allocation2 + $0x30] sm:$0xf] }
 0x1b1   : > { %v9974_v18 = vsel %vm9887_vm8, %v9973_v31, %v9972_v61  ;;  %v9984_v62 = vsel %vm9902_vm6, %v23770_v27, %v9681_v25  ;;  %v12157_v0 = vrot.slane %v21921_v1, 1  ;;  %v12158_v60 = vrot.slane %v21922_v16, 1  ;;  %v23856_v16 = vpop.f32.mrb[57].mxu0 }
 0x1b2   : > { %v9976_v50 = vsel %vm9890_vm9, %v9975_v4, %v9974_v18  ;;  %v9986_v32 = vsel %vm9884_vm7, %v23775_v13, %v9984_v62  ;;  %v23840_v59 = vadd.f32 %v23585_v47, %v1761_v33  ;;  %v1215_v35 = vadd.f32 %v23538_v63, %v23365_v2  ;;  %v23861_v25 = vpop.f32.mrb[58].mxu0  ;;  %v29040_v33 = vld [vmem:[#allocation10_spill] sm:$0xff] }
 0x1b3   : > { %v9978_v12 = vsel %vm9893_vm10, %v9977_v37, %v9976_v50  ;;  %v9988_v27 = vsel %vm9887_vm8, %v23777_v54, %v9986_v32  ;;  %v12159_v44 = vsel %vm11290_vm3, %v12157_v0, %v12158_v60  ;;  %v11294_v45 = vrot.slane %v21924_v22, 1  ;;  %29038 = vst [vmem:[#allocation17_spill] sm:$0xff] %v23861_v25  ;;  %v23868_v22 = vpop.f32.mrb[59].mxu0  ;;  %v29041_v60 = vld [vmem:[#allocation11_spill] sm:$0xff] }
 0x1b4   : > { %v9980_v30 = vsel %vm9896_vm11, %v9979_v11, %v9978_v12  ;;  %v9990_v13 = vsel %vm9890_vm9, %v23785_v21, %v9988_v27  ;;  %v2003_v1 = vpack.c.bf16 %v23840_v59, %v23804_v51  ;;  %12205 = vrot.lane.b32.xlu0 %v12159_v44, %s22728_s22  ;;  %v1627_v2 = vmax.f32 %v1215_v35, 0.0  ;;  %29039 = vst [vmem:[#allocation18_spill] sm:$0xff] %v23868_v22  ;;  %v29042_v35 = vld [vmem:[#allocation12_spill] sm:$0xff] }
 0x1b5   : > { %v9982_v54 = vsel %vm9899_vm12, %v9981_v29, %v9980_v30  ;;  %v9992_v48 = vsel %vm9893_vm10, %v23779_v19, %v9990_v13  ;;  %v11295_v57 = vrot.slane %v21925_v53, 1  ;;  %v10870_v37 = vshrl.u32 %v21926_v23, 16  ;;  %v23887_v30 = vld [vmem:[#allocation2 + $0x20] ss:$0 sps:$4 sm:$0x11]  }
 0x1b6   : > { %v23865_v21 = vsel %vm9896_vm11, %v23787_v26, %v9992_v48  ;;  %v10330_v31 = vpack.c.b16 %v9982_v54, %v9982_v54  ;;  %v1759_v4 = vmul.f32 %v23551_v52, %v1627_v2  ;;  %v10872_v11 = vshll.u32 %v21926_v23, 16 }
 0x1b7   : > { %v11296_v61 = vsel %vm11290_vm3, %v11294_v45, %v11295_v57  ;;  %v10877_v29 = vshll.u32 %v21927_v9, 16  ;;  %v1236_v19 = vadd.f32 %v23538_v63, %v23401_v41  ;;  %v1228_v18 = vadd.f32 %v23538_v63, %v29040_v33  ;;  %v29043_v45 = vld [vmem:[#allocation13_spill] sm:$0xff] }
 0x1b8   : > { %v10446_v62 = vsel %vm23321_vm14, %v10330_v31, %v10445_v46  ;;  %v1891_v26 = vadd.f32 %v23585_v47, %v1759_v4  ;;  %11341 = vrot.lane.b32.xlu1 %v11296_v61, %s22726_s15  ;;  %v10874_v0 = vrot.slane %v10872_v11, 1  ;;  %v1239_v53 = vadd.f32 %v23538_v63, %v29041_v60  ;;  %v21933_v46 = vld [vmem:[#allocation2 + $0x20] ss:$0 sps:$4 sm:$0x11]  }
 0x1b9   : > { %10447 = vst [vmem:[#allocation2 + $0x30] sm:$0xf] %v10446_v62  ;;  %v10879_v23 = vrot.slane %v10877_v29, 1  ;;  %v1632_v50 = vmax.f32 %v1236_v19, 0.0  ;;  %v1630_v32 = vmax.f32 %v1228_v18, 0.0  ;;  %v1231_v41 = vadd.f32 %v23538_v63, %v29042_v35  ;;  %v29044_v29 = vld [vmem:[#allocation14_spill] sm:$0xff] }
 0x1ba   : > { %v2002_v12 = vpack.c.bf16 %v1891_v26, %v23830_v49  ;;  %v10875_v27 = vor.u32 %v10874_v0, %v10870_v37  ;;  %v1633_v44 = vmax.f32 %v1239_v53, 0.0  ;;  %v9942_v9 = vsel %vm9899_vm12, %v29043_v45, %v23516_v6  ;;  %v23897_v6 = vld [vmem:[#allocation2 + $0x20] ss:$0 sps:$4 sm:$0x11]  }
 0x1bb   : > { %v1764_v13 = vmul.f32 %v23551_v52, %v1632_v50  ;;  %v1762_v2 = vmul.f32 %v23551_v52, %v1630_v32  ;;  %v1631_v54 = vmax.f32 %v1231_v41, 0.0  ;;  %v10325_v48 = vpack.c.b16 %v9942_v9, %v9942_v9 }
 0x1bc   : > { %v10880_v57 = vsel %vm10856_vm15, %v10875_v27, %v10879_v23  ;;  %v1765_v31 = vmul.f32 %v23551_v52, %v1633_v44  ;;  %v1252_v49 = vadd.f32 %v23538_v63, %v23468_v28  ;;  %v1244_v37 = vadd.f32 %v23538_v63, %v23471_v24 }
 0x1bd   : > { %11051 = vrot.lane.b32.xlu1 %v10880_v57, %s22728_s22  ;;  %v1896_v4 = vadd.f32 %v23585_v47, %v1764_v13  ;;  %v1894_v11 = vadd.f32 %v23585_v47, %v1762_v2  ;;  %v1763_v61 = vmul.f32 %v23551_v52, %v1631_v54  ;;  %10434 = vst.msk [vmem:[#allocation2 + $0x1c] sm:$0xf] %vm5730_vm2, %v10325_v48  ;;  %v12630_v60 = vshll.u32 %v21933_v46, 16 }
 0x1be   : > { %v1255_v19 = vadd.f32 %v23538_v63, %v29044_v29  ;;  %v1897_v28 = vadd.f32 %v23585_v47, %v1765_v31  ;;  %v1636_v33 = vmax.f32 %v1252_v49, 0.0  ;;  %v1634_v18 = vmax.f32 %v1244_v37, 0.0 }
 0x1bf   : > { %v1895_v62 = vadd.f32 %v23585_v47, %v1763_v61  ;;  %v1247_v0 = vadd.f32 %v23538_v63, %v23573_v7  ;;  %v23915_v44 = vrot.slane %v12630_v60, 1  ;;  %v1268_v9 = vadd.f32 %v23538_v63, %v23603_v39 }
 0x1c0   : > { %v1637_v26 = vmax.f32 %v1255_v19, 0.0  ;;  %v2005_v53 = vpack.c.bf16 %v1897_v28, %v1896_v4  ;;  %v1768_v23 = vmul.f32 %v23551_v52, %v1636_v33  ;;  %v1766_v50 = vmul.f32 %v23551_v52, %v1634_v18 }
 0x1c1   : > { %v2004_v35 = vpack.c.bf16 %v1895_v62, %v1894_v11  ;;  %v1635_v27 = vmax.f32 %v1247_v0, 0.0  ;;  %v1640_v59 = vmax.f32 %v1268_v9, 0.0  ;;  %v23944_v37 = vadd.f32 %v23538_v63, %v23608_v17 }
 0x1c2   : > { %v1769_v41 = vmul.f32 %v23551_v52, %v1637_v26  ;;  %v2059_v45 = vmax.bf16 %v2005_v53, %v2003_v1  ;;  %v23921_v7 = vadd.f32 %v23585_v47, %v1768_v23  ;;  %v23926_v2 = vadd.f32 %v23585_v47, %v1766_v50 }
 0x1c3   : > { %v2058_v13 = vmax.bf16 %v2004_v35, %v2002_v12  ;;  %v1767_v48 = vmul.f32 %v23551_v52, %v1635_v27  ;;  %v23935_v1 = vadd.f32 %v23538_v63, %v23606_v5  ;;  %v23957_v63 = vmul.f32 %v23551_v52, %v1640_v59 }
 0x1c4   : > { %v23929_v54 = vadd.f32 %v23585_v47, %v1769_v41  ;;  %v2555_v46 = vcombine.high %v2059_v45, %v2059_v45  ;;  %v2562_v57 = vrot.slane %v2059_v45, %v23126_v3  ;;  %v21928_v51 = vld [vmem:[#allocation2 + $0x18] sm:$0xff]  }
 0x1c5   : > { %v2506_v31 = vcombine.high %v2058_v13, %v2058_v13  ;;  %v2513_v39 = vrot.slane %v2058_v13, %v23126_v3  ;;  %v23940_v49 = vld [vmem:[#allocation2 + $0x18] sm:$0xfe]   ;;  %12382 = vrot.lane.b32.xlu1 %v21928_v51, %s22726_s15  ;;  %v23950_v5 = vadd.f32 %v23585_v47, %v1767_v48 }
 0x1c6   : > { %v2569_v4 = vrot.slane %v2555_v46, %v23126_v3  ;;  %v2570_v11 = vcombine.high %v2562_v57, %v2562_v57  ;;  %v2578_v61 = vrot.slane %v2562_v57, %v23126_v3  ;;  %v21931_v33 = vld [vmem:[#allocation2 + $0x18] sm:$0xff]  }
 0x1c7   : > { %v2520_v29 = vrot.slane %v2506_v31, %v23126_v3  ;;  %v2521_v19 = vcombine.high %v2513_v39, %v2513_v39  ;;  %v23954_v28 = vrot.slane %v2513_v39, %v23126_v3 }
 0x1c8   : > { %v2571_v17 = vcombine.high %v2569_v4, %v2569_v4  ;;  %v2585_v18 = vrot.slane %v2569_v4, %v23126_v3  ;;  %v2592_v62 = vrot.slane %v2570_v11, %v23126_v3  ;;  %v2600_v26 = vcombine.high %v2578_v61, %v2578_v61 }
 0x1c9   : > { %v4299_v0 = vshrl.u32 %v2578_v61, 16  ;;  %v2522_v60 = vcombine.high %v2520_v29, %v2520_v29  ;;  %v23962_v47 = vrot.slane %v2520_v29, %v23126_v3  ;;  %11518 = vrot.lane.b32.xlu1 %v21931_v33, %s22729_s24  ;;  %v23968_v9 = vrot.slane %v2521_v19, %v23126_v3 }
 0x1ca   : > { %v2599_v23 = vrot.slane %v2571_v17, %v23126_v3  ;;  %v2601_v50 = vcombine.high %v2585_v18, %v2585_v18  ;;  %v2602_v35 = vcombine.high %v2592_v62, %v2592_v62  ;;  %v4304_v41 = vshrl.u32 %v2592_v62, 16 }
 0x1cb   : > { %v4309_v52 = vshrl.u32 %v2600_v26, 16  ;;  %v4319_v27 = vshrl.u32 %v2585_v18, 16  ;;  %v5546_v45 = vmax.bf16 %v4299_v0, %v2578_v61 }
 0x1cc   : > { %v2603_v13 = vcombine.high %v2599_v23, %v2599_v23  ;;  %v4314_v48 = vshrl.u32 %v2602_v35, 16  ;;  %v4324_v46 = vshrl.u32 %v2599_v23, 16  ;;  %v4329_v57 = vshrl.u32 %v2601_v50, 16 }
 0x1cd   : > { %v5547_v51 = vmax.bf16 %v4304_v41, %v2592_v62  ;;  %v5548_v59 = vmax.bf16 %v4309_v52, %v2600_v26  ;;  %v5550_v31 = vmax.bf16 %v4319_v27, %v2585_v18  ;;  %v7056_v39 = vrot.slane %v5546_v45, %v23133_v14  ;;  %v23978_v26 = vpop.f32.mrb[60].mxu0 }
 0x1ce   : > { %v4334_v4 = vshrl.u32 %v2603_v13, 16  ;;  %v5549_v11 = vmax.bf16 %v4314_v48, %v2602_v35  ;;  %v5551_v29 = vmax.bf16 %v4324_v46, %v2599_v23  ;;  %v5552_v17 = vmax.bf16 %v4329_v57, %v2601_v50  ;;  %29045 = vst [vmem:[#allocation10_spill] sm:$0xff] %v23978_v26  ;;  %v23983_v52 = vpop.f32.mrb[61].mxu0 }
 0x1cf   : > { %v7063_v33 = vrot.slane %v7056_v39, %v23133_v14  ;;  %v7070_v61 = vrot.slane %v5547_v51, %v23133_v14  ;;  %v7084_v19 = vrot.slane %v5548_v59, %v23133_v14  ;;  %v7112_v0 = vrot.slane %v5550_v31, %v23133_v14  ;;  %29046 = vst [vmem:[#allocation11_spill] sm:$0xff] %v23983_v52  ;;  %v23991_v46 = vpop.f32.mrb[62].mxu0 }
 0x1d0   : > { %v5553_v12 = vmax.bf16 %v4334_v4, %v2603_v13  ;;  %v7098_v32 = vrot.slane %v5549_v11, %v23133_v14  ;;  %v7126_v62 = vrot.slane %v5551_v29, %v23133_v14  ;;  %v7140_v18 = vrot.slane %v5552_v17, %v23133_v14  ;;  %29047 = vst [vmem:[#allocation12_spill] sm:$0xff] %v23991_v46 }
 0x1d1   : > { %v7077_v23 = vrot.slane %v7070_v61, %v23133_v14  ;;  %v7091_v50 = vrot.slane %v7084_v19, %v23133_v14  ;;  %v7119_v35 = vrot.slane %v7112_v0, %v23133_v14  ;;  %v9698_v41 = vunpack.c.l.b16 %v7063_v33 }
 0x1d2   : > { %v7105_v27 = vrot.slane %v7098_v32, %v23133_v14  ;;  %v7133_v45 = vrot.slane %v7126_v62, %v23133_v14  ;;  %v23988_v13 = vrot.slane %v7140_v18, %v23133_v14  ;;  %v7154_v48 = vrot.slane %v5553_v12, %v23133_v14  ;;  %v10456_v12 = vld [vmem:[#allocation2 + $0x44] sm:$0x1]  ;;  %v24010_v18 = vpop.f32.mrb[63].mxu0 }
 0x1d3   : > { %v9699_v57 = vunpack.c.l.b16 %v7077_v23  ;;  %v9700_v51 = vunpack.c.l.b16 %v7091_v50  ;;  %v9702_v59 = vunpack.c.l.b16 %v7119_v35  ;;  %v2550_v31 = vrot.slane %v2522_v60, %v23126_v3  ;;  %29048 = vst [vmem:[#allocation13_spill] sm:$0xff] %v24010_v18 }
 0x1d4   : > { %v7161_v39 = vrot.slane %v7154_v48, %v23133_v14  ;;  %v9701_v4 = vunpack.c.l.b16 %v7105_v27  ;;  %v9703_v11 = vunpack.c.l.b16 %v7133_v45  ;;  %v23995_v29 = vrot.slane %v9698_v41, 7 }
 0x1d5   : > { %v9704_v32 = vunpack.c.l.b16 %v23988_v13  ;;  %v23998_v17 = vrot.slane %v9699_v57, 6  ;;  %v24000_v33 = vrot.slane %v9700_v51, 5  ;;  %v2551_v61 = vcombine.high %v23954_v28, %v23954_v28 }
 0x1d6   : > { %v24004_v19 = vrot.slane %v9701_v4, 4  ;;  %v24006_v0 = vrot.slane %v9702_v59, 3  ;;  %v24008_v60 = vrot.slane %v9703_v11, 2  ;;  %v20542_v62 = vcombine.low %v7161_v39, %v7161_v39 }
 0x1d7   : > { %v2552_v23 = vcombine.high %v23962_v47, %v23962_v47  ;;  %v2553_v50 = vcombine.high %v23968_v9, %v23968_v9  ;;  %v2554_v35 = vcombine.high %v2550_v31, %v2550_v31  ;;  %v4259_v41 = vshrl.u32 %v23954_v28, 16 }
 0x1d8   : > { %v10457_v27 = vsel %vm23219_vm5, %v20542_v62, %v10456_v12  ;;  %v4264_v45 = vshrl.u32 %v23968_v9, 16  ;;  %v4269_v13 = vshrl.u32 %v2551_v61, 16  ;;  %v4279_v48 = vshrl.u32 %v23962_v47, 16 }
 0x1d9   : > { %10458 = vst [vmem:[#allocation2 + $0x44] sm:$0x1] %v10457_v27  ;;  %v4274_v57 = vshrl.u32 %v2553_v50, 16  ;;  %v4284_v51 = vshrl.u32 %v2550_v31, 16  ;;  %v4289_v59 = vshrl.u32 %v2552_v23, 16  ;;  %v4294_v39 = vshrl.u32 %v2554_v35, 16 }
 0x1da   : > { %v5538_v4 = vmax.bf16 %v4259_v41, %v23954_v28  ;;  %v5539_v11 = vmax.bf16 %v4264_v45, %v23968_v9  ;;  %v5540_v53 = vmax.bf16 %v4269_v13, %v2551_v61  ;;  %v5542_v24 = vmax.bf16 %v4279_v48, %v23962_v47  ;;  %v21934_v48 = vld [vmem:[#allocation2 + $0x18] sm:$0xfe]  }
 0x1db   : > { %v5541_v18 = vmax.bf16 %v4274_v57, %v2553_v50  ;;  %v5543_v46 = vmax.bf16 %v4284_v51, %v2550_v31  ;;  %v5544_v12 = vmax.bf16 %v4289_v59, %v2552_v23  ;;  %v5545_v62 = vmax.bf16 %v4294_v39, %v2554_v35  ;;  %v24040_v35 = vpop.f32.mrb[64].mxu0 }
 0x1dc   : > { %v6944_v52 = vrot.slane %v5538_v4, %v23133_v14  ;;  %v6958_v26 = vrot.slane %v5539_v11, %v23133_v14  ;;  %v6972_v27 = vrot.slane %v5540_v53, %v23133_v14  ;;  %v7000_v22 = vrot.slane %v5542_v24, %v23133_v14 }
 0x1dd   : > { %v6986_v25 = vrot.slane %v5541_v18, %v23133_v14  ;;  %v7014_v28 = vrot.slane %v5543_v46, %v23133_v14  ;;  %v7028_v9 = vrot.slane %v5544_v12, %v23133_v14  ;;  %v7042_v47 = vrot.slane %v5545_v62, %v23133_v14 }
 0x1de   : > { %v6951_v31 = vrot.slane %v6944_v52, %v23133_v14  ;;  %v6965_v61 = vrot.slane %v6958_v26, %v23133_v14  ;;  %v6979_v23 = vrot.slane %v6972_v27, %v23133_v14  ;;  %v7007_v50 = vrot.slane %v7000_v22, %v23133_v14  ;;  %v24042_v26 = vpop.f32.mrb[65].mxu0 }
 0x1df   : > { %v6993_v53 = vrot.slane %v6986_v25, %v23133_v14  ;;  %v7021_v24 = vrot.slane %v7014_v28, %v23133_v14  ;;  %v7035_v18 = vrot.slane %v7028_v9, %v23133_v14  ;;  %v7049_v46 = vrot.slane %v7042_v47, %v23133_v14  ;;  %v21932_v25 = vld [vmem:[#allocation2 + $0x18] sm:$0xff]   ;;  %v24044_v39 = vpop.f32.mrb[66].mxu0 }
 0x1e0   : > { %v9690_v41 = vunpack.c.l.b16 %v6951_v31  ;;  %v9691_v45 = vunpack.c.l.b16 %v6965_v61  ;;  %v9692_v13 = vunpack.c.l.b16 %v6979_v23  ;;  %v9694_v52 = vunpack.c.l.b16 %v7007_v50  ;;  %v24048_v27 = vpop.f32.mrb[67].mxu0 }
 0x1e1   : > { %v9693_v57 = vunpack.c.l.b16 %v6993_v53  ;;  %v9695_v51 = vunpack.c.l.b16 %v7021_v24  ;;  %v9696_v22 = vunpack.c.l.b16 %v7035_v18  ;;  %v9697_v59 = vunpack.c.l.b16 %v7049_v46 }
 0x1e2   : > { %v24046_v4 = vrot.slane %v9704_v32, 1  ;;  %v9997_v11 = vrot.slane %v9690_v41, 7  ;;  %v9998_v12 = vrot.slane %v9691_v45, 6  ;;  %v10000_v62 = vrot.slane %v9692_v13, 5  ;;  %v21936_v13 = vld [vmem:[#allocation2 + $0x18] sm:$0xff]  }
 0x1e3   : > { %v10002_v28 = vrot.slane %v9693_v57, 4  ;;  %v10004_v9 = vrot.slane %v9694_v52, 3  ;;  %v10006_v47 = vrot.slane %v9695_v51, 2  ;;  %v10011_v31 = vsel %vm9902_vm6, %v23995_v29, %v9697_v59 }
 0x1e4   : > { %v9999_v61 = vsel %vm9884_vm7, %v9998_v12, %v9997_v11  ;;  %v10013_v23 = vsel %vm9884_vm7, %v23998_v17, %v10011_v31  ;;  %v29049_v50 = vrot.slane %v23887_v30, 1  ;;  %v29050_v32 = vrot.slane %v23940_v49, 1 }
 0x1e5   : > { %v2006_v24 = vpack.c.bf16 %v23950_v5, %v23926_v2  ;;  %v10001_v18 = vsel %vm9887_vm8, %v10000_v62, %v9999_v61  ;;  %v10008_v46 = vrot.slane %v9696_v22, 1  ;;  %v10015_v29 = vsel %vm9887_vm8, %v24000_v33, %v10013_v23  ;;  %v21937_v33 = vld [vmem:[#allocation2 + $0x20] ss:$0 sps:$4 sm:$0x11]   ;;  %v10452_v62 = vld [vmem:[#allocation2 + $0x3c] sm:$0xf] }
 0x1e6   : > { %v12162_v53 = vsel %vm11290_vm3, %v29050_v32, %v29049_v50  ;;  %v12625_v41 = vshll.u32 %v21932_v25, 16  ;;  %v10003_v17 = vsel %vm9890_vm9, %v10002_v28, %v10001_v18  ;;  %v10017_v30 = vsel %vm9890_vm9, %v24004_v19, %v10015_v29 }
 0x1e7   : > { %12207 = vrot.lane.b32.xlu0 %v12162_v53, %s22728_s22  ;;  %v12623_v49 = vshrl.u32 %v21932_v25, 16  ;;  %v11297_v45 = vrot.slane %v21934_v48, 1  ;;  %v10005_v52 = vsel %vm9893_vm10, %v10004_v9, %v10003_v17  ;;  %v10019_v57 = vsel %vm9893_vm10, %v24006_v0, %v10017_v30 }
 0x1e8   : > { %v12627_v51 = vrot.slane %v12625_v41, 1  ;;  %v1638_v22 = vmax.f32 %v23935_v1, 0.0  ;;  %v10007_v59 = vsel %vm9896_vm11, %v10006_v47, %v10005_v52  ;;  %v24076_v11 = vsel %vm9896_vm11, %v24008_v60, %v10019_v57  ;;  %v24087_v1 = vld [vmem:[%s28998_s2 + $0x2] ss:$0 sm:$0xff]  ;;  %v24101_v47 = vld [vmem:[%s28998_s2 + $0x1] ss:$0 sm:$0xff] }
 0x1e9   : > { %v29051_v19 = vrot.slane %v23897_v6, 1  ;;  %v1641_v25 = vmax.f32 %v23944_v37, 0.0  ;;  %v10009_v12 = vsel %vm9899_vm12, %v10008_v46, %v10007_v59  ;;  %v1904_v60 = vadd.f32 %v24087_v1, %v23957_v63  ;;  %v24094_v6 = vld [vmem:[%s28998_s2] ss:$0 sm:$0xff]  ;;  %v29053_v41 = vld [vmem:[#allocation16_spill] sm:$0xff] }
 0x1ea   : > { %v12628_v0 = vor.u32 %v12627_v51, %v12623_v49  ;;  %v29052_v37 = vld [vmem:[#allocation15_spill] sm:$0xff]  ;;  %v10333_v9 = vpack.c.b16 %v10009_v12, %v10009_v12  ;;  %v1770_v31 = vmul.f32 %v24101_v47, %v1638_v22  ;;  %v10884_v23 = vshll.u32 %v21936_v13, 16 }
 0x1eb   : > { %v11299_v48 = vsel %vm11290_vm3, %v11297_v45, %v29051_v19  ;;  %v1263_v28 = vadd.f32 %v24094_v6, %v29052_v37  ;;  %v1773_v61 = vmul.f32 %v24101_v47, %v1641_v25  ;;  %v10882_v32 = vshrl.u32 %v21936_v13, 16  ;;  %v24117_v13 = vld [vmem:[#allocation2 + $0x2c] ss:$0 sps:$4 sm:$0x11]  }
 0x1ec   : > { %11343 = vrot.lane.b32.xlu1 %v11299_v48, %s22726_s15  ;;  %v12633_v63 = vsel %vm10856_vm15, %v12628_v0, %v23915_v44  ;;  %v10889_v53 = vshll.u32 %v21937_v33, 16  ;;  %v10453_v18 = vsel %vm23321_vm14, %v10333_v9, %v10452_v62  ;;  %v10886_v29 = vrot.slane %v10884_v23, 1  ;;  %v24123_v33 = vld [vmem:[#allocation2 + $0x2c] ss:$0 sps:$4 sm:$0x11]  }
 0x1ed   : > { %v1639_v50 = vmax.f32 %v1263_v28, 0.0  ;;  %12814 = vrot.lane.b32.xlu0 %v12633_v63, %s22729_s24  ;;  %v1905_v46 = vadd.f32 %v24087_v1, %v1773_v61  ;;  %v9969_v17 = vsel %vm9899_vm12, %v29053_v41, %v23706_v10  ;;  %10454 = vst [vmem:[#allocation2 + $0x3c] sm:$0xf] %v10453_v18  ;;  %v1284_v45 = vadd.f32 %v24094_v6, %v23674_v34  ;;  %v24130_v48 = vld [vmem:[#allocation2 + $0x2c] ss:$0 sps:$4 sm:$0x11]  }
 0x1ee   : > { %v10891_v49 = vrot.slane %v10889_v53, 1  ;;  %v10328_v44 = vpack.c.b16 %v9969_v17, %v9969_v17  ;;  %v10887_v57 = vor.u32 %v10886_v29, %v10882_v32  ;;  %v1276_v51 = vadd.f32 %v24094_v6, %v23681_v42 }
 0x1ef   : > { %v1771_v30 = vmul.f32 %v24101_v47, %v1639_v50  ;;  %v2009_v52 = vpack.c.bf16 %v1905_v46, %v1904_v60  ;;  %v1287_v22 = vadd.f32 %v24094_v6, %v23688_v8  ;;  %v1902_v10 = vadd.f32 %v24087_v1, %v1770_v31 }
 0x1f0   : > { %10441 = vst.msk [vmem:[#allocation2 + $0x28] sm:$0xf] %vm5730_vm2, %v10328_v44  ;;  %v1644_v19 = vmax.f32 %v1284_v45, 0.0  ;;  %v1279_v34 = vadd.f32 %v24094_v6, %v23693_v15  ;;  %v29054_v42 = vpack.c.bf16 %v23929_v54, %v23921_v7  ;;  %v10892_v8 = vsel %vm10856_vm15, %v10887_v57, %v10891_v49 }
 0x1f1   : > { %v1903_v59 = vadd.f32 %v24087_v1, %v1771_v30  ;;  %v1642_v12 = vmax.f32 %v1276_v51, 0.0  ;;  %v1645_v62 = vmax.f32 %v1287_v22, 0.0  ;;  %11053 = vrot.lane.b32.xlu1 %v10892_v8, %s22728_s22 }
 0x1f2   : > { %v2061_v25 = vmax.bf16 %v2009_v52, %v29054_v42  ;;  %v1776_v60 = vmul.f32 %v24101_v47, %v1644_v19  ;;  %v1643_v37 = vmax.f32 %v1279_v34, 0.0 }
 0x1f3   : > { %v2008_v0 = vpack.c.bf16 %v1903_v59, %v1902_v10  ;;  %v1774_v31 = vmul.f32 %v24101_v47, %v1642_v12  ;;  %v1777_v7 = vmul.f32 %v24101_v47, %v1645_v62 }
 0x1f4   : > { %v2653_v9 = vcombine.high %v2061_v25, %v2061_v25  ;;  %v2660_v15 = vrot.slane %v2061_v25, %v23126_v3  ;;  %v1775_v61 = vmul.f32 %v24101_v47, %v1643_v37  ;;  %v24151_v18 = vadd.f32 %v24087_v1, %v1776_v60 }
 0x1f5   : > { %v2060_v54 = vmax.bf16 %v2008_v0, %v2006_v24  ;;  %v24157_v2 = vadd.f32 %v24087_v1, %v1774_v31  ;;  %v24160_v5 = vadd.f32 %v24087_v1, %v1777_v7 }
 0x1f6   : > { %v2667_v50 = vrot.slane %v2653_v9, %v23126_v3  ;;  %v2668_v32 = vcombine.high %v2660_v15, %v2660_v15  ;;  %v2676_v53 = vrot.slane %v2660_v15, %v23126_v3  ;;  %v24170_v51 = vadd.f32 %v24087_v1, %v1775_v61 }
 0x1f7   : > { %v2604_v46 = vcombine.high %v2060_v54, %v2060_v54  ;;  %v24154_v29 = vrot.slane %v2060_v54, %v23126_v3  ;;  %v21938_v49 = vld [vmem:[#allocation2 + $0x24] sm:$0xff]  }
 0x1f8   : > { %v2669_v24 = vcombine.high %v2667_v50, %v2667_v50  ;;  %v2683_v41 = vrot.slane %v2667_v50, %v23126_v3  ;;  %v2690_v17 = vrot.slane %v2668_v32, %v23126_v3  ;;  %v2698_v30 = vcombine.high %v2676_v53, %v2676_v53  ;;  %v21939_v57 = vld [vmem:[#allocation2 + $0x24] sm:$0xff]   ;;  %12384 = vrot.lane.b32.xlu0 %v21938_v49, %s22726_s15 }
 0x1f9   : > { %v4379_v44 = vshrl.u32 %v2676_v53, 16  ;;  %v24165_v45 = vrot.slane %v2604_v46, %v23126_v3  ;;  %v2619_v52 = vcombine.high %v24154_v29, %v24154_v29  ;;  %v24176_v8 = vrot.slane %v24154_v29, %v23126_v3  ;;  %11520 = vrot.lane.b32.xlu1 %v21939_v57, %s22729_s24 }
 0x1fa   : > { %v2697_v22 = vrot.slane %v2669_v24, %v23126_v3  ;;  %v2699_v10 = vcombine.high %v2683_v41, %v2683_v41  ;;  %v2700_v59 = vcombine.high %v2690_v17, %v2690_v17  ;;  %v4384_v19 = vshrl.u32 %v2690_v17, 16 }
 0x1fb   : > { %v4389_v34 = vshrl.u32 %v2698_v30, 16  ;;  %v4399_v42 = vshrl.u32 %v2683_v41, 16  ;;  %v5562_v25 = vmax.bf16 %v4379_v44, %v2676_v53 }
 0x1fc   : > { %v2701_v12 = vcombine.high %v2697_v22, %v2697_v22  ;;  %v4394_v62 = vshrl.u32 %v2700_v59, 16  ;;  %v4404_v0 = vshrl.u32 %v2697_v22, 16  ;;  %v4409_v60 = vshrl.u32 %v2699_v10, 16 }
 0x1fd   : > { %v5563_v37 = vmax.bf16 %v4384_v19, %v2690_v17  ;;  %v5564_v9 = vmax.bf16 %v4389_v34, %v2698_v30  ;;  %v5566_v15 = vmax.bf16 %v4399_v42, %v2683_v41  ;;  %v7280_v31 = vrot.slane %v5562_v25, %v23133_v14  ;;  %v21962_v25 = vld [vmem:[%s28999_s3 + $0x50] sm:$0xff]  }
 0x1fe   : > { %v4414_v7 = vshrl.u32 %v2701_v12, 16  ;;  %v5565_v54 = vmax.bf16 %v4394_v62, %v2700_v59  ;;  %v5567_v61 = vmax.bf16 %v4404_v0, %v2697_v22  ;;  %v5568_v50 = vmax.bf16 %v4409_v60, %v2699_v10  ;;  %v24202_v62 = vpop.f32.mrb[68].mxu0  ;;  %21352 = vmatprep.subr.bf16.mxu0 %v21962_v25 }
 0x1ff   : > { %v7287_v32 = vrot.slane %v7280_v31, %v23133_v14  ;;  %v7294_v53 = vrot.slane %v5563_v37, %v23133_v14  ;;  %v7308_v46 = vrot.slane %v5564_v9, %v23133_v14  ;;  %v7336_v24 = vrot.slane %v5566_v15, %v23133_v14  ;;  %29055 = vst [vmem:[#allocation14_spill] sm:$0xff] %v24202_v62  ;;  %v24206_v15 = vpop.f32.mrb[69].mxu0 }
 0x200   : > { %v5569_v49 = vmax.bf16 %v4414_v7, %v2701_v12  ;;  %v7322_v44 = vrot.slane %v5565_v54, %v23133_v14  ;;  %v7350_v17 = vrot.slane %v5567_v61, %v23133_v14  ;;  %v7364_v41 = vrot.slane %v5568_v50, %v23133_v14  ;;  %v21963_v12 = vld [vmem:[%s28999_s3 + $0x10] sm:$0xff]   ;;  %29056 = vst [vmem:[#allocation15_spill] sm:$0xff] %v24206_v15  ;;  %v24211_v50 = vpop.f32.mrb[70].mxu0 }
 0x201   : > { %v7301_v30 = vrot.slane %v7294_v53, %v23133_v14  ;;  %v7315_v57 = vrot.slane %v7308_v46, %v23133_v14  ;;  %v7343_v22 = vrot.slane %v7336_v24, %v23133_v14  ;;  %v9714_v10 = vunpack.c.l.b16 %v7287_v32  ;;  %29057 = vst [vmem:[#allocation16_spill] sm:$0xff] %v24211_v50  ;;  %v10463_v24 = vld [vmem:[#allocation2 + $0x50] sm:$0x1]  ;;  %21353 = vmatpush3.bf16.msra.mxu0 %v21963_v12  ;;  %v24238_v12 = vpop.f32.mrb[71].mxu0 }
 0x202   : > { %v7329_v59 = vrot.slane %v7322_v44, %v23133_v14  ;;  %v7357_v19 = vrot.slane %v7350_v17, %v23133_v14  ;;  %v24193_v34 = vrot.slane %v7364_v41, %v23133_v14  ;;  %v7378_v42 = vrot.slane %v5569_v49, %v23133_v14  ;;  %29058 = vst [vmem:[#allocation19_spill] sm:$0xff] %v24238_v12 }
 0x203   : > { %v9715_v0 = vunpack.c.l.b16 %v7301_v30  ;;  %v9716_v60 = vunpack.c.l.b16 %v7315_v57  ;;  %v9718_v37 = vunpack.c.l.b16 %v7343_v22  ;;  %v2620_v9 = vcombine.high %v24165_v45, %v24165_v45 }
 0x204   : > { %v7385_v31 = vrot.slane %v7378_v42, %v23133_v14  ;;  %v9717_v7 = vunpack.c.l.b16 %v7329_v59  ;;  %v9719_v54 = vunpack.c.l.b16 %v7357_v19  ;;  %v24209_v61 = vrot.slane %v9714_v10, 7 }
 0x205   : > { %v24214_v53 = vrot.slane %v9715_v0, 6  ;;  %v24216_v46 = vrot.slane %v9716_v60, 5  ;;  %v2634_v49 = vrot.slane %v24165_v45, %v23126_v3  ;;  %v24222_v17 = vrot.slane %v9718_v37, 3 }
 0x206   : > { %v24220_v44 = vrot.slane %v9717_v7, 4  ;;  %v24224_v41 = vrot.slane %v9719_v54, 2  ;;  %v20543_v30 = vcombine.low %v7385_v31, %v7385_v31  ;;  %v2641_v57 = vrot.slane %v2619_v52, %v23126_v3 }
 0x207   : > { %v2648_v22 = vrot.slane %v2620_v9, %v23126_v3  ;;  %v2649_v10 = vcombine.high %v24176_v8, %v24176_v8  ;;  %v2650_v59 = vcombine.high %v2634_v49, %v2634_v49  ;;  %v4339_v19 = vshrl.u32 %v24176_v8, 16 }
 0x208   : > { %v10464_v45 = vsel %vm23219_vm5, %v20543_v30, %v10463_v24  ;;  %v4359_v42 = vshrl.u32 %v2634_v49, 16  ;;  %v2651_v29 = vcombine.high %v2641_v57, %v2641_v57  ;;  %v4344_v0 = vshrl.u32 %v2641_v57, 16 }
 0x209   : > { %10465 = vst [vmem:[#allocation2 + $0x50] sm:$0x1] %v10464_v45  ;;  %v2652_v52 = vcombine.high %v2648_v22, %v2648_v22  ;;  %v4349_v60 = vshrl.u32 %v2649_v10, 16  ;;  %v4364_v37 = vshrl.u32 %v2648_v22, 16  ;;  %v4369_v9 = vshrl.u32 %v2650_v59, 16 }
 0x20a   : > { %v5554_v31 = vmax.bf16 %v4339_v19, %v24176_v8  ;;  %v5558_v7 = vmax.bf16 %v4359_v42, %v2634_v49  ;;  %v4354_v54 = vshrl.u32 %v2651_v29, 16  ;;  %v5555_v30 = vmax.bf16 %v4344_v0, %v2641_v57  ;;  %v21942_v42 = vld [vmem:[#allocation2 + $0x24] sm:$0xfe]   ;;  %v24255_v0 = vpop.f32.mrb[72].mxu0 }
 0x20b   : > { %v4374_v24 = vshrl.u32 %v2652_v52, 16  ;;  %v5556_v32 = vmax.bf16 %v4349_v60, %v2649_v10  ;;  %v5559_v63 = vmax.bf16 %v4364_v37, %v2648_v22  ;;  %v5560_v23 = vmax.bf16 %v4369_v9, %v2650_v59  ;;  %v24259_v60 = vpop.f32.mrb[73].mxu0 }
 0x20c   : > { %v7168_v25 = vrot.slane %v5554_v31, %v23133_v14  ;;  %v7224_v28 = vrot.slane %v5558_v7, %v23133_v14  ;;  %v5557_v45 = vmax.bf16 %v4354_v54, %v2651_v29  ;;  %v7182_v50 = vrot.slane %v5555_v30, %v23133_v14  ;;  %v21946_v7 = vld [vmem:[#allocation2 + $0x24] sm:$0xff]   ;;  %v24261_v54 = vpop.f32.mrb[74].mxu0 }
 0x20d   : > { %v5561_v12 = vmax.bf16 %v4374_v24, %v2652_v52  ;;  %v7196_v15 = vrot.slane %v5556_v32, %v23133_v14  ;;  %v7238_v49 = vrot.slane %v5559_v63, %v23133_v14  ;;  %v7252_v57 = vrot.slane %v5560_v23, %v23133_v14 }
 0x20e   : > { %v7175_v62 = vrot.slane %v7168_v25, %v23133_v14  ;;  %v7231_v8 = vrot.slane %v7224_v28, %v23133_v14  ;;  %v7189_v22 = vrot.slane %v7182_v50, %v23133_v14  ;;  %v7210_v59 = vrot.slane %v5557_v45, %v23133_v14  ;;  %v21944_v28 = vld [vmem:[#allocation2 + $0x24] sm:$0xfe]  }
 0x20f   : > { %v7203_v10 = vrot.slane %v7196_v15, %v23133_v14  ;;  %v7266_v19 = vrot.slane %v5561_v12, %v23133_v14  ;;  %v7245_v29 = vrot.slane %v7238_v49, %v23133_v14  ;;  %v7259_v32 = vrot.slane %v7252_v57, %v23133_v14 }
 0x210   : > { %v9706_v25 = vunpack.c.l.b16 %v7175_v62  ;;  %v9710_v52 = vunpack.c.l.b16 %v7231_v8  ;;  %v7217_v23 = vrot.slane %v7210_v59, %v23133_v14  ;;  %v9707_v50 = vunpack.c.l.b16 %v7189_v22  ;;  %v24263_v8 = vpop.f32.mrb[75].mxu0  ;;  %v21948_v59 = vld [vmem:[#allocation2 + $0x24] sm:$0xff]  }
 0x211   : > { %v7273_v63 = vrot.slane %v7266_v19, %v23133_v14  ;;  %v9708_v15 = vunpack.c.l.b16 %v7203_v10  ;;  %v9711_v37 = vunpack.c.l.b16 %v7245_v29  ;;  %v9712_v12 = vunpack.c.l.b16 %v7259_v32  ;;  %29059 = vst [vmem:[#allocation20_spill] sm:$0xff] %v24263_v8 }
 0x212   : > { %v10024_v9 = vrot.slane %v9706_v25, 7  ;;  %v10031_v31 = vrot.slane %v9710_v52, 3  ;;  %v9709_v62 = vunpack.c.l.b16 %v7217_v23  ;;  %v10025_v30 = vrot.slane %v9707_v50, 6 }
 0x213   : > { %v9713_v24 = vunpack.c.l.b16 %v7273_v63  ;;  %v10027_v45 = vrot.slane %v9708_v15, 5  ;;  %v10033_v49 = vrot.slane %v9711_v37, 2  ;;  %v10035_v57 = vrot.slane %v9712_v12, 1  ;;  %v21949_v37 = vld [vmem:[#allocation2 + $0x2c] ss:$0 sps:$4 sm:$0x11]  }
 0x214   : > { %v2010_v22 = vpack.c.bf16 %v24170_v51, %v24157_v2  ;;  %v12163_v10 = vrot.slane %v21942_v42, 1  ;;  %v10026_v19 = vsel %vm9884_vm7, %v10025_v30, %v10024_v9  ;;  %v10029_v29 = vrot.slane %v9709_v62, 4 }
 0x215   : > { %v10038_v32 = vsel %vm9902_vm6, %v24209_v61, %v9713_v24  ;;  %v11300_v25 = vrot.slane %v21944_v28, 1  ;;  %v10028_v52 = vsel %vm9887_vm8, %v10027_v45, %v10026_v19  ;;  %v29060_v63 = vrot.slane %v24117_v13, 1 }
 0x216   : > { %v10040_v23 = vsel %vm9884_vm7, %v24214_v53, %v10038_v32  ;;  %v12635_v15 = vshrl.u32 %v21946_v7, 16  ;;  %v10030_v42 = vsel %vm9890_vm9, %v10029_v29, %v10028_v52  ;;  %v29061_v61 = vrot.slane %v24123_v33, 1 }
 0x217   : > { %v12165_v50 = vsel %vm11290_vm3, %v12163_v10, %v29060_v63  ;;  %v10042_v12 = vsel %vm9887_vm8, %v24216_v46, %v10040_v23  ;;  %v12637_v9 = vshll.u32 %v21946_v7, 16  ;;  %v10032_v53 = vsel %vm9893_vm10, %v10031_v31, %v10030_v42 }
 0x218   : > { %12209 = vrot.lane.b32.xlu0 %v12165_v50, %s22728_s22  ;;  %v11302_v28 = vsel %vm11290_vm3, %v11300_v25, %v29061_v61  ;;  %v10044_v13 = vsel %vm9890_vm9, %v24220_v44, %v10042_v12  ;;  %v29062_v62 = vshll.u32 %v24130_v48, 16  ;;  %v10894_v30 = vshrl.u32 %v21948_v59, 16  ;;  %v10459_v44 = vld [vmem:[#allocation2 + $0x48] sm:$0xf] }
 0x219   : > { %11345 = vrot.lane.b32.xlu1 %v11302_v28, %s22726_s15  ;;  %v10034_v46 = vsel %vm9896_vm11, %v10033_v49, %v10032_v53  ;;  %v10046_v45 = vsel %vm9893_vm10, %v24222_v17, %v10044_v13  ;;  %v12639_v33 = vrot.slane %v12637_v9, 1  ;;  %v10896_v10 = vshll.u32 %v21948_v59, 16  ;;  %v24317_v61 = vld [vmem:[#allocation2 + $0x38] ss:$0 sps:$4 sm:$0x11]  }
 0x21a   : > { %v12644_v24 = vrot.slane %v29062_v62, 1  ;;  %v10036_v7 = vsel %vm9899_vm12, %v10035_v57, %v10034_v46  ;;  %v24295_v31 = vsel %vm9896_vm11, %v24224_v41, %v10046_v45  ;;  %v10901_v19 = vshll.u32 %v21949_v37, 16  ;;  %v24319_v28 = vld [vmem:[#allocation2 + $0x38] ss:$0 sps:$4 sm:$0x11]  }
 0x21b   : > { %v1300_v48 = vadd.f32 %v24094_v6, %v23773_v43  ;;  %v10336_v29 = vpack.c.b16 %v10036_v7, %v10036_v7  ;;  %v12640_v32 = vor.u32 %v12639_v33, %v12635_v15  ;;  %v10898_v25 = vrot.slane %v10896_v10, 1  ;;  %v21957_v62 = vld [vmem:[#allocation2 + $0x38] ss:$0 sps:$4 sm:$0x11]  }
 0x21c   : > { %v1292_v49 = vadd.f32 %v24094_v6, %v23783_v38  ;;  %v10903_v17 = vrot.slane %v10901_v19, 1  ;;  %v1303_v57 = vadd.f32 %v24094_v6, %v23791_v20  ;;  %v1295_v41 = vadd.f32 %v24094_v6, %v23826_v58  ;;  %v29065_v46 = vld [vmem:[#allocation18_spill] sm:$0xff] }
 0x21d   : > { %v1648_v52 = vmax.f32 %v1300_v48, 0.0  ;;  %v10460_v59 = vsel %vm23321_vm14, %v10336_v29, %v10459_v44  ;;  %v12645_v23 = vsel %vm10856_vm15, %v12640_v32, %v12644_v24  ;;  %v10899_v43 = vor.u32 %v10898_v25, %v10894_v30  ;;  %v29064_v30 = vld [vmem:[#allocation17_spill] sm:$0xff]  ;;  %v21959_v33 = vld [vmem:[#allocation2 + $0x38] ss:$0 sps:$4 sm:$0x11]  }
 0x21e   : > { %v1646_v63 = vmax.f32 %v1292_v49, 0.0  ;;  %10461 = vst [vmem:[#allocation2 + $0x48] sm:$0xf] %v10460_v59  ;;  %12816 = vrot.lane.b32.xlu0 %v12645_v23, %s22729_s24  ;;  %v1649_v50 = vmax.f32 %v1303_v57, 0.0  ;;  %v1647_v15 = vmax.f32 %v1295_v41, 0.0  ;;  %v9996_v20 = vsel %vm9899_vm12, %v23789_v40, %v23865_v21 }
 0x21f   : > { %v1780_v38 = vmul.f32 %v24101_v47, %v1648_v52  ;;  %v10904_v58 = vsel %vm10856_vm15, %v10899_v43, %v10903_v17  ;;  %v10331_v42 = vpack.c.b16 %v9996_v20, %v9996_v20  ;;  %v1316_v12 = vadd.f32 %v24094_v6, %v23848_v36 }
 0x220   : > { %v1778_v37 = vmul.f32 %v24101_v47, %v1646_v63  ;;  %v29063_v9 = vunpack.c.l.b16 %v24193_v34  ;;  %11055 = vrot.lane.b32.xlu1 %v10904_v58, %s22728_s22  ;;  %v1781_v40 = vmul.f32 %v24101_v47, %v1649_v50  ;;  %v1779_v21 = vmul.f32 %v24101_v47, %v1647_v15 }
 0x221   : > { %v1308_v13 = vadd.f32 %v24094_v6, %v23856_v16  ;;  %v1912_v36 = vadd.f32 %v24087_v1, %v1780_v38  ;;  %10448 = vst.msk [vmem:[#allocation2 + $0x34] sm:$0xf] %vm5730_vm2, %v10331_v42  ;;  %v1652_v24 = vmax.f32 %v1316_v12, 0.0  ;;  %v1319_v34 = vadd.f32 %v24094_v6, %v29064_v30 }
 0x222   : > { %v24323_v53 = vrot.slane %v29063_v9, 1  ;;  %v1311_v45 = vadd.f32 %v24094_v6, %v29065_v46  ;;  %v1910_v10 = vadd.f32 %v24087_v1, %v1778_v37  ;;  %v1913_v7 = vadd.f32 %v24087_v1, %v1781_v40 }
 0x223   : > { %v1911_v44 = vadd.f32 %v24087_v1, %v1779_v21  ;;  %v1650_v16 = vmax.f32 %v1308_v13, 0.0  ;;  %v1784_v19 = vmul.f32 %v24101_v47, %v1652_v24  ;;  %v1653_v48 = vmax.f32 %v1319_v34, 0.0 }
 0x224   : > { %v1651_v29 = vmax.f32 %v1311_v45, 0.0  ;;  %v2013_v25 = vpack.c.bf16 %v1913_v7, %v1912_v36  ;;  %v12654_v52 = vshll.u32 %v21957_v62, 16  ;;  %v10913_v23 = vshll.u32 %v21959_v33, 16  ;;  %v29068_v33 = vld [vmem:[#allocation11_spill] sm:$0xff] }
 0x225   : > { %v2012_v49 = vpack.c.bf16 %v1911_v44, %v1910_v10  ;;  %v1782_v17 = vmul.f32 %v24101_v47, %v1650_v16  ;;  %v1785_v57 = vmul.f32 %v24101_v47, %v1653_v48  ;;  %v29066_v43 = vpack.c.bf16 %v24160_v5, %v24151_v18  ;;  %v29067_v18 = vld [vmem:[#allocation10_spill] sm:$0xff] }
 0x226   : > { %v1783_v41 = vmul.f32 %v24101_v47, %v1651_v29  ;;  %v24352_v50 = vadd.f32 %v24087_v1, %v1784_v19  ;;  %v24363_v37 = vrot.slane %v12654_v52, 1  ;;  %v24367_v5 = vadd.f32 %v24094_v6, %v29067_v18 }
 0x227   : > { %v2063_v63 = vmax.bf16 %v2013_v25, %v29066_v43  ;;  %v2062_v38 = vmax.bf16 %v2012_v49, %v2010_v22  ;;  %v24355_v15 = vadd.f32 %v24087_v1, %v1782_v17  ;;  %v24358_v20 = vadd.f32 %v24087_v1, %v1785_v57 }
 0x228   : > { %v24361_v58 = vadd.f32 %v24087_v1, %v1783_v41  ;;  %v21950_v12 = vld [vmem:[#allocation2 + $0x30] sm:$0xff]   ;;  %v24377_v13 = vrot.slane %v10913_v23, 1  ;;  %v1656_v45 = vmax.f32 %v24367_v5, 0.0  ;;  %v24390_v10 = vadd.f32 %v24094_v6, %v29068_v33  ;;  %v24407_v1 = vpop.f32.mrb[76].mxu0 }
 0x229   : > { %v2751_v2 = vcombine.high %v2063_v63, %v2063_v63  ;;  %v2758_v51 = vrot.slane %v2063_v63, %v23126_v3  ;;  %v2702_v22 = vcombine.high %v2062_v38, %v2062_v38  ;;  %v2709_v42 = vrot.slane %v2062_v38, %v23126_v3  ;;  %v21951_v9 = vld [vmem:[#allocation2 + $0x30] sm:$0xff]   ;;  %12386 = vrot.lane.b32.xlu0 %v21950_v12, %s22726_s15 }
 0x22a   : > { %v24375_v21 = vld [vmem:[#allocation2 + $0x30] sm:$0xfe]   ;;  %11522 = vrot.lane.b32.xlu1 %v21951_v9, %s22729_s24  ;;  %29069 = vst [vmem:[#allocation17_spill] sm:$0xff] %v24407_v1 }
 0x22b   : > { %v2765_v62 = vrot.slane %v2751_v2, %v23126_v3  ;;  %v2766_v36 = vcombine.high %v2758_v51, %v2758_v51  ;;  %v2774_v24 = vrot.slane %v2758_v51, %v23126_v3  ;;  %v2716_v30 = vrot.slane %v2702_v22, %v23126_v3 }
 0x22c   : > { %v2717_v34 = vcombine.high %v2709_v42, %v2709_v42  ;;  %v24384_v46 = vrot.slane %v2709_v42, %v23126_v3 }
 0x22d   : > { %v2767_v7 = vcombine.high %v2765_v62, %v2765_v62  ;;  %v2781_v44 = vrot.slane %v2765_v62, %v23126_v3  ;;  %v2788_v16 = vrot.slane %v2766_v36, %v23126_v3  ;;  %v2796_v19 = vcombine.high %v2774_v24, %v2774_v24 }
 0x22e   : > { %v4459_v48 = vshrl.u32 %v2774_v24, 16  ;;  %v2718_v29 = vcombine.high %v2716_v30, %v2716_v30  ;;  %v24395_v25 = vrot.slane %v2716_v30, %v23126_v3  ;;  %v24400_v38 = vrot.slane %v2717_v34, %v23126_v3 }
 0x22f   : > { %v2795_v17 = vrot.slane %v2767_v7, %v23126_v3  ;;  %v2797_v52 = vcombine.high %v2781_v44, %v2781_v44  ;;  %v2798_v57 = vcombine.high %v2788_v16, %v2788_v16  ;;  %v4464_v41 = vshrl.u32 %v2788_v16, 16 }
 0x230   : > { %v4469_v23 = vshrl.u32 %v2796_v19, 16  ;;  %v4479_v43 = vshrl.u32 %v2781_v44, 16  ;;  %v5578_v63 = vmax.bf16 %v4459_v48, %v2774_v24 }
 0x231   : > { %v2799_v18 = vcombine.high %v2795_v17, %v2795_v17  ;;  %v4474_v5 = vshrl.u32 %v2798_v57, 16  ;;  %v4484_v2 = vshrl.u32 %v2795_v17, 16  ;;  %v4489_v51 = vshrl.u32 %v2797_v52, 16 }
 0x232   : > { %v5579_v22 = vmax.bf16 %v4464_v41, %v2788_v16  ;;  %v5580_v42 = vmax.bf16 %v4469_v23, %v2796_v19  ;;  %v5582_v12 = vmax.bf16 %v4479_v43, %v2781_v44  ;;  %v7504_v9 = vrot.slane %v5578_v63, %v23133_v14 }
 0x233   : > { %v4494_v62 = vshrl.u32 %v2799_v18, 16  ;;  %v5581_v36 = vmax.bf16 %v4474_v5, %v2798_v57  ;;  %v5583_v30 = vmax.bf16 %v4484_v2, %v2795_v17  ;;  %v5584_v33 = vmax.bf16 %v4489_v51, %v2797_v52  ;;  %v24412_v57 = vpop.f32.mrb[77].mxu0 }
 0x234   : > { %v7511_v7 = vrot.slane %v7504_v9, %v23133_v14  ;;  %v7518_v24 = vrot.slane %v5579_v22, %v23133_v14  ;;  %v7532_v34 = vrot.slane %v5580_v42, %v23133_v14  ;;  %v7560_v48 = vrot.slane %v5582_v12, %v23133_v14  ;;  %29070 = vst [vmem:[#allocation18_spill] sm:$0xff] %v24412_v57  ;;  %v24417_v43 = vpop.f32.mrb[78].mxu0 }
 0x235   : > { %v5585_v40 = vmax.bf16 %v4494_v62, %v2799_v18  ;;  %v7546_v16 = vrot.slane %v5581_v36, %v23133_v14  ;;  %v7574_v44 = vrot.slane %v5583_v30, %v23133_v14  ;;  %v7588_v19 = vrot.slane %v5584_v33, %v23133_v14  ;;  %29071 = vst [vmem:[#allocation10_spill] sm:$0xff] %v24417_v43 }
 0x236   : > { %v7525_v17 = vrot.slane %v7518_v24, %v23133_v14  ;;  %v7539_v52 = vrot.slane %v7532_v34, %v23133_v14  ;;  %v7567_v41 = vrot.slane %v7560_v48, %v23133_v14  ;;  %v9730_v23 = vunpack.c.l.b16 %v7511_v7  ;;  %v24440_v48 = vpop.f32.mrb[79].mxu0 }
 0x237   : > { %v7553_v63 = vrot.slane %v7546_v16, %v23133_v14  ;;  %v24421_v18 = vrot.slane %v7574_v44, %v23133_v14  ;;  %v24424_v5 = vrot.slane %v7588_v19, %v23133_v14  ;;  %v7602_v2 = vrot.slane %v5585_v40, %v23133_v14  ;;  %v10470_v40 = vld [vmem:[#allocation2 + $0x5c] sm:$0x1]  ;;  %29072 = vst [vmem:[#allocation11_spill] sm:$0xff] %v24440_v48 }
 0x238   : > { %v9731_v51 = vunpack.c.l.b16 %v7525_v17  ;;  %v9732_v22 = vunpack.c.l.b16 %v7539_v52  ;;  %v9734_v42 = vunpack.c.l.b16 %v7567_v41  ;;  %v2746_v12 = vrot.slane %v2718_v29, %v23126_v3 }
 0x239   : > { %v7609_v9 = vrot.slane %v7602_v2, %v23133_v14  ;;  %v9733_v62 = vunpack.c.l.b16 %v7553_v63  ;;  %v24429_v36 = vrot.slane %v9730_v23, 7  ;;  %v24432_v30 = vmul.f32 %v24101_v47, %v1656_v45 }
 0x23a   : > { %v9735_v33 = vunpack.c.l.b16 %v24421_v18  ;;  %v24436_v24 = vrot.slane %v9731_v51, 6  ;;  %v2747_v34 = vcombine.high %v24384_v46, %v24384_v46  ;;  %v24442_v29 = vrot.slane %v9732_v22, 5 }
 0x23b   : > { %v24444_v16 = vrot.slane %v9733_v62, 4  ;;  %v24446_v44 = vrot.slane %v9734_v42, 3  ;;  %v20544_v45 = vcombine.low %v7609_v9, %v7609_v9  ;;  %v2748_v19 = vcombine.high %v24395_v25, %v24395_v25 }
 0x23c   : > { %v2749_v17 = vcombine.high %v24400_v38, %v24400_v38  ;;  %v2750_v52 = vcombine.high %v2746_v12, %v2746_v12  ;;  %v4419_v41 = vshrl.u32 %v24384_v46, 16  ;;  %v4424_v63 = vshrl.u32 %v24400_v38, 16 }
 0x23d   : > { %v10471_v23 = vsel %vm23219_vm5, %v20544_v45, %v10470_v40  ;;  %v4429_v18 = vshrl.u32 %v2747_v34, 16  ;;  %v4439_v2 = vshrl.u32 %v24395_v25, 16  ;;  %v4444_v22 = vshrl.u32 %v2746_v12, 16 }
 0x23e   : > { %10472 = vst [vmem:[#allocation2 + $0x5c] sm:$0x1] %v10471_v23  ;;  %v4434_v51 = vshrl.u32 %v2749_v17, 16  ;;  %v4449_v42 = vshrl.u32 %v2748_v19, 16  ;;  %v4454_v9 = vshrl.u32 %v2750_v52, 16  ;;  %v5570_v62 = vmax.bf16 %v4419_v41, %v24384_v46 }
 0x23f   : > { %v5571_v7 = vmax.bf16 %v4424_v63, %v24400_v38  ;;  %v5572_v59 = vmax.bf16 %v4429_v18, %v2747_v34  ;;  %v5574_v49 = vmax.bf16 %v4439_v2, %v24395_v25  ;;  %v5575_v48 = vmax.bf16 %v4444_v22, %v2746_v12  ;;  %v24468_v34 = vpop.f32.mrb[80].mxu0  ;;  %v21954_v2 = vld [vmem:[#allocation2 + $0x30] sm:$0xfe]  }
 0x240   : > { %v5573_v32 = vmax.bf16 %v4434_v51, %v2749_v17  ;;  %v5576_v40 = vmax.bf16 %v4449_v42, %v2748_v19  ;;  %v5577_v45 = vmax.bf16 %v4454_v9, %v2750_v52  ;;  %v7392_v43 = vrot.slane %v5570_v62, %v23133_v14  ;;  %29073 = vst [vmem:[#allocation21_spill] sm:$0xff] %v24468_v34  ;;  %v24474_v17 = vpop.f32.mrb[81].mxu0  ;;  %v21956_v51 = vld [vmem:[#allocation2 + $0x30] sm:$0xff]  }
 0x241   : > { %v7406_v57 = vrot.slane %v5571_v7, %v23133_v14  ;;  %v7420_v23 = vrot.slane %v5572_v59, %v23133_v14  ;;  %v7448_v1 = vrot.slane %v5574_v49, %v23133_v14  ;;  %v7462_v46 = vrot.slane %v5575_v48, %v23133_v14  ;;  %29074 = vst [vmem:[#allocation22_spill] sm:$0xff] %v24474_v17  ;;  %v24480_v41 = vpop.f32.mrb[82].mxu0 }
 0x242   : > { %v7434_v8 = vrot.slane %v5573_v32, %v23133_v14  ;;  %v7476_v38 = vrot.slane %v5576_v40, %v23133_v14  ;;  %v7490_v25 = vrot.slane %v5577_v45, %v23133_v14  ;;  %v7399_v12 = vrot.slane %v7392_v43, %v23133_v14  ;;  %29075 = vst [vmem:[#allocation23_spill] sm:$0xff] %v24480_v41  ;;  %v24482_v22 = vpop.f32.mrb[83].mxu0 }
 0x243   : > { %v7413_v19 = vrot.slane %v7406_v57, %v23133_v14  ;;  %v7427_v7 = vrot.slane %v7420_v23, %v23133_v14  ;;  %v7455_v59 = vrot.slane %v7448_v1, %v23133_v14  ;;  %v7469_v49 = vrot.slane %v7462_v46, %v23133_v14  ;;  %29076 = vst [vmem:[#allocation24_spill] sm:$0xff] %v24482_v22 }
 0x244   : > { %v7441_v32 = vrot.slane %v7434_v8, %v23133_v14  ;;  %v7483_v48 = vrot.slane %v7476_v38, %v23133_v14  ;;  %v7497_v52 = vrot.slane %v7490_v25, %v23133_v14  ;;  %v9722_v63 = vunpack.c.l.b16 %v7399_v12 }
 0x245   : > { %v9723_v43 = vunpack.c.l.b16 %v7413_v19  ;;  %v9724_v18 = vunpack.c.l.b16 %v7427_v7  ;;  %v9726_v57 = vunpack.c.l.b16 %v7455_v59  ;;  %v9727_v42 = vunpack.c.l.b16 %v7469_v49  ;;  %v21958_v19 = vld [vmem:[#allocation2 + $0x30] sm:$0xff]  }
 0x246   : > { %v9725_v1 = vunpack.c.l.b16 %v7441_v32  ;;  %v9728_v9 = vunpack.c.l.b16 %v7483_v48  ;;  %v9729_v8 = vunpack.c.l.b16 %v7497_v52  ;;  %v10074_v62 = vrot.slane %v9735_v33, 2 }
 0x247   : > { %v10051_v40 = vrot.slane %v9722_v63, 7  ;;  %v10052_v45 = vrot.slane %v9723_v43, 6  ;;  %v10054_v23 = vrot.slane %v9724_v18, 5  ;;  %v10058_v38 = vrot.slane %v9726_v57, 3 }
 0x248   : > { %v10056_v46 = vrot.slane %v9725_v1, 4  ;;  %v10060_v25 = vrot.slane %v9727_v42, 2  ;;  %v10065_v12 = vsel %vm9902_vm6, %v24429_v36, %v9729_v8  ;;  %v29077_v32 = vrot.slane %v24317_v61, 1 }
 0x249   : > { %v10053_v7 = vsel %vm9884_vm7, %v10052_v45, %v10051_v40  ;;  %v10067_v59 = vsel %vm9884_vm7, %v24436_v24, %v10065_v12  ;;  %v29078_v49 = vrot.slane %v24375_v21, 1  ;;  %v11303_v48 = vrot.slane %v21954_v2, 1 }
 0x24a   : > { %v10055_v52 = vsel %vm9887_vm8, %v10054_v23, %v10053_v7  ;;  %v10062_v63 = vrot.slane %v9728_v9, 1  ;;  %v10069_v43 = vsel %vm9887_vm8, %v24442_v29, %v10067_v59  ;;  %v12649_v36 = vshll.u32 %v21956_v51, 16  ;;  %v29081_v7 = vld [vmem:[#allocation13_spill] sm:$0xff] }
 0x24b   : > { %v12168_v33 = vsel %vm11290_vm3, %v29078_v49, %v29077_v32  ;;  %v10057_v18 = vsel %vm9890_vm9, %v10056_v46, %v10055_v52  ;;  %v10071_v24 = vsel %vm9890_vm9, %v24444_v16, %v10069_v43  ;;  %v29079_v61 = vrot.slane %v24319_v28, 1  ;;  %v29080_v46 = vld [vmem:[#allocation12_spill] sm:$0xff] }
 0x24c   : > { %12211 = vrot.lane.b32.xlu0 %v12168_v33, %s22728_s22  ;;  %v12647_v57 = vshrl.u32 %v21956_v51, 16  ;;  %v10059_v2 = vsel %vm9893_vm10, %v10058_v38, %v10057_v18  ;;  %v10073_v1 = vsel %vm9893_vm10, %v24446_v44, %v10071_v24  ;;  %v12651_v29 = vrot.slane %v12649_v36, 1  ;;  %v10466_v51 = vld [vmem:[#allocation2 + $0x54] sm:$0xf] }
 0x24d   : > { %v11305_v21 = vsel %vm11290_vm3, %v11303_v48, %v29079_v61  ;;  %v10908_v42 = vshll.u32 %v21958_v19, 16  ;;  %v10061_v9 = vsel %vm9896_vm11, %v10060_v25, %v10059_v2  ;;  %v24510_v8 = vsel %vm9896_vm11, %v10074_v62, %v10073_v1  ;;  %v24543_v48 = vld [vmem:[%s28998_s2 + $0x1] ss:$0 sm:$0xff]  ;;  %v24551_v43 = vld [vmem:[#allocation2 + $0x44] ss:$0 sps:$4 sm:$0x11]  }
 0x24e   : > { %11347 = vrot.lane.b32.xlu1 %v11305_v21, %s22726_s15  ;;  %v10906_v16 = vshrl.u32 %v21958_v19, 16  ;;  %v1654_v28 = vmax.f32 %v24390_v10, 0.0  ;;  %v10063_v40 = vsel %vm9899_vm12, %v10062_v63, %v10061_v9  ;;  %v12652_v45 = vor.u32 %v12651_v29, %v12647_v57  ;;  %v21971_v36 = vld [vmem:[#allocation2 + $0x44] ss:$0 sps:$4 sm:$0x11]  }
 0x24f   : > { %v10910_v23 = vrot.slane %v10908_v42, 1  ;;  %v1335_v44 = vadd.f32 %v24094_v6, %v29080_v46  ;;  %v10339_v38 = vpack.c.b16 %v10063_v40, %v10063_v40  ;;  %v1327_v25 = vadd.f32 %v24094_v6, %v29081_v7 }
 0x250   : > { %v1786_v12 = vmul.f32 %v24101_v47, %v1654_v28  ;;  %v10023_v62 = vsel %vm9899_vm12, %v24046_v4, %v24076_v11  ;;  %v12657_v10 = vsel %vm10856_vm15, %v12652_v45, %v24363_v37  ;;  %v29082_v49 = vunpack.c.l.b16 %v24424_v5  ;;  %v24534_v4 = vld [vmem:[%s28998_s2] ss:$0 sm:$0xff]  ;;  %v21969_v37 = vld [vmem:[#allocation2 + $0x44] ss:$0 sps:$4 sm:$0x11]  }
 0x251   : > { %v10911_v19 = vor.u32 %v10910_v23, %v10906_v16  ;;  %v1657_v59 = vmax.f32 %v1335_v44, 0.0  ;;  %v10334_v32 = vpack.c.b16 %v10023_v62, %v10023_v62  ;;  %v10467_v47 = vsel %vm23321_vm14, %v10339_v38, %v10466_v51  ;;  %12818 = vrot.lane.b32.xlu0 %v12657_v10, %s22729_s24 }
 0x252   : > { %v24526_v33 = vrot.slane %v29082_v49, 1  ;;  %v1655_v6 = vmax.f32 %v1327_v25, 0.0  ;;  %v1348_v11 = vadd.f32 %v24534_v4, %v24040_v35  ;;  %10468 = vst [vmem:[#allocation2 + $0x54] sm:$0xf] %v10467_v47  ;;  %v1340_v63 = vadd.f32 %v24534_v4, %v24042_v26 }
 0x253   : > { %v10916_v5 = vsel %vm10856_vm15, %v10911_v19, %v24377_v13  ;;  %v1789_v52 = vmul.f32 %v24543_v48, %v1657_v59  ;;  %10455 = vst.msk [vmem:[#allocation2 + $0x40] sm:$0xf] %vm5730_vm2, %v10334_v32  ;;  %v1351_v35 = vadd.f32 %v24534_v4, %v24044_v39  ;;  %v24557_v13 = vld [vmem:[%s28998_s2 + $0x2] ss:$0 sm:$0xff]  ;;  %v1343_v26 = vadd.f32 %v24534_v4, %v24048_v27 }
 0x254   : > { %11057 = vrot.lane.b32.xlu1 %v10916_v5, %s22728_s22  ;;  %v1920_v18 = vadd.f32 %v24557_v13, %v24432_v30  ;;  %v1787_v24 = vmul.f32 %v24543_v48, %v1655_v6  ;;  %v1660_v61 = vmax.f32 %v1348_v11, 0.0  ;;  %v24564_v39 = vld [vmem:[#allocation2 + $0x44] ss:$0 sps:$4 sm:$0x11]   ;;  %v1918_v21 = vadd.f32 %v24557_v13, %v1786_v12 }
 0x255   : > { %v1921_v57 = vadd.f32 %v24557_v13, %v1789_v52  ;;  %v1658_v2 = vmax.f32 %v1340_v63, 0.0  ;;  %v1661_v1 = vmax.f32 %v1351_v35, 0.0  ;;  %v1659_v9 = vmax.f32 %v1343_v26, 0.0  ;;  %v29086_v35 = vld [vmem:[#allocation15_spill] sm:$0xff]  ;;  %v29087_v26 = vld [vmem:[#allocation16_spill] sm:$0xff] }
 0x256   : > { %v1919_v29 = vadd.f32 %v24557_v13, %v1787_v24  ;;  %v1792_v42 = vmul.f32 %v24543_v48, %v1660_v61  ;;  %v12666_v30 = vshll.u32 %v21969_v37, 16  ;;  %v10925_v27 = vshll.u32 %v21971_v36, 16 }
 0x257   : > { %v2017_v16 = vpack.c.bf16 %v1921_v57, %v1920_v18  ;;  %v1790_v28 = vmul.f32 %v24543_v48, %v1658_v2  ;;  %v1793_v40 = vmul.f32 %v24543_v48, %v1661_v1  ;;  %v1791_v45 = vmul.f32 %v24543_v48, %v1659_v9  ;;  %v21984_v9 = vld [vmem:[%s28999_s3 + $0x58] sm:$0xff]   ;;  %v24655_v1 = vpop.f32.mrb[84].mxu0 }
 0x258   : > { %v2016_v51 = vpack.c.bf16 %v1919_v29, %v1918_v21  ;;  %v29083_v44 = vpack.c.bf16 %v24358_v20, %v24352_v50  ;;  %v24579_v12 = vadd.f32 %v24557_v13, %v1792_v42  ;;  %v24584_v25 = vrot.slane %v12666_v30, 1  ;;  %v29088_v29 = vld [vmem:[#allocation19_spill] sm:$0xff]  ;;  %21354 = vmatprep.subr.bf16.mxu0 %v21984_v9  ;;  %29089 = vst [vmem:[#allocation12_spill] sm:$0xff] %v24655_v1 }
 0x259   : > { %v24582_v7 = vadd.f32 %v24557_v13, %v1793_v40  ;;  %v29084_v62 = vpack.c.bf16 %v24361_v58, %v24355_v15  ;;  %v24590_v59 = vadd.f32 %v24557_v13, %v1790_v28  ;;  %v24593_v32 = vadd.f32 %v24557_v13, %v1791_v45  ;;  %v29085_v15 = vld [vmem:[#allocation14_spill] sm:$0xff] }
 0x25a   : > { %v2065_v38 = vmax.bf16 %v2017_v16, %v29083_v44  ;;  %v21960_v19 = vld [vmem:[#allocation2 + $0x3c] sm:$0xff]   ;;  %v24595_v50 = vrot.slane %v10925_v27, 1  ;;  %v24604_v58 = vadd.f32 %v24534_v4, %v29085_v15  ;;  %v24616_v36 = vadd.f32 %v24534_v4, %v29086_v35 }
 0x25b   : > { %v2064_v10 = vmax.bf16 %v2016_v51, %v29084_v62  ;;  %v21961_v47 = vld [vmem:[#allocation2 + $0x3c] sm:$0xff]   ;;  %12388 = vrot.lane.b32.xlu0 %v21960_v19, %s22726_s15  ;;  %v24623_v21 = vadd.f32 %v24534_v4, %v29087_v26  ;;  %v24631_v42 = vadd.f32 %v24534_v4, %v29088_v29 }
 0x25c   : > { %v2849_v20 = vcombine.high %v2065_v38, %v2065_v38  ;;  %v2856_v49 = vrot.slane %v2065_v38, %v23126_v3  ;;  %v24600_v11 = vld [vmem:[#allocation2 + $0x3c] sm:$0xfe]   ;;  %11524 = vrot.lane.b32.xlu1 %v21961_v47, %s22729_s24 }
 0x25d   : > { %v2800_v37 = vcombine.high %v2064_v10, %v2064_v10  ;;  %v24607_v5 = vrot.slane %v2064_v10, %v23126_v3  ;;  %v24612_v63 = vld [vmem:[#allocation2 + $0x3c] sm:$0xfe]  }
 0x25e   : > { %v2863_v18 = vrot.slane %v2849_v20, %v23126_v3  ;;  %v2864_v24 = vcombine.high %v2856_v49, %v2856_v49  ;;  %v2872_v61 = vrot.slane %v2856_v49, %v23126_v3  ;;  %v21985_v27 = vld [vmem:[%s28999_s3 + $0x18] sm:$0xff]  }
 0x25f   : > { %v2814_v57 = vrot.slane %v2800_v37, %v23126_v3  ;;  %v2815_v2 = vcombine.high %v24607_v5, %v24607_v5  ;;  %v24643_v44 = vrot.slane %v24607_v5, %v23126_v3  ;;  %21355 = vmatpush3.bf16.msra.mxu0 %v21985_v27 }
 0x260   : > { %v2865_v30 = vcombine.high %v2863_v18, %v2863_v18  ;;  %v2879_v16 = vrot.slane %v2863_v18, %v23126_v3  ;;  %v2886_v28 = vrot.slane %v2864_v24, %v23126_v3  ;;  %v2894_v40 = vcombine.high %v2872_v61, %v2872_v61 }
 0x261   : > { %v4539_v51 = vshrl.u32 %v2872_v61, 16  ;;  %v2816_v45 = vcombine.high %v2814_v57, %v2814_v57  ;;  %v24648_v37 = vrot.slane %v2814_v57, %v23126_v3 }
 0x262   : > { %v2893_v62 = vrot.slane %v2865_v30, %v23126_v3  ;;  %v2895_v10 = vcombine.high %v2879_v16, %v2879_v16  ;;  %v2896_v19 = vcombine.high %v2886_v28, %v2886_v28  ;;  %v4544_v20 = vshrl.u32 %v2886_v28, 16 }
 0x263   : > { %v4549_v49 = vshrl.u32 %v2894_v40, 16  ;;  %v4559_v47 = vshrl.u32 %v2879_v16, 16  ;;  %v5594_v15 = vmax.bf16 %v4539_v51, %v2872_v61 }
 0x264   : > { %v2897_v35 = vcombine.high %v2893_v62, %v2893_v62  ;;  %v4554_v18 = vshrl.u32 %v2896_v19, 16  ;;  %v4564_v24 = vshrl.u32 %v2893_v62, 16  ;;  %v4569_v5 = vshrl.u32 %v2895_v10, 16 }
 0x265   : > { %v5595_v26 = vmax.bf16 %v4544_v20, %v2886_v28  ;;  %v5596_v29 = vmax.bf16 %v4549_v49, %v2894_v40  ;;  %v5598_v52 = vmax.bf16 %v4559_v47, %v2879_v16  ;;  %v7728_v9 = vrot.slane %v5594_v15, %v23133_v14 }
 0x266   : > { %v4574_v30 = vshrl.u32 %v2897_v35, 16  ;;  %v5597_v6 = vmax.bf16 %v4554_v18, %v2896_v19  ;;  %v5599_v38 = vmax.bf16 %v4564_v24, %v2893_v62  ;;  %v5600_v46 = vmax.bf16 %v4569_v5, %v2895_v10  ;;  %v24660_v19 = vpop.f32.mrb[85].mxu0 }
 0x267   : > { %v7735_v27 = vrot.slane %v7728_v9, %v23133_v14  ;;  %v7742_v61 = vrot.slane %v5595_v26, %v23133_v14  ;;  %v7756_v57 = vrot.slane %v5596_v29, %v23133_v14  ;;  %v7784_v51 = vrot.slane %v5598_v52, %v23133_v14  ;;  %29090 = vst [vmem:[#allocation13_spill] sm:$0xff] %v24660_v19  ;;  %v24665_v47 = vpop.f32.mrb[86].mxu0 }
 0x268   : > { %v5601_v23 = vmax.bf16 %v4574_v30, %v2897_v35  ;;  %v7770_v28 = vrot.slane %v5597_v6, %v23133_v14  ;;  %v7798_v16 = vrot.slane %v5599_v38, %v23133_v14  ;;  %v7812_v40 = vrot.slane %v5600_v46, %v23133_v14  ;;  %29091 = vst [vmem:[#allocation14_spill] sm:$0xff] %v24665_v47 }
 0x269   : > { %v7749_v62 = vrot.slane %v7742_v61, %v23133_v14  ;;  %v7763_v10 = vrot.slane %v7756_v57, %v23133_v14  ;;  %v7791_v20 = vrot.slane %v7784_v51, %v23133_v14  ;;  %v9746_v49 = vunpack.c.l.b16 %v7735_v27  ;;  %v24684_v57 = vpop.f32.mrb[87].mxu0 }
 0x26a   : > { %v7777_v52 = vrot.slane %v7770_v28, %v23133_v14  ;;  %v7805_v15 = vrot.slane %v7798_v16, %v23133_v14  ;;  %v7826_v6 = vrot.slane %v5601_v23, %v23133_v14  ;;  %v2837_v38 = vrot.slane %v2815_v2, %v23126_v3  ;;  %v10477_v23 = vld [vmem:[#allocation2 + $0x68] sm:$0x1]  ;;  %29092 = vst [vmem:[#allocation15_spill] sm:$0xff] %v24684_v57 }
 0x26b   : > { %v9747_v46 = vunpack.c.l.b16 %v7749_v62  ;;  %v9748_v35 = vunpack.c.l.b16 %v7763_v10  ;;  %v9750_v18 = vunpack.c.l.b16 %v7791_v20  ;;  %v2844_v24 = vrot.slane %v2816_v45, %v23126_v3 }
 0x26c   : > { %v24673_v5 = vrot.slane %v7812_v40, %v23133_v14  ;;  %v7833_v26 = vrot.slane %v7826_v6, %v23133_v14  ;;  %v9749_v29 = vunpack.c.l.b16 %v7777_v52  ;;  %v9751_v9 = vunpack.c.l.b16 %v7805_v15 }
 0x26d   : > { %v24676_v30 = vrot.slane %v9746_v49, 7  ;;  %v24678_v27 = vrot.slane %v9747_v46, 6  ;;  %v24680_v61 = vrot.slane %v9748_v35, 5  ;;  %v2845_v2 = vcombine.high %v24643_v44, %v24643_v44 }
 0x26e   : > { %v24686_v45 = vrot.slane %v9749_v29, 4  ;;  %v24688_v51 = vrot.slane %v9750_v18, 3  ;;  %v24690_v28 = vrot.slane %v9751_v9, 2  ;;  %v20545_v16 = vcombine.low %v7833_v26, %v7833_v26  ;;  %v21994_v26 = vld [vmem:[#allocation2] sm:$0xff]  }
 0x26f   : > { %v2846_v40 = vcombine.high %v24648_v37, %v24648_v37  ;;  %v2847_v62 = vcombine.high %v2837_v38, %v2837_v38  ;;  %v2848_v10 = vcombine.high %v2844_v24, %v2844_v24  ;;  %v4499_v20 = vshrl.u32 %v24643_v44, 16  ;;  %10664 = vst.msk [vmem:[#allocation3] sm:$0xff] %vm856_vm0, %v21994_v26 }
 0x270   : > { %v10478_v49 = vsel %vm23219_vm5, %v20545_v16, %v10477_v23  ;;  %v4504_v52 = vshrl.u32 %v2837_v38, 16  ;;  %v4509_v15 = vshrl.u32 %v2845_v2, 16  ;;  %v4519_v6 = vshrl.u32 %v24648_v37, 16 }
 0x271   : > { %10479 = vst [vmem:[#allocation2 + $0x68] sm:$0x1] %v10478_v49  ;;  %v4514_v46 = vshrl.u32 %v2847_v62, 16  ;;  %v4524_v35 = vshrl.u32 %v2844_v24, 16  ;;  %v4529_v18 = vshrl.u32 %v2846_v40, 16  ;;  %v4534_v29 = vshrl.u32 %v2848_v10, 16 }
 0x272   : > { %v5586_v9 = vmax.bf16 %v4499_v20, %v24643_v44  ;;  %v5587_v57 = vmax.bf16 %v4504_v52, %v2837_v38  ;;  %v5588_v47 = vmax.bf16 %v4509_v15, %v2845_v2  ;;  %v5590_v19 = vmax.bf16 %v4519_v6, %v24648_v37  ;;  %v24709_v2 = vpop.f32.mrb[88].mxu0 }
 0x273   : > { %v5589_v1 = vmax.bf16 %v4514_v46, %v2847_v62  ;;  %v5591_v22 = vmax.bf16 %v4524_v35, %v2844_v24  ;;  %v5592_v41 = vmax.bf16 %v4529_v18, %v2846_v40  ;;  %v5593_v23 = vmax.bf16 %v4534_v29, %v2848_v10  ;;  %v24715_v10 = vpop.f32.mrb[89].mxu0  ;;  %v21968_v35 = vld [vmem:[#allocation2 + $0x3c] sm:$0xff]  }
 0x274   : > { %v7616_v16 = vrot.slane %v5586_v9, %v23133_v14  ;;  %v7630_v49 = vrot.slane %v5587_v57, %v23133_v14  ;;  %v7644_v17 = vrot.slane %v5588_v47, %v23133_v14  ;;  %v7672_v34 = vrot.slane %v5590_v19, %v23133_v14  ;;  %v24721_v20 = vpop.f32.mrb[90].mxu0 }
 0x275   : > { %v7658_v44 = vrot.slane %v5589_v1, %v23133_v14  ;;  %v7686_v38 = vrot.slane %v5591_v22, %v23133_v14  ;;  %v7700_v37 = vrot.slane %v5592_v41, %v23133_v14  ;;  %v7714_v24 = vrot.slane %v5593_v23, %v23133_v14  ;;  %v24723_v18 = vpop.f32.mrb[91].mxu0 }
 0x276   : > { %v7623_v40 = vrot.slane %v7616_v16, %v23133_v14  ;;  %v7637_v62 = vrot.slane %v7630_v49, %v23133_v14  ;;  %v7651_v57 = vrot.slane %v7644_v17, %v23133_v14  ;;  %v7679_v47 = vrot.slane %v7672_v34, %v23133_v14  ;;  %v21970_v17 = vld [vmem:[#allocation2 + $0x3c] sm:$0xff]  }
 0x277   : > { %v7665_v1 = vrot.slane %v7658_v44, %v23133_v14  ;;  %v7693_v22 = vrot.slane %v7686_v38, %v23133_v14  ;;  %v7707_v41 = vrot.slane %v7700_v37, %v23133_v14  ;;  %v7721_v19 = vrot.slane %v7714_v24, %v23133_v14 }
 0x278   : > { %v9738_v52 = vunpack.c.l.b16 %v7623_v40  ;;  %v9739_v15 = vunpack.c.l.b16 %v7637_v62  ;;  %v9740_v6 = vunpack.c.l.b16 %v7651_v57  ;;  %v9742_v46 = vunpack.c.l.b16 %v7679_v47 }
 0x279   : > { %v9741_v34 = vunpack.c.l.b16 %v7665_v1  ;;  %v9743_v29 = vunpack.c.l.b16 %v7693_v22  ;;  %v9744_v26 = vunpack.c.l.b16 %v7707_v41  ;;  %v9745_v9 = vunpack.c.l.b16 %v7721_v19 }
 0x27a   : > { %v10078_v23 = vrot.slane %v9738_v52, 7  ;;  %v10079_v16 = vrot.slane %v9739_v15, 6  ;;  %v10081_v49 = vrot.slane %v9740_v6, 5  ;;  %v10085_v44 = vrot.slane %v9742_v46, 3 }
 0x27b   : > { %v10083_v38 = vrot.slane %v9741_v34, 4  ;;  %v10087_v37 = vrot.slane %v9743_v29, 2  ;;  %v10089_v24 = vrot.slane %v9744_v26, 1  ;;  %v10092_v40 = vsel %vm9902_vm6, %v24676_v30, %v9745_v9 }
 0x27c   : > { %v10080_v62 = vsel %vm9884_vm7, %v10079_v16, %v10078_v23  ;;  %v10094_v57 = vsel %vm9884_vm7, %v24678_v27, %v10092_v40  ;;  %v29093_v47 = vrot.slane %v24551_v43, 1  ;;  %v29094_v1 = vrot.slane %v24600_v11, 1 }
 0x27d   : > { %v29095_v41 = vrot.slane %v24564_v39, 1  ;;  %v29096_v19 = vrot.slane %v24612_v63, 1  ;;  %v10082_v15 = vsel %vm9887_vm8, %v10081_v49, %v10080_v62  ;;  %v10096_v30 = vsel %vm9887_vm8, %v24680_v61, %v10094_v57  ;;  %v21979_v57 = vld [vmem:[#allocation2 + $0x50] ss:$0 sps:$4 sm:$0x11]  }
 0x27e   : > { %v12171_v22 = vsel %vm11290_vm3, %v29094_v1, %v29093_v47  ;;  %v12659_v43 = vshrl.u32 %v21968_v35, 16  ;;  %v12661_v27 = vshll.u32 %v21968_v35, 16  ;;  %v10084_v11 = vsel %vm9890_vm9, %v10083_v38, %v10082_v15  ;;  %v24783_v1 = vld [vmem:[#allocation2 + $0x50] ss:$0 sps:$4 sm:$0x11]  }
 0x27f   : > { %v11308_v52 = vsel %vm11290_vm3, %v29096_v19, %v29095_v41  ;;  %12213 = vrot.lane.b32.xlu0 %v12171_v22, %s22728_s22  ;;  %v10098_v39 = vsel %vm9890_vm9, %v24686_v45, %v10096_v30  ;;  %v10918_v6 = vshrl.u32 %v21970_v17, 16  ;;  %v10920_v63 = vshll.u32 %v21970_v17, 16  ;;  %v10473_v17 = vld [vmem:[#allocation2 + $0x60] sm:$0xf] }
 0x280   : > { %11349 = vrot.lane.b32.xlu1 %v11308_v52, %s22726_s15  ;;  %v10086_v46 = vsel %vm9893_vm10, %v10085_v44, %v10084_v11  ;;  %v10100_v34 = vsel %vm9893_vm10, %v24688_v51, %v10098_v39  ;;  %v12663_v29 = vrot.slane %v12661_v27, 1  ;;  %v1664_v61 = vmax.f32 %v24604_v58, 0.0  ;;  %v29097_v19 = vld [vmem:[#allocation20_spill] sm:$0xff]  ;;  %v21981_v15 = vld [vmem:[#allocation2 + $0x50] ss:$0 sps:$4 sm:$0x11]  }
 0x281   : > { %v10088_v26 = vsel %vm9896_vm11, %v10087_v37, %v10086_v46  ;;  %v24755_v35 = vsel %vm9896_vm11, %v24690_v28, %v10100_v34  ;;  %v10922_v9 = vrot.slane %v10920_v63, 1  ;;  %v1662_v23 = vmax.f32 %v24616_v36, 0.0  ;;  %v24794_v27 = vld [vmem:[#allocation2 + $0x50] ss:$0 sps:$4 sm:$0x11]  }
 0x282   : > { %v10090_v45 = vsel %vm9899_vm12, %v10089_v24, %v10088_v26  ;;  %v12664_v16 = vor.u32 %v12663_v29, %v12659_v43  ;;  %v1796_v49 = vmul.f32 %v24543_v48, %v1664_v61  ;;  %v1665_v51 = vmax.f32 %v24623_v21, 0.0 }
 0x283   : > { %v10342_v44 = vpack.c.b16 %v10090_v45, %v10090_v45  ;;  %v10923_v38 = vor.u32 %v10922_v9, %v10918_v6  ;;  %v1794_v58 = vmul.f32 %v24543_v48, %v1662_v23  ;;  %v1663_v37 = vmax.f32 %v24631_v42, 0.0 }
 0x284   : > { %v9752_v28 = vunpack.c.l.b16 %v24673_v5  ;;  %v12669_v40 = vsel %vm10856_vm15, %v12664_v16, %v24584_v25  ;;  %v1797_v36 = vmul.f32 %v24543_v48, %v1665_v51  ;;  %v10050_v24 = vsel %vm9899_vm12, %v24323_v53, %v24295_v31 }
 0x285   : > { %v10474_v21 = vsel %vm23321_vm14, %v10342_v44, %v10473_v17  ;;  %12820 = vrot.lane.b32.xlu0 %v12669_v40, %s22729_s24  ;;  %v10928_v62 = vsel %vm10856_vm15, %v10923_v38, %v24595_v50  ;;  %v1928_v42 = vadd.f32 %v24557_v13, %v1796_v49  ;;  %v1795_v5 = vmul.f32 %v24543_v48, %v1663_v37  ;;  %v22007_v40 = vld [vmem:[#allocation2 + $0xc] sm:$0xff]  }
 0x286   : > { %10475 = vst [vmem:[#allocation2 + $0x60] sm:$0xf] %v10474_v21  ;;  %11059 = vrot.lane.b32.xlu1 %v10928_v62, %s22728_s22  ;;  %v1929_v25 = vadd.f32 %v24557_v13, %v1797_v36  ;;  %v10337_v47 = vpack.c.b16 %v10050_v24, %v10050_v24  ;;  %v1380_v31 = vadd.f32 %v24534_v4, %v24255_v0  ;;  %v24791_v30 = vrot.slane %v9752_v28, 1 }
 0x287   : > { %v1372_v53 = vadd.f32 %v24534_v4, %v24259_v60  ;;  %v1926_v50 = vadd.f32 %v24557_v13, %v1794_v58  ;;  %v1927_v22 = vadd.f32 %v24557_v13, %v1795_v5  ;;  %v1383_v41 = vadd.f32 %v24534_v4, %v24261_v54  ;;  %10665 = vst.msk [vmem:[#allocation3 + $0x18] sm:$0xff] %vm856_vm0, %v22007_v40 }
 0x288   : > { %v1375_v52 = vadd.f32 %v24534_v4, %v29097_v19  ;;  %v2021_v43 = vpack.c.bf16 %v1929_v25, %v1928_v42  ;;  %10462 = vst.msk [vmem:[#allocation2 + $0x4c] sm:$0xf] %vm5730_vm2, %v10337_v47  ;;  %v1668_v0 = vmax.f32 %v1380_v31, 0.0  ;;  %v12678_v63 = vshll.u32 %v21979_v57, 16 }
 0x289   : > { %v1666_v60 = vmax.f32 %v1372_v53, 0.0  ;;  %v2020_v11 = vpack.c.bf16 %v1927_v22, %v1926_v50  ;;  %v1669_v39 = vmax.f32 %v1383_v41, 0.0  ;;  %v29098_v54 = vpack.c.bf16 %v24582_v7, %v24579_v12 }
 0x28a   : > { %v1667_v6 = vmax.f32 %v1375_v52, 0.0  ;;  %v1800_v34 = vmul.f32 %v24543_v48, %v1668_v0  ;;  %v12173_v61 = vrot.slane %v24783_v1, 1  ;;  %v29099_v26 = vpack.c.bf16 %v24593_v32, %v24590_v59 }
 0x28b   : > { %v2067_v46 = vmax.bf16 %v2021_v43, %v29098_v54  ;;  %v1798_v29 = vmul.f32 %v24543_v48, %v1666_v60  ;;  %v1801_v23 = vmul.f32 %v24543_v48, %v1669_v39  ;;  %v10937_v17 = vshll.u32 %v21981_v15, 16 }
 0x28c   : > { %v2066_v9 = vmax.bf16 %v2020_v11, %v29099_v26  ;;  %v1799_v45 = vmul.f32 %v24543_v48, %v1667_v6  ;;  %v11310_v12 = vrot.slane %v24794_v27, 1  ;;  %v24809_v7 = vrot.slane %v12678_v63, 1  ;;  %v29102_v27 = vld [vmem:[#allocation18_spill] sm:$0xff] }
 0x28d   : > { %v2947_v16 = vcombine.high %v2067_v46, %v2067_v46  ;;  %v2954_v49 = vrot.slane %v2067_v46, %v23126_v3  ;;  %v24813_v38 = vadd.f32 %v24557_v13, %v1800_v34  ;;  %v24816_v59 = vadd.f32 %v24557_v13, %v1801_v23 }
 0x28e   : > { %v2898_v51 = vcombine.high %v2066_v9, %v2066_v9  ;;  %v2905_v44 = vrot.slane %v2066_v9, %v23126_v3  ;;  %v24821_v28 = vadd.f32 %v24557_v13, %v1798_v29  ;;  %v24827_v62 = vadd.f32 %v24557_v13, %v1799_v45 }
 0x28f   : > { %v2961_v32 = vrot.slane %v2947_v16, %v23126_v3  ;;  %v2962_v58 = vcombine.high %v2954_v49, %v2954_v49  ;;  %v2970_v37 = vrot.slane %v2954_v49, %v23126_v3  ;;  %v21972_v24 = vld [vmem:[#allocation2 + $0x48] sm:$0xff]   ;;  %v24829_v42 = vrot.slane %v10937_v17, 1 }
 0x290   : > { %v2912_v36 = vrot.slane %v2898_v51, %v23126_v3  ;;  %v21973_v31 = vld [vmem:[#allocation2 + $0x48] sm:$0xff]   ;;  %v2913_v50 = vcombine.high %v2905_v44, %v2905_v44  ;;  %v24835_v41 = vrot.slane %v2905_v44, %v23126_v3  ;;  %12390 = vrot.lane.b32.xlu0 %v21972_v24, %s22726_s15 }
 0x291   : > { %v2963_v5 = vcombine.high %v2961_v32, %v2961_v32  ;;  %v2977_v57 = vrot.slane %v2961_v32, %v23126_v3  ;;  %v2984_v25 = vrot.slane %v2962_v58, %v23126_v3  ;;  %v2992_v47 = vcombine.high %v2970_v37, %v2970_v37  ;;  %11526 = vrot.lane.b32.xlu1 %v21973_v31, %s22729_s24 }
 0x292   : > { %v4619_v53 = vshrl.u32 %v2970_v37, 16  ;;  %v2914_v22 = vcombine.high %v2912_v36, %v2912_v36  ;;  %v24841_v39 = vrot.slane %v2912_v36, %v23126_v3 }
 0x293   : > { %v2991_v19 = vrot.slane %v2963_v5, %v23126_v3  ;;  %v2993_v52 = vcombine.high %v2977_v57, %v2977_v57  ;;  %v2994_v15 = vcombine.high %v2984_v25, %v2984_v25  ;;  %v4624_v43 = vshrl.u32 %v2984_v25, 16 }
 0x294   : > { %v4629_v0 = vshrl.u32 %v2992_v47, 16  ;;  %v4639_v60 = vshrl.u32 %v2977_v57, 16  ;;  %v5610_v11 = vmax.bf16 %v4619_v53, %v2970_v37 }
 0x295   : > { %v2995_v6 = vcombine.high %v2991_v19, %v2991_v19  ;;  %v4634_v63 = vshrl.u32 %v2994_v15, 16  ;;  %v4644_v54 = vshrl.u32 %v2991_v19, 16  ;;  %v4649_v46 = vshrl.u32 %v2993_v52, 16 }
 0x296   : > { %v5611_v34 = vmax.bf16 %v4624_v43, %v2984_v25  ;;  %v5612_v29 = vmax.bf16 %v4629_v0, %v2992_v47  ;;  %v5614_v26 = vmax.bf16 %v4639_v60, %v2977_v57  ;;  %v7952_v9 = vrot.slane %v5610_v11, %v23133_v14 }
 0x297   : > { %v4654_v23 = vshrl.u32 %v2995_v6, 16  ;;  %v5613_v45 = vmax.bf16 %v4634_v63, %v2994_v15  ;;  %v5615_v17 = vmax.bf16 %v4644_v54, %v2991_v19  ;;  %v5616_v16 = vmax.bf16 %v4649_v46, %v2993_v52  ;;  %v24858_v52 = vpop.f32.mrb[92].mxu0 }
 0x298   : > { %v7959_v49 = vrot.slane %v7952_v9, %v23133_v14  ;;  %v7966_v51 = vrot.slane %v5611_v34, %v23133_v14  ;;  %v7980_v44 = vrot.slane %v5612_v29, %v23133_v14  ;;  %v8008_v32 = vrot.slane %v5614_v26, %v23133_v14  ;;  %v24861_v11 = vpop.f32.mrb[93].mxu0  ;;  %v10484_v9 = vld [vmem:[#allocation2 + $0x74] sm:$0x1] }
 0x299   : > { %v5617_v58 = vmax.bf16 %v4654_v23, %v2995_v6  ;;  %v7994_v37 = vrot.slane %v5613_v45, %v23133_v14  ;;  %v8022_v40 = vrot.slane %v5615_v17, %v23133_v14  ;;  %v8036_v36 = vrot.slane %v5616_v16, %v23133_v14  ;;  %v24867_v34 = vpop.f32.mrb[94].mxu0 }
 0x29a   : > { %v7973_v24 = vrot.slane %v7966_v51, %v23133_v14  ;;  %v7987_v5 = vrot.slane %v7980_v44, %v23133_v14  ;;  %v8015_v57 = vrot.slane %v8008_v32, %v23133_v14  ;;  %v9762_v25 = vunpack.c.l.b16 %v7959_v49 }
 0x29b   : > { %v8001_v47 = vrot.slane %v7994_v37, %v23133_v14  ;;  %v8029_v31 = vrot.slane %v8022_v40, %v23133_v14  ;;  %v8050_v53 = vrot.slane %v5617_v58, %v23133_v14  ;;  %v2935_v19 = vrot.slane %v2913_v50, %v23126_v3 }
 0x29c   : > { %v9763_v15 = vunpack.c.l.b16 %v7973_v24  ;;  %v9764_v43 = vunpack.c.l.b16 %v7987_v5  ;;  %v9766_v0 = vunpack.c.l.b16 %v8015_v57  ;;  %v2942_v60 = vrot.slane %v2914_v22, %v23126_v3 }
 0x29d   : > { %v24864_v6 = vrot.slane %v8036_v36, %v23133_v14  ;;  %v8057_v63 = vrot.slane %v8050_v53, %v23133_v14  ;;  %v9765_v54 = vunpack.c.l.b16 %v8001_v47  ;;  %v9767_v46 = vunpack.c.l.b16 %v8029_v31 }
 0x29e   : > { %v24869_v29 = vrot.slane %v9762_v25, 7  ;;  %v24871_v50 = vrot.slane %v9763_v15, 6  ;;  %v24873_v26 = vrot.slane %v9764_v43, 5  ;;  %v2943_v22 = vcombine.high %v24835_v41, %v24835_v41 }
 0x29f   : > { %v24877_v23 = vrot.slane %v9765_v54, 4  ;;  %v24879_v45 = vrot.slane %v9766_v0, 3  ;;  %v24881_v17 = vrot.slane %v9767_v46, 2  ;;  %v20546_v16 = vcombine.low %v8057_v63, %v8057_v63 }
 0x2a0   : > { %v2944_v49 = vcombine.high %v24841_v39, %v24841_v39  ;;  %v2945_v51 = vcombine.high %v2935_v19, %v2935_v19  ;;  %v2946_v44 = vcombine.high %v2942_v60, %v2942_v60  ;;  %v4579_v32 = vshrl.u32 %v24835_v41, 16 }
 0x2a1   : > { %v10485_v58 = vsel %vm23219_vm5, %v20546_v16, %v10484_v9  ;;  %v4584_v37 = vshrl.u32 %v2935_v19, 16  ;;  %v4589_v40 = vshrl.u32 %v2943_v22, 16  ;;  %v4599_v36 = vshrl.u32 %v24841_v39, 16 }
 0x2a2   : > { %10486 = vst [vmem:[#allocation2 + $0x74] sm:$0x1] %v10485_v58  ;;  %v4594_v24 = vshrl.u32 %v2945_v51, 16  ;;  %v4604_v5 = vshrl.u32 %v2942_v60, 16  ;;  %v4609_v57 = vshrl.u32 %v2944_v49, 16  ;;  %v4614_v25 = vshrl.u32 %v2946_v44, 16 }
 0x2a3   : > { %v5602_v47 = vmax.bf16 %v4579_v32, %v24835_v41  ;;  %v5603_v31 = vmax.bf16 %v4584_v37, %v2935_v19  ;;  %v5604_v53 = vmax.bf16 %v4589_v40, %v2943_v22  ;;  %v5606_v15 = vmax.bf16 %v4599_v36, %v24841_v39 }
 0x2a4   : > { %v5605_v43 = vmax.bf16 %v4594_v24, %v2945_v51  ;;  %v5607_v0 = vmax.bf16 %v4604_v5, %v2942_v60  ;;  %v5608_v63 = vmax.bf16 %v4609_v57, %v2944_v49  ;;  %v5609_v54 = vmax.bf16 %v4614_v25, %v2946_v44  ;;  %v21974_v44 = vld [vmem:[#allocation2 + $0x48] sm:$0xfe]   ;;  %v22026_v57 = vld [vmem:[#allocation2 + $0x18] sm:$0xff]  }
 0x2a5   : > { %v7840_v46 = vrot.slane %v5602_v47, %v23133_v14  ;;  %v7854_v9 = vrot.slane %v5603_v31, %v23133_v14  ;;  %v7868_v16 = vrot.slane %v5604_v53, %v23133_v14  ;;  %v7896_v58 = vrot.slane %v5606_v15, %v23133_v14  ;;  %v21976_v24 = vld [vmem:[#allocation2 + $0x48] sm:$0xfe]   ;;  %10666 = vst.msk [vmem:[#allocation3 + $0x30] sm:$0xff] %vm856_vm0, %v22026_v57 }
 0x2a6   : > { %v7882_v21 = vrot.slane %v5605_v43, %v23133_v14  ;;  %v7910_v41 = vrot.slane %v5607_v0, %v23133_v14  ;;  %v7924_v19 = vrot.slane %v5608_v63, %v23133_v14  ;;  %v7938_v39 = vrot.slane %v5609_v54, %v23133_v14  ;;  %v21978_v5 = vld [vmem:[#allocation2 + $0x48] sm:$0xff]  }
 0x2a7   : > { %v7847_v60 = vrot.slane %v7840_v46, %v23133_v14  ;;  %v7861_v22 = vrot.slane %v7854_v9, %v23133_v14  ;;  %v7875_v49 = vrot.slane %v7868_v16, %v23133_v14  ;;  %v7903_v51 = vrot.slane %v7896_v58, %v23133_v14 }
 0x2a8   : > { %v7889_v32 = vrot.slane %v7882_v21, %v23133_v14  ;;  %v7917_v37 = vrot.slane %v7910_v41, %v23133_v14  ;;  %v7931_v40 = vrot.slane %v7924_v19, %v23133_v14  ;;  %v7945_v36 = vrot.slane %v7938_v39, %v23133_v14  ;;  %v21980_v39 = vld [vmem:[#allocation2 + $0x48] sm:$0xff]  }
 0x2a9   : > { %v9754_v25 = vunpack.c.l.b16 %v7847_v60  ;;  %v9755_v47 = vunpack.c.l.b16 %v7861_v22  ;;  %v9756_v31 = vunpack.c.l.b16 %v7875_v49  ;;  %v9758_v53 = vunpack.c.l.b16 %v7903_v51 }
 0x2aa   : > { %v9757_v15 = vunpack.c.l.b16 %v7889_v32  ;;  %v9759_v43 = vunpack.c.l.b16 %v7917_v37  ;;  %v9760_v0 = vunpack.c.l.b16 %v7931_v40  ;;  %v9761_v63 = vunpack.c.l.b16 %v7945_v36 }
 0x2ab   : > { %v10105_v21 = vrot.slane %v9754_v25, 7  ;;  %v10106_v54 = vrot.slane %v9755_v47, 6  ;;  %v10108_v46 = vrot.slane %v9756_v31, 5  ;;  %v10112_v9 = vrot.slane %v9758_v53, 3  ;;  %v29101_v53 = vld [vmem:[#allocation17_spill] sm:$0xff] }
 0x2ac   : > { %v10110_v16 = vrot.slane %v9757_v15, 4  ;;  %v10114_v58 = vrot.slane %v9759_v43, 2  ;;  %v10116_v41 = vrot.slane %v9760_v0, 1  ;;  %v10119_v19 = vsel %vm9902_vm6, %v24869_v29, %v9761_v63  ;;  %v29103_v43 = vld [vmem:[#allocation10_spill] sm:$0xff] }
 0x2ad   : > { %v10107_v60 = vsel %vm9884_vm7, %v10106_v54, %v10105_v21  ;;  %v10121_v22 = vsel %vm9884_vm7, %v24871_v50, %v10119_v19  ;;  %v2022_v49 = vpack.c.bf16 %v24827_v62, %v24821_v28  ;;  %v12172_v51 = vrot.slane %v21974_v44, 1  ;;  %v29104_v54 = vld [vmem:[#allocation11_spill] sm:$0xff] }
 0x2ae   : > { %v10109_v32 = vsel %vm9887_vm8, %v10108_v46, %v10107_v60  ;;  %v10123_v37 = vsel %vm9887_vm8, %v24873_v26, %v10121_v22  ;;  %v11309_v40 = vrot.slane %v21976_v24, 1  ;;  %v12671_v36 = vshrl.u32 %v21978_v5, 16 }
 0x2af   : > { %v10111_v57 = vsel %vm9890_vm9, %v10110_v16, %v10109_v32  ;;  %v10125_v29 = vsel %vm9890_vm9, %v24877_v23, %v10123_v37  ;;  %v12174_v50 = vsel %vm11290_vm3, %v12172_v51, %v12173_v61  ;;  %v12673_v25 = vshll.u32 %v21978_v5, 16 }
 0x2b0   : > { %v10113_v47 = vsel %vm9893_vm10, %v10112_v9, %v10111_v57  ;;  %v10127_v44 = vsel %vm9893_vm10, %v24879_v45, %v10125_v29  ;;  %12215 = vrot.lane.b32.xlu0 %v12174_v50, %s22728_s22  ;;  %v11311_v26 = vsel %vm11290_vm3, %v11309_v40, %v11310_v12  ;;  %v10930_v24 = vshrl.u32 %v21980_v39, 16  ;;  %v10480_v45 = vld [vmem:[#allocation2 + $0x6c] sm:$0xf]  ;;  %v29106_v50 = vld [vmem:[#allocation22_spill] sm:$0xff] }
 0x2b1   : > { %v10115_v31 = vsel %vm9896_vm11, %v10114_v58, %v10113_v47  ;;  %v24934_v1 = vsel %vm9896_vm11, %v24881_v17, %v10127_v44  ;;  %11351 = vrot.lane.b32.xlu1 %v11311_v26, %s22726_s15  ;;  %v12675_v61 = vrot.slane %v12673_v25, 1  ;;  %v10932_v23 = vshll.u32 %v21980_v39, 16  ;;  %v29105_v57 = vld [vmem:[#allocation21_spill] sm:$0xff]  ;;  %v21991_v47 = vld [vmem:[#allocation2 + $0x5c] ss:$0 sps:$4 sm:$0x11]  }
 0x2b2   : > { %29100 = vst [vmem:[#allocation16_spill] sm:$0xff] %v24934_v1  ;;  %v10117_v5 = vsel %vm9899_vm12, %v10116_v41, %v10115_v31  ;;  %v1396_v15 = vadd.f32 %v24534_v4, %v29101_v53  ;;  %v1388_v12 = vadd.f32 %v24534_v4, %v29102_v27  ;;  %v1399_v0 = vadd.f32 %v24534_v4, %v29103_v43  ;;  %v29108_v53 = vld [vmem:[#allocation24_spill] sm:$0xff] }
 0x2b3   : > { %v10345_v63 = vpack.c.b16 %v10117_v5, %v10117_v5  ;;  %v12676_v21 = vor.u32 %v12675_v61, %v12671_v36  ;;  %v10934_v17 = vrot.slane %v10932_v23, 1  ;;  %v1391_v46 = vadd.f32 %v24534_v4, %v29104_v54  ;;  %v24957_v36 = vld [vmem:[#allocation2 + $0x5c] ss:$0 sps:$4 sm:$0x11]   ;;  %v24980_v61 = vpop.f32.mrb[95].mxu0 }
 0x2b4   : > { %v1672_v9 = vmax.f32 %v1396_v15, 0.0  ;;  %v1670_v16 = vmax.f32 %v1388_v12, 0.0  ;;  %v1673_v58 = vmax.f32 %v1399_v0, 0.0  ;;  %v10077_v41 = vsel %vm9899_vm12, %v24526_v33, %v24510_v8  ;;  %v24959_v8 = vld [vmem:[#allocation2 + $0x5c] ss:$0 sps:$4 sm:$0x11]  }
 0x2b5   : > { %v10481_v19 = vsel %vm23321_vm14, %v10345_v63, %v10480_v45  ;;  %v12681_v39 = vsel %vm10856_vm15, %v12676_v21, %v24809_v7  ;;  %v10935_v60 = vor.u32 %v10934_v17, %v10930_v24  ;;  %v1671_v22 = vmax.f32 %v1391_v46, 0.0  ;;  %v24990_v21 = vld [vmem:[%s28998_s2 + $0x1] ss:$0 sm:$0xff] }
 0x2b6   : > { %10482 = vst [vmem:[#allocation2 + $0x6c] sm:$0xf] %v10481_v19  ;;  %12822 = vrot.lane.b32.xlu0 %v12681_v39, %s22729_s24  ;;  %v1804_v51 = vmul.f32 %v24543_v48, %v1672_v9  ;;  %v1802_v32 = vmul.f32 %v24543_v48, %v1670_v16  ;;  %v1805_v37 = vmul.f32 %v24543_v48, %v1673_v58  ;;  %v12690_v58 = vshll.u32 %v21991_v47, 16 }
 0x2b7   : > { %v10340_v40 = vpack.c.b16 %v10077_v41, %v10077_v41  ;;  %v10940_v33 = vsel %vm10856_vm15, %v10935_v60, %v24829_v42  ;;  %v1803_v7 = vmul.f32 %v24543_v48, %v1671_v22  ;;  %v1412_v29 = vadd.f32 %v24534_v4, %v29105_v57  ;;  %v24976_v48 = vld [vmem:[%s28998_s2] ss:$0 sm:$0xff]  ;;  %v25005_v60 = vld [vmem:[%s28998_s2 + $0x2] ss:$0 sm:$0xff] }
 0x2b8   : > { %v1404_v25 = vadd.f32 %v24534_v4, %v29106_v50  ;;  %11061 = vrot.lane.b32.xlu1 %v10940_v33, %s22728_s22  ;;  %v1936_v44 = vadd.f32 %v24557_v13, %v1804_v51  ;;  %v1934_v26 = vadd.f32 %v24557_v13, %v1802_v32  ;;  %v1937_v24 = vadd.f32 %v24557_v13, %v1805_v37  ;;  %v29107_v42 = vld [vmem:[#allocation23_spill] sm:$0xff] }
 0x2b9   : > { %10469 = vst.msk [vmem:[#allocation2 + $0x58] sm:$0xf] %vm5730_vm2, %v10340_v40  ;;  %v1415_v31 = vadd.f32 %v24976_v48, %v29107_v42  ;;  %v21993_v4 = vld [vmem:[#allocation2 + $0x5c] ss:$0 sps:$4 sm:$0x11]   ;;  %v1935_v23 = vadd.f32 %v24557_v13, %v1803_v7  ;;  %v1676_v5 = vmax.f32 %v1412_v29, 0.0  ;;  %v1407_v15 = vadd.f32 %v24976_v48, %v29108_v53 }
 0x2ba   : > { %v1674_v45 = vmax.f32 %v1404_v25, 0.0  ;;  %v2025_v27 = vpack.c.bf16 %v1937_v24, %v1936_v44  ;;  %v29109_v46 = vpack.c.bf16 %v24816_v59, %v24813_v38  ;;  %v10949_v41 = vshll.u32 %v21993_v4, 16 }
 0x2bb   : > { %v1677_v12 = vmax.f32 %v1415_v31, 0.0  ;;  %v2024_v63 = vpack.c.bf16 %v1935_v23, %v1934_v26  ;;  %v1808_v17 = vmul.f32 %v24990_v21, %v1676_v5  ;;  %v1675_v54 = vmax.f32 %v1407_v15, 0.0 }
 0x2bc   : > { %v1806_v13 = vmul.f32 %v24990_v21, %v1674_v45  ;;  %v2069_v9 = vmax.bf16 %v2025_v27, %v29109_v46  ;;  %v25022_v33 = vrot.slane %v12690_v58, 1  ;;  %v25032_v24 = vrot.slane %v10949_v41, 1 }
 0x2bd   : > { %v1809_v16 = vmul.f32 %v24990_v21, %v1677_v12  ;;  %v2068_v39 = vmax.bf16 %v2024_v63, %v2022_v49  ;;  %v25008_v22 = vadd.f32 %v25005_v60, %v1808_v17  ;;  %v1807_v38 = vmul.f32 %v24990_v21, %v1675_v54 }
 0x2be   : > { %v3045_v59 = vcombine.high %v2069_v9, %v2069_v9  ;;  %v3052_v51 = vrot.slane %v2069_v9, %v23126_v3  ;;  %v25013_v32 = vadd.f32 %v25005_v60, %v1806_v13 }
 0x2bf   : > { %v25016_v37 = vadd.f32 %v25005_v60, %v1809_v16  ;;  %v2996_v28 = vcombine.high %v2068_v39, %v2068_v39  ;;  %v3003_v62 = vrot.slane %v2068_v39, %v23126_v3  ;;  %v25020_v40 = vadd.f32 %v25005_v60, %v1807_v38 }
 0x2c0   : > { %v21982_v49 = vld [vmem:[#allocation2 + $0x54] sm:$0xff]   ;;  %v3059_v7 = vrot.slane %v3045_v59, %v23126_v3  ;;  %v3060_v57 = vcombine.high %v3052_v51, %v3052_v51  ;;  %v3068_v29 = vrot.slane %v3052_v51, %v23126_v3 }
 0x2c1   : > { %v21983_v50 = vld [vmem:[#allocation2 + $0x54] sm:$0xff]   ;;  %v3010_v47 = vrot.slane %v2996_v28, %v23126_v3  ;;  %v3011_v44 = vcombine.high %v3003_v62, %v3003_v62  ;;  %12392 = vrot.lane.b32.xlu0 %v21982_v49, %s22726_s15  ;;  %v25038_v53 = vrot.slane %v3003_v62, %v23126_v3 }
 0x2c2   : > { %v3061_v42 = vcombine.high %v3059_v7, %v3059_v7  ;;  %v3075_v31 = vrot.slane %v3059_v7, %v23126_v3  ;;  %v3082_v4 = vrot.slane %v3060_v57, %v23126_v3  ;;  %v3090_v23 = vcombine.high %v3068_v29, %v3068_v29  ;;  %11528 = vrot.lane.b32.xlu1 %v21983_v50, %s22729_s24 }
 0x2c3   : > { %v4699_v5 = vshrl.u32 %v3068_v29, 16  ;;  %v3012_v45 = vcombine.high %v3010_v47, %v3010_v47  ;;  %v25041_v15 = vrot.slane %v3010_v47, %v23126_v3  ;;  %v25045_v9 = vrot.slane %v3011_v44, %v23126_v3 }
 0x2c4   : > { %v3089_v27 = vrot.slane %v3061_v42, %v23126_v3  ;;  %v3091_v12 = vcombine.high %v3075_v31, %v3075_v31  ;;  %v3092_v63 = vcombine.high %v3082_v4, %v3082_v4  ;;  %v4704_v17 = vshrl.u32 %v3082_v4, 16 }
 0x2c5   : > { %v4709_v13 = vshrl.u32 %v3090_v23, 16  ;;  %v4719_v54 = vshrl.u32 %v3075_v31, 16  ;;  %v5626_v46 = vmax.bf16 %v4699_v5, %v3068_v29 }
 0x2c6   : > { %v3093_v16 = vcombine.high %v3089_v27, %v3089_v27  ;;  %v4714_v58 = vshrl.u32 %v3092_v63, 16  ;;  %v4724_v41 = vshrl.u32 %v3089_v27, 16  ;;  %v4729_v39 = vshrl.u32 %v3091_v12, 16 }
 0x2c7   : > { %v5627_v38 = vmax.bf16 %v4704_v17, %v3082_v4  ;;  %v5628_v59 = vmax.bf16 %v4709_v13, %v3090_v23  ;;  %v5630_v51 = vmax.bf16 %v4719_v54, %v3075_v31  ;;  %v8176_v28 = vrot.slane %v5626_v46, %v23133_v14 }
 0x2c8   : > { %v4734_v62 = vshrl.u32 %v3093_v16, 16  ;;  %v5629_v49 = vmax.bf16 %v4714_v58, %v3092_v63  ;;  %v5631_v7 = vmax.bf16 %v4724_v41, %v3089_v27  ;;  %v5632_v57 = vmax.bf16 %v4729_v39, %v3091_v12  ;;  %v22010_v58 = vld [vmem:[%s28999_s3 + $0x60] sm:$0xff]  }
 0x2c9   : > { %v8183_v50 = vrot.slane %v8176_v28, %v23133_v14  ;;  %v8190_v29 = vrot.slane %v5627_v38, %v23133_v14  ;;  %v8204_v47 = vrot.slane %v5628_v59, %v23133_v14  ;;  %v8232_v44 = vrot.slane %v5630_v51, %v23133_v14  ;;  %v22011_v41 = vld [vmem:[%s28999_s3 + $0x20] sm:$0xff]   ;;  %v25073_v28 = vpop.permute.xlu1 %11339  ;;  %21356 = vmatprep.subr.bf16.mxu0 %v22010_v58 }
 0x2ca   : > { %v5633_v42 = vmax.bf16 %v4734_v62, %v3093_v16  ;;  %v8218_v5 = vrot.slane %v5629_v49, %v23133_v14  ;;  %v8246_v4 = vrot.slane %v5631_v7, %v23133_v14  ;;  %v8260_v31 = vrot.slane %v5632_v57, %v23133_v14  ;;  %v25064_v16 = vpop.f32.mrb[96].mxu0  ;;  %v22018_v49 = vld [vmem:[%s28999_s3 + $0x68] sm:$0xff]   ;;  %21357 = vmatpush3.bf16.msra.mxu0 %v22011_v41 }
 0x2cb   : > { %v8197_v23 = vrot.slane %v8190_v29, %v23133_v14  ;;  %v8211_v27 = vrot.slane %v8204_v47, %v23133_v14  ;;  %v8239_v12 = vrot.slane %v8232_v44, %v23133_v14  ;;  %v9778_v63 = vunpack.c.l.b16 %v8183_v50  ;;  %29110 = vst [vmem:[#allocation19_spill] sm:$0xff] %v25064_v16  ;;  %v25075_v62 = vpop.f32.mrb[97].mxu0  ;;  %21358 = vmatprep.subr.bf16.mxu0 %v22018_v49 }
 0x2cc   : > { %v8225_v17 = vrot.slane %v8218_v5, %v23133_v14  ;;  %v8253_v13 = vrot.slane %v8246_v4, %v23133_v14  ;;  %v25061_v54 = vrot.slane %v8260_v31, %v23133_v14  ;;  %v8274_v46 = vrot.slane %v5633_v42, %v23133_v14  ;;  %29111 = vst [vmem:[#allocation20_spill] sm:$0xff] %v25075_v62  ;;  %v25083_v47 = vpop.f32.mrb[98].mxu0  ;;  %v10491_v5 = vld [vmem:[#allocation2 + $0x80] sm:$0x1] }
 0x2cd   : > { %v9779_v39 = vunpack.c.l.b16 %v8197_v23  ;;  %v9780_v38 = vunpack.c.l.b16 %v8211_v27  ;;  %v9782_v59 = vunpack.c.l.b16 %v8239_v12  ;;  %v3040_v51 = vrot.slane %v3012_v45, %v23126_v3  ;;  %29112 = vst [vmem:[#allocation17_spill] sm:$0xff] %v25083_v47  ;;  %v25092_v31 = vpop.f32.mrb[99].mxu0  ;;  %v22019_v23 = vld [vmem:[%s28999_s3 + $0x28] sm:$0xff]   ;;  %v25116_v19 = vpop.permute.xlu1 %11516 }
 0x2ce   : > { %v8281_v7 = vrot.slane %v8274_v46, %v23133_v14  ;;  %v9781_v57 = vunpack.c.l.b16 %v8225_v17  ;;  %v9783_v50 = vunpack.c.l.b16 %v8253_v13  ;;  %v25081_v29 = vrot.slane %v9778_v63, 7  ;;  %29113 = vst [vmem:[#allocation18_spill] sm:$0xff] %v25092_v31  ;;  %21359 = vmatpush3.bf16.msra.mxu0 %v22019_v23 }
 0x2cf   : > { %v25086_v45 = vrot.slane %v9779_v39, 6  ;;  %v25088_v42 = vrot.slane %v9780_v38, 5  ;;  %v3041_v4 = vcombine.high %v25038_v53, %v25038_v53  ;;  %v25099_v12 = vrot.slane %v9782_v59, 3  ;;  %v25108_v39 = vpop.f32.mrb[100].mxu0 }
 0x2d0   : > { %v25097_v27 = vrot.slane %v9781_v57, 4  ;;  %v25101_v63 = vrot.slane %v9783_v50, 2  ;;  %v20547_v17 = vcombine.low %v8281_v7, %v8281_v7  ;;  %v3042_v13 = vcombine.high %v25041_v15, %v25041_v15  ;;  %29114 = vst [vmem:[#allocation10_spill] sm:$0xff] %v25108_v39  ;;  %v25114_v49 = vpop.f32.mrb[101].mxu0 }
 0x2d1   : > { %v3043_v46 = vcombine.high %v25045_v9, %v25045_v9  ;;  %v3044_v58 = vcombine.high %v3040_v51, %v3040_v51  ;;  %v4659_v41 = vshrl.u32 %v25038_v53, 16  ;;  %v4664_v59 = vshrl.u32 %v25045_v9, 16  ;;  %29115 = vst [vmem:[#allocation11_spill] sm:$0xff] %v25114_v49  ;;  %v25118_v0 = vpop.f32.mrb[102].mxu0 }
 0x2d2   : > { %v10492_v38 = vsel %vm23219_vm5, %v20547_v17, %v10491_v5  ;;  %v4669_v57 = vshrl.u32 %v3041_v4, 16  ;;  %v4679_v7 = vshrl.u32 %v25041_v15, 16  ;;  %v4684_v26 = vshrl.u32 %v3040_v51, 16  ;;  %29116 = vst [vmem:[#allocation21_spill] sm:$0xff] %v25118_v0 }
 0x2d3   : > { %10493 = vst [vmem:[#allocation2 + $0x80] sm:$0x1] %v10492_v38  ;;  %v4674_v50 = vshrl.u32 %v3043_v46, 16  ;;  %v4689_v25 = vshrl.u32 %v3042_v13, 16  ;;  %v4694_v44 = vshrl.u32 %v3044_v58, 16  ;;  %v5618_v43 = vmax.bf16 %v4659_v41, %v25038_v53  ;;  %v25139_v41 = vpop.permute.xlu1 %11341 }
 0x2d4   : > { %v5619_v5 = vmax.bf16 %v4664_v59, %v25045_v9  ;;  %v5620_v17 = vmax.bf16 %v4669_v57, %v3041_v4  ;;  %v5622_v39 = vmax.bf16 %v4679_v7, %v25041_v15  ;;  %v5623_v47 = vmax.bf16 %v4684_v26, %v3040_v51 }
 0x2d5   : > { %v5621_v31 = vmax.bf16 %v4674_v50, %v3043_v46  ;;  %v5624_v49 = vmax.bf16 %v4689_v25, %v3042_v13  ;;  %v5625_v38 = vmax.bf16 %v4694_v44, %v3044_v58  ;;  %v8064_v62 = vrot.slane %v5618_v43, %v23133_v14  ;;  %v21986_v13 = vld [vmem:[#allocation2 + $0x54] sm:$0xfe]  }
 0x2d6   : > { %v8078_v16 = vrot.slane %v5619_v5, %v23133_v14  ;;  %v8092_v1 = vrot.slane %v5620_v17, %v23133_v14  ;;  %v8120_v23 = vrot.slane %v5622_v39, %v23133_v14  ;;  %v8134_v53 = vrot.slane %v5623_v47, %v23133_v14  ;;  %v21988_v46 = vld [vmem:[#allocation2 + $0x54] sm:$0xfe]  }
 0x2d7   : > { %v8106_v0 = vrot.slane %v5621_v31, %v23133_v14  ;;  %v8148_v9 = vrot.slane %v5624_v49, %v23133_v14  ;;  %v8162_v15 = vrot.slane %v5625_v38, %v23133_v14  ;;  %v8071_v26 = vrot.slane %v8064_v62, %v23133_v14  ;;  %v21990_v58 = vld [vmem:[#allocation2 + $0x54] sm:$0xff]  }
 0x2d8   : > { %v8085_v25 = vrot.slane %v8078_v16, %v23133_v14  ;;  %v8099_v43 = vrot.slane %v8092_v1, %v23133_v14  ;;  %v8127_v51 = vrot.slane %v8120_v23, %v23133_v14  ;;  %v8141_v4 = vrot.slane %v8134_v53, %v23133_v14 }
 0x2d9   : > { %v8113_v44 = vrot.slane %v8106_v0, %v23133_v14  ;;  %v8155_v31 = vrot.slane %v8148_v9, %v23133_v14  ;;  %v8169_v47 = vrot.slane %v8162_v15, %v23133_v14  ;;  %v9770_v62 = vunpack.c.l.b16 %v8071_v26  ;;  %v21992_v15 = vld [vmem:[#allocation2 + $0x54] sm:$0xff]  }
 0x2da   : > { %v9771_v39 = vunpack.c.l.b16 %v8085_v25  ;;  %v9772_v16 = vunpack.c.l.b16 %v8099_v43  ;;  %v9774_v59 = vunpack.c.l.b16 %v8127_v51  ;;  %v9775_v57 = vunpack.c.l.b16 %v8141_v4 }
 0x2db   : > { %v9773_v1 = vunpack.c.l.b16 %v8113_v44  ;;  %v9776_v7 = vunpack.c.l.b16 %v8155_v31  ;;  %v9777_v49 = vunpack.c.l.b16 %v8169_v47  ;;  %v10132_v0 = vrot.slane %v9770_v62, 7  ;;  %v11052_v62 = vpop.permute.xlu1 %11051 }
 0x2dc   : > { %v10133_v50 = vrot.slane %v9771_v39, 6  ;;  %v10135_v5 = vrot.slane %v9772_v16, 5  ;;  %v10139_v17 = vrot.slane %v9774_v59, 3  ;;  %v10141_v23 = vrot.slane %v9775_v57, 2  ;;  %v29119_v57 = vld [vmem:[#allocation12_spill] sm:$0xff]  ;;  %11099 = vst.msk [vmem:[#allocation3 + $0x18] sm:$0xff] %vm11097_vm1, %v11052_v62 }
 0x2dd   : > { %v10137_v38 = vrot.slane %v9773_v1, 4  ;;  %v10143_v53 = vrot.slane %v9776_v7, 1  ;;  %v10146_v9 = vsel %vm9902_vm6, %v25081_v29, %v9777_v49  ;;  %v12175_v43 = vrot.slane %v21986_v13, 1  ;;  %11389 = vst.msk [vmem:[#allocation3 + $0x18] sm:$0xff] %vm11387_vm13, %v25139_v41 }
 0x2de   : > { %v10134_v26 = vsel %vm9884_vm7, %v10133_v50, %v10132_v0  ;;  %v10148_v25 = vsel %vm9884_vm7, %v25086_v45, %v10146_v9  ;;  %v11312_v51 = vrot.slane %v21988_v46, 1  ;;  %v12683_v31 = vshrl.u32 %v21990_v58, 16  ;;  %v10487_v0 = vld [vmem:[#allocation2 + $0x78] sm:$0xf]  ;;  %v29120_v50 = vld [vmem:[#allocation13_spill] sm:$0xff]  ;;  %v11050_v9 = vpop.permute.xlu0 %11049 }
 0x2df   : > { %v10136_v44 = vsel %vm9887_vm8, %v10135_v5, %v10134_v26  ;;  %v10150_v4 = vsel %vm9887_vm8, %v25088_v42, %v10148_v25  ;;  %v12685_v47 = vshll.u32 %v21990_v58, 16  ;;  %v29117_v16 = vrot.slane %v24957_v36, 1  ;;  %11098 = vst.msk [vmem:[#allocation3] sm:$0xff] %vm11097_vm1, %v11050_v9 }
 0x2e0   : > { %v10138_v39 = vsel %vm9890_vm9, %v10137_v38, %v10136_v44  ;;  %v10152_v29 = vsel %vm9890_vm9, %v25097_v27, %v10150_v4  ;;  %v29118_v45 = vrot.slane %v24959_v8, 1  ;;  %v10942_v1 = vshrl.u32 %v21992_v15, 16  ;;  %11388 = vst.msk [vmem:[#allocation3] sm:$0xff] %vm11387_vm13, %v25073_v28  ;;  %v25233_v28 = vld [vmem:[#allocation2 + $0xc] sm:$0xff]  }
 0x2e1   : > { %v12177_v59 = vsel %vm11290_vm3, %v12175_v43, %v29117_v16  ;;  %v10140_v46 = vsel %vm9893_vm10, %v10139_v17, %v10138_v39  ;;  %v10154_v42 = vsel %vm9893_vm10, %v25099_v12, %v10152_v29  ;;  %v12687_v58 = vrot.slane %v12685_v47, 1  ;;  %v29121_v17 = vld [vmem:[#allocation14_spill] sm:$0xff]  ;;  %11565 = vst.msk [vmem:[#allocation3] sm:$0xff] %vm11564_vm4, %v25116_v19 }
 0x2e2   : > { %v11314_v13 = vsel %vm11290_vm3, %v11312_v51, %v29118_v45  ;;  %12217 = vrot.lane.b32.xlu0 %v12177_v59, %s22728_s22  ;;  %v10142_v27 = vsel %vm9896_vm11, %v10141_v23, %v10140_v46  ;;  %v25166_v36 = vsel %vm9896_vm11, %v25101_v63, %v10154_v42  ;;  %v10944_v8 = vshll.u32 %v21992_v15, 16  ;;  %v25175_v23 = vpop.permute.xlu1 %12382  ;;  %v29122_v15 = vld [vmem:[#allocation15_spill] sm:$0xff]  ;;  %v25198_v42 = vld [vmem:[#allocation2 + $0x68] ss:$0 sps:$4 sm:$0x11]  }
 0x2e3   : > { %11353 = vrot.lane.b32.xlu1 %v11314_v13, %s22726_s15  ;;  %v1428_v7 = vadd.f32 %v24976_v48, %v29119_v57  ;;  %v10144_v49 = vsel %vm9899_vm12, %v10143_v53, %v10142_v27  ;;  %v12688_v12 = vor.u32 %v12687_v58, %v12683_v31  ;;  %v1420_v5 = vadd.f32 %v24976_v48, %v29120_v50  ;;  %v22001_v58 = vld [vmem:[#allocation2 + $0x14] ss:$0 sps:$4 sm:$0x11]   ;;  %v25205_v27 = vld [vmem:[#allocation2 + $0x68] ss:$0 sps:$4 sm:$0x11]  }
 0x2e4   : > { %v1431_v38 = vadd.f32 %v24976_v48, %v29121_v17  ;;  %v10348_v26 = vpack.c.b16 %v10144_v49, %v10144_v49  ;;  %v10946_v63 = vrot.slane %v10944_v8, 1  ;;  %v1423_v43 = vadd.f32 %v24976_v48, %v29122_v15  ;;  %v25214_v49 = vpop.f32.mrb[103].mxu0 }
 0x2e5   : > { %v1680_v25 = vmax.f32 %v1428_v7, 0.0  ;;  %v12693_v53 = vsel %vm10856_vm15, %v12688_v12, %v25022_v33  ;;  %v1678_v51 = vmax.f32 %v1420_v5, 0.0  ;;  %v10104_v16 = vsel %vm9899_vm12, %v24791_v30, %v24755_v35  ;;  %v22024_v7 = vld [vmem:[%s28999_s3 + $0x70] sm:$0xff]  }
 0x2e6   : > { %v1681_v44 = vmax.f32 %v1431_v38, 0.0  ;;  %v10488_v4 = vsel %vm23321_vm14, %v10348_v26, %v10487_v0  ;;  %12824 = vrot.lane.b32.xlu0 %v12693_v53, %s22729_s24  ;;  %v10947_v31 = vor.u32 %v10946_v63, %v10942_v1  ;;  %v1679_v39 = vmax.f32 %v1423_v43, 0.0  ;;  %21360 = vmatprep.subr.bf16.mxu0 %v22024_v7 }
 0x2e7   : > { %v1812_v47 = vmul.f32 %v24990_v21, %v1680_v25  ;;  %10489 = vst [vmem:[#allocation2 + $0x78] sm:$0xf] %v10488_v4  ;;  %v1810_v29 = vmul.f32 %v24990_v21, %v1678_v51  ;;  %v1444_v59 = vadd.f32 %v24976_v48, %v24709_v2  ;;  %v10343_v62 = vpack.c.b16 %v10104_v16, %v10104_v16 }
 0x2e8   : > { %v1813_v33 = vmul.f32 %v24990_v21, %v1681_v44  ;;  %v10952_v45 = vsel %vm10856_vm15, %v10947_v31, %v25032_v24  ;;  %v1811_v46 = vmul.f32 %v24990_v21, %v1679_v39  ;;  %v1436_v2 = vadd.f32 %v24976_v48, %v24715_v10  ;;  %v11519_v24 = vpop.permute.xlu1 %11518 }
 0x2e9   : > { %v1944_v13 = vadd.f32 %v25005_v60, %v1812_v47  ;;  %11063 = vrot.lane.b32.xlu1 %v10952_v45, %s22728_s22  ;;  %v1942_v1 = vadd.f32 %v25005_v60, %v1810_v29  ;;  %v1684_v30 = vmax.f32 %v1444_v59, 0.0  ;;  %10476 = vst.msk [vmem:[#allocation2 + $0x64] sm:$0xf] %vm5730_vm2, %v10343_v62  ;;  %v1447_v57 = vadd.f32 %v24976_v48, %v24721_v20 }
 0x2ea   : > { %v1945_v35 = vadd.f32 %v25005_v60, %v1813_v33  ;;  %v1943_v8 = vadd.f32 %v25005_v60, %v1811_v46  ;;  %v1682_v12 = vmax.f32 %v1436_v2, 0.0  ;;  %v1439_v50 = vadd.f32 %v24976_v48, %v24723_v18  ;;  %11566 = vst.msk [vmem:[#allocation3 + $0x18] sm:$0xff] %vm11564_vm4, %v11519_v24 }
 0x2eb   : > { %v1816_v10 = vmul.f32 %v24990_v21, %v1684_v30  ;;  %v29123_v20 = vunpack.c.l.b16 %v24864_v6  ;;  %v29124_v17 = vunpack.c.l.b16 %v25061_v54  ;;  %v1685_v26 = vmax.f32 %v1447_v57, 0.0 }
 0x2ec   : > { %v2029_v0 = vpack.c.bf16 %v1945_v35, %v1944_v13  ;;  %v2028_v9 = vpack.c.bf16 %v1943_v8, %v1942_v1  ;;  %v29125_v18 = vpack.c.bf16 %v25016_v37, %v25008_v22  ;;  %v1814_v48 = vmul.f32 %v24990_v21, %v1682_v12 }
 0x2ed   : > { %v25225_v5 = vrot.slane %v29123_v20, 1  ;;  %v25229_v38 = vrot.slane %v29124_v17, 1  ;;  %v1683_v41 = vmax.f32 %v1439_v50, 0.0  ;;  %v29126_v63 = vpack.c.bf16 %v25020_v40, %v25013_v32 }
 0x2ee   : > { %v2071_v6 = vmax.bf16 %v2029_v0, %v29125_v18  ;;  %v1817_v19 = vmul.f32 %v24990_v21, %v1685_v26  ;;  %v11765_v43 = vshll.u32 %v22001_v58, 16  ;;  %v25248_v22 = vadd.f32 %v25005_v60, %v1816_v10 }
 0x2ef   : > { %v2070_v25 = vmax.bf16 %v2028_v9, %v29126_v63  ;;  %v1815_v37 = vmul.f32 %v24990_v21, %v1683_v41  ;;  %v25259_v33 = vadd.f32 %v25005_v60, %v1814_v48  ;;  %v11344_v63 = vpop.permute.xlu1 %11343 }
 0x2f0   : > { %v3143_v53 = vcombine.high %v2071_v6, %v2071_v6  ;;  %v3150_v51 = vrot.slane %v2071_v6, %v23126_v3  ;;  %v25253_v31 = vadd.f32 %v25005_v60, %v1817_v19  ;;  %v21995_v29 = vld [vmem:[#allocation2 + $0x60] sm:$0xff]   ;;  %v25267_v13 = vrot.slane %v11765_v43, 1 }
 0x2f1   : > { %v3094_v44 = vcombine.high %v2070_v25, %v2070_v25  ;;  %v3101_v4 = vrot.slane %v2070_v25, %v23126_v3  ;;  %v21996_v21 = vld [vmem:[#allocation2 + $0x60] sm:$0xff]   ;;  %v25265_v45 = vadd.f32 %v25005_v60, %v1815_v37  ;;  %12394 = vrot.lane.b32.xlu0 %v21995_v29, %s22726_s15 }
 0x2f2   : > { %v3157_v40 = vrot.slane %v3143_v53, %v23126_v3  ;;  %v3158_v47 = vcombine.high %v3150_v51, %v3150_v51  ;;  %v3166_v39 = vrot.slane %v3150_v51, %v23126_v3  ;;  %11530 = vrot.lane.b32.xlu1 %v21996_v21, %s22729_s24 }
 0x2f3   : > { %v3108_v16 = vrot.slane %v3094_v44, %v23126_v3  ;;  %v3109_v30 = vcombine.high %v3101_v4, %v3101_v4  ;;  %v25273_v24 = vrot.slane %v3101_v4, %v23126_v3 }
 0x2f4   : > { %v3159_v46 = vcombine.high %v3157_v40, %v3157_v40  ;;  %v3173_v62 = vrot.slane %v3157_v40, %v23126_v3  ;;  %v3180_v58 = vrot.slane %v3158_v47, %v23126_v3  ;;  %v3188_v1 = vcombine.high %v3166_v39, %v3166_v39 }
 0x2f5   : > { %v4779_v35 = vshrl.u32 %v3166_v39, 16  ;;  %v3110_v2 = vcombine.high %v3108_v16, %v3108_v16  ;;  %v25278_v50 = vrot.slane %v3108_v16, %v23126_v3  ;;  %v22041_v16 = vld [vmem:[#allocation2 + $0x24] sm:$0xff]  }
 0x2f6   : > { %v3187_v60 = vrot.slane %v3159_v46, %v23126_v3  ;;  %v3189_v8 = vcombine.high %v3173_v62, %v3173_v62  ;;  %v3190_v57 = vcombine.high %v3180_v58, %v3180_v58  ;;  %v4784_v7 = vshrl.u32 %v3180_v58, 16  ;;  %10667 = vst.msk [vmem:[#allocation3 + $0x48] sm:$0xff] %vm856_vm0, %v22041_v16 }
 0x2f7   : > { %v4789_v0 = vshrl.u32 %v3188_v1, 16  ;;  %v4799_v10 = vshrl.u32 %v3173_v62, 16  ;;  %v5642_v12 = vmax.bf16 %v4779_v35, %v3166_v39  ;;  %v4739_v16 = vshrl.u32 %v25273_v24, 16 }
 0x2f8   : > { %v3191_v20 = vcombine.high %v3187_v60, %v3187_v60  ;;  %v4794_v17 = vshrl.u32 %v3190_v57, 16  ;;  %v4804_v9 = vshrl.u32 %v3187_v60, 16  ;;  %v4809_v26 = vshrl.u32 %v3189_v8, 16 }
 0x2f9   : > { %v5643_v18 = vmax.bf16 %v4784_v7, %v3180_v58  ;;  %v5644_v6 = vmax.bf16 %v4789_v0, %v3188_v1  ;;  %v5646_v48 = vmax.bf16 %v4799_v10, %v3173_v62  ;;  %v8400_v41 = vrot.slane %v5642_v12, %v23133_v14  ;;  %v22025_v12 = vld [vmem:[%s28999_s3 + $0x30] sm:$0xff]  }
 0x2fa   : > { %v4814_v25 = vshrl.u32 %v3191_v20, 16  ;;  %v5645_v19 = vmax.bf16 %v4794_v17, %v3190_v57  ;;  %v5647_v43 = vmax.bf16 %v4804_v9, %v3187_v60  ;;  %v5648_v53 = vmax.bf16 %v4809_v26, %v3189_v8  ;;  %v22027_v17 = vld [vmem:[%s28999_s3 + $0x78] sm:$0xff]   ;;  %v25303_v9 = vpop.f32.mrb[104].mxu0  ;;  %21361 = vmatpush3.bf16.msra.mxu0 %v22025_v12 }
 0x2fb   : > { %v8407_v51 = vrot.slane %v8400_v41, %v23133_v14  ;;  %v8414_v37 = vrot.slane %v5643_v18, %v23133_v14  ;;  %v8428_v44 = vrot.slane %v5644_v6, %v23133_v14  ;;  %v8456_v4 = vrot.slane %v5646_v48, %v23133_v14  ;;  %v10498_v48 = vld [vmem:[#allocation2 + $0x8c] sm:$0x1]  ;;  %21362 = vmatprep.subr.bf16.mxu0 %v22027_v17 }
 0x2fc   : > { %v5649_v40 = vmax.bf16 %v4814_v25, %v3191_v20  ;;  %v8442_v47 = vrot.slane %v5645_v19, %v23133_v14  ;;  %v8470_v39 = vrot.slane %v5647_v43, %v23133_v14  ;;  %v8484_v29 = vrot.slane %v5648_v53, %v23133_v14  ;;  %v11054_v20 = vpop.permute.xlu1 %11053  ;;  %v22028_v53 = vld [vmem:[%s28999_s3 + $0x38] sm:$0xff]  }
 0x2fd   : > { %v8421_v21 = vrot.slane %v8414_v37, %v23133_v14  ;;  %v8435_v46 = vrot.slane %v8428_v44, %v23133_v14  ;;  %v8463_v62 = vrot.slane %v8456_v4, %v23133_v14  ;;  %v9794_v58 = vunpack.c.l.b16 %v8407_v51  ;;  %11100 = vst.msk [vmem:[#allocation3 + $0x30] sm:$0xff] %vm11097_vm1, %v11054_v20 }
 0x2fe   : > { %v8449_v1 = vrot.slane %v8442_v47, %v23133_v14  ;;  %v8477_v35 = vrot.slane %v8470_v39, %v23133_v14  ;;  %v8498_v60 = vrot.slane %v5649_v40, %v23133_v14  ;;  %v3131_v8 = vrot.slane %v3109_v30, %v23126_v3  ;;  %11390 = vst.msk [vmem:[#allocation3 + $0x30] sm:$0xff] %vm11387_vm13, %v11344_v63 }
 0x2ff   : > { %v9795_v57 = vunpack.c.l.b16 %v8421_v21  ;;  %v9796_v7 = vunpack.c.l.b16 %v8435_v46  ;;  %v9798_v0 = vunpack.c.l.b16 %v8463_v62  ;;  %v3138_v10 = vrot.slane %v3110_v2, %v23126_v3  ;;  %v25310_v2 = vpop.f32.mrb[105].mxu0  ;;  %21363 = vmatpush3.bf16.msra.mxu0 %v22028_v53 }
 0x300   : > { %v25306_v30 = vrot.slane %v8484_v29, %v23133_v14  ;;  %v8505_v26 = vrot.slane %v8498_v60, %v23133_v14  ;;  %v9797_v18 = vunpack.c.l.b16 %v8449_v1  ;;  %v9799_v6 = vunpack.c.l.b16 %v8477_v35  ;;  %v25324_v51 = vpop.f32.mrb[106].mxu0  ;;  %v11521_v21 = vpop.permute.xlu1 %11520 }
 0x301   : > { %v25312_v41 = vrot.slane %v9794_v58, 7  ;;  %v25314_v25 = vrot.slane %v9795_v57, 6  ;;  %v25316_v19 = vrot.slane %v9796_v7, 5  ;;  %v3139_v43 = vcombine.high %v25273_v24, %v25273_v24  ;;  %v25332_v47 = vpop.f32.mrb[107].mxu0  ;;  %11567 = vst.msk [vmem:[#allocation3 + $0x30] sm:$0xff] %vm11564_vm4, %v11521_v21 }
 0x302   : > { %v25326_v37 = vrot.slane %v9797_v18, 4  ;;  %v25328_v44 = vrot.slane %v9798_v0, 3  ;;  %v25330_v4 = vrot.slane %v9799_v6, 2  ;;  %v20548_v40 = vcombine.low %v8505_v26, %v8505_v26  ;;  %v25337_v46 = vpop.f32.mrb[108].mxu0 }
 0x303   : > { %v3140_v39 = vcombine.high %v25278_v50, %v25278_v50  ;;  %v3141_v63 = vcombine.high %v3131_v8, %v3131_v8  ;;  %v3142_v29 = vcombine.high %v3138_v10, %v3138_v10  ;;  %v4744_v58 = vshrl.u32 %v3131_v8, 16  ;;  %v25343_v12 = vpop.f32.mrb[109].mxu0 }
 0x304   : > { %v10499_v62 = vsel %vm23219_vm5, %v20548_v40, %v10498_v48  ;;  %v4749_v1 = vshrl.u32 %v3139_v43, 16  ;;  %v4759_v35 = vshrl.u32 %v25278_v50, 16  ;;  %v4764_v57 = vshrl.u32 %v3138_v10, 16  ;;  %v25347_v6 = vpop.f32.mrb[110].mxu0 }
 0x305   : > { %10500 = vst [vmem:[#allocation2 + $0x8c] sm:$0x1] %v10499_v62  ;;  %v4754_v60 = vshrl.u32 %v3141_v63, 16  ;;  %v4769_v7 = vshrl.u32 %v3140_v39, 16  ;;  %v4774_v0 = vshrl.u32 %v3142_v29, 16  ;;  %v5634_v20 = vmax.bf16 %v4739_v16, %v25273_v24  ;;  %v11346_v62 = vpop.permute.xlu1 %11345 }
 0x306   : > { %v5635_v17 = vmax.bf16 %v4744_v58, %v3131_v8  ;;  %v5636_v26 = vmax.bf16 %v4749_v1, %v3139_v43  ;;  %v5638_v18 = vmax.bf16 %v4759_v35, %v25278_v50  ;;  %v5639_v40 = vmax.bf16 %v4764_v57, %v3138_v10 }
 0x307   : > { %v5637_v48 = vmax.bf16 %v4754_v60, %v3141_v63  ;;  %v5640_v59 = vmax.bf16 %v4769_v7, %v3140_v39  ;;  %v5641_v21 = vmax.bf16 %v4774_v0, %v3142_v29  ;;  %v8288_v32 = vrot.slane %v5634_v20, %v23133_v14  ;;  %v21997_v60 = vld [vmem:[#allocation2 + $0x60] sm:$0xfe]  }
 0x308   : > { %v8302_v15 = vrot.slane %v5635_v17, %v23133_v14  ;;  %v8316_v53 = vrot.slane %v5636_v26, %v23133_v14  ;;  %v8344_v54 = vrot.slane %v5638_v18, %v23133_v14  ;;  %v8358_v8 = vrot.slane %v5639_v40, %v23133_v14 }
 0x309   : > { %v8330_v24 = vrot.slane %v5637_v48, %v23133_v14  ;;  %v8372_v50 = vrot.slane %v5640_v59, %v23133_v14  ;;  %v8386_v43 = vrot.slane %v5641_v21, %v23133_v14  ;;  %v8295_v10 = vrot.slane %v8288_v32, %v23133_v14  ;;  %v21999_v59 = vld [vmem:[#allocation2 + $0x60] sm:$0xfe]   ;;  %v11056_v57 = vpop.permute.xlu1 %11055 }
 0x30a   : > { %v8309_v39 = vrot.slane %v8302_v15, %v23133_v14  ;;  %v8323_v63 = vrot.slane %v8316_v53, %v23133_v14  ;;  %v8351_v29 = vrot.slane %v8344_v54, %v23133_v14  ;;  %v8365_v58 = vrot.slane %v8358_v8, %v23133_v14  ;;  %v22003_v15 = vld [vmem:[#allocation2 + $0x60] sm:$0xff]   ;;  %11101 = vst.msk [vmem:[#allocation3 + $0x48] sm:$0xff] %vm11097_vm1, %v11056_v57 }
 0x30b   : > { %v8337_v16 = vrot.slane %v8330_v24, %v23133_v14  ;;  %v8379_v1 = vrot.slane %v8372_v50, %v23133_v14  ;;  %v8393_v35 = vrot.slane %v8386_v43, %v23133_v14  ;;  %v9786_v7 = vunpack.c.l.b16 %v8295_v10  ;;  %11391 = vst.msk [vmem:[#allocation3 + $0x48] sm:$0xff] %vm11387_vm13, %v11346_v62  ;;  %v12206_v24 = vpop.permute.xlu0 %12205 }
 0x30c   : > { %v9787_v0 = vunpack.c.l.b16 %v8309_v39  ;;  %v9788_v32 = vunpack.c.l.b16 %v8323_v63  ;;  %v9790_v20 = vunpack.c.l.b16 %v8351_v29  ;;  %v9791_v54 = vunpack.c.l.b16 %v8365_v58  ;;  %v22058_v39 = vld [vmem:[#allocation2 + $0x30] sm:$0xff]   ;;  %v22004_v58 = vld [vmem:[#allocation2 + $0x68] ss:$0 sps:$4 sm:$0x11]  }
 0x30d   : > { %v9789_v17 = vunpack.c.l.b16 %v8337_v16  ;;  %v9792_v26 = vunpack.c.l.b16 %v8379_v1  ;;  %v9793_v18 = vunpack.c.l.b16 %v8393_v35  ;;  %v10159_v48 = vrot.slane %v9786_v7, 7  ;;  %10668 = vst.msk [vmem:[#allocation3 + $0x60] sm:$0xff] %vm856_vm0, %v22058_v39 }
 0x30e   : > { %v10160_v40 = vrot.slane %v9787_v0, 6  ;;  %v10162_v21 = vrot.slane %v9788_v32, 5  ;;  %v10166_v53 = vrot.slane %v9790_v20, 3  ;;  %v10168_v50 = vrot.slane %v9791_v54, 2 }
 0x30f   : > { %v10164_v8 = vrot.slane %v9789_v17, 4  ;;  %v10170_v43 = vrot.slane %v9792_v26, 1  ;;  %v10173_v10 = vsel %vm9902_vm6, %v25312_v41, %v9793_v18  ;;  %v2030_v62 = vpack.c.bf16 %v25265_v45, %v25259_v33  ;;  %v22005_v41 = vld [vmem:[#allocation2 + $0x60] sm:$0xff]   ;;  %v22006_v17 = vld [vmem:[#allocation2 + $0x68] ss:$0 sps:$4 sm:$0x11]   ;;  %v25385_v54 = vpop.permute.xlu0 %12207 }
 0x310   : > { %v10161_v63 = vsel %vm9884_vm7, %v10160_v40, %v10159_v48  ;;  %v10175_v29 = vsel %vm9884_vm7, %v25314_v25, %v10173_v10  ;;  %v12178_v16 = vrot.slane %v21997_v60, 1  ;;  %v11315_v57 = vrot.slane %v21999_v59, 1 }
 0x311   : > { %v10163_v1 = vsel %vm9887_vm8, %v10162_v21, %v10161_v63  ;;  %v10177_v35 = vsel %vm9887_vm8, %v25316_v19, %v10175_v29  ;;  %v11760_v7 = vshll.u32 %v25233_v28, 16  ;;  %v29127_v32 = vrot.slane %v25198_v42, 1 }
 0x312   : > { %v10165_v0 = vsel %vm9890_vm9, %v10164_v8, %v10163_v1  ;;  %v10179_v25 = vsel %vm9890_vm9, %v25326_v37, %v10177_v35  ;;  %v12695_v20 = vshrl.u32 %v22003_v15, 16  ;;  %v29128_v26 = vrot.slane %v25205_v27, 1 }
 0x313   : > { %v12180_v60 = vsel %vm11290_vm3, %v12178_v16, %v29127_v32  ;;  %v10167_v19 = vsel %vm9893_vm10, %v10166_v53, %v10165_v0  ;;  %v10181_v59 = vsel %vm9893_vm10, %v25328_v44, %v10179_v25  ;;  %v11762_v37 = vrot.slane %v11760_v7, 1  ;;  %v10494_v44 = vld [vmem:[#allocation2 + $0x84] sm:$0xf]  ;;  %v12815_v7 = vpop.permute.xlu0 %12814 }
 0x314   : > { %12219 = vrot.lane.b32.xlu0 %v12180_v60, %s22728_s22  ;;  %v11317_v18 = vsel %vm11290_vm3, %v11315_v57, %v29128_v26  ;;  %v10169_v42 = vsel %vm9896_vm11, %v10168_v50, %v10167_v19  ;;  %v25397_v48 = vsel %vm9896_vm11, %v25330_v4, %v10181_v59  ;;  %v12697_v40 = vshll.u32 %v22003_v15, 16  ;;  %v25408_v15 = vld [vmem:[%s28998_s2] ss:$0 sm:$0xff]  ;;  %v29131_v60 = vld [vmem:[#allocation16_spill] sm:$0xff] }
 0x315   : > { %29129 = vst [vmem:[#allocation22_spill] sm:$0xff] %v25397_v48  ;;  %11355 = vrot.lane.b32.xlu1 %v11317_v18, %s22726_s15  ;;  %v12702_v21 = vshll.u32 %v22004_v58, 16  ;;  %v10171_v53 = vsel %vm9899_vm12, %v10170_v43, %v10169_v42  ;;  %v29130_v8 = vshrl.u32 %v25233_v28, 16  ;;  %v10954_v27 = vshrl.u32 %v22005_v41, 16  ;;  %v29133_v42 = vld [vmem:[#allocation20_spill] sm:$0xff] }
 0x316   : > { %v10956_v39 = vshll.u32 %v22005_v41, 16  ;;  %v10351_v63 = vpack.c.b16 %v10171_v53, %v10171_v53  ;;  %v12699_v29 = vrot.slane %v12697_v40, 1  ;;  %v10961_v50 = vshll.u32 %v22006_v17, 16  ;;  %v29132_v17 = vld [vmem:[#allocation19_spill] sm:$0xff] }
 0x317   : > { %v11763_v10 = vor.u32 %v11762_v37, %v29130_v8  ;;  %v12704_v16 = vrot.slane %v12702_v21, 1  ;;  %v1460_v43 = vadd.f32 %v25408_v15, %v24858_v52  ;;  %v1452_v28 = vadd.f32 %v25408_v15, %v24861_v11  ;;  %v25439_v26 = vld [vmem:[#allocation2 + $0x74] ss:$0 sps:$4 sm:$0x11]   ;;  %v25448_v53 = vpop.permute.xlu0 %12384  ;;  %v25454_v8 = vld [vmem:[%s28998_s2 + $0x2] ss:$0 sm:$0xff] }
 0x318   : > { %v10958_v1 = vrot.slane %v10956_v39, 1  ;;  %v10495_v58 = vsel %vm23321_vm14, %v10351_v63, %v10494_v44  ;;  %v12700_v35 = vor.u32 %v12699_v29, %v12695_v20  ;;  %v10963_v57 = vrot.slane %v10961_v50, 1  ;;  %v25446_v21 = vld [vmem:[#allocation2 + $0x74] ss:$0 sps:$4 sm:$0x11]   ;;  %v29134_v39 = vld [vmem:[#allocation17_spill] sm:$0xff] }
 0x319   : > { %v11768_v4 = vsel %vm10856_vm15, %v11763_v10, %v25267_v13  ;;  %v1463_v13 = vadd.f32 %v25408_v15, %v24867_v34  ;;  %10496 = vst [vmem:[#allocation2 + $0x84] sm:$0xf] %v10495_v58  ;;  %v1688_v0 = vmax.f32 %v1460_v43, 0.0  ;;  %v1686_v52 = vmax.f32 %v1452_v28, 0.0  ;;  %v22016_v29 = vld [vmem:[#allocation2 + $0x18] sm:$0xff]   ;;  %v25465_v58 = vpop.f32.mrb[111].mxu0 }
 0x31a   : > { %11965 = vst.msk [vmem:[#allocation3 + $0x8] sm:$0xff] %vm856_vm0, %v11768_v4  ;;  %v10959_v41 = vor.u32 %v10958_v1, %v10954_v27  ;;  %v1455_v11 = vadd.f32 %v25408_v15, %v24980_v61  ;;  %v12705_v25 = vsel %vm10856_vm15, %v12700_v35, %v12704_v16  ;;  %v10131_v20 = vsel %vm9899_vm12, %v25225_v5, %v29131_v60  ;;  %v25435_v61 = vld [vmem:[%s28998_s2 + $0x1] ss:$0 sm:$0xff]  ;;  %v29135_v1 = vld [vmem:[#allocation18_spill] sm:$0xff] }
 0x31b   : > { %12253 = vst.msk [vmem:[#allocation3 + $0x8] sm:$0xff] %vm11097_vm1, %v12206_v24  ;;  %v1689_v32 = vmax.f32 %v1463_v13, 0.0  ;;  %v1476_v34 = vadd.f32 %v25408_v15, %v29132_v17  ;;  %12826 = vrot.lane.b32.xlu0 %v12705_v25, %s22729_s24  ;;  %v1820_v19 = vmul.f32 %v25435_v61, %v1688_v0  ;;  %v1818_v59 = vmul.f32 %v25435_v61, %v1686_v52  ;;  %v22017_v28 = vld [vmem:[#allocation2 + $0x20] ss:$0 sps:$4 sm:$0x11]  }
 0x31c   : > { %12430 = vst.msk [vmem:[#allocation3 + $0x8] sm:$0xff] %vm11387_vm13, %v25175_v23  ;;  %v10964_v24 = vsel %vm10856_vm15, %v10959_v41, %v10963_v57  ;;  %v1687_v5 = vmax.f32 %v1455_v11, 0.0  ;;  %v10346_v18 = vpack.c.b16 %v10131_v20, %v10131_v20  ;;  %v1468_v40 = vadd.f32 %v25408_v15, %v29133_v42  ;;  %v25473_v17 = vld [vmem:[#allocation2 + $0x74] ss:$0 sps:$4 sm:$0x11]  }
 0x31d   : > { %12862 = vst.msk [vmem:[#allocation3 + $0x8] sm:$0xff] %vm11564_vm4, %v12815_v7  ;;  %11065 = vrot.lane.b32.xlu1 %v10964_v24, %s22728_s22  ;;  %v1821_v23 = vmul.f32 %v25435_v61, %v1689_v32  ;;  %v1692_v37 = vmax.f32 %v1476_v34, 0.0  ;;  %v1952_v10 = vadd.f32 %v25454_v8, %v1820_v19  ;;  %v1479_v63 = vadd.f32 %v25408_v15, %v29134_v39 }
 0x31e   : > { %v1819_v27 = vmul.f32 %v25435_v61, %v1687_v5  ;;  %10483 = vst.msk [vmem:[#allocation2 + $0x70] sm:$0xf] %vm5730_vm2, %v10346_v18  ;;  %v1690_v4 = vmax.f32 %v1468_v40, 0.0  ;;  %v1471_v43 = vadd.f32 %v25408_v15, %v29135_v1  ;;  %v1950_v35 = vadd.f32 %v25454_v8, %v1818_v59  ;;  %v25482_v18 = vpop.permute.xlu0 %12209 }
 0x31f   : > { %v1953_v16 = vadd.f32 %v25454_v8, %v1821_v23  ;;  %v1824_v50 = vmul.f32 %v25435_v61, %v1692_v37  ;;  %v1693_v13 = vmax.f32 %v1479_v63, 0.0  ;;  %v11770_v60 = vshrl.u32 %v22016_v29, 16 }
 0x320   : > { %v1951_v57 = vadd.f32 %v25454_v8, %v1819_v27  ;;  %v1822_v0 = vmul.f32 %v25435_v61, %v1690_v4  ;;  %v1691_v52 = vmax.f32 %v1471_v43, 0.0  ;;  %v11772_v20 = vshll.u32 %v22016_v29, 16 }
 0x321   : > { %v2033_v41 = vpack.c.bf16 %v1953_v16, %v1952_v10  ;;  %v1825_v32 = vmul.f32 %v25435_v61, %v1693_v13  ;;  %v29136_v34 = vpack.c.bf16 %v25253_v31, %v25248_v22  ;;  %v25479_v19 = vadd.f32 %v25454_v8, %v1824_v50  ;;  %v13134_v31 = vld [vmem:[#allocation3] sm:$0xff] }
 0x322   : > { %v2032_v25 = vpack.c.bf16 %v1951_v57, %v1950_v35  ;;  %v1823_v59 = vmul.f32 %v25435_v61, %v1691_v52  ;;  %v11777_v5 = vshll.u32 %v22017_v28, 16  ;;  %v25488_v42 = vadd.f32 %v25454_v8, %v1822_v0 }
 0x323   : > { %v2073_v24 = vmax.bf16 %v2033_v41, %v29136_v34  ;;  %v25491_v40 = vadd.f32 %v25454_v8, %v1825_v32  ;;  %v11774_v22 = vrot.slane %v11772_v20, 1 }
 0x324   : > { %v13135_v23 = vld [vmem:[#allocation3 + $0x8] sm:$0xff]  ;;  %v2072_v37 = vmax.bf16 %v2032_v25, %v2030_v62  ;;  %v25495_v39 = vadd.f32 %v25454_v8, %v1823_v59  ;;  %v11779_v63 = vrot.slane %v11777_v5, 1 }
 0x325   : > { %13413 = vmatprep.mubr.bf16.mxu0 %v13135_v23  ;;  %v3241_v10 = vcombine.high %v2073_v24, %v2073_v24  ;;  %v3248_v27 = vrot.slane %v2073_v24, %v23126_v3  ;;  %v22008_v45 = vld [vmem:[#allocation2 + $0x6c] sm:$0xff]   ;;  %v11775_v16 = vor.u32 %v11774_v22, %v11770_v60  ;;  %v12817_v60 = vpop.permute.xlu0 %12816 }
 0x326   : > { %13414 = vmatmul.mubr.bf16.vlgmr.msra.gmra.mrb[128].mxu0 %v13134_v31  ;;  %v3192_v29 = vcombine.high %v2072_v37, %v2072_v37  ;;  %v3199_v33 = vrot.slane %v2072_v37, %v23126_v3  ;;  %v22009_v43 = vld [vmem:[#allocation2 + $0x6c] sm:$0xff]   ;;  %12396 = vrot.lane.b32.xlu0 %v22008_v45, %s22726_s15 }
 0x327   : > { %v3255_v50 = vrot.slane %v3241_v10, %v23126_v3  ;;  %v3256_v4 = vcombine.high %v3248_v27, %v3248_v27  ;;  %v3264_v1 = vrot.slane %v3248_v27, %v23126_v3  ;;  %v11780_v13 = vsel %vm10856_vm15, %v11775_v16, %v11779_v63  ;;  %11532 = vrot.lane.b32.xlu1 %v22009_v43, %s22729_s24 }
 0x328   : > { %v3206_v35 = vrot.slane %v3192_v29, %v23126_v3  ;;  %v3207_v57 = vcombine.high %v3199_v33, %v3199_v33  ;;  %11966 = vst.msk [vmem:[#allocation3 + $0x20] sm:$0xff] %vm856_vm0, %v11780_v13  ;;  %v25513_v24 = vrot.slane %v3199_v33, %v23126_v3 }
 0x329   : > { %v3257_v0 = vcombine.high %v3255_v50, %v3255_v50  ;;  %v3271_v52 = vrot.slane %v3255_v50, %v23126_v3  ;;  %v3278_v25 = vrot.slane %v3256_v4, %v23126_v3  ;;  %v3286_v32 = vcombine.high %v3264_v1, %v3264_v1  ;;  %12254 = vst.msk [vmem:[#allocation3 + $0x20] sm:$0xff] %vm11097_vm1, %v25385_v54 }
 0x32a   : > { %v4859_v20 = vshrl.u32 %v3264_v1, 16  ;;  %v3208_v34 = vcombine.high %v3206_v35, %v3206_v35  ;;  %v25516_v59 = vrot.slane %v3206_v35, %v23126_v3  ;;  %12431 = vst.msk [vmem:[#allocation3 + $0x20] sm:$0xff] %vm11387_vm13, %v25448_v53  ;;  %v25524_v63 = vrot.slane %v3207_v57, %v23126_v3 }
 0x32b   : > { %v3285_v5 = vrot.slane %v3257_v0, %v23126_v3  ;;  %v3287_v23 = vcombine.high %v3271_v52, %v3271_v52  ;;  %v3288_v37 = vcombine.high %v3278_v25, %v3278_v25  ;;  %v4864_v22 = vshrl.u32 %v3278_v25, 16  ;;  %12863 = vst.msk [vmem:[#allocation3 + $0x20] sm:$0xff] %vm11564_vm4, %v12817_v60 }
 0x32c   : > { %v4869_v31 = vshrl.u32 %v3286_v32, 16  ;;  %v4879_v10 = vshrl.u32 %v3271_v52, 16  ;;  %v5658_v27 = vmax.bf16 %v4859_v20, %v3264_v1 }
 0x32d   : > { %v3289_v29 = vcombine.high %v3285_v5, %v3285_v5  ;;  %v4874_v33 = vshrl.u32 %v3288_v37, 16  ;;  %v4884_v45 = vshrl.u32 %v3285_v5, 16  ;;  %v4889_v54 = vshrl.u32 %v3287_v23, 16 }
 0x32e   : > { %v5659_v16 = vmax.bf16 %v4864_v22, %v3278_v25  ;;  %v5660_v50 = vmax.bf16 %v4869_v31, %v3286_v32  ;;  %v5662_v4 = vmax.bf16 %v4879_v10, %v3271_v52  ;;  %v8624_v43 = vrot.slane %v5658_v27, %v23133_v14 }
 0x32f   : > { %v4894_v35 = vshrl.u32 %v3289_v29, 16  ;;  %v5661_v13 = vmax.bf16 %v4874_v33, %v3288_v37  ;;  %v5663_v53 = vmax.bf16 %v4884_v45, %v3285_v5  ;;  %v5664_v0 = vmax.bf16 %v4889_v54, %v3287_v23 }
 0x330   : > { %v8631_v1 = vrot.slane %v8624_v43, %v23133_v14  ;;  %v8638_v57 = vrot.slane %v5659_v16, %v23133_v14  ;;  %v8652_v20 = vrot.slane %v5660_v50, %v23133_v14  ;;  %v8680_v60 = vrot.slane %v5662_v4, %v23133_v14  ;;  %v25545_v16 = vpop.f32.mrb[112].mxu0  ;;  %v22046_v4 = vld [vmem:[%s28999_s3 + $0x80] sm:$0xff]  }
 0x331   : > { %v5665_v28 = vmax.bf16 %v4894_v35, %v3289_v29  ;;  %v8666_v62 = vrot.slane %v5661_v13, %v23133_v14  ;;  %v8694_v25 = vrot.slane %v5663_v53, %v23133_v14  ;;  %v8708_v52 = vrot.slane %v5664_v0, %v23133_v14  ;;  %29137 = vst [vmem:[#allocation23_spill] sm:$0xff] %v25545_v16  ;;  %v25553_v53 = vpop.f32.mrb[113].mxu0  ;;  %v13137_v0 = vld [vmem:[#allocation3 + $0x18] sm:$0xff] }
 0x332   : > { %v8645_v32 = vrot.slane %v8638_v57, %v23133_v14  ;;  %v8659_v5 = vrot.slane %v8652_v20, %v23133_v14  ;;  %v8687_v23 = vrot.slane %v8680_v60, %v23133_v14  ;;  %v9810_v37 = vunpack.c.l.b16 %v8631_v1  ;;  %v13138_v50 = vld [vmem:[#allocation3 + $0x20] sm:$0xff]  ;;  %29138 = vst [vmem:[#allocation24_spill] sm:$0xff] %v25553_v53  ;;  %21772 = vmatprep.subr.bf16.mxu1 %v22046_v4 }
 0x333   : > { %v8673_v22 = vrot.slane %v8666_v62, %v23133_v14  ;;  %v8701_v31 = vrot.slane %v8694_v25, %v23133_v14  ;;  %v25541_v10 = vrot.slane %v8708_v52, %v23133_v14  ;;  %v8722_v27 = vrot.slane %v5665_v28, %v23133_v14  ;;  %v11523_v28 = vpop.permute.xlu1 %11522  ;;  %13421 = vmatprep.mubr.bf16.mxu0 %v13138_v50  ;;  %v10505_v60 = vld [vmem:[#allocation2 + $0x98] sm:$0x1]  ;;  %v25566_v52 = vpop.f32.mrb[114].mxu0 }
 0x334   : > { %v9811_v29 = vunpack.c.l.b16 %v8645_v32  ;;  %v9812_v33 = vunpack.c.l.b16 %v8659_v5  ;;  %v9814_v45 = vunpack.c.l.b16 %v8687_v23  ;;  %v3236_v54 = vrot.slane %v3208_v34, %v23126_v3  ;;  %v22053_v34 = vld [vmem:[%s28999_s3 + $0x88] sm:$0xff]   ;;  %11568 = vst.msk [vmem:[#allocation3 + $0x48] sm:$0xff] %vm11564_vm4, %v11523_v28  ;;  %29139 = vst [vmem:[#allocation12_spill] sm:$0xff] %v25566_v52  ;;  %13422 = vmatmul.mubr.bf16.gmra.mrb[132].mxu0 %v13137_v0  ;;  %21774 = vmatpush3.bf16.msra.mxu1 %v22046_v4 }
 0x335   : > { %v8729_v62 = vrot.slane %v8722_v27, %v23133_v14  ;;  %v9813_v43 = vunpack.c.l.b16 %v8673_v22  ;;  %v9815_v35 = vunpack.c.l.b16 %v8701_v31  ;;  %v25551_v13 = vrot.slane %v9810_v37, 7  ;;  %v25574_v22 = vpop.f32.mrb[115].mxu0  ;;  %21720 = vmatprep.subr.bf16.mxu0 %v22046_v4  ;;  %21773 = vmatprep.subr.bf16.mxu1 %v22053_v34 }
 0x336   : > { %v25559_v57 = vrot.slane %v9811_v29, 6  ;;  %v25561_v20 = vrot.slane %v9812_v33, 5  ;;  %v3237_v25 = vcombine.high %v25513_v24, %v25513_v24  ;;  %v25570_v5 = vrot.slane %v9814_v45, 3  ;;  %29140 = vst [vmem:[#allocation13_spill] sm:$0xff] %v25574_v22  ;;  %v25581_v50 = vpop.f32.mrb[116].mxu0  ;;  %21721 = vmatpush3.bf16.msra.mxu0 %v22046_v4 }
 0x337   : > { %v25568_v32 = vrot.slane %v9813_v43, 4  ;;  %v25572_v23 = vrot.slane %v9815_v35, 2  ;;  %v20549_v37 = vcombine.low %v8729_v62, %v8729_v62  ;;  %v3238_v31 = vcombine.high %v25516_v59, %v25516_v59  ;;  %29141 = vst [vmem:[#allocation14_spill] sm:$0xff] %v25581_v50  ;;  %v11348_v28 = vpop.permute.xlu1 %11347  ;;  %21722 = vmatprep.subr.bf16.mxu0 %v22053_v34  ;;  %v25587_v11 = vpop.f32.mrb[117].mxu0 }
 0x338   : > { %v3239_v27 = vcombine.high %v25524_v63, %v25524_v63  ;;  %v3240_v29 = vcombine.high %v3236_v54, %v3236_v54  ;;  %v4819_v33 = vshrl.u32 %v25513_v24, 16  ;;  %v4824_v62 = vshrl.u32 %v25524_v63, 16  ;;  %29142 = vst [vmem:[#allocation15_spill] sm:$0xff] %v25587_v11  ;;  %21775 = vmatpush3.bf16.msra.mxu1 %v22053_v34 }
 0x339   : > { %v10506_v45 = vsel %vm23219_vm5, %v20549_v37, %v10505_v60  ;;  %v4829_v43 = vshrl.u32 %v3237_v25, 16  ;;  %v4839_v35 = vshrl.u32 %v25516_v59, 16  ;;  %v4844_v1 = vshrl.u32 %v3236_v54, 16  ;;  %v25592_v37 = vpop.f32.mrb[118].mxu0 }
 0x33a   : > { %10507 = vst [vmem:[#allocation2 + $0x98] sm:$0x1] %v10506_v45  ;;  %v4834_v0 = vshrl.u32 %v3239_v27, 16  ;;  %v4849_v44 = vshrl.u32 %v3238_v31, 16  ;;  %v4854_v41 = vshrl.u32 %v3240_v29, 16  ;;  %v5650_v7 = vmax.bf16 %v4819_v33, %v25513_v24  ;;  %21723 = vmatpush3.bf16.msra.mxu0 %v22053_v34 }
 0x33b   : > { %v5651_v4 = vmax.bf16 %v4824_v62, %v25524_v63  ;;  %v5652_v50 = vmax.bf16 %v4829_v43, %v3237_v25  ;;  %v5654_v60 = vmax.bf16 %v4839_v35, %v25516_v59  ;;  %v5655_v52 = vmax.bf16 %v4844_v1, %v3236_v54  ;;  %v11058_v63 = vpop.permute.xlu1 %11057 }
 0x33c   : > { %v5653_v22 = vmax.bf16 %v4834_v0, %v3239_v27  ;;  %v5656_v53 = vmax.bf16 %v4849_v44, %v3238_v31  ;;  %v5657_v45 = vmax.bf16 %v4854_v41, %v3240_v29  ;;  %v8512_v16 = vrot.slane %v5650_v7, %v23133_v14  ;;  %11102 = vst.msk [vmem:[#allocation3 + $0x60] sm:$0xff] %vm11097_vm1, %v11058_v63  ;;  %v22012_v31 = vld [vmem:[#allocation2 + $0x6c] sm:$0xfe]  }
 0x33d   : > { %v8526_v48 = vrot.slane %v5651_v4, %v23133_v14  ;;  %v8540_v11 = vrot.slane %v5652_v50, %v23133_v14  ;;  %v8568_v24 = vrot.slane %v5654_v60, %v23133_v14  ;;  %v8582_v59 = vrot.slane %v5655_v52, %v23133_v14  ;;  %11392 = vst.msk [vmem:[#allocation3 + $0x60] sm:$0xff] %vm11387_vm13, %v11348_v28  ;;  %v22014_v27 = vld [vmem:[#allocation2 + $0x6c] sm:$0xfe]   ;;  %v22073_v28 = vld [vmem:[#allocation2 + $0x3c] sm:$0xff]  }
 0x33e   : > { %v8554_v25 = vrot.slane %v5653_v22, %v23133_v14  ;;  %v8596_v33 = vrot.slane %v5656_v53, %v23133_v14  ;;  %v8610_v54 = vrot.slane %v5657_v45, %v23133_v14  ;;  %v8519_v44 = vrot.slane %v8512_v16, %v23133_v14  ;;  %v22020_v29 = vld [vmem:[#allocation2 + $0x6c] sm:$0xff]   ;;  %10669 = vst.msk [vmem:[#allocation3 + $0x78] sm:$0xff] %vm856_vm0, %v22073_v28 }
 0x33f   : > { %v8533_v7 = vrot.slane %v8526_v48, %v23133_v14  ;;  %v8547_v41 = vrot.slane %v8540_v11, %v23133_v14  ;;  %v8575_v34 = vrot.slane %v8568_v24, %v23133_v14  ;;  %v8589_v52 = vrot.slane %v8582_v59, %v23133_v14  ;;  %v10501_v28 = vld [vmem:[#allocation2 + $0x90] sm:$0xf] }
 0x340   : > { %v8561_v1 = vrot.slane %v8554_v25, %v23133_v14  ;;  %v8603_v53 = vrot.slane %v8596_v33, %v23133_v14  ;;  %v8617_v22 = vrot.slane %v8610_v54, %v23133_v14  ;;  %v9802_v16 = vunpack.c.l.b16 %v8519_v44 }
 0x341   : > { %v9803_v50 = vunpack.c.l.b16 %v8533_v7  ;;  %v9804_v48 = vunpack.c.l.b16 %v8547_v41  ;;  %v9806_v62 = vunpack.c.l.b16 %v8575_v34  ;;  %v9807_v43 = vunpack.c.l.b16 %v8589_v52  ;;  %v22022_v34 = vld [vmem:[#allocation2 + $0x6c] sm:$0xff]  }
 0x342   : > { %v9805_v11 = vunpack.c.l.b16 %v8561_v1  ;;  %v9808_v35 = vunpack.c.l.b16 %v8603_v53  ;;  %v9809_v0 = vunpack.c.l.b16 %v8617_v22  ;;  %v10186_v4 = vrot.slane %v9802_v16, 7  ;;  %v22023_v16 = vld [vmem:[#allocation2 + $0x74] ss:$0 sps:$4 sm:$0x11]  }
 0x343   : > { %v10187_v60 = vrot.slane %v9803_v50, 6  ;;  %v10189_v45 = vrot.slane %v9804_v48, 5  ;;  %v10193_v24 = vrot.slane %v9806_v62, 3  ;;  %v10195_v25 = vrot.slane %v9807_v43, 2 }
 0x344   : > { %v10191_v63 = vrot.slane %v9805_v11, 4  ;;  %v10197_v59 = vrot.slane %v9808_v35, 1  ;;  %v10200_v33 = vsel %vm9902_vm6, %v25551_v13, %v9809_v0  ;;  %v12181_v7 = vrot.slane %v22012_v31, 1 }
 0x345   : > { %v10188_v54 = vsel %vm9884_vm7, %v10187_v60, %v10186_v4  ;;  %v10202_v44 = vsel %vm9884_vm7, %v25559_v57, %v10200_v33  ;;  %v11318_v41 = vrot.slane %v22014_v27, 1  ;;  %v12707_v53 = vshrl.u32 %v22020_v29, 16  ;;  %v29146_v60 = vld [vmem:[#allocation10_spill] sm:$0xff] }
 0x346   : > { %v10190_v1 = vsel %vm9887_vm8, %v10189_v45, %v10188_v54  ;;  %v10204_v52 = vsel %vm9887_vm8, %v25561_v20, %v10202_v44  ;;  %v12709_v22 = vshll.u32 %v22020_v29, 16  ;;  %v29143_v48 = vrot.slane %v25439_v26, 1 }
 0x347   : > { %v10192_v13 = vsel %vm9890_vm9, %v10191_v63, %v10190_v1  ;;  %v10206_v50 = vsel %vm9890_vm9, %v25568_v32, %v10204_v52  ;;  %v29144_v31 = vrot.slane %v25446_v21, 1  ;;  %v29145_v32 = vshll.u32 %v25473_v17, 16  ;;  %v29147_v17 = vld [vmem:[#allocation11_spill] sm:$0xff] }
 0x348   : > { %v12183_v57 = vsel %vm11290_vm3, %v12181_v7, %v29143_v48  ;;  %v10194_v62 = vsel %vm9893_vm10, %v10193_v24, %v10192_v13  ;;  %v10208_v20 = vsel %vm9893_vm10, %v25570_v5, %v10206_v50  ;;  %v12711_v29 = vrot.slane %v12709_v22, 1 }
 0x349   : > { %v11320_v27 = vsel %vm11290_vm3, %v11318_v41, %v29144_v31  ;;  %12221 = vrot.lane.b32.xlu0 %v12183_v57, %s22728_s22  ;;  %v12716_v11 = vrot.slane %v29145_v32, 1  ;;  %v10196_v26 = vsel %vm9896_vm11, %v10195_v25, %v10194_v62  ;;  %v25640_v21 = vsel %vm9896_vm11, %v25572_v23, %v10208_v20  ;;  %v29148_v25 = vld [vmem:[#allocation21_spill] sm:$0xff]  ;;  %v25664_v31 = vld [vmem:[#allocation2 + $0x80] ss:$0 sps:$4 sm:$0x11]  }
 0x34a   : > { %11357 = vrot.lane.b32.xlu1 %v11320_v27, %s22726_s15  ;;  %v10966_v43 = vshrl.u32 %v22022_v34, 16  ;;  %v10968_v35 = vshll.u32 %v22022_v34, 16  ;;  %v10198_v0 = vsel %vm9899_vm12, %v10197_v59, %v10196_v26  ;;  %v12712_v5 = vor.u32 %v12711_v29, %v12707_v53  ;;  %v25674_v20 = vld [vmem:[#allocation2 + $0x80] ss:$0 sps:$4 sm:$0x11]   ;;  %v25683_v26 = vld [vmem:[#allocation2 + $0x24] sm:$0xff]  }
 0x34b   : > { %v10973_v4 = vshll.u32 %v22023_v16, 16  ;;  %v1492_v45 = vadd.f32 %v25408_v15, %v29146_v60  ;;  %v10354_v24 = vpack.c.b16 %v10198_v0, %v10198_v0  ;;  %v1484_v33 = vadd.f32 %v25408_v15, %v29147_v17 }
 0x34c   : > { %v10970_v63 = vrot.slane %v10968_v35, 1  ;;  %v1495_v54 = vadd.f32 %v25408_v15, %v29148_v25  ;;  %v12717_v23 = vsel %vm10856_vm15, %v12712_v5, %v12716_v11  ;;  %v1487_v59 = vadd.f32 %v25408_v15, %v25214_v49  ;;  %v25699_v25 = vpop.f32.mrb[119].mxu0 }
 0x34d   : > { %v10975_v44 = vrot.slane %v10973_v4, 1  ;;  %v1696_v7 = vmax.f32 %v1492_v45, 0.0  ;;  %v10502_v41 = vsel %vm23321_vm14, %v10354_v24, %v10501_v28  ;;  %12828 = vrot.lane.b32.xlu0 %v12717_v23, %s22729_s24  ;;  %v1694_v1 = vmax.f32 %v1484_v33, 0.0  ;;  %v25688_v28 = vld [vmem:[#allocation2 + $0x2c] ss:$0 sps:$4 sm:$0x11]  }
 0x34e   : > { %v10971_v34 = vor.u32 %v10970_v63, %v10966_v43  ;;  %v1697_v52 = vmax.f32 %v1495_v54, 0.0  ;;  %10503 = vst [vmem:[#allocation2 + $0x90] sm:$0xf] %v10502_v41  ;;  %v1695_v22 = vmax.f32 %v1487_v59, 0.0  ;;  %v10158_v16 = vsel %vm9899_vm12, %v25229_v38, %v25166_v36 }
 0x34f   : > { %v1828_v53 = vmul.f32 %v25435_v61, %v1696_v7  ;;  %v1508_v13 = vadd.f32 %v25408_v15, %v25303_v9  ;;  %v1826_v50 = vmul.f32 %v25435_v61, %v1694_v1  ;;  %v10349_v57 = vpack.c.b16 %v10158_v16, %v10158_v16  ;;  %v25697_v33 = vld [vmem:[#allocation2 + $0x80] ss:$0 sps:$4 sm:$0x11]  }
 0x350   : > { %v10976_v49 = vsel %vm10856_vm15, %v10971_v34, %v10975_v44  ;;  %v1829_v48 = vmul.f32 %v25435_v61, %v1697_v52  ;;  %v29149_v27 = vunpack.c.l.b16 %v25306_v30  ;;  %v1827_v36 = vmul.f32 %v25435_v61, %v1695_v22 }
 0x351   : > { %11067 = vrot.lane.b32.xlu1 %v10976_v49, %s22728_s22  ;;  %v1700_v38 = vmax.f32 %v1508_v13, 0.0  ;;  %v1500_v9 = vadd.f32 %v25408_v15, %v25310_v2  ;;  %v1960_v29 = vadd.f32 %v25454_v8, %v1828_v53  ;;  %10490 = vst.msk [vmem:[#allocation2 + $0x7c] sm:$0xf] %vm5730_vm2, %v10349_v57  ;;  %v1511_v30 = vadd.f32 %v25408_v15, %v25324_v51 }
 0x352   : > { %v25668_v62 = vrot.slane %v29149_v27, 1  ;;  %v1961_v32 = vadd.f32 %v25454_v8, %v1829_v48  ;;  %v1503_v11 = vadd.f32 %v25408_v15, %v25332_v47  ;;  %v1958_v43 = vadd.f32 %v25454_v8, %v1826_v50 }
 0x353   : > { %v1959_v2 = vadd.f32 %v25454_v8, %v1827_v36  ;;  %v1832_v35 = vmul.f32 %v25435_v61, %v1700_v38  ;;  %v1698_v0 = vmax.f32 %v1500_v9, 0.0  ;;  %v29150_v5 = vunpack.c.l.b16 %v25541_v10 }
 0x354   : > { %v2037_v60 = vpack.c.bf16 %v1961_v32, %v1960_v29  ;;  %v1701_v51 = vmax.f32 %v1511_v30, 0.0  ;;  %v1699_v45 = vmax.f32 %v1503_v11, 0.0  ;;  %v29151_v54 = vpack.c.bf16 %v25491_v40, %v25479_v19 }
 0x355   : > { %v25692_v4 = vrot.slane %v29150_v5, 1  ;;  %v2036_v24 = vpack.c.bf16 %v1959_v2, %v1958_v43  ;;  %v1830_v47 = vmul.f32 %v25435_v61, %v1698_v0  ;;  %v29152_v59 = vpack.c.bf16 %v25495_v39, %v25488_v42 }
 0x356   : > { %v2075_v10 = vmax.bf16 %v2037_v60, %v29151_v54  ;;  %v1833_v23 = vmul.f32 %v25435_v61, %v1701_v51  ;;  %v1831_v44 = vmul.f32 %v25435_v61, %v1699_v45  ;;  %v25711_v34 = vadd.f32 %v25454_v8, %v1832_v35 }
 0x357   : > { %v2074_v41 = vmax.bf16 %v2036_v24, %v29152_v59  ;;  %v11784_v1 = vshll.u32 %v25683_v26, 16  ;;  %v25724_v16 = vadd.f32 %v25454_v8, %v1830_v47  ;;  %v25739_v9 = vadd.f32 %v25408_v15, %v25337_v46 }
 0x358   : > { %v3339_v53 = vcombine.high %v2075_v10, %v2075_v10  ;;  %v3346_v19 = vrot.slane %v2075_v10, %v23126_v3  ;;  %v25717_v40 = vadd.f32 %v25454_v8, %v1833_v23  ;;  %v25720_v61 = vadd.f32 %v25454_v8, %v1831_v44  ;;  %v22029_v39 = vld [vmem:[#allocation2 + $0x78] sm:$0xff]  }
 0x359   : > { %v3290_v22 = vcombine.high %v2074_v41, %v2074_v41  ;;  %v3297_v42 = vrot.slane %v2074_v41, %v23126_v3  ;;  %v22030_v57 = vld [vmem:[#allocation2 + $0x78] sm:$0xff]   ;;  %12398 = vrot.lane.b32.xlu0 %v22029_v39, %s22726_s15  ;;  %v25735_v8 = vrot.slane %v11784_v1, 1 }
 0x35a   : > { %v3353_v49 = vrot.slane %v3339_v53, %v23126_v3  ;;  %v3354_v50 = vcombine.high %v3346_v19, %v3346_v19  ;;  %v3362_v48 = vrot.slane %v3346_v19, %v23126_v3  ;;  %11534 = vrot.lane.b32.xlu1 %v22030_v57, %s22729_s24 }
 0x35b   : > { %v3304_v36 = vrot.slane %v3290_v22, %v23126_v3  ;;  %v3305_v2 = vcombine.high %v3297_v42, %v3297_v42  ;;  %v25745_v0 = vrot.slane %v3297_v42, %v23126_v3 }
 0x35c   : > { %v3355_v29 = vcombine.high %v3353_v49, %v3353_v49  ;;  %v3369_v32 = vrot.slane %v3353_v49, %v23126_v3  ;;  %v3376_v30 = vrot.slane %v3354_v50, %v23126_v3  ;;  %v3384_v11 = vcombine.high %v3362_v48, %v3362_v48 }
 0x35d   : > { %v4939_v43 = vshrl.u32 %v3362_v48, 16  ;;  %v3306_v35 = vcombine.high %v3304_v36, %v3304_v36  ;;  %v25749_v47 = vrot.slane %v3304_v36, %v23126_v3 }
 0x35e   : > { %v3383_v5 = vrot.slane %v3355_v29, %v23126_v3  ;;  %v3385_v60 = vcombine.high %v3369_v32, %v3369_v32  ;;  %v3386_v51 = vcombine.high %v3376_v30, %v3376_v30  ;;  %v4944_v46 = vshrl.u32 %v3376_v30, 16 }
 0x35f   : > { %v4949_v15 = vshrl.u32 %v3384_v11, 16  ;;  %v4959_v45 = vshrl.u32 %v3369_v32, 16  ;;  %v5674_v24 = vmax.bf16 %v4939_v43, %v3362_v48 }
 0x360   : > { %v3387_v54 = vcombine.high %v3383_v5, %v3383_v5  ;;  %v4954_v10 = vshrl.u32 %v3386_v51, 16  ;;  %v4964_v23 = vshrl.u32 %v3383_v5, 16  ;;  %v4969_v44 = vshrl.u32 %v3385_v60, 16 }
 0x361   : > { %v5675_v59 = vmax.bf16 %v4944_v46, %v3376_v30  ;;  %v5676_v41 = vmax.bf16 %v4949_v15, %v3384_v11  ;;  %v5678_v1 = vmax.bf16 %v4959_v45, %v3369_v32  ;;  %v8848_v53 = vrot.slane %v5674_v24, %v23133_v14 }
 0x362   : > { %v4974_v19 = vshrl.u32 %v3387_v54, 16  ;;  %v5677_v22 = vmax.bf16 %v4954_v10, %v3386_v51  ;;  %v5679_v42 = vmax.bf16 %v4964_v23, %v3383_v5  ;;  %v5680_v39 = vmax.bf16 %v4969_v44, %v3385_v60 }
 0x363   : > { %v8855_v49 = vrot.slane %v8848_v53, %v23133_v14  ;;  %v8862_v50 = vrot.slane %v5675_v59, %v23133_v14  ;;  %v8876_v48 = vrot.slane %v5676_v41, %v23133_v14  ;;  %v8904_v57 = vrot.slane %v5678_v1, %v23133_v14 }
 0x364   : > { %v5681_v36 = vmax.bf16 %v4974_v19, %v3387_v54  ;;  %v8890_v29 = vrot.slane %v5677_v22, %v23133_v14  ;;  %v8918_v30 = vrot.slane %v5679_v42, %v23133_v14  ;;  %v8932_v32 = vrot.slane %v5680_v39, %v23133_v14  ;;  %v10512_v42 = vld [vmem:[#allocation2 + $0xa4] sm:$0x1]  ;;  %v25779_v39 = vpop.f32.mrb[120].mxu0 }
 0x365   : > { %v8869_v11 = vrot.slane %v8862_v50, %v23133_v14  ;;  %v8883_v43 = vrot.slane %v8876_v48, %v23133_v14  ;;  %v8911_v5 = vrot.slane %v8904_v57, %v23133_v14  ;;  %v9826_v60 = vunpack.c.l.b16 %v8855_v49  ;;  %v25787_v57 = vpop.f32.mrb[121].mxu0 }
 0x366   : > { %v8897_v51 = vrot.slane %v8890_v29, %v23133_v14  ;;  %v8925_v46 = vrot.slane %v8918_v30, %v23133_v14  ;;  %v8946_v15 = vrot.slane %v5681_v36, %v23133_v14  ;;  %v3327_v45 = vrot.slane %v3305_v2, %v23126_v3  ;;  %v11525_v36 = vpop.permute.xlu1 %11524 }
 0x367   : > { %v9827_v24 = vunpack.c.l.b16 %v8869_v11  ;;  %v9828_v54 = vunpack.c.l.b16 %v8883_v43  ;;  %v9830_v10 = vunpack.c.l.b16 %v8911_v5  ;;  %v3334_v23 = vrot.slane %v3306_v35, %v23126_v3  ;;  %11569 = vst.msk [vmem:[#allocation3 + $0x60] sm:$0xff] %vm11564_vm4, %v11525_v36  ;;  %v25793_v43 = vpop.f32.mrb[122].mxu0 }
 0x368   : > { %v25768_v44 = vrot.slane %v8932_v32, %v23133_v14  ;;  %v8953_v59 = vrot.slane %v8946_v15, %v23133_v14  ;;  %v9829_v41 = vunpack.c.l.b16 %v8897_v51  ;;  %v9831_v1 = vunpack.c.l.b16 %v8925_v46  ;;  %v25798_v15 = vpop.f32.mrb[123].mxu0 }
 0x369   : > { %v25771_v53 = vrot.slane %v9826_v60, 7  ;;  %v25773_v19 = vrot.slane %v9827_v24, 6  ;;  %v25775_v22 = vrot.slane %v9828_v54, 5  ;;  %v3335_v2 = vcombine.high %v25745_v0, %v25745_v0  ;;  %29153 = vst [vmem:[#allocation16_spill] sm:$0xff] %v25798_v15 }
 0x36a   : > { %v25781_v35 = vrot.slane %v9829_v41, 4  ;;  %v25783_v49 = vrot.slane %v9830_v10, 3  ;;  %v25785_v50 = vrot.slane %v9831_v1, 2  ;;  %v20550_v48 = vcombine.low %v8953_v59, %v8953_v59  ;;  %v25800_v41 = vpop.f32.mrb[124].mxu0 }
 0x36b   : > { %v3336_v29 = vcombine.high %v25749_v47, %v25749_v47  ;;  %v3337_v30 = vcombine.high %v3327_v45, %v3327_v45  ;;  %v3338_v32 = vcombine.high %v3334_v23, %v3334_v23  ;;  %v4899_v11 = vshrl.u32 %v25745_v0, 16  ;;  %29154 = vst [vmem:[#allocation19_spill] sm:$0xff] %v25800_v41  ;;  %v25804_v52 = vpop.f32.mrb[125].mxu0 }
 0x36c   : > { %v10513_v5 = vsel %vm23219_vm5, %v20550_v48, %v10512_v42  ;;  %v4904_v60 = vshrl.u32 %v3327_v45, 16  ;;  %v4909_v51 = vshrl.u32 %v3335_v2, 16  ;;  %v4919_v46 = vshrl.u32 %v25749_v47, 16  ;;  %v11350_v42 = vpop.permute.xlu1 %11349 }
 0x36d   : > { %10514 = vst [vmem:[#allocation2 + $0xa4] sm:$0x1] %v10513_v5  ;;  %v4914_v24 = vshrl.u32 %v3337_v30, 16  ;;  %v4924_v54 = vshrl.u32 %v3334_v23, 16  ;;  %v4929_v10 = vshrl.u32 %v3336_v29, 16  ;;  %v4934_v59 = vshrl.u32 %v3338_v32, 16 }
 0x36e   : > { %v5666_v1 = vmax.bf16 %v4899_v11, %v25745_v0  ;;  %v5667_v36 = vmax.bf16 %v4904_v60, %v3327_v45  ;;  %v5668_v38 = vmax.bf16 %v4909_v51, %v3335_v2  ;;  %v5670_v27 = vmax.bf16 %v4919_v46, %v25749_v47  ;;  %v25810_v0 = vpop.permute.xlu0 %12386  ;;  %v25812_v45 = vpop.f32.mrb[126].mxu0 }
 0x36f   : > { %v5669_v48 = vmax.bf16 %v4914_v24, %v3337_v30  ;;  %v5671_v13 = vmax.bf16 %v4924_v54, %v3334_v23  ;;  %v5672_v17 = vmax.bf16 %v4929_v10, %v3336_v29  ;;  %v5673_v63 = vmax.bf16 %v4934_v59, %v3338_v32  ;;  %v22033_v24 = vld [vmem:[#allocation2 + $0x78] sm:$0xfe]  }
 0x370   : > { %v8736_v5 = vrot.slane %v5666_v1, %v23133_v14  ;;  %v8750_v7 = vrot.slane %v5667_v36, %v23133_v14  ;;  %v8764_v15 = vrot.slane %v5668_v38, %v23133_v14  ;;  %v8792_v41 = vrot.slane %v5670_v27, %v23133_v14  ;;  %v11060_v11 = vpop.permute.xlu1 %11059 }
 0x371   : > { %v8778_v47 = vrot.slane %v5669_v48, %v23133_v14  ;;  %v8806_v23 = vrot.slane %v5671_v13, %v23133_v14  ;;  %v8820_v2 = vrot.slane %v5672_v17, %v23133_v14  ;;  %v8834_v29 = vrot.slane %v5673_v63, %v23133_v14  ;;  %v22031_v17 = vld [vmem:[#allocation2 + $0x78] sm:$0xfe]   ;;  %11103 = vst.msk [vmem:[#allocation3 + $0x78] sm:$0xff] %vm11097_vm1, %v11060_v11  ;;  %v22088_v63 = vld [vmem:[#allocation2 + $0x48] sm:$0xff]  }
 0x372   : > { %v8743_v30 = vrot.slane %v8736_v5, %v23133_v14  ;;  %v8757_v32 = vrot.slane %v8750_v7, %v23133_v14  ;;  %v8771_v38 = vrot.slane %v8764_v15, %v23133_v14  ;;  %v8799_v27 = vrot.slane %v8792_v41, %v23133_v14  ;;  %11393 = vst.msk [vmem:[#allocation3 + $0x78] sm:$0xff] %vm11387_vm13, %v11350_v42 }
 0x373   : > { %v8785_v60 = vrot.slane %v8778_v47, %v23133_v14  ;;  %v8813_v51 = vrot.slane %v8806_v23, %v23133_v14  ;;  %v8827_v46 = vrot.slane %v8820_v2, %v23133_v14  ;;  %v8841_v13 = vrot.slane %v8834_v29, %v23133_v14  ;;  %10670 = vst.msk [vmem:[#allocation3 + $0x90] sm:$0xff] %vm856_vm0, %v22088_v63  ;;  %v25829_v2 = vpop.permute.xlu0 %12211 }
 0x374   : > { %v9818_v54 = vunpack.c.l.b16 %v8743_v30  ;;  %v9819_v7 = vunpack.c.l.b16 %v8757_v32  ;;  %v9820_v10 = vunpack.c.l.b16 %v8771_v38  ;;  %v9822_v15 = vunpack.c.l.b16 %v8799_v27  ;;  %v22037_v38 = vld [vmem:[#allocation2 + $0x78] sm:$0xff]  }
 0x375   : > { %v9821_v59 = vunpack.c.l.b16 %v8785_v60  ;;  %v9823_v41 = vunpack.c.l.b16 %v8813_v51  ;;  %v9824_v1 = vunpack.c.l.b16 %v8827_v46  ;;  %v9825_v36 = vunpack.c.l.b16 %v8841_v13 }
 0x376   : > { %v10213_v48 = vrot.slane %v9818_v54, 7  ;;  %v10214_v5 = vrot.slane %v9819_v7, 6  ;;  %v10216_v47 = vrot.slane %v9820_v10, 5  ;;  %v10220_v23 = vrot.slane %v9822_v15, 3  ;;  %v22039_v10 = vld [vmem:[#allocation2 + $0x78] sm:$0xff]  }
 0x377   : > { %v10218_v29 = vrot.slane %v9821_v59, 4  ;;  %v10222_v11 = vrot.slane %v9823_v41, 2  ;;  %v10224_v30 = vrot.slane %v9824_v1, 1  ;;  %v10227_v32 = vsel %vm9902_vm6, %v25771_v53, %v9825_v36  ;;  %v22040_v15 = vld [vmem:[#allocation2 + $0x80] ss:$0 sps:$4 sm:$0x11]  }
 0x378   : > { %v10215_v42 = vsel %vm9884_vm7, %v10214_v5, %v10213_v48  ;;  %v10229_v27 = vsel %vm9884_vm7, %v25773_v19, %v10227_v32  ;;  %v12184_v60 = vrot.slane %v22031_v17, 1  ;;  %v11321_v51 = vrot.slane %v22033_v24, 1  ;;  %v22042_v1 = vld [vmem:[#allocation2 + $0x78] sm:$0xfe]  }
 0x379   : > { %v10217_v46 = vsel %vm9887_vm8, %v10216_v47, %v10215_v42  ;;  %v10231_v13 = vsel %vm9887_vm8, %v25775_v22, %v10229_v27  ;;  %v29155_v63 = vshrl.u32 %v25683_v26, 16  ;;  %v29156_v7 = vshll.u32 %v25688_v28, 16  ;;  %v10508_v36 = vld [vmem:[#allocation2 + $0x9c] sm:$0xf]  ;;  %v12819_v47 = vpop.permute.xlu0 %12818 }
 0x37a   : > { %v10219_v59 = vsel %vm9890_vm9, %v10218_v29, %v10217_v46  ;;  %v10233_v19 = vsel %vm9890_vm9, %v25781_v35, %v10231_v13  ;;  %v29157_v17 = vrot.slane %v25664_v31, 1  ;;  %v29158_v22 = vrot.slane %v25674_v20, 1  ;;  %v22043_v42 = vld [vmem:[#allocation2 + $0x80] ss:$0 sps:$4 sm:$0x11]  }
 0x37b   : > { %v11787_v54 = vor.u32 %v25735_v8, %v29155_v63  ;;  %v11791_v53 = vrot.slane %v29156_v7, 1  ;;  %v10221_v8 = vsel %vm9893_vm10, %v10220_v23, %v10219_v59  ;;  %v10235_v28 = vsel %vm9893_vm10, %v25783_v49, %v10233_v19  ;;  %v25888_v63 = vld [vmem:[%s28998_s2 + $0x1] ss:$0 sm:$0xff]  ;;  %v29160_v19 = vld [vmem:[#allocation22_spill] sm:$0xff] }
 0x37c   : > { %v12186_v24 = vsel %vm11290_vm3, %v12184_v60, %v29157_v17  ;;  %v11323_v26 = vsel %vm11290_vm3, %v11321_v51, %v29158_v22  ;;  %v12719_v35 = vshrl.u32 %v22037_v38, 16  ;;  %v10223_v31 = vsel %vm9896_vm11, %v10222_v11, %v10221_v8 }
 0x37d   : > { %12223 = vrot.lane.b32.xlu0 %v12186_v24, %s22728_s22  ;;  %11359 = vrot.lane.b32.xlu1 %v11323_v26, %s22726_s15  ;;  %v11792_v41 = vsel %vm10856_vm15, %v11787_v54, %v11791_v53  ;;  %v25862_v20 = vsel %vm9896_vm11, %v25785_v50, %v10235_v28  ;;  %v12721_v48 = vshll.u32 %v22037_v38, 16  ;;  %v29159_v49 = vshll.u32 %v25697_v33, 16  ;;  %v25874_v38 = vld [vmem:[%s28998_s2] ss:$0 sm:$0xff] }
 0x37e   : > { %11967 = vst.msk [vmem:[#allocation3 + $0x38] sm:$0xff] %vm856_vm0, %v11792_v41  ;;  %v10225_v23 = vsel %vm9899_vm12, %v10224_v30, %v10223_v31  ;;  %v10978_v29 = vshrl.u32 %v22039_v10, 16  ;;  %v10980_v32 = vshll.u32 %v22039_v10, 16  ;;  %v10985_v11 = vshll.u32 %v22040_v15, 16  ;;  %v29161_v41 = vld [vmem:[#allocation23_spill] sm:$0xff] }
 0x37f   : > { %v12728_v5 = vrot.slane %v29159_v49, 1  ;;  %12255 = vst.msk [vmem:[#allocation3 + $0x38] sm:$0xff] %vm11097_vm1, %v25482_v18  ;;  %v10357_v27 = vpack.c.b16 %v10225_v23, %v10225_v23  ;;  %v12723_v50 = vrot.slane %v12721_v48, 1  ;;  %v1704_v60 = vmax.f32 %v25739_v9, 0.0  ;;  %v29164_v23 = vld [vmem:[#allocation13_spill] sm:$0xff] }
 0x380   : > { %v1516_v33 = vadd.f32 %v25874_v38, %v25343_v12  ;;  %12432 = vst.msk [vmem:[#allocation3 + $0x38] sm:$0xff] %vm11387_vm13, %v25810_v0  ;;  %v10982_v18 = vrot.slane %v10980_v32, 1  ;;  %v10987_v30 = vrot.slane %v10985_v11, 1  ;;  %v1527_v51 = vadd.f32 %v25874_v38, %v25347_v6  ;;  %v22052_v32 = vld [vmem:[#allocation2 + $0x38] ss:$0 sps:$4 sm:$0x11]  }
 0x381   : > { %v13078_v46 = vrot.slane %v22042_v1, 1  ;;  %12864 = vst.msk [vmem:[#allocation3 + $0x38] sm:$0xff] %vm11564_vm4, %v12819_v47  ;;  %v10509_v9 = vsel %vm23321_vm14, %v10357_v27, %v10508_v36  ;;  %v12724_v13 = vor.u32 %v12723_v50, %v12719_v35  ;;  %v1836_v12 = vmul.f32 %v25888_v63, %v1704_v60  ;;  %v29162_v1 = vld [vmem:[#allocation24_spill] sm:$0xff]  ;;  %v22051_v36 = vld [vmem:[#allocation2 + $0x30] sm:$0xff]  }
 0x382   : > { %v1702_v0 = vmax.f32 %v1516_v33, 0.0  ;;  %10510 = vst [vmem:[#allocation2 + $0x9c] sm:$0xf] %v10509_v9  ;;  %v10983_v54 = vor.u32 %v10982_v18, %v10978_v29  ;;  %v1705_v7 = vmax.f32 %v1527_v51, 0.0  ;;  %v13079_v53 = vrot.slane %v22043_v42, 1  ;;  %v13140_v9 = vld [vmem:[#allocation3 + $0x30] sm:$0xff] }
 0x383   : > { %v1519_v6 = vadd.f32 %v25874_v38, %v25465_v58  ;;  %v9832_v10 = vunpack.c.l.b16 %v25768_v44  ;;  %v12729_v15 = vsel %vm10856_vm15, %v12724_v13, %v12728_v5  ;;  %v10185_v17 = vsel %vm9899_vm12, %v25668_v62, %v29160_v19  ;;  %v25903_v58 = vpop.permute.xlu0 %12388  ;;  %v25909_v44 = vld [vmem:[%s28998_s2 + $0x2] ss:$0 sm:$0xff]  ;;  %v25930_v13 = vpop.f32.mrb[127].mxu0 }
 0x384   : > { %v1834_v59 = vmul.f32 %v25888_v63, %v1702_v0  ;;  %12830 = vrot.lane.b32.xlu0 %v12729_v15, %s22729_s24  ;;  %v10988_v24 = vsel %vm10856_vm15, %v10983_v54, %v10987_v30  ;;  %v1837_v22 = vmul.f32 %v25888_v63, %v1705_v7  ;;  %v13080_v26 = vsel %vm11290_vm3, %v13078_v46, %v13079_v53  ;;  %v29163_v5 = vld [vmem:[#allocation12_spill] sm:$0xff]  ;;  %v25928_v46 = vld [vmem:[#allocation2 + $0x8c] ss:$0 sps:$4 sm:$0x11]  }
 0x385   : > { %v1703_v8 = vmax.f32 %v1519_v6, 0.0  ;;  %11069 = vrot.lane.b32.xlu1 %v10988_v24, %s22728_s22  ;;  %v1968_v62 = vadd.f32 %v25909_v44, %v1836_v12  ;;  %13126 = vst.msk [vmem:[#allocation3 + $0xd0] sm:$0xff] %vm856_vm0, %v13080_v26  ;;  %v10352_v28 = vpack.c.b16 %v10185_v17, %v10185_v17  ;;  %v1540_v35 = vadd.f32 %v25874_v38, %v29161_v41  ;;  %v25944_v24 = vld [vmem:[#allocation2 + $0x8c] ss:$0 sps:$4 sm:$0x11]  }
 0x386   : > { %v1532_v31 = vadd.f32 %v25874_v38, %v29162_v1  ;;  %v1969_v48 = vadd.f32 %v25909_v44, %v1837_v22  ;;  %v1543_v47 = vadd.f32 %v25874_v38, %v29163_v5  ;;  %v1535_v29 = vadd.f32 %v25874_v38, %v29164_v23 }
 0x387   : > { %v1835_v49 = vmul.f32 %v25888_v63, %v1703_v8  ;;  %v25923_v11 = vrot.slane %v9832_v10, 1  ;;  %v1966_v42 = vadd.f32 %v25909_v44, %v1834_v59  ;;  %10497 = vst.msk [vmem:[#allocation2 + $0x88] sm:$0xf] %vm5730_vm2, %v10352_v28  ;;  %v1708_v27 = vmax.f32 %v1540_v35, 0.0  ;;  %v25939_v19 = vpop.permute.xlu0 %12213 }
 0x388   : > { %v1706_v50 = vmax.f32 %v1532_v31, 0.0  ;;  %v13141_v60 = vld [vmem:[#allocation3 + $0x38] sm:$0xff]  ;;  %v2041_v33 = vpack.c.bf16 %v1969_v48, %v1968_v62  ;;  %v1709_v30 = vmax.f32 %v1543_v47, 0.0  ;;  %v1707_v51 = vmax.f32 %v1535_v29, 0.0 }
 0x389   : > { %29165 = vst [vmem:[#allocation20_spill] sm:$0xff] %v25923_v11  ;;  %v1967_v18 = vadd.f32 %v25909_v44, %v1835_v49  ;;  %13429 = vmatprep.mubr.bf16.mxu0 %v13141_v60  ;;  %v1840_v12 = vmul.f32 %v25888_v63, %v1708_v27  ;;  %v11794_v54 = vshrl.u32 %v22051_v36, 16  ;;  %v11796_v7 = vshll.u32 %v22051_v36, 16  ;;  %v25960_v48 = vld [vmem:[#allocation2 + $0x8c] ss:$0 sps:$4 sm:$0x11]  }
 0x38a   : > { %v1838_v0 = vmul.f32 %v25888_v63, %v1706_v50  ;;  %13430 = vmatmul.mubr.bf16.gmra.mrb[136].mxu0 %v13140_v9  ;;  %v29166_v53 = vpack.c.bf16 %v25717_v40, %v25711_v34  ;;  %v1841_v15 = vmul.f32 %v25888_v63, %v1709_v30  ;;  %v1839_v59 = vmul.f32 %v25888_v63, %v1707_v51 }
 0x38b   : > { %v2040_v10 = vpack.c.bf16 %v1967_v18, %v1966_v42  ;;  %v25942_v17 = vadd.f32 %v25909_v44, %v1840_v12  ;;  %v11798_v22 = vrot.slane %v11796_v7, 1  ;;  %v11801_v26 = vshll.u32 %v22052_v32, 16  ;;  %v12821_v30 = vpop.permute.xlu0 %12820 }
 0x38c   : > { %v2077_v6 = vmax.bf16 %v2041_v33, %v29166_v53  ;;  %v13160_v28 = vld [vmem:[#allocation3 + $0xd0] sm:$0xff]  ;;  %v29167_v34 = vpack.c.bf16 %v25720_v61, %v25724_v16  ;;  %v25951_v41 = vadd.f32 %v25909_v44, %v1841_v15  ;;  %v25955_v35 = vadd.f32 %v25909_v44, %v1838_v0 }
 0x38d   : > { %21740 = vmatprep.mubr.msk.bf16.mxu1 %vm856_vm0, %v13160_v28  ;;  %v25958_v1 = vadd.f32 %v25909_v44, %v1839_v59  ;;  %v11799_v31 = vor.u32 %v11798_v22, %v11794_v54  ;;  %v11803_v36 = vrot.slane %v11801_v26, 1 }
 0x38e   : > { %v3437_v8 = vcombine.high %v2077_v6, %v2077_v6  ;;  %v3444_v62 = vrot.slane %v2077_v6, %v23126_v3  ;;  %v2076_v40 = vmax.bf16 %v2040_v10, %v29167_v34  ;;  %v22044_v16 = vld [vmem:[#allocation2 + $0x84] sm:$0xff]  }
 0x38f   : > { %v22045_v29 = vld [vmem:[#allocation2 + $0x84] sm:$0xff]   ;;  %v11804_v27 = vsel %vm10856_vm15, %v11799_v31, %v11803_v36  ;;  %12400 = vrot.lane.b32.xlu0 %v22044_v16, %s22726_s15 }
 0x390   : > { %v3451_v49 = vrot.slane %v3437_v8, %v23126_v3  ;;  %v3452_v5 = vcombine.high %v3444_v62, %v3444_v62  ;;  %v3460_v61 = vrot.slane %v3444_v62, %v23126_v3  ;;  %v3388_v23 = vcombine.high %v2076_v40, %v2076_v40  ;;  %11968 = vst.msk [vmem:[#allocation3 + $0x50] sm:$0xff] %vm856_vm0, %v11804_v27 }
 0x391   : > { %v25975_v9 = vrot.slane %v2076_v40, %v23126_v3  ;;  %11536 = vrot.lane.b32.xlu1 %v22045_v29, %s22729_s24  ;;  %12256 = vst.msk [vmem:[#allocation3 + $0x50] sm:$0xff] %vm11097_vm1, %v25829_v2 }
 0x392   : > { %v3453_v50 = vcombine.high %v3451_v49, %v3451_v49  ;;  %v3467_v60 = vrot.slane %v3451_v49, %v23126_v3  ;;  %v3474_v33 = vrot.slane %v3452_v5, %v23126_v3  ;;  %v3482_v18 = vcombine.high %v3460_v61, %v3460_v61  ;;  %12433 = vst.msk [vmem:[#allocation3 + $0x50] sm:$0xff] %vm11387_vm13, %v25903_v58 }
 0x393   : > { %v5019_v51 = vshrl.u32 %v3460_v61, 16  ;;  %v3402_v22 = vrot.slane %v3388_v23, %v23126_v3  ;;  %12865 = vst.msk [vmem:[#allocation3 + $0x50] sm:$0xff] %vm11564_vm4, %v12821_v30  ;;  %v3403_v58 = vcombine.high %v25975_v9, %v25975_v9 }
 0x394   : > { %v3481_v54 = vrot.slane %v3453_v50, %v23126_v3  ;;  %v3483_v7 = vcombine.high %v3467_v60, %v3467_v60  ;;  %v3484_v53 = vcombine.high %v3474_v33, %v3474_v33  ;;  %v5024_v6 = vshrl.u32 %v3474_v33, 16 }
 0x395   : > { %v5029_v10 = vshrl.u32 %v3482_v18, 16  ;;  %v5039_v15 = vshrl.u32 %v3467_v60, 16  ;;  %v5690_v59 = vmax.bf16 %v5019_v51, %v3460_v61 }
 0x396   : > { %v3485_v26 = vcombine.high %v3481_v54, %v3481_v54  ;;  %v5034_v8 = vshrl.u32 %v3484_v53, 16  ;;  %v5044_v2 = vshrl.u32 %v3481_v54, 16  ;;  %v5049_v62 = vshrl.u32 %v3483_v7, 16 }
 0x397   : > { %v5691_v28 = vmax.bf16 %v5024_v6, %v3474_v33  ;;  %v5692_v34 = vmax.bf16 %v5029_v10, %v3482_v18  ;;  %v5694_v40 = vmax.bf16 %v5039_v15, %v3467_v60  ;;  %v9072_v31 = vrot.slane %v5690_v59, %v23133_v14 }
 0x398   : > { %v5054_v36 = vshrl.u32 %v3485_v26, 16  ;;  %v5693_v49 = vmax.bf16 %v5034_v8, %v3484_v53  ;;  %v5695_v5 = vmax.bf16 %v5044_v2, %v3481_v54  ;;  %v25994_v27 = vmax.bf16 %v5049_v62, %v3483_v7 }
 0x399   : > { %v9079_v61 = vrot.slane %v9072_v31, %v23133_v14  ;;  %v9086_v16 = vrot.slane %v5691_v28, %v23133_v14  ;;  %v9100_v23 = vrot.slane %v5692_v34, %v23133_v14  ;;  %v9128_v29 = vrot.slane %v5694_v40, %v23133_v14  ;;  %v26009_v40 = vld [vmem:[#allocation2 + $0x84] sm:$0xfe]  }
 0x39a   : > { %v5697_v50 = vmax.bf16 %v5054_v36, %v3485_v26  ;;  %v9114_v60 = vrot.slane %v5693_v49, %v23133_v14  ;;  %v9142_v33 = vrot.slane %v5695_v5, %v23133_v14  ;;  %v3411_v7 = vrot.slane %v25975_v9, %v23126_v3  ;;  %v10519_v9 = vld [vmem:[#allocation2 + $0xb0] sm:$0x1] }
 0x39b   : > { %v9093_v18 = vrot.slane %v9086_v16, %v23133_v14  ;;  %v9107_v30 = vrot.slane %v9100_v23, %v23133_v14  ;;  %v9135_v51 = vrot.slane %v9128_v29, %v23133_v14  ;;  %v9842_v54 = vunpack.c.l.b16 %v9079_v61  ;;  %v11527_v61 = vpop.permute.xlu1 %11526  ;;  %v13144_v16 = vld [vmem:[#allocation3 + $0x50] sm:$0xff] }
 0x39c   : > { %v9121_v53 = vrot.slane %v9114_v60, %v23133_v14  ;;  %v9149_v6 = vrot.slane %v9142_v33, %v23133_v14  ;;  %v9170_v10 = vrot.slane %v5697_v50, %v23133_v14  ;;  %v3404_v8 = vcombine.high %v3402_v22, %v3402_v22  ;;  %11570 = vst.msk [vmem:[#allocation3 + $0x78] sm:$0xff] %vm11564_vm4, %v11527_v61  ;;  %v13143_v33 = vld [vmem:[#allocation3 + $0x48] sm:$0xff] }
 0x39d   : > { %v9843_v15 = vunpack.c.l.b16 %v9093_v18  ;;  %v9844_v59 = vunpack.c.l.b16 %v9107_v30  ;;  %v9846_v26 = vunpack.c.l.b16 %v9135_v51  ;;  %v26011_v31 = vrot.slane %v9842_v54, 7  ;;  %13437 = vmatprep.mubr.bf16.mxu0 %v13144_v16 }
 0x39e   : > { %v9177_v62 = vrot.slane %v9170_v10, %v23133_v14  ;;  %v9845_v28 = vunpack.c.l.b16 %v9121_v53  ;;  %v9847_v34 = vunpack.c.l.b16 %v9149_v6  ;;  %v3418_v5 = vrot.slane %v3402_v22, %v23126_v3  ;;  %13438 = vmatmul.mubr.bf16.gmra.mrb[140].mxu0 %v13143_v33 }
 0x39f   : > { %v26013_v36 = vrot.slane %v9843_v15, 6  ;;  %v26015_v49 = vrot.slane %v9844_v59, 5  ;;  %v26020_v29 = vrot.slane %v9846_v26, 3  ;;  %v3425_v18 = vrot.slane %v3403_v58, %v23126_v3 }
 0x3a0   : > { %v26018_v23 = vrot.slane %v9845_v28, 4  ;;  %v26022_v50 = vrot.slane %v9847_v34, 2  ;;  %v20551_v60 = vcombine.low %v9177_v62, %v9177_v62  ;;  %v3432_v30 = vrot.slane %v3404_v8, %v23126_v3  ;;  %v11352_v28 = vpop.permute.xlu1 %11351  ;;  %v22103_v34 = vld [vmem:[#allocation2 + $0x54] sm:$0xff]  }
 0x3a1   : > { %v3433_v51 = vcombine.high %v3411_v7, %v3411_v7  ;;  %v3434_v54 = vcombine.high %v3418_v5, %v3418_v5  ;;  %v4979_v53 = vshrl.u32 %v3411_v7, 16  ;;  %v4999_v6 = vshrl.u32 %v3418_v5, 16  ;;  %10671 = vst.msk [vmem:[#allocation3 + $0xa8] sm:$0xff] %vm856_vm0, %v22103_v34 }
 0x3a2   : > { %v10520_v22 = vsel %vm23219_vm5, %v20551_v60, %v10519_v9  ;;  %v12187_v10 = vrot.slane %v26009_v40, 1  ;;  %v3435_v15 = vcombine.high %v3425_v18, %v3425_v18  ;;  %v3436_v59 = vcombine.high %v3432_v30, %v3432_v30 }
 0x3a3   : > { %10521 = vst [vmem:[#allocation2 + $0xb0] sm:$0x1] %v10520_v22  ;;  %v4984_v26 = vshrl.u32 %v3425_v18, 16  ;;  %v4989_v62 = vshrl.u32 %v3433_v51, 16  ;;  %v5004_v58 = vshrl.u32 %v3432_v30, 16  ;;  %v5009_v61 = vshrl.u32 %v3434_v54, 16 }
 0x3a4   : > { %v5682_v8 = vmax.bf16 %v4979_v53, %v3411_v7  ;;  %v5686_v16 = vmax.bf16 %v4999_v6, %v3418_v5  ;;  %v4994_v42 = vshrl.u32 %v3435_v15, 16  ;;  %v5014_v33 = vshrl.u32 %v3436_v59, 16  ;;  %v11062_v7 = vpop.permute.xlu1 %11061 }
 0x3a5   : > { %v5683_v32 = vmax.bf16 %v4984_v26, %v3425_v18  ;;  %v5684_v2 = vmax.bf16 %v4989_v62, %v3433_v51  ;;  %v5687_v9 = vmax.bf16 %v5004_v58, %v3432_v30  ;;  %v5688_v60 = vmax.bf16 %v5009_v61, %v3434_v54  ;;  %11104 = vst.msk [vmem:[#allocation3 + $0x90] sm:$0xff] %vm11097_vm1, %v11062_v7  ;;  %v22049_v26 = vld [vmem:[#allocation2 + $0x84] sm:$0xfe]  }
 0x3a6   : > { %v8960_v40 = vrot.slane %v5682_v8, %v23133_v14  ;;  %v9016_v22 = vrot.slane %v5686_v16, %v23133_v14  ;;  %v5685_v0 = vmax.bf16 %v4994_v42, %v3435_v15  ;;  %v5689_v12 = vmax.bf16 %v5014_v33, %v3436_v59  ;;  %11394 = vst.msk [vmem:[#allocation3 + $0x90] sm:$0xff] %vm11387_vm13, %v11352_v28 }
 0x3a7   : > { %v8974_v47 = vrot.slane %v5683_v32, %v23133_v14  ;;  %v8988_v11 = vrot.slane %v5684_v2, %v23133_v14  ;;  %v9030_v51 = vrot.slane %v5687_v9, %v23133_v14  ;;  %v9044_v30 = vrot.slane %v5688_v60, %v23133_v14 }
 0x3a8   : > { %v8967_v5 = vrot.slane %v8960_v40, %v23133_v14  ;;  %v9023_v18 = vrot.slane %v9016_v22, %v23133_v14  ;;  %v9002_v53 = vrot.slane %v5685_v0, %v23133_v14  ;;  %v9058_v32 = vrot.slane %v5689_v12, %v23133_v14  ;;  %v11529_v61 = vpop.permute.xlu1 %11528  ;;  %v22056_v40 = vld [vmem:[#allocation2 + $0x84] sm:$0xff]  }
 0x3a9   : > { %v8981_v54 = vrot.slane %v8974_v47, %v23133_v14  ;;  %v8995_v42 = vrot.slane %v8988_v11, %v23133_v14  ;;  %v9037_v2 = vrot.slane %v9030_v51, %v23133_v14  ;;  %v9051_v6 = vrot.slane %v9044_v30, %v23133_v14  ;;  %v22054_v11 = vld [vmem:[#allocation2 + $0x84] sm:$0xff]   ;;  %11571 = vst.msk [vmem:[#allocation3 + $0x90] sm:$0xff] %vm11564_vm4, %v11529_v61  ;;  %v22057_v30 = vld [vmem:[#allocation2 + $0x8c] ss:$0 sps:$4 sm:$0x11]  }
 0x3aa   : > { %v9834_v15 = vunpack.c.l.b16 %v8967_v5  ;;  %v9838_v59 = vunpack.c.l.b16 %v9023_v18  ;;  %v9009_v62 = vrot.slane %v9002_v53, %v23133_v14  ;;  %v9065_v34 = vrot.slane %v9058_v32, %v23133_v14 }
 0x3ab   : > { %v9835_v47 = vunpack.c.l.b16 %v8981_v54  ;;  %v9836_v58 = vunpack.c.l.b16 %v8995_v42  ;;  %v9839_v0 = vunpack.c.l.b16 %v9037_v2  ;;  %v9840_v8 = vunpack.c.l.b16 %v9051_v6 }
 0x3ac   : > { %v10240_v12 = vrot.slane %v9834_v15, 7  ;;  %v10247_v16 = vrot.slane %v9838_v59, 3  ;;  %v9837_v28 = vunpack.c.l.b16 %v9009_v62  ;;  %v9841_v33 = vunpack.c.l.b16 %v9065_v34  ;;  %v11354_v2 = vpop.permute.xlu1 %11353 }
 0x3ad   : > { %v10241_v9 = vrot.slane %v9835_v47, 6  ;;  %v10243_v60 = vrot.slane %v9836_v58, 5  ;;  %v10249_v22 = vrot.slane %v9839_v0, 2  ;;  %v10251_v7 = vrot.slane %v9840_v8, 1  ;;  %v22059_v0 = vld [vmem:[#allocation2 + $0x84] sm:$0xfe]  }
 0x3ae   : > { %v29168_v5 = vrot.slane %v25928_v46, 1  ;;  %v11324_v51 = vrot.slane %v22049_v26, 1  ;;  %v10245_v42 = vrot.slane %v9837_v28, 4  ;;  %v10254_v53 = vsel %vm9902_vm6, %v26011_v31, %v9841_v33  ;;  %v29171_v28 = vld [vmem:[#allocation14_spill] sm:$0xff] }
 0x3af   : > { %v10242_v54 = vsel %vm9884_vm7, %v10241_v9, %v10240_v12  ;;  %v12731_v32 = vshrl.u32 %v22054_v11, 16  ;;  %v10256_v15 = vsel %vm9884_vm7, %v26013_v36, %v10254_v53  ;;  %v29169_v46 = vrot.slane %v25944_v24, 1  ;;  %v22060_v33 = vld [vmem:[#allocation2 + $0x8c] ss:$0 sps:$4 sm:$0x11]  }
 0x3b0   : > { %v12189_v18 = vsel %vm11290_vm3, %v12187_v10, %v29168_v5  ;;  %v10244_v6 = vsel %vm9887_vm8, %v10243_v60, %v10242_v54  ;;  %v12733_v59 = vshll.u32 %v22054_v11, 16  ;;  %v10258_v62 = vsel %vm9887_vm8, %v26015_v49, %v10256_v15  ;;  %v22116_v11 = vld [vmem:[#allocation2 + $0x60] sm:$0xff]   ;;  %v11064_v9 = vpop.permute.xlu1 %11063  ;;  %v10515_v60 = vld [vmem:[#allocation2 + $0xa8] sm:$0xf] }
 0x3b1   : > { %12225 = vrot.lane.b32.xlu0 %v12189_v18, %s22728_s22  ;;  %v11326_v10 = vsel %vm11290_vm3, %v11324_v51, %v29169_v46  ;;  %v10246_v26 = vsel %vm9890_vm9, %v10245_v42, %v10244_v6  ;;  %v29170_v31 = vshll.u32 %v25960_v48, 16  ;;  %v10990_v47 = vshrl.u32 %v22056_v40, 16  ;;  %11105 = vst.msk [vmem:[#allocation3 + $0xa8] sm:$0xff] %vm11097_vm1, %v11064_v9  ;;  %v29172_v51 = vld [vmem:[#allocation15_spill] sm:$0xff] }
 0x3b2   : > { %11361 = vrot.lane.b32.xlu1 %v11326_v10, %s22726_s15  ;;  %v10248_v58 = vsel %vm9893_vm10, %v10247_v16, %v10246_v26  ;;  %v10260_v36 = vsel %vm9890_vm9, %v26018_v23, %v10258_v62  ;;  %v12735_v24 = vrot.slane %v12733_v59, 1  ;;  %v10992_v61 = vshll.u32 %v22056_v40, 16  ;;  %10672 = vst.msk [vmem:[#allocation3 + $0xc0] sm:$0xff] %vm856_vm0, %v22116_v11 }
 0x3b3   : > { %v12740_v34 = vrot.slane %v29170_v31, 1  ;;  %v10250_v8 = vsel %vm9896_vm11, %v10249_v22, %v10248_v58  ;;  %v10262_v49 = vsel %vm9893_vm10, %v26020_v29, %v10260_v36  ;;  %v10997_v12 = vshll.u32 %v22057_v30, 16  ;;  %11395 = vst.msk [vmem:[#allocation3 + $0xa8] sm:$0xff] %vm11387_vm13, %v11354_v2  ;;  %v22067_v58 = vld [vmem:[#allocation2 + $0x3c] sm:$0xff]  }
 0x3b4   : > { %v1556_v48 = vadd.f32 %v25874_v38, %v29171_v28  ;;  %v10252_v16 = vsel %vm9899_vm12, %v10251_v7, %v10250_v8  ;;  %v26080_v23 = vsel %vm9896_vm11, %v26022_v50, %v10262_v49  ;;  %v12736_v40 = vor.u32 %v12735_v24, %v12731_v32  ;;  %v11531_v46 = vpop.permute.xlu1 %11530  ;;  %v26118_v24 = vpop.permute.xlu0 %12390  ;;  %v29174_v8 = vld [vmem:[#allocation16_spill] sm:$0xff] }
 0x3b5   : > { %v10994_v5 = vrot.slane %v10992_v61, 1  ;;  %v10360_v29 = vpack.c.b16 %v10252_v16, %v10252_v16  ;;  %v10999_v22 = vrot.slane %v10997_v12, 1  ;;  %v1548_v30 = vadd.f32 %v25874_v38, %v29172_v51  ;;  %11572 = vst.msk [vmem:[#allocation3 + $0xa8] sm:$0xff] %vm11564_vm4, %v11531_v46  ;;  %v22068_v12 = vld [vmem:[#allocation2 + $0x44] ss:$0 sps:$4 sm:$0x11]  }
 0x3b6   : > { %v1712_v18 = vmax.f32 %v1556_v48, 0.0  ;;  %v12741_v7 = vsel %vm10856_vm15, %v12736_v40, %v12740_v34  ;;  %v1559_v50 = vadd.f32 %v25874_v38, %v25592_v37  ;;  %v13081_v42 = vrot.slane %v22059_v0, 1 }
 0x3b7   : > { %v10995_v54 = vor.u32 %v10994_v5, %v10990_v47  ;;  %v10516_v53 = vsel %vm23321_vm14, %v10360_v29, %v10515_v60  ;;  %12832 = vrot.lane.b32.xlu0 %v12741_v7, %s22729_s24  ;;  %v1710_v6 = vmax.f32 %v1548_v30, 0.0  ;;  %v13082_v15 = vrot.slane %v22060_v33, 1  ;;  %v26135_v30 = vld [vmem:[#allocation2 + $0x98] ss:$0 sps:$4 sm:$0x11]  }
 0x3b8   : > { %v1844_v32 = vmul.f32 %v25888_v63, %v1712_v18  ;;  %10517 = vst [vmem:[#allocation2 + $0xa8] sm:$0xf] %v10516_v53  ;;  %v1713_v10 = vmax.f32 %v1559_v50, 0.0  ;;  %v1551_v59 = vadd.f32 %v25874_v38, %v25699_v25  ;;  %v10212_v37 = vsel %vm9899_vm12, %v25692_v4, %v25640_v21  ;;  %v26110_v25 = vld [vmem:[#allocation2 + $0x98] ss:$0 sps:$4 sm:$0x11]   ;;  %v11356_v28 = vpop.permute.xlu1 %11355 }
 0x3b9   : > { %v11000_v2 = vsel %vm10856_vm15, %v10995_v54, %v10999_v22  ;;  %v29173_v26 = vrot.slane %v25994_v27, %v23133_v14  ;;  %v1842_v31 = vmul.f32 %v25888_v63, %v1710_v6  ;;  %v13083_v34 = vsel %vm11290_vm3, %v13081_v42, %v13082_v15  ;;  %v22070_v22 = vld [vmem:[#allocation2 + $0x98] ss:$0 sps:$4 sm:$0x11]  }
 0x3ba   : > { %11071 = vrot.lane.b32.xlu1 %v11000_v2, %s22728_s22  ;;  %v10355_v47 = vpack.c.b16 %v10212_v37, %v10212_v37  ;;  %v1845_v21 = vmul.f32 %v25888_v63, %v1713_v10  ;;  %13127 = vst.msk [vmem:[#allocation3 + $0xe8] sm:$0xff] %vm856_vm0, %v13083_v34  ;;  %v1711_v4 = vmax.f32 %v1551_v59, 0.0  ;;  %v1572_v27 = vadd.f32 %v25874_v38, %v25779_v39  ;;  %v26137_v50 = vld [vmem:[#allocation2 + $0x98] ss:$0 sps:$4 sm:$0x11]   ;;  %v26146_v2 = vpop.permute.xlu0 %12215 }
 0x3bb   : > { %v26105_v62 = vrot.slane %v29173_v26, %v23133_v14  ;;  %v1564_v36 = vadd.f32 %v25874_v38, %v25787_v57  ;;  %v1976_v61 = vadd.f32 %v25909_v44, %v1844_v32  ;;  %v1974_v0 = vadd.f32 %v25909_v44, %v1842_v31 }
 0x3bc   : > { %10504 = vst.msk [vmem:[#allocation2 + $0x94] sm:$0xf] %vm5730_vm2, %v10355_v47  ;;  %v1575_v11 = vadd.f32 %v25874_v38, %v25793_v43  ;;  %v1567_v49 = vadd.f32 %v25874_v38, %v29174_v8  ;;  %v1977_v39 = vadd.f32 %v25909_v44, %v1845_v21  ;;  %v1843_v57 = vmul.f32 %v25888_v63, %v1711_v4  ;;  %v11066_v42 = vpop.permute.xlu1 %11065 }
 0x3bd   : > { %v1716_v48 = vmax.f32 %v1572_v27, 0.0  ;;  %v1714_v33 = vmax.f32 %v1564_v36, 0.0  ;;  %v12191_v60 = vrot.slane %v26110_v25, 1  ;;  %v11806_v40 = vshrl.u32 %v22067_v58, 16  ;;  %11106 = vst.msk [vmem:[#allocation3 + $0xc0] sm:$0xff] %vm11097_vm1, %v11066_v42 }
 0x3be   : > { %v1717_v9 = vmax.f32 %v1575_v11, 0.0  ;;  %v1715_v16 = vmax.f32 %v1567_v49, 0.0  ;;  %v2045_v5 = vpack.c.bf16 %v1977_v39, %v1976_v61  ;;  %v1975_v29 = vadd.f32 %v25909_v44, %v1843_v57  ;;  %11396 = vst.msk [vmem:[#allocation3 + $0xc0] sm:$0xff] %vm11387_vm13, %v11356_v28 }
 0x3bf   : > { %v1848_v43 = vmul.f32 %v25888_v63, %v1716_v48  ;;  %v1846_v38 = vmul.f32 %v25888_v63, %v1714_v33  ;;  %v11808_v7 = vshll.u32 %v22067_v58, 16  ;;  %v11813_v54 = vshll.u32 %v22068_v12, 16 }
 0x3c0   : > { %v1849_v18 = vmul.f32 %v25888_v63, %v1717_v9  ;;  %v1847_v51 = vmul.f32 %v25888_v63, %v1715_v16  ;;  %v9848_v53 = vunpack.c.l.b16 %v26105_v62  ;;  %v29175_v32 = vpack.c.bf16 %v25951_v41, %v25942_v17  ;;  %v12823_v16 = vpop.permute.xlu0 %12822 }
 0x3c1   : > { %v2044_v15 = vpack.c.bf16 %v1975_v29, %v1974_v0  ;;  %v26144_v46 = vadd.f32 %v25909_v44, %v1848_v43  ;;  %v13163_v63 = vld [vmem:[#allocation3 + $0xe8] sm:$0xff]  ;;  %v26150_v10 = vadd.f32 %v25909_v44, %v1846_v38  ;;  %v11810_v17 = vrot.slane %v11808_v7, 1  ;;  %v11533_v0 = vpop.permute.xlu1 %11532 }
 0x3c2   : > { %v2079_v6 = vmax.bf16 %v2045_v5, %v29175_v32  ;;  %v26153_v59 = vadd.f32 %v25909_v44, %v1849_v18  ;;  %v26156_v37 = vadd.f32 %v25909_v44, %v1847_v51  ;;  %21741 = vmatmul.mubr.msk.bf16.vlgmr.msra.gmra.mrb[0].mxu1 %vm856_vm0, %v13163_v63  ;;  %v29176_v31 = vpack.c.bf16 %v25958_v1, %v25955_v35 }
 0x3c3   : > { %v22061_v47 = vld [vmem:[#allocation2 + $0x90] sm:$0xff]   ;;  %v11815_v58 = vrot.slane %v11813_v54, 1  ;;  %v11811_v36 = vor.u32 %v11810_v17, %v11806_v40  ;;  %v12750_v61 = vshll.u32 %v22070_v22, 16  ;;  %11573 = vst.msk [vmem:[#allocation3 + $0xc0] sm:$0xff] %vm11564_vm4, %v11533_v0  ;;  %v11328_v12 = vrot.slane %v26135_v30, 1 }
 0x3c4   : > { %v3535_v41 = vcombine.high %v2079_v6, %v2079_v6  ;;  %v3542_v26 = vrot.slane %v2079_v6, %v23126_v3  ;;  %v2078_v34 = vmax.bf16 %v2044_v15, %v29176_v31  ;;  %v22062_v21 = vld [vmem:[#allocation2 + $0x90] sm:$0xff]   ;;  %v2047_v4 = vpack.c.bf16 %v26153_v59, %v26144_v46  ;;  %12402 = vrot.lane.b32.xlu0 %v22061_v47, %s22726_s15 }
 0x3c5   : > { %v2046_v44 = vpack.c.bf16 %v26156_v37, %v26150_v10  ;;  %v26168_v27 = vld [vmem:[#allocation2 + $0x90] sm:$0xfe]   ;;  %11538 = vrot.lane.b32.xlu1 %v22062_v21, %s22729_s24  ;;  %v11816_v28 = vsel %vm10856_vm15, %v11811_v36, %v11815_v58  ;;  %v11009_v39 = vshll.u32 %v26137_v50, 16  ;;  %v26190_v43 = vrot.slane %v12750_v61, 1  ;;  %v11358_v38 = vpop.permute.xlu1 %11357 }
 0x3c6   : > { %v3549_v11 = vrot.slane %v3535_v41, %v23126_v3  ;;  %v3550_v8 = vcombine.high %v3542_v26, %v3542_v26  ;;  %v3558_v35 = vrot.slane %v3542_v26, %v23126_v3  ;;  %v3486_v1 = vcombine.high %v2078_v34, %v2078_v34  ;;  %11969 = vst.msk [vmem:[#allocation3 + $0x68] sm:$0xff] %vm856_vm0, %v11816_v28  ;;  %v22129_v22 = vld [vmem:[#allocation2 + $0x6c] sm:$0xff]   ;;  %v22137_v26 = vld [vmem:[#allocation2 + $0x78] sm:$0xff]  }
 0x3c7   : > { %v26175_v49 = vrot.slane %v2078_v34, %v23126_v3  ;;  %v12190_v29 = vrot.slane %v26168_v27, 1  ;;  %12257 = vst.msk [vmem:[#allocation3 + $0x68] sm:$0xff] %vm11097_vm1, %v25939_v19  ;;  %v11011_v30 = vrot.slane %v11009_v39, 1 }
 0x3c8   : > { %v3551_v57 = vcombine.high %v3549_v11, %v3549_v11  ;;  %v3565_v48 = vrot.slane %v3549_v11, %v23126_v3  ;;  %v3572_v33 = vrot.slane %v3550_v8, %v23126_v3  ;;  %v3580_v9 = vcombine.high %v3558_v35, %v3558_v35  ;;  %12434 = vst.msk [vmem:[#allocation3 + $0x68] sm:$0xff] %vm11387_vm13, %v26118_v24  ;;  %v22140_v11 = vld [vmem:[#allocation2 + $0x84] sm:$0xff]  }
 0x3c9   : > { %v5099_v40 = vshrl.u32 %v3558_v35, 16  ;;  %v26185_v5 = vrot.slane %v3486_v1, %v23126_v3  ;;  %v3501_v15 = vcombine.high %v26175_v49, %v26175_v49  ;;  %12866 = vst.msk [vmem:[#allocation3 + $0x68] sm:$0xff] %vm11564_vm4, %v12823_v16  ;;  %v11068_v58 = vpop.permute.xlu1 %11067 }
 0x3ca   : > { %v3579_v18 = vrot.slane %v3551_v57, %v23126_v3  ;;  %v3581_v51 = vcombine.high %v3565_v48, %v3565_v48  ;;  %v3582_v7 = vcombine.high %v3572_v33, %v3572_v33  ;;  %v5104_v54 = vshrl.u32 %v3572_v33, 16  ;;  %10673 = vst.msk [vmem:[#allocation3 + $0xd8] sm:$0xff] %vm856_vm0, %v22129_v22  ;;  %10674 = vst.msk [vmem:[#allocation3 + $0xf0] sm:$0xff] %vm856_vm0, %v22137_v26 }
 0x3cb   : > { %v5109_v42 = vshrl.u32 %v3580_v9, 16  ;;  %v5119_v32 = vshrl.u32 %v3565_v48, 16  ;;  %v5706_v6 = vmax.bf16 %v5099_v40, %v3558_v35  ;;  %11107 = vst.msk [vmem:[#allocation3 + $0xd8] sm:$0xff] %vm11097_vm1, %v11068_v58 }
 0x3cc   : > { %v3583_v19 = vcombine.high %v3579_v18, %v3579_v18  ;;  %v5114_v63 = vshrl.u32 %v3582_v7, 16  ;;  %v5124_v17 = vshrl.u32 %v3579_v18, 16  ;;  %v5129_v41 = vshrl.u32 %v3581_v51, 16  ;;  %11397 = vst.msk [vmem:[#allocation3 + $0xd8] sm:$0xff] %vm11387_vm13, %v11358_v38 }
 0x3cd   : > { %v5707_v31 = vmax.bf16 %v5104_v54, %v3572_v33  ;;  %v5708_v34 = vmax.bf16 %v5109_v42, %v3580_v9  ;;  %v5710_v47 = vmax.bf16 %v5119_v32, %v3565_v48  ;;  %v9296_v24 = vrot.slane %v5706_v6, %v23133_v14  ;;  %10675 = vst.msk [vmem:[#allocation3 + $0x108] sm:$0xff] %vm856_vm0, %v22140_v11 }
 0x3ce   : > { %v5134_v21 = vshrl.u32 %v3583_v19, 16  ;;  %v5709_v36 = vmax.bf16 %v5114_v63, %v3582_v7  ;;  %v5711_v61 = vmax.bf16 %v5124_v17, %v3579_v18  ;;  %v5712_v0 = vmax.bf16 %v5129_v41, %v3581_v51  ;;  %v13146_v17 = vld [vmem:[#allocation3 + $0x60] sm:$0xff]  ;;  %v11535_v41 = vpop.permute.xlu1 %11534 }
 0x3cf   : > { %v9303_v8 = vrot.slane %v9296_v24, %v23133_v14  ;;  %v9310_v35 = vrot.slane %v5707_v31, %v23133_v14  ;;  %v9324_v1 = vrot.slane %v5708_v34, %v23133_v14  ;;  %v9352_v28 = vrot.slane %v5710_v47, %v23133_v14  ;;  %11574 = vst.msk [vmem:[#allocation3 + $0xd8] sm:$0xff] %vm11564_vm4, %v11535_v41 }
 0x3d0   : > { %v5713_v57 = vmax.bf16 %v5134_v21, %v3583_v19  ;;  %v9338_v48 = vrot.slane %v5709_v36, %v23133_v14  ;;  %v9366_v33 = vrot.slane %v5711_v61, %v23133_v14  ;;  %v9380_v9 = vrot.slane %v5712_v0, %v23133_v14  ;;  %v13147_v42 = vld [vmem:[#allocation3 + $0x68] sm:$0xff]  ;;  %v10526_v21 = vld [vmem:[#allocation2 + $0xbc] sm:$0x1] }
 0x3d1   : > { %v9317_v16 = vrot.slane %v9310_v35, %v23133_v14  ;;  %v9331_v40 = vrot.slane %v9324_v1, %v23133_v14  ;;  %v9359_v22 = vrot.slane %v9352_v28, %v23133_v14  ;;  %v9858_v18 = vunpack.c.l.b16 %v9303_v8  ;;  %13445 = vmatprep.mubr.bf16.mxu0 %v13147_v42 }
 0x3d2   : > { %v9345_v51 = vrot.slane %v9338_v48, %v23133_v14  ;;  %v9373_v38 = vrot.slane %v9366_v33, %v23133_v14  ;;  %v9394_v7 = vrot.slane %v5713_v57, %v23133_v14  ;;  %v3509_v54 = vrot.slane %v26175_v49, %v23126_v3  ;;  %13446 = vmatmul.mubr.bf16.gmra.mrb[144].mxu0 %v13146_v17 }
 0x3d3   : > { %v9859_v32 = vunpack.c.l.b16 %v9317_v16  ;;  %v9860_v6 = vunpack.c.l.b16 %v9331_v40  ;;  %v9862_v19 = vunpack.c.l.b16 %v9359_v22  ;;  %v3502_v63 = vcombine.high %v26185_v5, %v26185_v5 }
 0x3d4   : > { %v26222_v26 = vrot.slane %v9380_v9, %v23133_v14  ;;  %v9401_v31 = vrot.slane %v9394_v7, %v23133_v14  ;;  %v9861_v34 = vunpack.c.l.b16 %v9345_v51  ;;  %v9863_v47 = vunpack.c.l.b16 %v9373_v38 }
 0x3d5   : > { %v26226_v49 = vrot.slane %v9858_v18, 7  ;;  %v26228_v24 = vrot.slane %v9859_v32, 6  ;;  %v26230_v58 = vrot.slane %v9860_v6, 5  ;;  %v3516_v36 = vrot.slane %v26185_v5, %v23126_v3 }
 0x3d6   : > { %v26234_v61 = vrot.slane %v9861_v34, 4  ;;  %v26236_v0 = vrot.slane %v9862_v19, 3  ;;  %v26238_v11 = vrot.slane %v9863_v47, 2  ;;  %v20552_v8 = vcombine.low %v9401_v31, %v9401_v31 }
 0x3d7   : > { %v3523_v35 = vrot.slane %v3501_v15, %v23126_v3  ;;  %v3530_v1 = vrot.slane %v3502_v63, %v23126_v3  ;;  %v3531_v28 = vcombine.high %v3509_v54, %v3509_v54  ;;  %v3532_v57 = vcombine.high %v3516_v36, %v3516_v36 }
 0x3d8   : > { %v10527_v48 = vsel %vm23219_vm5, %v20552_v8, %v10526_v21  ;;  %v5059_v33 = vshrl.u32 %v3509_v54, 16  ;;  %v5079_v9 = vshrl.u32 %v3516_v36, 16  ;;  %v12192_v5 = vsel %vm11290_vm3, %v12190_v29, %v12191_v60 }
 0x3d9   : > { %10528 = vst [vmem:[#allocation2 + $0xbc] sm:$0x1] %v10527_v48  ;;  %v3533_v16 = vcombine.high %v3523_v35, %v3523_v35  ;;  %v3534_v40 = vcombine.high %v3530_v1, %v3530_v1  ;;  %v5064_v22 = vshrl.u32 %v3523_v35, 16  ;;  %v5069_v15 = vshrl.u32 %v3531_v28, 16  ;;  %12227 = vrot.lane.b32.xlu0 %v12192_v5, %s22728_s22  ;;  %v22065_v5 = vld [vmem:[#allocation2 + $0x90] sm:$0xfe]  }
 0x3da   : > { %v5084_v18 = vshrl.u32 %v3530_v1, 16  ;;  %v5089_v51 = vshrl.u32 %v3532_v57, 16  ;;  %v5698_v38 = vmax.bf16 %v5059_v33, %v3509_v54  ;;  %v5702_v7 = vmax.bf16 %v5079_v9, %v3516_v36 }
 0x3db   : > { %v5074_v42 = vshrl.u32 %v3533_v16, 16  ;;  %v5094_v32 = vshrl.u32 %v3534_v40, 16  ;;  %v5699_v6 = vmax.bf16 %v5064_v22, %v3523_v35  ;;  %v5700_v19 = vmax.bf16 %v5069_v15, %v3531_v28  ;;  %v22143_v28 = vld [vmem:[#allocation2 + $0x90] sm:$0xff]  }
 0x3dc   : > { %v5703_v25 = vmax.bf16 %v5084_v18, %v3530_v1  ;;  %v5704_v63 = vmax.bf16 %v5089_v51, %v3532_v57  ;;  %v9184_v27 = vrot.slane %v5698_v38, %v23133_v14  ;;  %v9240_v60 = vrot.slane %v5702_v7, %v23133_v14  ;;  %v22071_v51 = vld [vmem:[#allocation2 + $0x90] sm:$0xff]   ;;  %10676 = vst.msk [vmem:[#allocation3 + $0x120] sm:$0xff] %vm856_vm0, %v22143_v28 }
 0x3dd   : > { %v5701_v29 = vmax.bf16 %v5074_v42, %v3533_v16  ;;  %v5705_v17 = vmax.bf16 %v5094_v32, %v3534_v40  ;;  %v9198_v41 = vrot.slane %v5699_v6, %v23133_v14  ;;  %v9212_v31 = vrot.slane %v5700_v19, %v23133_v14  ;;  %v22069_v16 = vld [vmem:[#allocation2 + $0x90] sm:$0xff]  }
 0x3de   : > { %v9191_v34 = vrot.slane %v9184_v27, %v23133_v14  ;;  %v9247_v54 = vrot.slane %v9240_v60, %v23133_v14  ;;  %v9254_v47 = vrot.slane %v5703_v25, %v23133_v14  ;;  %v9268_v21 = vrot.slane %v5704_v63, %v23133_v14 }
 0x3df   : > { %v9205_v36 = vrot.slane %v9198_v41, %v23133_v14  ;;  %v9219_v8 = vrot.slane %v9212_v31, %v23133_v14  ;;  %v9226_v35 = vrot.slane %v5701_v29, %v23133_v14  ;;  %v9282_v1 = vrot.slane %v5705_v17, %v23133_v14 }
 0x3e0   : > { %v9261_v57 = vrot.slane %v9254_v47, %v23133_v14  ;;  %v9275_v48 = vrot.slane %v9268_v21, %v23133_v14  ;;  %v9850_v33 = vunpack.c.l.b16 %v9191_v34  ;;  %v9854_v9 = vunpack.c.l.b16 %v9247_v54 }
 0x3e1   : > { %v9233_v40 = vrot.slane %v9226_v35, %v23133_v14  ;;  %v9289_v22 = vrot.slane %v9282_v1, %v23133_v14  ;;  %v9851_v15 = vunpack.c.l.b16 %v9205_v36  ;;  %v9852_v18 = vunpack.c.l.b16 %v9219_v8 }
 0x3e2   : > { %v9855_v38 = vunpack.c.l.b16 %v9261_v57  ;;  %v9856_v7 = vunpack.c.l.b16 %v9275_v48  ;;  %v10267_v42 = vrot.slane %v9850_v33, 7  ;;  %v10274_v32 = vrot.slane %v9854_v9, 3  ;;  %v22074_v9 = vld [vmem:[#allocation2 + $0x90] sm:$0xfe]  }
 0x3e3   : > { %v9853_v6 = vunpack.c.l.b16 %v9233_v40  ;;  %v9857_v19 = vunpack.c.l.b16 %v9289_v22  ;;  %v10268_v25 = vrot.slane %v9851_v15, 6  ;;  %v10270_v63 = vrot.slane %v9852_v18, 5  ;;  %v10522_v15 = vld [vmem:[#allocation2 + $0xb4] sm:$0xf] }
 0x3e4   : > { %v10276_v27 = vrot.slane %v9855_v38, 2  ;;  %v10278_v60 = vrot.slane %v9856_v7, 1  ;;  %v11327_v29 = vrot.slane %v22065_v5, 1  ;;  %v12743_v17 = vshrl.u32 %v22069_v16, 16  ;;  %v26289_v5 = vpop.permute.xlu0 %12392 }
 0x3e5   : > { %v10269_v41 = vsel %vm9884_vm7, %v10268_v25, %v10267_v42  ;;  %v10272_v31 = vrot.slane %v9853_v6, 4  ;;  %v10281_v34 = vsel %vm9902_vm6, %v26226_v49, %v9857_v19  ;;  %v12745_v54 = vshll.u32 %v22069_v16, 16 }
 0x3e6   : > { %v10271_v47 = vsel %vm9887_vm8, %v10270_v63, %v10269_v41  ;;  %v10283_v21 = vsel %vm9884_vm7, %v26228_v24, %v10281_v34  ;;  %v11329_v36 = vsel %vm11290_vm3, %v11327_v29, %v11328_v12  ;;  %v11002_v8 = vshrl.u32 %v22071_v51, 16  ;;  %v22655_v12 = vld [vmem:[%s28998_s2] ss:$0 sm:$0xff]  ;;  %v22082_v63 = vld [vmem:[#allocation2 + $0x48] sm:$0xff]  }
 0x3e7   : > { %v10273_v35 = vsel %vm9890_vm9, %v10272_v31, %v10271_v47  ;;  %v10285_v1 = vsel %vm9887_vm8, %v26230_v58, %v10283_v21  ;;  %11363 = vrot.lane.b32.xlu1 %v11329_v36, %s22726_s15  ;;  %v12747_v28 = vrot.slane %v12745_v54, 1  ;;  %v11004_v49 = vshll.u32 %v22071_v51, 16  ;;  %v29177_v24 = vld [vmem:[#allocation19_spill] sm:$0xff]  ;;  %v22075_v58 = vld [vmem:[#allocation2 + $0x98] ss:$0 sps:$4 sm:$0x11]  }
 0x3e8   : > { %v10275_v57 = vsel %vm9893_vm10, %v10274_v32, %v10273_v35  ;;  %v10287_v48 = vsel %vm9890_vm9, %v26234_v61, %v10285_v1  ;;  %v1588_v33 = vadd.f32 %v22655_v12, %v29177_v24  ;;  %v1580_v51 = vadd.f32 %v22655_v12, %v25804_v52  ;;  %v22085_v31 = vld [vmem:[#allocation2 + $0xa4] ss:$0 sps:$4 sm:$0x11]   ;;  %v26316_v54 = vpop.permute.xlu0 %12217  ;;  %v22657_v1 = vld [vmem:[%s28998_s2 + $0x2] ss:$0 sm:$0xff] }
 0x3e9   : > { %v10277_v16 = vsel %vm9896_vm11, %v10276_v27, %v10275_v57  ;;  %v10289_v40 = vsel %vm9893_vm10, %v26236_v0, %v10287_v48  ;;  %v12748_v22 = vor.u32 %v12747_v28, %v12743_v17  ;;  %v11006_v61 = vrot.slane %v11004_v49, 1  ;;  %v22656_v0 = vld [vmem:[%s28998_s2 + $0x1] ss:$0 sm:$0xff]  ;;  %v29178_v17 = vld [vmem:[#allocation20_spill] sm:$0xff] }
 0x3ea   : > { %v10279_v50 = vsel %vm9899_vm12, %v10278_v60, %v10277_v16  ;;  %v26297_v39 = vsel %vm9896_vm11, %v26238_v11, %v10289_v40  ;;  %v1720_v18 = vmax.f32 %v1588_v33, 0.0  ;;  %v1591_v32 = vadd.f32 %v22655_v12, %v25812_v45  ;;  %v22083_v45 = vld [vmem:[#allocation2 + $0x50] ss:$0 sps:$4 sm:$0x11]  }
 0x3eb   : > { %v10363_v38 = vpack.c.b16 %v10279_v50, %v10279_v50  ;;  %v12753_v7 = vsel %vm10856_vm15, %v12748_v22, %v26190_v43  ;;  %v11007_v42 = vor.u32 %v11006_v61, %v11002_v8  ;;  %v1718_v11 = vmax.f32 %v1580_v51, 0.0  ;;  %v22087_v34 = vld [vmem:[#allocation2 + $0xa4] ss:$0 sps:$4 sm:$0x11]   ;;  %v26336_v51 = vld [vmem:[#allocation2 + $0x54] sm:$0xff]  }
 0x3ec   : > { %12834 = vrot.lane.b32.xlu0 %v12753_v7, %s22729_s24  ;;  %v1852_v6 = vmul.f32 %v22656_v0, %v1720_v18  ;;  %v13084_v19 = vrot.slane %v22074_v9, 1  ;;  %v13085_v25 = vrot.slane %v22075_v58, 1  ;;  %v1721_v43 = vmax.f32 %v1591_v32, 0.0  ;;  %v26325_v28 = vld [vmem:[#allocation2 + $0xa4] ss:$0 sps:$4 sm:$0x11]   ;;  %v12825_v7 = vpop.permute.xlu0 %12824 }
 0x3ed   : > { %v10523_v52 = vsel %vm23321_vm14, %v10363_v38, %v10522_v15  ;;  %v11012_v27 = vsel %vm10856_vm15, %v11007_v42, %v11011_v30  ;;  %v1583_v60 = vadd.f32 %v22655_v12, %v25930_v13  ;;  %v10239_v41 = vsel %vm9899_vm12, %v29178_v17, %v25862_v20  ;;  %v26328_v30 = vld [vmem:[#allocation2 + $0xa4] ss:$0 sps:$4 sm:$0x11]   ;;  %v26334_v22 = vld [vmem:[#allocation2 + $0xb0] ss:$0 sps:$4 sm:$0x11]  }
 0x3ee   : > { %10524 = vst [vmem:[#allocation2 + $0xb4] sm:$0xf] %v10523_v52  ;;  %11073 = vrot.lane.b32.xlu1 %v11012_v27, %s22728_s22  ;;  %v13086_v29 = vsel %vm11290_vm3, %v13084_v19, %v13085_v25  ;;  %v1850_v47 = vmul.f32 %v22656_v0, %v1718_v11  ;;  %v1853_v21 = vmul.f32 %v22656_v0, %v1721_v43  ;;  %v10265_v8 = vrot.slane %v9848_v53, 1  ;;  %v26338_v38 = vld [vmem:[#allocation2 + $0x5c] ss:$0 sps:$4 sm:$0x11]  }
 0x3ef   : > { %13128 = vst.msk [vmem:[#allocation3 + $0x100] sm:$0xff] %vm856_vm0, %v13086_v29  ;;  %v1719_v36 = vmax.f32 %v1583_v60, 0.0  ;;  %v10358_v13 = vpack.c.b16 %v10239_v41, %v10239_v41  ;;  %v9864_v35 = vunpack.c.l.b16 %v26222_v26  ;;  %v1984_v20 = vadd.f32 %v22657_v1, %v1852_v6  ;;  %v26330_v26 = vld [vmem:[#allocation2 + $0xa4] ss:$0 sps:$4 sm:$0x11]   ;;  %v11360_v6 = vpop.permute.xlu1 %11359 }
 0x3f0   : > { %v11820_v49 = vshll.u32 %v22082_v63, 16  ;;  %v1985_v57 = vadd.f32 %v22657_v1, %v1853_v21  ;;  %v11818_v12 = vshrl.u32 %v22082_v63, 16  ;;  %v11825_v24 = vshll.u32 %v22083_v45, 16  ;;  %v26352_v27 = vld [vmem:[#allocation2 + $0xb0] ss:$0 sps:$4 sm:$0x11]   ;;  %v26366_v17 = vpop.permute.xlu0 %12394 }
 0x3f1   : > { %v1851_v48 = vmul.f32 %v22656_v0, %v1719_v36  ;;  %10511 = vst.msk [vmem:[#allocation2 + $0xa0] sm:$0xf] %vm5730_vm2, %v10358_v13  ;;  %v12762_v53 = vshll.u32 %v22085_v31, 16  ;;  %v11021_v33 = vshll.u32 %v22087_v34, 16  ;;  %v10266_v9 = vsel %vm9899_vm12, %v10265_v8, %v26080_v23 }
 0x3f2   : > { %v11822_v62 = vrot.slane %v11820_v49, 1  ;;  %v1982_v58 = vadd.f32 %v22657_v1, %v1850_v47  ;;  %v2049_v16 = vpack.c.bf16 %v1985_v57, %v1984_v20  ;;  %v10292_v61 = vrot.slane %v9864_v35, 1 }
 0x3f3   : > { %v1983_v40 = vadd.f32 %v22657_v1, %v1851_v48  ;;  %v11827_v15 = vrot.slane %v11825_v24, 1  ;;  %v10361_v18 = vpack.c.b16 %v10266_v9, %v10266_v9  ;;  %v12194_v23 = vrot.slane %v26325_v28, 1 }
 0x3f4   : > { %v11823_v50 = vor.u32 %v11822_v62, %v11818_v12  ;;  %v2081_v42 = vmax.bf16 %v2049_v16, %v2047_v4  ;;  %v11331_v0 = vrot.slane %v26328_v30, 1  ;;  %v26346_v25 = vrot.slane %v12762_v53, 1 }
 0x3f5   : > { %v2048_v32 = vpack.c.bf16 %v1983_v40, %v1982_v58  ;;  %v26348_v63 = vrot.slane %v11021_v33, 1  ;;  %v13088_v52 = vrot.slane %v26330_v26, 1  ;;  %10518 = vst.msk [vmem:[#allocation2 + $0xac] sm:$0xf] %vm5730_vm2, %v10361_v18  ;;  %v12197_v43 = vrot.slane %v26334_v22, 1  ;;  %v26392_v58 = vpop.permute.xlu0 %12219 }
 0x3f6   : > { %v13166_v11 = vld [vmem:[#allocation3 + $0x100] sm:$0xff]  ;;  %v11828_v19 = vsel %vm10856_vm15, %v11823_v50, %v11827_v15  ;;  %v3633_v46 = vcombine.high %v2081_v42, %v2081_v42  ;;  %v3640_v59 = vrot.slane %v2081_v42, %v23126_v3  ;;  %v11832_v45 = vshll.u32 %v26336_v51, 16 }
 0x3f7   : > { %21744 = vmatprep.mubr.msk.bf16.mxu1 %vm856_vm0, %v13166_v11  ;;  %v2080_v4 = vmax.bf16 %v2048_v32, %v2046_v44  ;;  %11970 = vst.msk [vmem:[#allocation3 + $0x80] sm:$0xff] %vm856_vm0, %v11828_v19  ;;  %v10293_v29 = vsel %vm9899_vm12, %v10292_v61, %v26297_v39  ;;  %v11837_v39 = vshll.u32 %v26338_v38, 16  ;;  %v12774_v49 = vshll.u32 %v26352_v27, 16 }
 0x3f8   : > { %v22076_v60 = vld [vmem:[#allocation2 + $0x9c] sm:$0xff]   ;;  %12258 = vst.msk [vmem:[#allocation3 + $0x80] sm:$0xff] %vm11097_vm1, %v26146_v2  ;;  %v3647_v41 = vrot.slane %v3633_v46, %v23126_v3  ;;  %v3648_v31 = vcombine.high %v3640_v59, %v3640_v59  ;;  %v3656_v10 = vrot.slane %v3640_v59, %v23126_v3  ;;  %v11830_v2 = vshrl.u32 %v26336_v51, 16 }
 0x3f9   : > { %v3584_v37 = vcombine.high %v2080_v4, %v2080_v4  ;;  %v22077_v44 = vld [vmem:[#allocation2 + $0x9c] sm:$0xff]   ;;  %12435 = vst.msk [vmem:[#allocation3 + $0x80] sm:$0xff] %vm11387_vm13, %v26289_v5  ;;  %v26373_v34 = vrot.slane %v2080_v4, %v23126_v3  ;;  %12404 = vrot.lane.b32.xlu0 %v22076_v60, %s22726_s15  ;;  %v10364_v47 = vpack.c.b16 %v10293_v29, %v10293_v29  ;;  %v11070_v5 = vpop.permute.xlu1 %11069  ;;  %v11834_v20 = vrot.slane %v11832_v45, 1  ;;  %v13149_v29 = vld [vmem:[#allocation3 + $0x78] sm:$0xff] }
 0x3fa   : > { %12867 = vst.msk [vmem:[#allocation3 + $0x80] sm:$0xff] %vm11564_vm4, %v12825_v7  ;;  %v3649_v21 = vcombine.high %v3647_v41, %v3647_v41  ;;  %v3663_v36 = vrot.slane %v3647_v41, %v23126_v3  ;;  %v3670_v13 = vrot.slane %v3648_v31, %v23126_v3  ;;  %v3678_v8 = vcombine.high %v3656_v10, %v3656_v10 }
 0x3fb   : > { %11540 = vrot.lane.b32.xlu1 %v22077_v44, %s22729_s24  ;;  %v5179_v35 = vshrl.u32 %v3656_v10, 16  ;;  %v26383_v1 = vrot.slane %v3584_v37, %v23126_v3  ;;  %10525 = vst.msk [vmem:[#allocation2 + $0xb8] sm:$0xf] %vm5730_vm2, %v10364_v47  ;;  %v3599_v9 = vcombine.high %v26373_v34, %v26373_v34  ;;  %v11839_v26 = vrot.slane %v11837_v39, 1 }
 0x3fc   : > { %11108 = vst.msk [vmem:[#allocation3 + $0xf0] sm:$0xff] %vm11097_vm1, %v11070_v5  ;;  %v3677_v57 = vrot.slane %v3649_v21, %v23126_v3  ;;  %v3679_v48 = vcombine.high %v3663_v36, %v3663_v36  ;;  %v3680_v12 = vcombine.high %v3670_v13, %v3670_v13  ;;  %v5184_v24 = vshrl.u32 %v3670_v13, 16  ;;  %v22092_v38 = vld [vmem:[#allocation2 + $0xa8] sm:$0xff]  }
 0x3fd   : > { %11398 = vst.msk [vmem:[#allocation3 + $0xf0] sm:$0xff] %vm11387_vm13, %v11360_v6  ;;  %v5189_v62 = vshrl.u32 %v3678_v8, 16  ;;  %v5199_v53 = vshrl.u32 %v3663_v36, 16  ;;  %v5722_v33 = vmax.bf16 %v5179_v35, %v3656_v10 }
 0x3fe   : > { %v3681_v16 = vcombine.high %v3677_v57, %v3677_v57  ;;  %v5194_v40 = vshrl.u32 %v3680_v12, 16  ;;  %v5204_v61 = vshrl.u32 %v3677_v57, 16  ;;  %v5209_v50 = vshrl.u32 %v3679_v48, 16 }
 0x3ff   : > { %v5723_v15 = vmax.bf16 %v5184_v24, %v3670_v13  ;;  %v5724_v18 = vmax.bf16 %v5189_v62, %v3678_v8  ;;  %v5726_v7 = vmax.bf16 %v5199_v53, %v3663_v36  ;;  %v9520_v42 = vrot.slane %v5722_v33, %v23133_v14  ;;  %v26405_v13 = vpop.permute.xlu0 %12826  ;;  %v10533_v62 = vld [vmem:[#allocation2 + $0xc8] sm:$0x1] }
 0x400   : > { %v5214_v32 = vshrl.u32 %v3681_v16, 16  ;;  %v5725_v11 = vmax.bf16 %v5194_v40, %v3680_v12  ;;  %v5727_v6 = vmax.bf16 %v5204_v61, %v3677_v57  ;;  %v5728_v19 = vmax.bf16 %v5209_v50, %v3679_v48  ;;  %v26420_v61 = vld [vmem:[#allocation2 + $0x9c] sm:$0xfe]  }
 0x401   : > { %v13150_v46 = vld [vmem:[#allocation3 + $0x80] sm:$0xff]  ;;  %v9527_v59 = vrot.slane %v9520_v42, %v23133_v14  ;;  %v9534_v4 = vrot.slane %v5723_v15, %v23133_v14  ;;  %v9548_v60 = vrot.slane %v5724_v18, %v23133_v14  ;;  %v9576_v45 = vrot.slane %v5726_v7, %v23133_v14 }
 0x402   : > { %13453 = vmatprep.mubr.bf16.mxu0 %v13150_v46  ;;  %v5729_v41 = vmax.bf16 %v5214_v32, %v3681_v16  ;;  %v9562_v31 = vrot.slane %v5725_v11, %v23133_v14  ;;  %v9590_v10 = vrot.slane %v5727_v6, %v23133_v14  ;;  %v9604_v37 = vrot.slane %v5728_v19, %v23133_v14  ;;  %v22146_v11 = vld [vmem:[#allocation2 + $0x9c] sm:$0xff]   ;;  %v22152_v27 = vld [vmem:[#allocation2 + $0xb4] sm:$0xff]  }
 0x403   : > { %13454 = vmatmul.mubr.bf16.gmra.mrb[148].mxu0 %v13149_v29  ;;  %v9541_v44 = vrot.slane %v9534_v4, %v23133_v14  ;;  %v9555_v47 = vrot.slane %v9548_v60, %v23133_v14  ;;  %v9583_v21 = vrot.slane %v9576_v45, %v23133_v14  ;;  %v9874_v36 = vunpack.c.l.b16 %v9527_v59  ;;  %v26433_v32 = vpop.permute.xlu0 %12396  ;;  %10677 = vst.msk [vmem:[#allocation3 + $0x138] sm:$0xff] %vm856_vm0, %v22146_v11 }
 0x404   : > { %v9569_v8 = vrot.slane %v9562_v31, %v23133_v14  ;;  %v26409_v5 = vrot.slane %v9590_v10, %v23133_v14  ;;  %v9618_v35 = vrot.slane %v5729_v41, %v23133_v14  ;;  %v3607_v57 = vrot.slane %v26373_v34, %v23126_v3  ;;  %v11537_v34 = vpop.permute.xlu1 %11536  ;;  %10679 = vst.msk [vmem:[#allocation3 + $0x168] sm:$0xff] %vm856_vm0, %v22152_v27 }
 0x405   : > { %v9875_v48 = vunpack.c.l.b16 %v9541_v44  ;;  %v9876_v12 = vunpack.c.l.b16 %v9555_v47  ;;  %v9878_v24 = vunpack.c.l.b16 %v9583_v21  ;;  %v3600_v53 = vcombine.high %v26383_v1, %v26383_v1  ;;  %11575 = vst.msk [vmem:[#allocation3 + $0xf0] sm:$0xff] %vm11564_vm4, %v11537_v34 }
 0x406   : > { %v26417_v33 = vrot.slane %v9604_v37, %v23133_v14  ;;  %v9625_v16 = vrot.slane %v9618_v35, %v23133_v14  ;;  %v9877_v40 = vunpack.c.l.b16 %v9569_v8  ;;  %v26424_v50 = vor.u32 %v11834_v20, %v11830_v2 }
 0x407   : > { %v9879_v15 = vunpack.c.l.b16 %v26409_v5  ;;  %v26427_v18 = vrot.slane %v9874_v36, 7  ;;  %v26429_v7 = vrot.slane %v9875_v48, 6  ;;  %v3614_v42 = vrot.slane %v26383_v1, %v23126_v3  ;;  %v26448_v48 = vpop.permute.xlu0 %12221 }
 0x408   : > { %v26436_v6 = vrot.slane %v9876_v12, 5  ;;  %v26438_v51 = vrot.slane %v9877_v40, 4  ;;  %v26440_v2 = vrot.slane %v9878_v24, 3  ;;  %v20553_v20 = vcombine.low %v9625_v16, %v9625_v16 }
 0x409   : > { %v3621_v19 = vrot.slane %v3599_v9, %v23126_v3  ;;  %v3628_v46 = vrot.slane %v3600_v53, %v23126_v3  ;;  %v3629_v59 = vcombine.high %v3607_v57, %v3607_v57  ;;  %v3630_v4 = vcombine.high %v3614_v42, %v3614_v42 }
 0x40a   : > { %v10534_v1 = vsel %vm23219_vm5, %v20553_v20, %v10533_v62  ;;  %v5139_v60 = vshrl.u32 %v3607_v57, 16  ;;  %v5159_v45 = vshrl.u32 %v3614_v42, 16  ;;  %v12193_v29 = vrot.slane %v26420_v61, 1 }
 0x40b   : > { %10535 = vst [vmem:[#allocation2 + $0xc8] sm:$0x1] %v10534_v1  ;;  %v3631_v41 = vcombine.high %v3621_v19, %v3621_v19  ;;  %v3632_v31 = vcombine.high %v3628_v46, %v3628_v46  ;;  %v5144_v10 = vshrl.u32 %v3621_v19, 16  ;;  %v5149_v37 = vshrl.u32 %v3629_v59, 16 }
 0x40c   : > { %v5164_v44 = vshrl.u32 %v3628_v46, 16  ;;  %v5169_v9 = vshrl.u32 %v3630_v4, 16  ;;  %v5714_v47 = vmax.bf16 %v5139_v60, %v3607_v57  ;;  %v5718_v21 = vmax.bf16 %v5159_v45, %v3614_v42 }
 0x40d   : > { %v5154_v36 = vshrl.u32 %v3631_v41, 16  ;;  %v5174_v8 = vshrl.u32 %v3632_v31, 16  ;;  %v5715_v5 = vmax.bf16 %v5144_v10, %v3621_v19  ;;  %v5716_v35 = vmax.bf16 %v5149_v37, %v3629_v59 }
 0x40e   : > { %v5719_v56 = vmax.bf16 %v5164_v44, %v3628_v46  ;;  %v5720_v12 = vmax.bf16 %v5169_v9, %v3630_v4  ;;  %v9408_v24 = vrot.slane %v5714_v47, %v23133_v14  ;;  %v9464_v62 = vrot.slane %v5718_v21, %v23133_v14  ;;  %v26466_v9 = vpop.permute.xlu0 %12828 }
 0x40f   : > { %v5717_v53 = vmax.bf16 %v5154_v36, %v3631_v41  ;;  %v5721_v16 = vmax.bf16 %v5174_v8, %v3632_v31  ;;  %v9422_v40 = vrot.slane %v5715_v5, %v23133_v14  ;;  %v9436_v61 = vrot.slane %v5716_v35, %v23133_v14  ;;  %v22080_v41 = vld [vmem:[#allocation2 + $0x9c] sm:$0xfe]   ;;  %v22149_v35 = vld [vmem:[#allocation2 + $0xa8] sm:$0xff]  }
 0x410   : > { %v9415_v57 = vrot.slane %v9408_v24, %v23133_v14  ;;  %v9471_v34 = vrot.slane %v9464_v62, %v23133_v14  ;;  %v9478_v42 = vrot.slane %v5719_v56, %v23133_v14  ;;  %v9492_v11 = vrot.slane %v5720_v12, %v23133_v14  ;;  %v22084_v5 = vld [vmem:[#allocation2 + $0x9c] sm:$0xff]   ;;  %10678 = vst.msk [vmem:[#allocation3 + $0x150] sm:$0xff] %vm856_vm0, %v22149_v35 }
 0x411   : > { %v9429_v20 = vrot.slane %v9422_v40, %v23133_v14  ;;  %v9443_v19 = vrot.slane %v9436_v61, %v23133_v14  ;;  %v9450_v46 = vrot.slane %v5717_v53, %v23133_v14  ;;  %v9506_v59 = vrot.slane %v5721_v16, %v23133_v14  ;;  %v22086_v53 = vld [vmem:[#allocation2 + $0x9c] sm:$0xff]  }
 0x412   : > { %v9485_v4 = vrot.slane %v9478_v42, %v23133_v14  ;;  %v9499_v1 = vrot.slane %v9492_v11, %v23133_v14  ;;  %v9866_v60 = vunpack.c.l.b16 %v9415_v57  ;;  %v9870_v45 = vunpack.c.l.b16 %v9471_v34  ;;  %v22089_v16 = vld [vmem:[#allocation2 + $0x9c] sm:$0xfe]  }
 0x413   : > { %v9457_v31 = vrot.slane %v9450_v46, %v23133_v14  ;;  %v9513_v10 = vrot.slane %v9506_v59, %v23133_v14  ;;  %v9867_v37 = vunpack.c.l.b16 %v9429_v20  ;;  %v9868_v44 = vunpack.c.l.b16 %v9443_v19  ;;  %v26476_v19 = vpop.permute.xlu0 %12398  ;;  %v10529_v35 = vld [vmem:[#allocation2 + $0xc0] sm:$0xf] }
 0x414   : > { %v10317_v47 = vrot.slane %v9879_v15, 2  ;;  %v9871_v21 = vunpack.c.l.b16 %v9485_v4  ;;  %v9872_v36 = vunpack.c.l.b16 %v9499_v1  ;;  %v10294_v8 = vrot.slane %v9866_v60, 7  ;;  %v22093_v60 = vld [vmem:[#allocation2 + $0xa8] sm:$0xfe]  }
 0x415   : > { %v9869_v56 = vunpack.c.l.b16 %v9457_v31  ;;  %v9873_v12 = vunpack.c.l.b16 %v9513_v10  ;;  %v10295_v24 = vrot.slane %v9867_v37, 6  ;;  %v10297_v62 = vrot.slane %v9868_v44, 5  ;;  %v26491_v10 = vld [vmem:[#allocation2 + $0xa8] sm:$0xff]  }
 0x416   : > { %v10301_v40 = vrot.slane %v9870_v45, 3  ;;  %v10303_v61 = vrot.slane %v9871_v21, 2  ;;  %v12195_v57 = vsel %vm11290_vm3, %v12193_v29, %v12194_v23  ;;  %v11330_v34 = vrot.slane %v22080_v41, 1  ;;  %v22096_v45 = vld [vmem:[#allocation2 + $0xb0] ss:$0 sps:$4 sm:$0x11]  }
 0x417   : > { %v10296_v15 = vsel %vm9884_vm7, %v10295_v24, %v10294_v8  ;;  %v10299_v42 = vrot.slane %v9869_v56, 4  ;;  %v10305_v11 = vrot.slane %v9872_v36, 1  ;;  %v10308_v20 = vsel %vm9902_vm6, %v26427_v18, %v9873_v12  ;;  %12229 = vrot.lane.b32.xlu0 %v12195_v57, %s22728_s22  ;;  %v22102_v36 = vld [vmem:[#allocation2 + $0xb0] ss:$0 sps:$4 sm:$0x11]   ;;  %v26503_v12 = vld [vmem:[#allocation2 + $0xa8] sm:$0xff]  }
 0x418   : > { %v10298_v46 = vsel %vm9887_vm8, %v10297_v62, %v10296_v15  ;;  %v10310_v28 = vsel %vm9884_vm7, %v26429_v7, %v10308_v20  ;;  %v11332_v23 = vsel %vm11290_vm3, %v11330_v34, %v11331_v0  ;;  %v12757_v29 = vshll.u32 %v22084_v5, 16  ;;  %v22095_v0 = vld [vmem:[#allocation2 + $0xa8] sm:$0xfe]   ;;  %v22111_v34 = vld [vmem:[#allocation2 + $0x68] ss:$0 sps:$4 sm:$0x11]  }
 0x419   : > { %v10300_v59 = vsel %vm9890_vm9, %v10299_v42, %v10298_v46  ;;  %v10312_v4 = vsel %vm9887_vm8, %v26436_v6, %v10310_v28  ;;  %11365 = vrot.lane.b32.xlu1 %v11332_v23, %s22726_s15  ;;  %v12755_v18 = vshrl.u32 %v22084_v5, 16  ;;  %v11016_v1 = vshll.u32 %v22086_v53, 16  ;;  %v22091_v42 = vld [vmem:[#allocation2 + $0xa8] sm:$0xff]   ;;  %v22110_v46 = vld [vmem:[#allocation2 + $0x60] sm:$0xff]   ;;  %v26523_v28 = vld [vmem:[#allocation2 + $0xb4] sm:$0xfe]  }
 0x41a   : > { %v10302_v41 = vsel %vm9893_vm10, %v10301_v40, %v10300_v59  ;;  %v10314_v7 = vsel %vm9890_vm9, %v26438_v51, %v10312_v4  ;;  %v12759_v30 = vrot.slane %v12757_v29, 1  ;;  %v13087_v31 = vrot.slane %v22089_v16, 1  ;;  %v22104_v16 = vld [vmem:[#allocation2 + $0xa8] sm:$0xfe]   ;;  %v22112_v23 = vld [vmem:[#allocation2 + $0xb4] sm:$0xff]  }
 0x41b   : > { %v10304_v37 = vsel %vm9896_vm11, %v10303_v61, %v10302_v41  ;;  %v10316_v6 = vsel %vm9893_vm10, %v26440_v2, %v10314_v7  ;;  %v11014_v44 = vshrl.u32 %v22086_v53, 16  ;;  %v11018_v21 = vrot.slane %v11016_v1, 1  ;;  %v22105_v40 = vld [vmem:[#allocation2 + $0xb0] ss:$0 sps:$4 sm:$0x11]   ;;  %v26507_v61 = vpop.permute.xlu0 %12223 }
 0x41c   : > { %v10306_v8 = vsel %vm9899_vm12, %v10305_v11, %v10304_v37  ;;  %v26498_v5 = vsel %vm9896_vm11, %v10317_v47, %v10316_v6  ;;  %v12760_v51 = vor.u32 %v12759_v30, %v12755_v18  ;;  %v13089_v56 = vsel %vm11290_vm3, %v13087_v31, %v13088_v52  ;;  %v26525_v29 = vld [vmem:[#allocation2 + $0xbc] ss:$0 sps:$4 sm:$0x11]   ;;  %v22117_v37 = vld [vmem:[#allocation2 + $0xb4] sm:$0xfe]  }
 0x41d   : > { %v9880_v24 = vunpack.c.l.b16 %v26417_v33  ;;  %v10366_v62 = vpack.c.b16 %v10306_v8, %v10306_v8  ;;  %v11019_v2 = vor.u32 %v11018_v21, %v11014_v44  ;;  %13129 = vst.msk [vmem:[#allocation3 + $0x118] sm:$0xff] %vm856_vm0, %v13089_v56  ;;  %v12196_v53 = vrot.slane %v22093_v60, 1  ;;  %v26533_v1 = vld [vmem:[#allocation2 + $0xbc] ss:$0 sps:$4 sm:$0x11]  }
 0x41e   : > { %v12765_v47 = vsel %vm10856_vm15, %v12760_v51, %v26346_v25  ;;  %v11333_v57 = vrot.slane %v22095_v0, 1  ;;  %v12769_v52 = vshll.u32 %v26491_v10, 16  ;;  %v11334_v11 = vrot.slane %v22096_v45, 1  ;;  %v22109_v7 = vld [vmem:[#allocation2 + $0xbc] ss:$0 sps:$4 sm:$0x11]  }
 0x41f   : > { %v10530_v33 = vsel %vm23321_vm14, %v10366_v62, %v10529_v35  ;;  %12836 = vrot.lane.b32.xlu0 %v12765_v47, %s22729_s24  ;;  %v11024_v15 = vsel %vm10856_vm15, %v11019_v2, %v26348_v63  ;;  %v11033_v20 = vshll.u32 %v22102_v36, 16  ;;  %v11840_v25 = vsel %vm10856_vm15, %v26424_v50, %v11839_v26  ;;  %v22118_v50 = vld [vmem:[#allocation2 + $0xbc] ss:$0 sps:$4 sm:$0x11]  }
 0x420   : > { %10531 = vst [vmem:[#allocation2 + $0xc0] sm:$0xf] %v10530_v33  ;;  %11075 = vrot.lane.b32.xlu1 %v11024_v15, %s22728_s22  ;;  %v12771_v39 = vrot.slane %v12769_v52, 1  ;;  %v11028_v55 = vshll.u32 %v26503_v12, 16  ;;  %v26527_v63 = vrot.slane %v9880_v24, 1  ;;  %v12198_v59 = vsel %vm11290_vm3, %v12196_v53, %v12197_v43  ;;  %11971 = vst.msk [vmem:[#allocation3 + $0x98] sm:$0xff] %vm856_vm0, %v11840_v25 }
 0x421   : > { %v13090_v4 = vrot.slane %v22104_v16, 1  ;;  %v13091_v18 = vrot.slane %v22105_v40, 1  ;;  %v11335_v60 = vsel %vm11290_vm3, %v11333_v57, %v11334_v11  ;;  %12259 = vst.msk [vmem:[#allocation3 + $0x98] sm:$0xff] %vm11097_vm1, %v26316_v54  ;;  %v12767_v45 = vshrl.u32 %v26491_v10, 16  ;;  %v26541_v43 = vld [vmem:[#allocation2 + $0xb4] sm:$0xff]   ;;  %v26548_v10 = vpop.permute.xlu0 %12830  ;;  %v22125_v33 = vld [vmem:[#allocation2 + $0x6c] sm:$0xff]  }
 0x422   : > { %v12776_v41 = vrot.slane %v12774_v49, 1  ;;  %v11030_v22 = vrot.slane %v11028_v55, 1  ;;  %v11026_v30 = vshrl.u32 %v26503_v12, 16  ;;  %12436 = vst.msk [vmem:[#allocation3 + $0x98] sm:$0xff] %vm11387_vm13, %v26366_v17  ;;  %v11844_v0 = vshll.u32 %v22110_v46, 16  ;;  %v26579_v25 = vld [vmem:[#allocation2 + $0xcc] sm:$0xff]  }
 0x423   : > { %12406 = vrot.lane.b32.xlu0 %v22091_v42, %s22726_s15  ;;  %v13092_v31 = vsel %vm11290_vm3, %v13090_v4, %v13091_v18  ;;  %v11849_v54 = vshll.u32 %v22111_v34, 16  ;;  %v12772_v6 = vor.u32 %v12771_v39, %v12767_v45  ;;  %v11035_v44 = vrot.slane %v11033_v20, 1  ;;  %12868 = vst.msk [vmem:[#allocation3 + $0x98] sm:$0xff] %vm11564_vm4, %v26405_v13  ;;  %v26556_v56 = vld [vmem:[#allocation2 + $0x74] ss:$0 sps:$4 sm:$0x11]  }
 0x424   : > { %v13169_v49 = vld [vmem:[#allocation3 + $0x118] sm:$0xff]  ;;  %11542 = vrot.lane.b32.xlu1 %v22092_v38, %s22729_s24  ;;  %13130 = vst.msk [vmem:[#allocation3 + $0x130] sm:$0xff] %vm856_vm0, %v13092_v31  ;;  %v12199_v21 = vrot.slane %v26523_v28, 1  ;;  %v11040_v36 = vshll.u32 %v22112_v23, 16  ;;  %v11031_v17 = vor.u32 %v11030_v22, %v11026_v30  ;;  %v11842_v8 = vshrl.u32 %v22110_v46, 16  ;;  %v26567_v40 = vpop.permute.xlu1 %11361  ;;  %v26581_v39 = vld [vmem:[#allocation2 + $0x78] sm:$0xff]  }
 0x425   : > { %21745 = vmatmul.mubr.msk.bf16.gmra.mrb[4].mxu1 %vm856_vm0, %v13169_v49  ;;  %v11846_v35 = vrot.slane %v11844_v0, 1  ;;  %v11038_v51 = vshrl.u32 %v22112_v23, 16  ;;  %v11851_v12 = vrot.slane %v11849_v54, 1  ;;  %v11045_v62 = vshll.u32 %v26525_v29, 16  ;;  %v26561_v53 = vld [vmem:[#allocation2 + $0xb4] sm:$0xfe]   ;;  %v26573_v15 = vpop.permute.xlu0 %12400 }
 0x426   : > { %v11042_v24 = vrot.slane %v11040_v36, 1  ;;  %v12781_v2 = vshll.u32 %v26541_v43, 16  ;;  %v26563_v16 = vld [vmem:[#allocation2 + $0xbc] ss:$0 sps:$4 sm:$0x11]   ;;  %v12786_v57 = vshll.u32 %v26533_v1, 16  ;;  %v12777_v42 = vsel %vm10856_vm15, %v12772_v6, %v12776_v41 }
 0x427   : > { %v26565_v13 = vld [vmem:[#allocation2 + $0xc8] ss:$0 sps:$4 sm:$0x11]   ;;  %12231 = vrot.lane.b32.xlu0 %v12198_v59, %s22728_s22  ;;  %v11847_v47 = vor.u32 %v11846_v35, %v11842_v8  ;;  %v13093_v26 = vrot.slane %v22117_v37, 1  ;;  %v13094_v52 = vrot.slane %v22118_v50, 1  ;;  %v12200_v11 = vrot.slane %v22109_v7, 1 }
 0x428   : > { %v26571_v34 = vld [vmem:[#allocation2 + $0xc8] ss:$0 sps:$4 sm:$0x11]   ;;  %11367 = vrot.lane.b32.xlu1 %v11335_v60, %s22726_s15  ;;  %v11043_v20 = vor.u32 %v11042_v24, %v11038_v51  ;;  %v12783_v46 = vrot.slane %v12781_v2, 1  ;;  %v11036_v28 = vsel %vm10856_vm15, %v11031_v17, %v11035_v44  ;;  %v22106_v23 = vld [vmem:[#allocation2 + $0xb4] sm:$0xff]   ;;  %v10320_v4 = vsel %vm9899_vm12, %v26527_v63, %v26498_v5 }
 0x429   : > { %v26577_v38 = vld [vmem:[#allocation2 + $0xc8] ss:$0 sps:$4 sm:$0x11]   ;;  %v26583_v55 = vld [vmem:[#allocation2 + $0x80] ss:$0 sps:$4 sm:$0x11]   ;;  %v11852_v29 = vsel %vm10856_vm15, %v11847_v47, %v11851_v12  ;;  %v13095_v59 = vsel %vm11290_vm3, %v13093_v26, %v13094_v52  ;;  %v26594_v1 = vsel %vm11290_vm3, %v12199_v21, %v12200_v11  ;;  %v10367_v45 = vpack.c.b16 %v10320_v4, %v10320_v4  ;;  %v26622_v35 = vpop.permute.xlu0 %12225 }
 0x42a   : > { %v26591_v18 = vld [vmem:[#allocation2 + $0xd4] ss:$0 sps:$4 sm:$0x11]   ;;  %11972 = vst.msk [vmem:[#allocation3 + $0xb0] sm:$0xff] %vm856_vm0, %v11852_v29  ;;  %v11047_v50 = vrot.slane %v11045_v62, 1  ;;  %v12779_v60 = vshrl.u32 %v26541_v43, 16 }
 0x42b   : > { %13131 = vst.msk [vmem:[#allocation3 + $0x148] sm:$0xff] %vm856_vm0, %v13095_v59  ;;  %v26599_v41 = vld [vmem:[#allocation2 + $0x84] sm:$0xff]   ;;  %v26601_v22 = vld [vmem:[#allocation2 + $0x8c] ss:$0 sps:$4 sm:$0x11]   ;;  %12838 = vrot.lane.b32.xlu0 %v12777_v42, %s22729_s24  ;;  %v12788_v63 = vrot.slane %v12786_v57, 1 }
 0x42c   : > { %v13172_v5 = vld [vmem:[#allocation3 + $0x130] sm:$0xff]  ;;  %12260 = vst.msk [vmem:[#allocation3 + $0xb0] sm:$0xff] %vm11097_vm1, %v26392_v58  ;;  %v11336_v7 = vrot.slane %v26561_v53, 1  ;;  %v13153_v30 = vld [vmem:[#allocation3 + $0x98] sm:$0xff]  ;;  %v11856_v31 = vshll.u32 %v22125_v33, 16  ;;  %v11861_v43 = vshll.u32 %v26556_v56, 16  ;;  %11077 = vrot.lane.b32.xlu1 %v11036_v28, %s22728_s22  ;;  %v11048_v54 = vsel %vm10856_vm15, %v11043_v20, %v11047_v50  ;;  %v11072_v49 = vpop.permute.xlu1 %11071 }
 0x42d   : > { %21748 = vmatprep.mubr.msk.bf16.mxu1 %vm856_vm0, %v13172_v5  ;;  %v22107_v0 = vld [vmem:[#allocation2 + $0xb4] sm:$0xff]   ;;  %v12784_v37 = vor.u32 %v12783_v46, %v12779_v60  ;;  %v11337_v27 = vrot.slane %v26563_v16, 1  ;;  %10532 = vst.msk [vmem:[#allocation2 + $0xc4] sm:$0xf] %vm5730_vm2, %v10367_v45  ;;  %v12798_v58 = vshll.u32 %v26565_v13, 16  ;;  %13461 = vmatprep.mubr.bf16.mxu0 %v13153_v30  ;;  %v12203_v44 = vrot.slane %v26571_v34, 1 }
 0x42e   : > { %12437 = vst.msk [vmem:[#allocation3 + $0xb0] sm:$0xff] %vm11387_vm13, %v26433_v32  ;;  %v26616_v6 = vld [vmem:[#allocation2 + $0x98] ss:$0 sps:$4 sm:$0x11]   ;;  %v13152_v21 = vld [vmem:[#allocation3 + $0x90] sm:$0xff]  ;;  %v11854_v36 = vshrl.u32 %v22125_v33, 16 }
 0x42f   : > { %v11858_v17 = vrot.slane %v11856_v31, 1  ;;  %12869 = vst.msk [vmem:[#allocation3 + $0xb0] sm:$0xff] %vm11564_vm4, %v26466_v9  ;;  %v12805_v8 = vshll.u32 %v26579_v25, 16  ;;  %v22141_v32 = vld [vmem:[#allocation2 + $0x90] sm:$0xff]   ;;  %13462 = vmatmul.mubr.bf16.gmra.mrb[152].mxu0 %v13152_v21  ;;  %v13097_v51 = vrot.slane %v26577_v38, 1  ;;  %v12803_v56 = vshrl.u32 %v26579_v25, 16  ;;  %12408 = vrot.lane.b32.xlu0 %v22106_v23, %s22726_s15 }
 0x430   : > { %11109 = vst.msk [vmem:[#allocation3 + $0x108] sm:$0xff] %vm11097_vm1, %v11072_v49  ;;  %v11868_v12 = vshll.u32 %v26581_v39, 16  ;;  %v11873_v24 = vshll.u32 %v26583_v55, 16  ;;  %v11863_v62 = vrot.slane %v11861_v43, 1  ;;  %v26632_v2 = vrot.slane %v12798_v58, 1  ;;  %11544 = vrot.lane.b32.xlu1 %v22107_v0, %s22729_s24  ;;  %v26648_v29 = vld [vmem:[#allocation2 + $0x9c] sm:$0xff]  }
 0x431   : > { %11399 = vst.msk [vmem:[#allocation3 + $0x108] sm:$0xff] %vm11387_vm13, %v26567_v40  ;;  %v11859_v9 = vor.u32 %v11858_v17, %v11854_v36  ;;  %v12810_v13 = vshll.u32 %v26591_v18, 16  ;;  %v11866_v47 = vshrl.u32 %v26581_v39, 16  ;;  %v11880_v26 = vshll.u32 %v26599_v41, 16  ;;  %v26650_v59 = vld [vmem:[#allocation2 + $0xa8] sm:$0xff]   ;;  %v12833_v18 = vpop.permute.xlu0 %12832  ;;  %v26665_v30 = vld [vmem:[#allocation2 + $0xb4] sm:$0xff]  }
 0x432   : > { %v11870_v57 = vrot.slane %v11868_v12, 1  ;;  %v11885_v52 = vshll.u32 %v26601_v22, 16  ;;  %v26639_v33 = vld [vmem:[#allocation2 + $0xa4] ss:$0 sps:$4 sm:$0x11]   ;;  %v26642_v11 = vrot.slane %v12805_v8, 1  ;;  %v12789_v4 = vsel %vm10856_vm15, %v12784_v37, %v12788_v63 }
 0x433   : > { %v13175_v40 = vld [vmem:[#allocation3 + $0x148] sm:$0xff]  ;;  %v11864_v42 = vsel %vm10856_vm15, %v11859_v9, %v11863_v62  ;;  %v11878_v20 = vshrl.u32 %v26599_v41, 16  ;;  %v11892_v46 = vshll.u32 %v22141_v32, 16  ;;  %v11875_v55 = vrot.slane %v11873_v24, 1  ;;  %12233 = vrot.lane.b32.xlu0 %v26594_v1, %s22728_s22 }
 0x434   : > { %21749 = vmatmul.mubr.msk.bf16.gmra.mrb[8].mxu1 %vm856_vm0, %v13175_v40  ;;  %11973 = vst.msk [vmem:[#allocation3 + $0xc8] sm:$0xff] %vm856_vm0, %v11864_v42  ;;  %v11871_v39 = vor.u32 %v11870_v57, %v11866_v47  ;;  %v11882_v28 = vrot.slane %v11880_v26, 1  ;;  %v11897_v23 = vshll.u32 %v26616_v6, 16  ;;  %v11890_v50 = vshrl.u32 %v22141_v32, 16  ;;  %11079 = vrot.lane.b32.xlu1 %v11048_v54, %s22728_s22  ;;  %v22123_v41 = vld [vmem:[#allocation2 + $0xc0] sm:$0xfe]  }
 0x435   : > { %12261 = vst.msk [vmem:[#allocation3 + $0xc8] sm:$0xff] %vm11097_vm1, %v26448_v48  ;;  %v11894_v60 = vrot.slane %v11892_v46, 1  ;;  %v26657_v45 = vld [vmem:[#allocation2 + $0xb0] ss:$0 sps:$4 sm:$0x11]   ;;  %v26660_v22 = vrot.slane %v12810_v13, 1  ;;  %v11338_v31 = vsel %vm11290_vm3, %v11336_v7, %v11337_v27 }
 0x436   : > { %12438 = vst.msk [vmem:[#allocation3 + $0xc8] sm:$0xff] %vm11387_vm13, %v26476_v19  ;;  %v11876_v1 = vsel %vm10856_vm15, %v11871_v39, %v11875_v55  ;;  %v11883_v5 = vor.u32 %v11882_v28, %v11878_v20  ;;  %v11887_v63 = vrot.slane %v11885_v52, 1  ;;  %v26667_v48 = vld [vmem:[#allocation2 + $0xbc] ss:$0 sps:$4 sm:$0x11]   ;;  %v22127_v43 = vld [vmem:[#allocation2 + $0xc0] sm:$0xff]  }
 0x437   : > { %v13155_v0 = vld [vmem:[#allocation3 + $0xa8] sm:$0xff]  ;;  %11974 = vst.msk [vmem:[#allocation3 + $0xe0] sm:$0xff] %vm856_vm0, %v11876_v1  ;;  %v11895_v19 = vor.u32 %v11894_v60, %v11890_v50  ;;  %v11899_v54 = vrot.slane %v11897_v23, 1  ;;  %v12202_v37 = vrot.slane %v22123_v41, 1  ;;  %v13156_v49 = vld [vmem:[#allocation3 + $0xb0] sm:$0xff]  ;;  %v11904_v53 = vshll.u32 %v26648_v29, 16  ;;  %12840 = vrot.lane.b32.xlu0 %v12789_v4, %s22729_s24 }
 0x438   : > { %12870 = vst.msk [vmem:[#allocation3 + $0xc8] sm:$0xff] %vm11564_vm4, %v26548_v10  ;;  %v22130_v58 = vld [vmem:[#allocation2 + $0xc0] sm:$0xfe]   ;;  %v11888_v16 = vsel %vm10856_vm15, %v11883_v5, %v11887_v63  ;;  %v11909_v7 = vshll.u32 %v26639_v33, 16  ;;  %v12791_v6 = vshrl.u32 %v22127_v43, 16  ;;  %v12793_v21 = vshll.u32 %v22127_v43, 16  ;;  %13469 = vmatprep.mubr.bf16.mxu0 %v13156_v49  ;;  %v12403_v10 = vpop.permute.xlu0 %12402  ;;  %11369 = vrot.lane.b32.xlu1 %v11338_v31, %s22726_s15 }
 0x439   : > { %12262 = vst.msk [vmem:[#allocation3 + $0xe0] sm:$0xff] %vm11097_vm1, %v26507_v61  ;;  %v22121_v27 = vld [vmem:[#allocation2 + $0xc0] sm:$0xff]   ;;  %v11900_v61 = vsel %vm10856_vm15, %v11895_v19, %v11899_v54  ;;  %v11902_v36 = vshrl.u32 %v26648_v29, 16  ;;  %v26688_v17 = vld [vmem:[#allocation2 + $0xc8] ss:$0 sps:$4 sm:$0x11]   ;;  %v12204_v32 = vsel %vm11290_vm3, %v12202_v37, %v12203_v44  ;;  %13470 = vmatmul.mubr.bf16.gmra.mrb[156].mxu0 %v13155_v0 }
 0x43a   : > { %12439 = vst.msk [vmem:[#allocation3 + $0xe0] sm:$0xff] %vm11387_vm13, %v26573_v15  ;;  %v22122_v8 = vld [vmem:[#allocation2 + $0xc0] sm:$0xff]   ;;  %v13096_v12 = vrot.slane %v22130_v58, 1  ;;  %v11539_v15 = vpop.permute.xlu1 %11538  ;;  %v11906_v24 = vrot.slane %v11904_v53, 1  ;;  %v11914_v9 = vshrl.u32 %v26650_v59, 16  ;;  %v21364_v13 = vpop.f32.mrb[128].mxu0 }
 0x43b   : > { %11975 = vst.msk [vmem:[#allocation3 + $0xf8] sm:$0xff] %vm856_vm0, %v11888_v16  ;;  %11976 = vst.msk [vmem:[#allocation3 + $0x110] sm:$0xff] %vm856_vm0, %v11900_v61  ;;  %v26699_v62 = vld [vmem:[#allocation2 + $0xc0] sm:$0xff]   ;;  %v12795_v47 = vrot.slane %v12793_v21, 1  ;;  %v11911_v34 = vrot.slane %v11909_v7, 1  ;;  %v11916_v44 = vshll.u32 %v26650_v59, 16  ;;  %12410 = vrot.lane.b32.xlu0 %v22121_v27, %s22726_s15  ;;  %v26735_v16 = vor.u32 %v26642_v11, %v12803_v56 }
 0x43c   : > { %12263 = vst.msk [vmem:[#allocation3 + $0xf8] sm:$0xff] %vm11097_vm1, %v26622_v35  ;;  %v11921_v35 = vshll.u32 %v26657_v45, 16  ;;  %v21365_v57 = vpop.f32.mrb[129].mxu0  ;;  %v26705_v26 = vld [vmem:[#allocation2 + $0x20] ss:$0 sps:$4 sm:$0x11]   ;;  %v13098_v52 = vsel %vm11290_vm3, %v13096_v12, %v13097_v51  ;;  %v11907_v33 = vor.u32 %v11906_v24, %v11902_v36  ;;  %11546 = vrot.lane.b32.xlu1 %v22122_v8, %s22729_s24 }
 0x43d   : > { %12871 = vst.msk [vmem:[#allocation3 + $0xe0] sm:$0xff] %vm11564_vm4, %v12833_v18  ;;  %11576 = vst.msk [vmem:[#allocation3 + $0x108] sm:$0xff] %vm11564_vm4, %v11539_v15  ;;  %v11928_v40 = vshll.u32 %v26665_v30, 16  ;;  %v11933_v42 = vshll.u32 %v26667_v48, 16  ;;  %v21367_v20 = vpop.f32.mrb[130].mxu0  ;;  %v12796_v39 = vor.u32 %v12795_v47, %v12791_v6  ;;  %v11918_v55 = vrot.slane %v11916_v44, 1 }
 0x43e   : > { %12440 = vst.msk [vmem:[#allocation3 + $0xf8] sm:$0xff] %vm11387_vm13, %v12403_v10  ;;  %v22157_v46 = vld [vmem:[#allocation2 + $0x18] sm:$0xfe]   ;;  %v11923_v28 = vrot.slane %v11921_v35, 1  ;;  %v11926_v23 = vshrl.u32 %v26665_v30, 16  ;;  %v21368_v29 = vpop.f32.mrb[131].mxu0  ;;  %v11912_v59 = vsel %vm10856_vm15, %v11907_v33, %v11911_v34  ;;  %v26725_v63 = vadd.f32 %v21365_v57, %v21364_v13 }
 0x43f   : > { %13132 = vst.msk [vmem:[#allocation3 + $0x160] sm:$0xff] %vm856_vm0, %v13098_v52  ;;  %v26715_v38 = vld [vmem:[#allocation2 + $0x2c] ss:$0 sps:$4 sm:$0x11]   ;;  %v13159_v51 = vld [vmem:[#allocation3 + $0xc8] sm:$0xff]  ;;  %v11930_v4 = vrot.slane %v11928_v40, 1  ;;  %v11919_v41 = vor.u32 %v11918_v55, %v11914_v9  ;;  %v26727_v19 = vadd.f32 %v21368_v29, %v21367_v20  ;;  %12235 = vrot.lane.b32.xlu0 %v12204_v32, %s22728_s22  ;;  %v12801_v49 = vsel %vm10856_vm15, %v12796_v39, %v26632_v2  ;;  %s28954_s22 = scalar_lea.hbm %s29007_s11, %s21278_s29 }
 0x440   : > { %v11938_v18 = vshrl.u32 %v26699_v62, 16  ;;  %v11940_v50 = vshll.u32 %v26699_v62, 16  ;;  %v22159_v60 = vld [vmem:[#allocation2 + $0x24] sm:$0xfe]   ;;  %13477 = vmatprep.mubr.bf16.mxu0 %v13159_v51  ;;  %11977 = vst.msk [vmem:[#allocation3 + $0x128] sm:$0xff] %vm856_vm0, %v11912_v59  ;;  %v11935_v1 = vrot.slane %v11933_v42, 1 }
 0x441   : > { %v26721_v45 = vld [vmem:[#allocation2 + $0x38] ss:$0 sps:$4 sm:$0x11]   ;;  %v11945_v5 = vshll.u32 %v26688_v17, 16  ;;  %v22161_v30 = vld [vmem:[#allocation2 + $0x30] sm:$0xfe]   ;;  %v11931_v43 = vor.u32 %v11930_v4, %v11926_v23  ;;  %v11924_v27 = vsel %vm10856_vm15, %v11919_v41, %v11923_v28 }
 0x442   : > { %v22163_v48 = vld [vmem:[#allocation2 + $0x3c] sm:$0xfe]   ;;  %v22164_v31 = vld [vmem:[#allocation2 + $0x44] ss:$0 sps:$4 sm:$0x11]   ;;  %v11942_v0 = vrot.slane %v11940_v50, 1 }
 0x443   : > { %v13054_v54 = vrot.slane %v22157_v46, 1  ;;  %v22165_v37 = vld [vmem:[#allocation2 + $0x48] sm:$0xfe]   ;;  %v22166_v58 = vld [vmem:[#allocation2 + $0x50] ss:$0 sps:$4 sm:$0x11]   ;;  %v11936_v2 = vsel %vm10856_vm15, %v11931_v43, %v11935_v1  ;;  %12842 = vrot.lane.b32.xlu0 %v12801_v49, %s22729_s24 }
 0x444   : > { %v13158_v53 = vld [vmem:[#allocation3 + $0xc0] sm:$0xff]  ;;  %v21370_v6 = vpop.f32.mrb[132].mxu0  ;;  %v22155_v21 = vld [vmem:[#allocation2 + $0xcc] sm:$0xfe]   ;;  %v13055_v10 = vrot.slane %v26705_v26, 1  ;;  %11978 = vst.msk [vmem:[#allocation3 + $0x140] sm:$0xff] %vm856_vm0, %v11924_v27  ;;  %v11943_v25 = vor.u32 %v11942_v0, %v11938_v18 }
 0x445   : > { %v13162_v7 = vld [vmem:[#allocation3 + $0xe0] sm:$0xff]  ;;  %v22169_v17 = vld [vmem:[#allocation2 + $0x60] sm:$0xfe]   ;;  %13478 = vmatmul.mubr.bf16.gmra.mrb[160].mxu0 %v13158_v53  ;;  %v11947_v8 = vrot.slane %v11945_v5, 1  ;;  %v21371_v56 = vpop.f32.mrb[133].mxu0  ;;  %v13057_v32 = vrot.slane %v22159_v60, 1  ;;  %v12813_v5 = vsel %vm10856_vm15, %v26735_v16, %v26660_v22 }
 0x446   : > { %v22167_v61 = vld [vmem:[#allocation2 + $0x54] sm:$0xfe]   ;;  %v22168_v36 = vld [vmem:[#allocation2 + $0x5c] ss:$0 sps:$4 sm:$0x11]   ;;  %13485 = vmatprep.mubr.bf16.mxu0 %v13162_v7  ;;  %11979 = vst.msk [vmem:[#allocation3 + $0x158] sm:$0xff] %vm856_vm0, %v11936_v2  ;;  %v26742_v24 = vadd.f32 %v21371_v56, %v21370_v6  ;;  %v13056_v13 = vsel %vm11290_vm3, %v13054_v54, %v13055_v10 }
 0x447   : > { %v22156_v11 = vld [vmem:[#allocation2 + $0xd4] ss:$0 sps:$4 sm:$0x11]   ;;  %v22170_v12 = vld [vmem:[#allocation2 + $0x68] ss:$0 sps:$4 sm:$0x11]   ;;  %v11948_v35 = vsel %vm10856_vm15, %v11943_v25, %v11947_v8 }
 0x448   : > { %v22172_v15 = vld [vmem:[#allocation2 + $0x74] ss:$0 sps:$4 sm:$0x11]   ;;  %v13099_v9 = vrot.slane %v22155_v21, 1  ;;  %v21373_v62 = vpop.f32.mrb[134].mxu0  ;;  %v13058_v47 = vrot.slane %v26715_v38, 1 }
 0x449   : > { %v22171_v34 = vld [vmem:[#allocation2 + $0x6c] sm:$0xfe]   ;;  %v13178_v44 = vld [vmem:[#allocation3 + $0x160] sm:$0xff]  ;;  %v13100_v57 = vrot.slane %v22156_v11, 1  ;;  %v21374_v26 = vpop.f32.mrb[135].mxu0  ;;  %13118 = vst.msk [vmem:[#allocation3 + $0x10] sm:$0xff] %vm856_vm0, %v13056_v13 }
 0x44a   : > { %v13060_v52 = vrot.slane %v22161_v30, 1  ;;  %v13061_v33 = vrot.slane %v26721_v45, 1  ;;  %21752 = vmatprep.mubr.msk.bf16.mxu1 %vm856_vm0, %v13178_v44  ;;  %v22132_v40 = vld [vmem:[#allocation2 + $0xcc] sm:$0xff]   ;;  %11980 = vst.msk [vmem:[#allocation3 + $0x170] sm:$0xff] %vm856_vm0, %v11948_v35  ;;  %v26752_v42 = vadd.f32 %v21374_v26, %v21373_v62  ;;  %v13059_v20 = vsel %vm11290_vm3, %v13057_v32, %v13058_v47 }
 0x44b   : > { %v13063_v46 = vrot.slane %v22163_v48, 1  ;;  %v13064_v39 = vrot.slane %v22164_v31, 1  ;;  %v13101_v55 = vsel %vm11290_vm3, %v13099_v9, %v13100_v57  ;;  %13119 = vst.msk [vmem:[#allocation3 + $0x28] sm:$0xff] %vm856_vm0, %v13059_v20  ;;  %v13066_v23 = vrot.slane %v22165_v37, 1  ;;  %12412 = vrot.lane.b32.xlu0 %v22132_v40, %s22726_s15  ;;  %v13161_v41 = vld [vmem:[#allocation3 + $0xd8] sm:$0xff]  ;;  %v12228_v31 = vpop.permute.xlu0 %12227  ;;  %v13164_v6 = vld [vmem:[#allocation3 + $0xf0] sm:$0xff] }
 0x44c   : > { %v13062_v28 = vsel %vm11290_vm3, %v13060_v52, %v13061_v33  ;;  %v13067_v29 = vrot.slane %v22166_v58, 1  ;;  %13133 = vst.msk [vmem:[#allocation3 + $0x178] sm:$0xff] %vm856_vm0, %v13101_v55  ;;  %v13069_v51 = vrot.slane %v22167_v61, 1  ;;  %v13070_v59 = vrot.slane %v22168_v36, 1  ;;  %v13167_v57 = vld [vmem:[#allocation3 + $0x108] sm:$0xff] }
 0x44d   : > { %13120 = vst.msk [vmem:[#allocation3 + $0x40] sm:$0xff] %vm856_vm0, %v13062_v28  ;;  %v13065_v38 = vsel %vm11290_vm3, %v13063_v46, %v13064_v39  ;;  %v13072_v4 = vrot.slane %v22169_v17, 1  ;;  %v13073_v50 = vrot.slane %v22170_v12, 1  ;;  %v13075_v60 = vrot.slane %v22171_v34, 1  ;;  %13486 = vmatmul.mubr.bf16.gmra.mrb[164].mxu0 %v13161_v41 }
 0x44e   : > { %13121 = vst.msk [vmem:[#allocation3 + $0x58] sm:$0xff] %vm856_vm0, %v13065_v38  ;;  %v13068_v18 = vsel %vm11290_vm3, %v13066_v23, %v13067_v29  ;;  %v13076_v45 = vrot.slane %v22172_v15, 1  ;;  %v13071_v1 = vsel %vm11290_vm3, %v13069_v51, %v13070_v59  ;;  %vm14745_vm2 = vcmask 516096  }
 0x44f   : > { %13122 = vst.msk [vmem:[#allocation3 + $0x70] sm:$0xff] %vm856_vm0, %v13068_v18  ;;  %13123 = vst.msk [vmem:[#allocation3 + $0x88] sm:$0xff] %vm856_vm0, %v13071_v1  ;;  %v13074_v30 = vsel %vm11290_vm3, %v13072_v4, %v13073_v50  ;;  %12844 = vrot.lane.b32.xlu0 %v12813_v5, %s22729_s24  ;;  %vm29185_vm5 = vsmask.f32 7938  ;;  %vm16010_vm14 = vsmask.f32 3328 }
 0x450   : > { %v13077_v48 = vsel %vm11290_vm3, %v13075_v60, %v13076_v45  ;;  %13124 = vst.msk [vmem:[#allocation3 + $0xa0] sm:$0xff] %vm856_vm0, %v13074_v30  ;;  %vm29180_vm3 = vsmask.f32 256  ;;  %vm16011_vm15 = vsmask.f32 7440  ;;  %s20076_s24 = scalar_lea.sflag [#allocation7], %s377_s16 }
 0x451   : > { %13125 = vst.msk [vmem:[#allocation3 + $0xb8] sm:$0xff] %vm856_vm0, %v13077_v48 }
 0x452   : > { %12264 = vst.msk [vmem:[#allocation3 + $0x110] sm:$0xff] %vm11097_vm1, %v12228_v31  ;;  %v29179_v31 = vmov 0  }
 0x453   : > { %v13181_v43 = vld [vmem:[#allocation3 + $0x178] sm:$0xff]  ;;  %14756 = vst.msk [vmem:[#allocation4 + $0x2c] sm:$0x1] %vm14745_vm2, %v29179_v31  ;;  %14746 = vst.msk [vmem:[#allocation4 + $0x4] sm:$0x1] %vm14745_vm2, %v29179_v31 }
 0x454   : > { %21753 = vmatmul.mubr.msk.bf16.gmra.mrb[12].mxu1 %vm856_vm0, %v13181_v43  ;;  %14748 = vst.msk [vmem:[#allocation4 + $0xc] sm:$0x1] %vm14745_vm2, %v29179_v31  ;;  %14750 = vst.msk [vmem:[#allocation4 + $0x14] sm:$0x1] %vm14745_vm2, %v29179_v31 }
 0x455   : > { %14752 = vst.msk [vmem:[#allocation4 + $0x1c] sm:$0x1] %vm14745_vm2, %v29179_v31  ;;  %14754 = vst.msk [vmem:[#allocation4 + $0x24] sm:$0x1] %vm14745_vm2, %v29179_v31 }
 0x456   : > { %14758 = vst.msk [vmem:[#allocation4 + $0x34] sm:$0x1] %vm14745_vm2, %v29179_v31  ;;  %14760 = vst.msk [vmem:[#allocation4 + $0x3c] sm:$0x1] %vm14745_vm2, %v29179_v31 }
 0x457   : > { %14762 = vst.msk [vmem:[#allocation4 + $0x44] sm:$0x1] %vm14745_vm2, %v29179_v31  ;;  %14764 = vst.msk [vmem:[#allocation4 + $0x4c] sm:$0x1] %vm14745_vm2, %v29179_v31 }
 0x459   : > { %v11364_v22 = vpop.permute.xlu1 %11363 }
 0x45d   : > { %v21376_v37 = vpop.f32.mrb[136].mxu0 }
 0x45e   : > { %v12835_v0 = vpop.permute.xlu0 %12834  ;;  %v21377_v58 = vpop.f32.mrb[137].mxu0 }
 0x45f   : > { %12872 = vst.msk [vmem:[#allocation3 + $0xf8] sm:$0xff] %vm11564_vm4, %v12835_v0  ;;  %v26780_v49 = vadd.f32 %v21377_v58, %v21376_v37  ;;  %v21379_v16 = vpop.f32.mrb[138].mxu0  ;;  %v13136_v58 = vld [vmem:[#allocation3 + $0x10] sm:$0xff] }
 0x460   : > { %v11074_v54 = vpop.permute.xlu1 %11073  ;;  %v21380_v53 = vpop.f32.mrb[139].mxu0 }
 0x461   : > { %11110 = vst.msk [vmem:[#allocation3 + $0x120] sm:$0xff] %vm11097_vm1, %v11074_v54  ;;  %v26782_v7 = vadd.f32 %v21380_v53, %v21379_v16  ;;  %v13139_v16 = vld [vmem:[#allocation3 + $0x28] sm:$0xff]  ;;  %v13142_v53 = vld [vmem:[#allocation3 + $0x40] sm:$0xff] }
 0x462   : > { %11400 = vst.msk [vmem:[#allocation3 + $0x120] sm:$0xff] %vm11387_vm13, %v11364_v22 }
 0x466   : > { %v13165_v27 = vld [vmem:[#allocation3 + $0xf8] sm:$0xff] }
 0x467   : > { %13493 = vmatprep.mubr.bf16.mxu0 %v13165_v27 }
 0x468   : > { %13494 = vmatmul.mubr.bf16.gmra.mrb[168].mxu0 %v13164_v6  ;;  %v13145_v6 = vld [vmem:[#allocation3 + $0x58] sm:$0xff] }
 0x46b   : > { %v12405_v21 = vpop.permute.xlu0 %12404 }
 0x46c   : > { %12441 = vst.msk [vmem:[#allocation3 + $0x110] sm:$0xff] %vm11387_vm13, %v12405_v21 }
 0x46d   : > { %v11541_v10 = vpop.permute.xlu1 %11540 }
 0x46e   : > { %11577 = vst.msk [vmem:[#allocation3 + $0x120] sm:$0xff] %vm11564_vm4, %v11541_v10  ;;  %v13148_v10 = vld [vmem:[#allocation3 + $0x70] sm:$0xff] }
 0x471   : > { %v21382_v61 = vpop.f32.mrb[140].mxu0 }
 0x472   : > { %v21383_v36 = vpop.f32.mrb[141].mxu0 }
 0x473   : > { %v26786_v17 = vadd.f32 %v21383_v36, %v21382_v61  ;;  %v21385_v2 = vpop.f32.mrb[142].mxu0 }
 0x474   : > { %v21386_v25 = vpop.f32.mrb[143].mxu0 }
 0x475   : > { %v26788_v8 = vadd.f32 %v21386_v25, %v21385_v2  ;;  %v13170_v55 = vld [vmem:[#allocation3 + $0x120] sm:$0xff] }
 0x489   : > { %v12230_v56 = vpop.permute.xlu0 %12229 }
 0x48a   : > { %12265 = vst.msk [vmem:[#allocation3 + $0x128] sm:$0xff] %vm11097_vm1, %v12230_v56  ;;  %v13151_v56 = vld [vmem:[#allocation3 + $0x88] sm:$0xff] }
 0x48b   : > { %v11366_v11 = vpop.permute.xlu1 %11365 }
 0x491   : > { %v12837_v32 = vpop.permute.xlu0 %12836 }
 0x492   : > { %12873 = vst.msk [vmem:[#allocation3 + $0x110] sm:$0xff] %vm11564_vm4, %v12837_v32  ;;  %v11076_v12 = vpop.permute.xlu1 %11075  ;;  %v13157_v32 = vld [vmem:[#allocation3 + $0xb8] sm:$0xff] }
 0x493   : > { %11111 = vst.msk [vmem:[#allocation3 + $0x138] sm:$0xff] %vm11097_vm1, %v11076_v12 }
 0x494   : > { %11401 = vst.msk [vmem:[#allocation3 + $0x138] sm:$0xff] %vm11387_vm13, %v11366_v11  ;;  %v13154_v11 = vld [vmem:[#allocation3 + $0xa0] sm:$0xff] }
 0x495   : > { %v12407_v15 = vpop.permute.xlu0 %12406  ;;  %v26795_v62 = vpop.f32.mrb[0].mxu1 }
 0x496   : > { %12442 = vst.msk [vmem:[#allocation3 + $0x128] sm:$0xff] %vm11387_vm13, %v12407_v15  ;;  %v11543_v9 = vpop.permute.xlu1 %11542  ;;  %v26798_v13 = vpop.f32.mrb[1].mxu1 }
 0x497   : > { %11578 = vst.msk [vmem:[#allocation3 + $0x138] sm:$0xff] %vm11564_vm4, %v11543_v9  ;;  %v26800_v47 = vpop.f32.mrb[2].mxu1 }
 0x498   : > { %v26802_v35 = vpop.f32.mrb[3].mxu1 }
 0x499   : > { %v13168_v34 = vld [vmem:[#allocation3 + $0x110] sm:$0xff]  ;;  %v12232_v44 = vpop.permute.xlu0 %12231 }
 0x49a   : > { %13501 = vmatprep.mubr.bf16.mxu0 %v13168_v34  ;;  %12266 = vst.msk [vmem:[#allocation3 + $0x140] sm:$0xff] %vm11097_vm1, %v12232_v44  ;;  %v11368_v26 = vpop.permute.xlu1 %11367 }
 0x49b   : > { %13502 = vmatmul.mubr.bf16.gmra.mrb[172].mxu0 %v13167_v57 }
 0x49d   : > { %v12839_v52 = vpop.permute.xlu0 %12838 }
 0x49e   : > { %12874 = vst.msk [vmem:[#allocation3 + $0x128] sm:$0xff] %vm11564_vm4, %v12839_v52  ;;  %v11078_v33 = vpop.permute.xlu1 %11077  ;;  %v13173_v5 = vld [vmem:[#allocation3 + $0x138] sm:$0xff] }
 0x49f   : > { %11112 = vst.msk [vmem:[#allocation3 + $0x150] sm:$0xff] %vm11097_vm1, %v11078_v33 }
 0x4a0   : > { %11402 = vst.msk [vmem:[#allocation3 + $0x150] sm:$0xff] %vm11387_vm13, %v11368_v26 }
 0x4a1   : > { %v12409_v40 = vpop.permute.xlu0 %12408 }
 0x4a2   : > { %12443 = vst.msk [vmem:[#allocation3 + $0x140] sm:$0xff] %vm11387_vm13, %v12409_v40  ;;  %v11545_v20 = vpop.permute.xlu1 %11544 }
 0x4a3   : > { %11579 = vst.msk [vmem:[#allocation3 + $0x150] sm:$0xff] %vm11564_vm4, %v11545_v20 }
 0x4a5   : > { %v13171_v46 = vld [vmem:[#allocation3 + $0x128] sm:$0xff]  ;;  %v12234_v39 = vpop.permute.xlu0 %12233  ;;  %v21388_v23 = vpop.f32.mrb[144].mxu0 }
 0x4a6   : > { %13509 = vmatprep.mubr.bf16.mxu0 %v13171_v46  ;;  %12267 = vst.msk [vmem:[#allocation3 + $0x158] sm:$0xff] %vm11097_vm1, %v12234_v39  ;;  %v11080_v28 = vpop.permute.xlu1 %11079  ;;  %v21389_v29 = vpop.f32.mrb[145].mxu0 }
 0x4a7   : > { %13510 = vmatmul.mubr.bf16.gmra.mrb[176].mxu0 %v13170_v55  ;;  %11113 = vst.msk [vmem:[#allocation3 + $0x168] sm:$0xff] %vm11097_vm1, %v11080_v28  ;;  %v26812_v38 = vadd.f32 %v21389_v29, %v21388_v23  ;;  %v21391_v51 = vpop.f32.mrb[146].mxu0 }
 0x4a8   : > { %v21392_v4 = vpop.f32.mrb[147].mxu0 }
 0x4a9   : > { %v12841_v59 = vpop.permute.xlu0 %12840  ;;  %v26815_v50 = vadd.f32 %v21392_v4, %v21391_v51 }
 0x4aa   : > { %12875 = vst.msk [vmem:[#allocation3 + $0x140] sm:$0xff] %vm11564_vm4, %v12841_v59  ;;  %v11370_v18 = vpop.permute.xlu1 %11369  ;;  %v13176_v0 = vld [vmem:[#allocation3 + $0x150] sm:$0xff] }
 0x4ab   : > { %11403 = vst.msk [vmem:[#allocation3 + $0x168] sm:$0xff] %vm11387_vm13, %v11370_v18 }
 0x4ad   : > { %v12411_v60 = vpop.permute.xlu0 %12410 }
 0x4ae   : > { %12444 = vst.msk [vmem:[#allocation3 + $0x158] sm:$0xff] %vm11387_vm13, %v12411_v60  ;;  %v11547_v45 = vpop.permute.xlu1 %11546 }
 0x4af   : > { %11580 = vst.msk [vmem:[#allocation3 + $0x168] sm:$0xff] %vm11564_vm4, %v11547_v45 }
 0x4b1   : > { %v13174_v41 = vld [vmem:[#allocation3 + $0x140] sm:$0xff]  ;;  %v12236_v1 = vpop.permute.xlu0 %12235 }
 0x4b2   : > { %13517 = vmatprep.mubr.bf16.mxu0 %v13174_v41  ;;  %12268 = vst.msk [vmem:[#allocation3 + $0x170] sm:$0xff] %vm11097_vm1, %v12236_v1  ;;  %v26883_v1 = vld [vmem:[%s29000_s4] ss:$0 sm:$0xff]  ;;  %vm27533_vm1 = vmor %vm16010_vm14, %vm16011_vm15 }
 0x4b3   : > { %13518 = vmatmul.mubr.bf16.gmra.mrb[180].mxu0 %v13173_v5 }
 0x4b5   : > { %v12843_v30 = vpop.permute.xlu0 %12842 }
 0x4b6   : > { %12876 = vst.msk [vmem:[#allocation3 + $0x158] sm:$0xff] %vm11564_vm4, %v12843_v30  ;;  %v13179_v37 = vld [vmem:[#allocation3 + $0x168] sm:$0xff] }
 0x4bd   : > { %v12413_v48 = vpop.permute.xlu0 %12412  ;;  %v13177_v22 = vld [vmem:[#allocation3 + $0x158] sm:$0xff] }
 0x4be   : > { %12445 = vst.msk [vmem:[#allocation3 + $0x170] sm:$0xff] %vm11387_vm13, %v12413_v48  ;;  %13525 = vmatprep.mubr.bf16.mxu0 %v13177_v22 }
 0x4bf   : > { %13526 = vmatmul.mubr.bf16.gmra.mrb[184].mxu0 %v13176_v0  ;;  %v26891_v0 = vld [vmem:[%s29000_s4 + $0x1] ss:$0 sm:$0xff] }
 0x4c1   : > { %v12845_v43 = vpop.permute.xlu0 %12844 }
 0x4c2   : > { %12877 = vst.msk [vmem:[#allocation3 + $0x170] sm:$0xff] %vm11564_vm4, %v12845_v43  ;;  %vm26955_vm4 = vmand %vm14745_vm2, %vm29180_vm3  ;;  %vm16149_vm2 = vcmask 1043968  }
 0x4c9   : > { %v13180_v54 = vld [vmem:[#allocation3 + $0x170] sm:$0xff] }
 0x4ca   : > { %13533 = vmatprep.mubr.bf16.mxu0 %v13180_v54 }
 0x4cb   : > { %13534 = vmatmul.mubr.bf16.gmra.mrb[188].mxu0 %v13179_v37 }
 0x4cc   : > { %21724 = vmatprep.mubr.msk.bf16.mxu0 %vm856_vm0, %v13136_v58 }
 0x4d3   : > { %21725 = vmatmul.mubr.msk.bf16.vlgmr.msra.gmra.mrb[192].mxu0 %vm856_vm0, %v13139_v16 }
 0x4d4   : > { %21728 = vmatprep.mubr.msk.bf16.mxu0 %vm856_vm0, %v13142_v53 }
 0x4d6   : > { %v21394_v27 = vpop.f32.mrb[148].mxu0 }
 0x4d7   : > { %v21395_v21 = vpop.f32.mrb[149].mxu0 }
 0x4d8   : > { %v26848_v61 = vadd.f32 %v21395_v21, %v21394_v27  ;;  %v21397_v36 = vpop.f32.mrb[150].mxu0 }
 0x4d9   : > { %v21398_v2 = vpop.f32.mrb[151].mxu0 }
 0x4da   : > { %v26851_v25 = vadd.f32 %v21398_v2, %v21397_v36 }
 0x4db   : > { %21729 = vmatmul.mubr.msk.bf16.gmra.mrb[196].mxu0 %vm856_vm0, %v13145_v6 }
 0x4dc   : > { %21732 = vmatprep.mubr.msk.bf16.mxu0 %vm856_vm0, %v13148_v10 }
 0x4e3   : > { %21733 = vmatmul.mubr.msk.bf16.gmra.mrb[200].mxu0 %vm856_vm0, %v13151_v56 }
 0x4e4   : > { %21736 = vmatprep.mubr.msk.bf16.mxu0 %vm856_vm0, %v13154_v11 }
 0x4eb   : > { %21737 = vmatmul.mubr.msk.bf16.gmra.mrb[204].mxu0 %vm856_vm0, %v13157_v32  ;;  %vm14743_vm0 = vcmask 519168  }
 0x4ec   : > { %14759 = vst.msk [vmem:[#allocation4 + $0x38] sm:$0xf] %vm14743_vm0, %v29179_v31  ;;  %14744 = vst.msk [vmem:[#allocation4] sm:$0xf] %vm14743_vm0, %v29179_v31 }
 0x4ed   : > { %14747 = vst.msk [vmem:[#allocation4 + $0x8] sm:$0xf] %vm14743_vm0, %v29179_v31  ;;  %14749 = vst.msk [vmem:[#allocation4 + $0x10] sm:$0xf] %vm14743_vm0, %v29179_v31 }
 0x4ee   : > { %14751 = vst.msk [vmem:[#allocation4 + $0x18] sm:$0xf] %vm14743_vm0, %v29179_v31  ;;  %14753 = vst.msk [vmem:[#allocation4 + $0x20] sm:$0xf] %vm14743_vm0, %v29179_v31 }
 0x4ef   : > { %14755 = vst.msk [vmem:[#allocation4 + $0x28] sm:$0xf] %vm14743_vm0, %v29179_v31  ;;  %14757 = vst.msk [vmem:[#allocation4 + $0x30] sm:$0xf] %vm14743_vm0, %v29179_v31 }
 0x4f0   : > { %14761 = vst.msk [vmem:[#allocation4 + $0x40] sm:$0xf] %vm14743_vm0, %v29179_v31  ;;  %14763 = vst.msk [vmem:[#allocation4 + $0x48] sm:$0xf] %vm14743_vm0, %v29179_v31 }
 0x4f1   : > { %vm27225_vm13 = vmand %vm14743_vm0, %vm29185_vm5 }
 0x4f8   : > { %v26856_v12 = vpop.f32.mrb[4].mxu1 }
 0x4f9   : > { %v26858_v15 = vpop.f32.mrb[5].mxu1 }
 0x4fa   : > { %v26860_v9 = vpop.f32.mrb[6].mxu1 }
 0x4fb   : > { %v26862_v34 = vpop.f32.mrb[7].mxu1 }
 0x502   : > { %v21400_v44 = vpop.f32.mrb[152].mxu0 }
 0x503   : > { %v21401_v57 = vpop.f32.mrb[153].mxu0 }
 0x504   : > { %v26864_v26 = vadd.f32 %v21401_v57, %v21400_v44  ;;  %v21403_v52 = vpop.f32.mrb[154].mxu0 }
 0x505   : > { %v21404_v33 = vpop.f32.mrb[155].mxu0 }
 0x506   : > { %v26868_v20 = vadd.f32 %v21404_v33, %v21403_v52 }
 0x507   : > { %v26866_v40 = vpop.f32.mrb[8].mxu1 }
 0x508   : > { %v26870_v46 = vpop.f32.mrb[9].mxu1 }
 0x509   : > { %v26872_v39 = vpop.f32.mrb[10].mxu1 }
 0x50a   : > { %v26874_v55 = vpop.f32.mrb[11].mxu1 }
 0x50c   : > { %v21406_v28 = vpop.f32.mrb[156].mxu0 }
 0x50d   : > { %v21407_v23 = vpop.f32.mrb[157].mxu0 }
 0x50e   : > { %v26876_v29 = vadd.f32 %v21407_v23, %v21406_v28  ;;  %v21409_v51 = vpop.f32.mrb[158].mxu0 }
 0x50f   : > { %v21410_v59 = vpop.f32.mrb[159].mxu0 }
 0x510   : > { %v26878_v4 = vadd.f32 %v21410_v59, %v21409_v51 }
 0x518   : > { %v21412_v18 = vpop.f32.mrb[160].mxu0 }
 0x519   : > { %v21413_v60 = vpop.f32.mrb[161].mxu0 }
 0x51a   : > { %v21414_v45 = vadd.f32 %v21413_v60, %v21412_v18  ;;  %v21415_v41 = vpop.f32.mrb[162].mxu0 }
 0x51b   : > { %v21416_v5 = vpop.f32.mrb[163].mxu0 }
 0x51c   : > { %v13480_v30 = vadd.f32 %v21414_v45, %v26883_v1  ;;  %v21417_v48 = vadd.f32 %v21416_v5, %v21415_v41 }
 0x51e   : > { %v13641_v43 = vadd.f32 %v26798_v13, %v13480_v30  ;;  %v13483_v22 = vadd.f32 %v21417_v48, %v26883_v1  ;;  %v26898_v13 = vld [vmem:[%s29000_s4 + $0x2] ss:$0 sm:$0xff] }
 0x520   : > { %v13719_v54 = vmax.f32 %v13641_v43, 0.0  ;;  %v13644_v37 = vadd.f32 %v26802_v35, %v13483_v22  ;;  %v21418_v58 = vpop.f32.mrb[164].mxu0 }
 0x521   : > { %v21419_v16 = vpop.f32.mrb[165].mxu0 }
 0x522   : > { %v13755_v53 = vmul.f32 %v26891_v0, %v13719_v54  ;;  %v13720_v27 = vmax.f32 %v13644_v37, 0.0  ;;  %v21420_v6 = vadd.f32 %v21419_v16, %v21418_v58  ;;  %v21421_v21 = vpop.f32.mrb[166].mxu0 }
 0x523   : > { %v21422_v10 = vpop.f32.mrb[167].mxu0 }
 0x524   : > { %v13756_v36 = vmul.f32 %v26891_v0, %v13720_v27  ;;  %v13488_v2 = vadd.f32 %v21420_v6, %v26883_v1  ;;  %v21423_v56 = vadd.f32 %v21422_v10, %v21421_v21  ;;  %v13791_v35 = vadd.f32 %v26898_v13, %v13755_v53 }
 0x526   : > { %v13792_v11 = vadd.f32 %v26898_v13, %v13756_v36  ;;  %v13649_v32 = vadd.f32 %v26795_v62, %v13488_v2  ;;  %v13491_v44 = vadd.f32 %v21423_v56, %v26883_v1 }
 0x528   : > { %v13815_v57 = vpack.c.bf16 %v13792_v11, %v13791_v35  ;;  %v13721_v52 = vmax.f32 %v13649_v32, 0.0  ;;  %v13652_v33 = vadd.f32 %v26800_v47, %v13491_v44 }
 0x52a   : > { %v13757_v28 = vmul.f32 %v26891_v0, %v13721_v52  ;;  %v13722_v23 = vmax.f32 %v13652_v33, 0.0 }
 0x52c   : > { %v13758_v51 = vmul.f32 %v26891_v0, %v13722_v23  ;;  %v13793_v59 = vadd.f32 %v26898_v13, %v13757_v28 }
 0x52e   : > { %v13794_v18 = vadd.f32 %v26898_v13, %v13758_v51 }
 0x530   : > { %v13816_v60 = vpack.c.bf16 %v13794_v18, %v13793_v59 }
 0x532   : > { %v13827_v45 = vmax.bf16 %v13816_v60, %v13815_v57 }
 0x534   : > { %v14035_v41 = vcombine.high %v13827_v45, %v13827_v45  ;;  %v14042_v62 = vrot.slane %v13827_v45, %v23126_v3 }
 0x536   : > { %v14049_v5 = vrot.slane %v14035_v41, %v23126_v3  ;;  %v14050_v30 = vcombine.high %v14042_v62, %v14042_v62  ;;  %v14058_v48 = vrot.slane %v14042_v62, %v23126_v3 }
 0x538   : > { %v14051_v47 = vcombine.high %v14049_v5, %v14049_v5  ;;  %v14065_v43 = vrot.slane %v14049_v5, %v23126_v3  ;;  %v14072_v22 = vrot.slane %v14050_v30, %v23126_v3  ;;  %v14080_v54 = vcombine.high %v14058_v48, %v14058_v48 }
 0x539   : > { %v14456_v37 = vshrl.u32 %v14058_v48, 16 }
 0x53a   : > { %v14079_v58 = vrot.slane %v14051_v47, %v23126_v3  ;;  %v14081_v16 = vcombine.high %v14065_v43, %v14065_v43  ;;  %v14082_v53 = vcombine.high %v14072_v22, %v14072_v22  ;;  %v14461_v27 = vshrl.u32 %v14072_v22, 16 }
 0x53b   : > { %v14466_v6 = vshrl.u32 %v14080_v54, 16  ;;  %v14476_v21 = vshrl.u32 %v14065_v43, 16  ;;  %v14711_v10 = vmax.bf16 %v14456_v37, %v14058_v48  ;;  %v21424_v60 = vpop.f32.mrb[168].mxu0 }
 0x53c   : > { %v14083_v36 = vcombine.high %v14079_v58, %v14079_v58  ;;  %v14471_v2 = vshrl.u32 %v14082_v53, 16  ;;  %v14481_v56 = vshrl.u32 %v14079_v58, 16  ;;  %v14486_v35 = vshrl.u32 %v14081_v16, 16  ;;  %v21425_v30 = vpop.f32.mrb[169].mxu0 }
 0x53d   : > { %v14712_v31 = vmax.bf16 %v14461_v27, %v14072_v22  ;;  %v14713_v11 = vmax.bf16 %v14466_v6, %v14080_v54  ;;  %v14715_v32 = vmax.bf16 %v14476_v21, %v14065_v43  ;;  %v15283_v44 = vrot.slane %v14711_v10, %v23133_v14  ;;  %v21427_v54 = vpop.f32.mrb[170].mxu0 }
 0x53e   : > { %v14491_v57 = vshrl.u32 %v14083_v36, 16  ;;  %v14714_v52 = vmax.bf16 %v14471_v2, %v14082_v53  ;;  %v14716_v33 = vmax.bf16 %v14481_v56, %v14079_v58  ;;  %v14717_v28 = vmax.bf16 %v14486_v35, %v14081_v16  ;;  %v21428_v27 = vpop.f32.mrb[171].mxu0 }
 0x53f   : > { %v15290_v23 = vrot.slane %v15283_v44, %v23133_v14  ;;  %v15297_v51 = vrot.slane %v14712_v31, %v23133_v14  ;;  %v15311_v59 = vrot.slane %v14713_v11, %v23133_v14  ;;  %v15339_v18 = vrot.slane %v14715_v32, %v23133_v14  ;;  %v15957_v44 = vld [vmem:[#allocation4 + $0x2c] sm:$0x1] }
 0x540   : > { %v14718_v45 = vmax.bf16 %v14491_v57, %v14083_v36  ;;  %v15325_v41 = vrot.slane %v14714_v52, %v23133_v14  ;;  %v15353_v62 = vrot.slane %v14716_v33, %v23133_v14  ;;  %v15367_v5 = vrot.slane %v14717_v28, %v23133_v14  ;;  %v22190_v32 = vld [vmem:[%s29001_s5 + $0x20] sm:$0xff]  }
 0x541   : > { %v15304_v48 = vrot.slane %v15297_v51, %v23133_v14  ;;  %v15318_v47 = vrot.slane %v15311_v59, %v23133_v14  ;;  %v15346_v43 = vrot.slane %v15339_v18, %v23133_v14  ;;  %v15757_v22 = vunpack.c.l.b16 %v15290_v23  ;;  %v26959_v23 = vpop.f32.mrb[12].mxu1 }
 0x542   : > { %v15332_v37 = vrot.slane %v15325_v41, %v23133_v14  ;;  %v15360_v58 = vrot.slane %v15353_v62, %v23133_v14  ;;  %v15374_v16 = vrot.slane %v15367_v5, %v23133_v14  ;;  %v15381_v53 = vrot.slane %v14718_v45, %v23133_v14  ;;  %v26963_v45 = vpop.f32.mrb[13].mxu1 }
 0x543   : > { %v15758_v6 = vunpack.c.l.b16 %v15304_v48  ;;  %v15759_v21 = vunpack.c.l.b16 %v15318_v47  ;;  %v15761_v2 = vunpack.c.l.b16 %v15346_v43  ;;  %v15841_v56 = vrot.slane %v15757_v22, 7  ;;  %v26968_v48 = vpop.f32.mrb[14].mxu1 }
 0x544   : > { %v15388_v10 = vrot.slane %v15381_v53, %v23133_v14  ;;  %v15760_v36 = vunpack.c.l.b16 %v15332_v37  ;;  %v15762_v35 = vunpack.c.l.b16 %v15360_v58  ;;  %v21426_v57 = vadd.f32 %v21425_v30, %v21424_v60  ;;  %v26973_v22 = vpop.f32.mrb[15].mxu1 }
 0x545   : > { %v15842_v31 = vrot.slane %v15758_v6, 6  ;;  %v15844_v11 = vrot.slane %v15759_v21, 5  ;;  %v15763_v52 = vunpack.c.l.b16 %v15374_v16  ;;  %v21429_v18 = vadd.f32 %v21428_v27, %v21427_v54 }
 0x546   : > { %v15846_v33 = vrot.slane %v15760_v36, 4  ;;  %v20899_v28 = vcombine.low %v15388_v10, %v15388_v10  ;;  %v13496_v59 = vadd.f32 %v21426_v57, %v26883_v1  ;;  %v15848_v62 = vrot.slane %v15761_v2, 3 }
 0x547   : > { %v15843_v51 = vsel %vm9884_vm7, %v15842_v31, %v15841_v56  ;;  %v15850_v30 = vrot.slane %v15762_v35, 2  ;;  %v13499_v43 = vadd.f32 %v21429_v18, %v26883_v1  ;;  %v15852_v37 = vrot.slane %v15763_v52, 1 }
 0x548   : > { %v15845_v41 = vsel %vm9887_vm8, %v15844_v11, %v15843_v51  ;;  %v15958_v5 = vsel %vm26955_vm4, %v20899_v28, %v15957_v44  ;;  %v13657_v47 = vadd.f32 %v26858_v15, %v13496_v59 }
 0x549   : > { %v15847_v60 = vsel %vm9890_vm9, %v15846_v33, %v15845_v41  ;;  %15959 = vst [vmem:[#allocation4 + $0x2c] sm:$0x1] %v15958_v5  ;;  %v13660_v53 = vadd.f32 %v26862_v34, %v13499_v43 }
 0x54a   : > { %v15849_v54 = vsel %vm9893_vm10, %v15848_v62, %v15847_v60  ;;  %v13723_v16 = vmax.f32 %v13657_v47, 0.0 }
 0x54b   : > { %v15851_v58 = vsel %vm9896_vm11, %v15850_v30, %v15849_v54  ;;  %v13724_v21 = vmax.f32 %v13660_v53, 0.0 }
 0x54c   : > { %v26979_v27 = vsel %vm9899_vm12, %v15852_v37, %v15851_v58  ;;  %v13759_v6 = vmul.f32 %v26891_v0, %v13723_v16 }
 0x54d   : > { %29183 = vst [vmem:[#allocation17_spill] sm:$0xff] %v26979_v27  ;;  %v13760_v15 = vmul.f32 %v26891_v0, %v13724_v21 }
 0x54e   : > { %v13795_v10 = vadd.f32 %v26898_v13, %v13759_v6 }
 0x54f   : > { %v13796_v36 = vadd.f32 %v26898_v13, %v13760_v15 }
 0x551   : > { %v13817_v2 = vpack.c.bf16 %v13796_v36, %v13795_v10 }
 0x56e   : > { %v21430_v56 = vpop.f32.mrb[172].mxu0 }
 0x56f   : > { %v21431_v35 = vpop.f32.mrb[173].mxu0 }
 0x570   : > { %v21432_v31 = vadd.f32 %v21431_v35, %v21430_v56  ;;  %v21433_v11 = vpop.f32.mrb[174].mxu0 }
 0x571   : > { %v21434_v44 = vpop.f32.mrb[175].mxu0 }
 0x572   : > { %v13504_v34 = vadd.f32 %v21432_v31, %v26883_v1  ;;  %v21435_v57 = vadd.f32 %v21434_v44, %v21433_v11 }
 0x574   : > { %v13665_v52 = vadd.f32 %v26856_v12, %v13504_v34  ;;  %v13507_v33 = vadd.f32 %v21435_v57, %v26883_v1 }
 0x576   : > { %v13725_v28 = vmax.f32 %v13665_v52, 0.0  ;;  %v13668_v51 = vadd.f32 %v26860_v9, %v13507_v33 }
 0x578   : > { %v13761_v59 = vmul.f32 %v26891_v0, %v13725_v28  ;;  %v13726_v18 = vmax.f32 %v13668_v51, 0.0 }
 0x57a   : > { %v13762_v41 = vmul.f32 %v26891_v0, %v13726_v18  ;;  %v21436_v62 = vpop.f32.mrb[176].mxu0  ;;  %v13797_v60 = vadd.f32 %v26898_v13, %v13761_v59 }
 0x57b   : > { %v21437_v5 = vpop.f32.mrb[177].mxu0 }
 0x57c   : > { %v13798_v30 = vadd.f32 %v26898_v13, %v13762_v41  ;;  %v21438_v47 = vadd.f32 %v21437_v5, %v21436_v62  ;;  %v21439_v43 = vpop.f32.mrb[178].mxu0 }
 0x57d   : > { %v21440_v54 = vpop.f32.mrb[179].mxu0 }
 0x57e   : > { %v13818_v12 = vpack.c.bf16 %v13798_v30, %v13797_v60  ;;  %v13512_v37 = vadd.f32 %v21438_v47, %v26883_v1  ;;  %v21441_v58 = vadd.f32 %v21440_v54, %v21439_v43 }
 0x580   : > { %v13828_v16 = vmax.bf16 %v13818_v12, %v13817_v2  ;;  %v13673_v9 = vadd.f32 %v26870_v46, %v13512_v37  ;;  %v13515_v53 = vadd.f32 %v21441_v58, %v26883_v1 }
 0x582   : > { %v14084_v6 = vcombine.high %v13828_v16, %v13828_v16  ;;  %v14091_v21 = vrot.slane %v13828_v16, %v23126_v3  ;;  %v13676_v15 = vadd.f32 %v26874_v55, %v13515_v53  ;;  %v13727_v10 = vmax.f32 %v13673_v9, 0.0 }
 0x584   : > { %v14098_v36 = vrot.slane %v14084_v6, %v23126_v3  ;;  %v14099_v56 = vcombine.high %v14091_v21, %v14091_v21  ;;  %v14107_v35 = vrot.slane %v14091_v21, %v23126_v3  ;;  %v13728_v31 = vmax.f32 %v13676_v15, 0.0 }
 0x585   : > { %v13763_v52 = vmul.f32 %v26891_v0, %v13727_v10 }
 0x586   : > { %v14100_v11 = vcombine.high %v14098_v36, %v14098_v36  ;;  %v14114_v44 = vrot.slane %v14098_v36, %v23126_v3  ;;  %v14121_v2 = vrot.slane %v14099_v56, %v23126_v3  ;;  %v14129_v46 = vcombine.high %v14107_v35, %v14107_v35  ;;  %v27002_v34 = vpop.f32.mrb[180].mxu0 }
 0x587   : > { %v14496_v57 = vshrl.u32 %v14107_v35, 16  ;;  %v13764_v55 = vmul.f32 %v26891_v0, %v13728_v31  ;;  %v21443_v33 = vpop.f32.mrb[181].mxu0 }
 0x588   : > { %v14128_v28 = vrot.slane %v14100_v11, %v23126_v3  ;;  %v14130_v51 = vcombine.high %v14114_v44, %v14114_v44  ;;  %v14131_v59 = vcombine.high %v14121_v2, %v14121_v2  ;;  %v14501_v18 = vshrl.u32 %v14121_v2, 16  ;;  %v21445_v41 = vpop.f32.mrb[182].mxu0 }
 0x589   : > { %v14506_v62 = vshrl.u32 %v14129_v46, 16  ;;  %v14516_v5 = vshrl.u32 %v14114_v44, 16  ;;  %v14719_v60 = vmax.bf16 %v14496_v57, %v14107_v35  ;;  %v27008_v30 = vadd.f32 %v26898_v13, %v13764_v55  ;;  %v21446_v47 = vpop.f32.mrb[183].mxu0 }
 0x58a   : > { %v14132_v43 = vcombine.high %v14128_v28, %v14128_v28  ;;  %v14511_v54 = vshrl.u32 %v14131_v59, 16  ;;  %v14521_v12 = vshrl.u32 %v14128_v28, 16  ;;  %v14526_v37 = vshrl.u32 %v14130_v51, 16 }
 0x58b   : > { %v14720_v58 = vmax.bf16 %v14501_v18, %v14121_v2  ;;  %v14721_v16 = vmax.bf16 %v14506_v62, %v14129_v46  ;;  %v14723_v9 = vmax.bf16 %v14516_v5, %v14114_v44  ;;  %v15395_v53 = vrot.slane %v14719_v60, %v23133_v14 }
 0x58c   : > { %v14531_v6 = vshrl.u32 %v14132_v43, 16  ;;  %v14722_v21 = vmax.bf16 %v14511_v54, %v14131_v59  ;;  %v14724_v15 = vmax.bf16 %v14521_v12, %v14128_v28  ;;  %v14725_v10 = vmax.bf16 %v14526_v37, %v14130_v51 }
 0x58d   : > { %v15402_v36 = vrot.slane %v15395_v53, %v23133_v14  ;;  %v15409_v56 = vrot.slane %v14720_v58, %v23133_v14  ;;  %v15423_v35 = vrot.slane %v14721_v16, %v23133_v14  ;;  %v15451_v31 = vrot.slane %v14723_v9, %v23133_v14 }
 0x58e   : > { %v14726_v11 = vmax.bf16 %v14531_v6, %v14132_v43  ;;  %v15437_v57 = vrot.slane %v14722_v21, %v23133_v14  ;;  %v15465_v2 = vrot.slane %v14724_v15, %v23133_v14  ;;  %v15479_v44 = vrot.slane %v14725_v10, %v23133_v14  ;;  %v15963_v15 = vld [vmem:[#allocation4 + $0x34] sm:$0x1] }
 0x58f   : > { %v15416_v46 = vrot.slane %v15409_v56, %v23133_v14  ;;  %v15430_v55 = vrot.slane %v15423_v35, %v23133_v14  ;;  %v15458_v28 = vrot.slane %v15451_v31, %v23133_v14  ;;  %v15765_v51 = vunpack.c.l.b16 %v15402_v36 }
 0x590   : > { %v15444_v59 = vrot.slane %v15437_v57, %v23133_v14  ;;  %v15472_v18 = vrot.slane %v15465_v2, %v23133_v14  ;;  %v15486_v62 = vrot.slane %v15479_v44, %v23133_v14  ;;  %v15493_v5 = vrot.slane %v14726_v11, %v23133_v14 }
 0x591   : > { %v15766_v60 = vunpack.c.l.b16 %v15416_v46  ;;  %v15767_v43 = vunpack.c.l.b16 %v15430_v55  ;;  %v15769_v54 = vunpack.c.l.b16 %v15458_v28  ;;  %v27026_v12 = vadd.f32 %v26898_v13, %v13763_v52 }
 0x592   : > { %v15500_v37 = vrot.slane %v15493_v5, %v23133_v14  ;;  %v15768_v58 = vunpack.c.l.b16 %v15444_v59  ;;  %v15770_v16 = vunpack.c.l.b16 %v15472_v18  ;;  %v21448_v9 = vpop.f32.mrb[184].mxu0  ;;  %v15854_v53 = vrot.slane %v15765_v51, 7 }
 0x593   : > { %v15855_v6 = vrot.slane %v15766_v60, 6  ;;  %v15857_v21 = vrot.slane %v15767_v43, 5  ;;  %v13819_v10 = vpack.c.bf16 %v27008_v30, %v27026_v12  ;;  %v21449_v36 = vpop.f32.mrb[185].mxu0  ;;  %v15771_v56 = vunpack.c.l.b16 %v15486_v62 }
 0x594   : > { %v15859_v35 = vrot.slane %v15768_v58, 4  ;;  %v15861_v31 = vrot.slane %v15769_v54, 3  ;;  %v20900_v11 = vcombine.low %v15500_v37, %v15500_v37  ;;  %v21451_v57 = vpop.f32.mrb[186].mxu0  ;;  %v21444_v2 = vadd.f32 %v21443_v33, %v27002_v34 }
 0x595   : > { %v15856_v52 = vsel %vm9884_vm7, %v15855_v6, %v15854_v53  ;;  %v21447_v44 = vadd.f32 %v21446_v47, %v21445_v41  ;;  %v21450_v46 = vadd.f32 %v21449_v36, %v21448_v9  ;;  %v21452_v55 = vpop.f32.mrb[187].mxu0  ;;  %v15863_v51 = vrot.slane %v15770_v16, 2 }
 0x596   : > { %v15858_v28 = vsel %vm9887_vm8, %v15857_v21, %v15856_v52  ;;  %v15964_v59 = vsel %vm26955_vm4, %v20900_v11, %v15963_v15  ;;  %v21453_v18 = vadd.f32 %v21452_v55, %v21451_v57  ;;  %v13520_v5 = vadd.f32 %v21444_v2, %v26883_v1 }
 0x597   : > { %v15860_v62 = vsel %vm9890_vm9, %v15859_v35, %v15858_v28  ;;  %15965 = vst [vmem:[#allocation4 + $0x34] sm:$0x1] %v15964_v59  ;;  %v13523_v60 = vadd.f32 %v21447_v44, %v26883_v1  ;;  %v13528_v43 = vadd.f32 %v21450_v46, %v26883_v1  ;;  %v15865_v33 = vrot.slane %v15771_v56, 1 }
 0x598   : > { %v15862_v34 = vsel %vm9893_vm10, %v15861_v31, %v15860_v62  ;;  %v13531_v41 = vadd.f32 %v21453_v18, %v26883_v1  ;;  %v13681_v54 = vadd.f32 %v26866_v40, %v13520_v5  ;;  %v13416_v6 = vadd.f32 %v26725_v63, %v26883_v1 }
 0x599   : > { %v15864_v47 = vsel %vm9896_vm11, %v15863_v51, %v15862_v34  ;;  %v13684_v37 = vadd.f32 %v26872_v39, %v13523_v60  ;;  %v13689_v58 = vadd.f32 %v26963_v45, %v13528_v43  ;;  %v13419_v40 = vadd.f32 %v26727_v19, %v26883_v1 }
 0x59a   : > { %v27047_v16 = vsel %vm9899_vm12, %v15865_v33, %v15864_v47  ;;  %v13692_v9 = vadd.f32 %v26973_v22, %v13531_v41  ;;  %v13729_v21 = vmax.f32 %v13681_v54, 0.0  ;;  %v13424_v45 = vadd.f32 %v26742_v24, %v26883_v1 }
 0x59b   : > { %29184 = vst [vmem:[#allocation18_spill] sm:$0xff] %v27047_v16  ;;  %v13730_v15 = vmax.f32 %v13684_v37, 0.0  ;;  %v13731_v36 = vmax.f32 %v13689_v58, 0.0  ;;  %v13427_v22 = vadd.f32 %v26752_v42, %v26883_v1  ;;  %v27063_v2 = vadd.f32 %v26780_v49, %v26883_v1 }
 0x59c   : > { %v13732_v35 = vmax.f32 %v13692_v9, 0.0  ;;  %v13765_v11 = vmul.f32 %v26891_v0, %v13729_v21  ;;  %v27069_v24 = vadd.f32 %v26782_v7, %v26883_v1  ;;  %v27075_v28 = vadd.f32 %v26786_v17, %v26883_v1 }
 0x59d   : > { %v13766_v63 = vmul.f32 %v26891_v0, %v13730_v15  ;;  %v13767_v57 = vmul.f32 %v26891_v0, %v13731_v36  ;;  %v27079_v49 = vadd.f32 %v26788_v8, %v26883_v1  ;;  %v27087_v5 = vadd.f32 %v26848_v61, %v26883_v1 }
 0x59e   : > { %v21454_v53 = vpop.f32.mrb[188].mxu0  ;;  %v13768_v19 = vmul.f32 %v26891_v0, %v13732_v35  ;;  %v13801_v42 = vadd.f32 %v26898_v13, %v13765_v11  ;;  %v27091_v17 = vadd.f32 %v26812_v38, %v26883_v1  ;;  %v27095_v8 = vadd.f32 %v26815_v50, %v26883_v1 }
 0x59f   : > { %v21455_v56 = vpop.f32.mrb[189].mxu0  ;;  %v13802_v55 = vadd.f32 %v26898_v13, %v13766_v63  ;;  %v13803_v51 = vadd.f32 %v26898_v13, %v13767_v57  ;;  %v27100_v33 = vadd.f32 %v26851_v25, %v26883_v1  ;;  %v27107_v47 = vadd.f32 %v26864_v26, %v26883_v1 }
 0x5a0   : > { %v21456_v39 = vadd.f32 %v21455_v56, %v21454_v53  ;;  %v21457_v31 = vpop.f32.mrb[190].mxu0  ;;  %v13804_v59 = vadd.f32 %v26898_v13, %v13768_v19  ;;  %v27111_v50 = vadd.f32 %v26868_v20, %v26883_v1  ;;  %v27116_v58 = vadd.f32 %v26876_v29, %v26883_v1 }
 0x5a1   : > { %v21458_v52 = vpop.f32.mrb[191].mxu0  ;;  %v13820_v62 = vpack.c.bf16 %v13802_v55, %v13801_v42 }
 0x5a2   : > { %v13536_v44 = vadd.f32 %v21456_v39, %v26883_v1  ;;  %v21459_v46 = vadd.f32 %v21458_v52, %v21457_v31  ;;  %v13821_v60 = vpack.c.bf16 %v13804_v59, %v13803_v51 }
 0x5a3   : > { %v13829_v61 = vmax.bf16 %v13820_v62, %v13819_v10 }
 0x5a4   : > { %v13697_v18 = vadd.f32 %v26959_v23, %v13536_v44  ;;  %v13539_v7 = vadd.f32 %v21459_v46, %v26883_v1 }
 0x5a5   : > { %v14133_v30 = vcombine.high %v13829_v61, %v13829_v61  ;;  %v14140_v12 = vrot.slane %v13829_v61, %v23126_v3 }
 0x5a6   : > { %v13733_v43 = vmax.f32 %v13697_v18, 0.0  ;;  %v13700_v34 = vadd.f32 %v26968_v48, %v13539_v7  ;;  %v21726_v23 = vpop.f32.mrb[192].mxu0 }
 0x5a7   : > { %v13585_v41 = vadd.f32 %v21726_v23, %v13424_v45  ;;  %v13576_v38 = vpop.f32.mrb[193].mxu0  ;;  %v14148_v36 = vcombine.high %v14140_v12, %v14140_v12  ;;  %v14156_v29 = vrot.slane %v14140_v12, %v23126_v3 }
 0x5a8   : > { %v13769_v48 = vmul.f32 %v26891_v0, %v13733_v43  ;;  %v13734_v54 = vmax.f32 %v13700_v34, 0.0  ;;  %v13577_v37 = vadd.f32 %v13576_v38, %v13416_v6  ;;  %v21727_v25 = vpop.f32.mrb[194].mxu0  ;;  %v14147_v6 = vrot.slane %v14133_v30, %v23126_v3 }
 0x5a9   : > { %v13705_v10 = vmax.f32 %v13585_v41, 0.0  ;;  %v27119_v9 = vadd.f32 %v21727_v25, %v13427_v22  ;;  %v13579_v26 = vpop.f32.mrb[195].mxu0  ;;  %v14178_v63 = vcombine.high %v14156_v29, %v14156_v29  ;;  %v14536_v57 = vshrl.u32 %v14156_v29, 16 }
 0x5aa   : > { %v13805_v53 = vadd.f32 %v26898_v13, %v13769_v48  ;;  %v13770_v20 = vmul.f32 %v26891_v0, %v13734_v54  ;;  %v13703_v21 = vmax.f32 %v13577_v37, 0.0  ;;  %v27123_v15 = vadd.f32 %v13579_v26, %v13419_v40 }
 0x5ab   : > { %v13741_v56 = vmul.f32 %v26891_v0, %v13705_v10  ;;  %v13706_v31 = vmax.f32 %v27119_v9, 0.0  ;;  %v14149_v22 = vcombine.high %v14147_v6, %v14147_v6  ;;  %v14163_v11 = vrot.slane %v14147_v6, %v23126_v3 }
 0x5ac   : > { %v13806_v35 = vadd.f32 %v26898_v13, %v13770_v20  ;;  %v13739_v39 = vmul.f32 %v26891_v0, %v13703_v21  ;;  %v13704_v45 = vmax.f32 %v27123_v15, 0.0  ;;  %v14170_v40 = vrot.slane %v14148_v36, %v23126_v3 }
 0x5ad   : > { %v27135_v19 = vadd.f32 %v26898_v13, %v13741_v56  ;;  %v14177_v42 = vrot.slane %v14149_v22, %v23126_v3  ;;  %v14179_v55 = vcombine.high %v14163_v11, %v14163_v11  ;;  %v14546_v7 = vshrl.u32 %v14178_v63, 16 }
 0x5ae   : > { %v13822_v52 = vpack.c.bf16 %v13806_v35, %v13805_v53  ;;  %v27138_v44 = vadd.f32 %v26898_v13, %v13739_v39  ;;  %v27140_v46 = vpop.f32.mrb[196].mxu0  ;;  %v14180_v51 = vcombine.high %v14170_v40, %v14170_v40  ;;  %v14541_v59 = vshrl.u32 %v14170_v40, 16 }
 0x5af   : > { %v27143_v18 = vpop.f32.mrb[197].mxu0  ;;  %v14556_v62 = vshrl.u32 %v14163_v11, 16  ;;  %v14727_v43 = vmax.bf16 %v14536_v57, %v14156_v29  ;;  %v14181_v61 = vcombine.high %v14177_v42, %v14177_v42  ;;  %v14561_v38 = vshrl.u32 %v14177_v42, 16  ;;  %v22173_v29 = vld [vmem:[%s29001_s5 + $0x100] sm:$0xff]  }
 0x5b0   : > { %v13830_v34 = vmax.bf16 %v13822_v52, %v13821_v60  ;;  %v27145_v23 = vpop.f32.mrb[198].mxu0  ;;  %v14551_v41 = vshrl.u32 %v14180_v51, 16  ;;  %v14566_v48 = vshrl.u32 %v14179_v55, 16  ;;  %v14728_v37 = vmax.bf16 %v14541_v59, %v14170_v40  ;;  %21756 = vmatprep.subr.bf16.mxu0 %v22173_v29 }
 0x5b1   : > { %v27147_v54 = vpop.f32.mrb[199].mxu0  ;;  %v14729_v25 = vmax.bf16 %v14546_v7, %v14178_v63  ;;  %v14731_v30 = vmax.bf16 %v14556_v62, %v14163_v11  ;;  %v15507_v12 = vrot.slane %v14727_v43, %v23133_v14  ;;  %v14571_v10 = vshrl.u32 %v14181_v61, 16  ;;  %21757 = vmatpush3.bf16.msra.mxu0 %v22173_v29 }
 0x5b2   : > { %v14730_v26 = vmax.bf16 %v14551_v41, %v14180_v51  ;;  %v14732_v53 = vmax.bf16 %v14561_v38, %v14177_v42  ;;  %v14733_v20 = vmax.bf16 %v14566_v48, %v14179_v55  ;;  %v15521_v60 = vrot.slane %v14728_v37, %v23133_v14  ;;  %v22174_v48 = vld [vmem:[%s29001_s5 + $0x108] sm:$0xff]  }
 0x5b3   : > { %v15514_v21 = vrot.slane %v15507_v12, %v23133_v14  ;;  %v15535_v6 = vrot.slane %v14729_v25, %v23133_v14  ;;  %v15563_v36 = vrot.slane %v14731_v30, %v23133_v14  ;;  %v14734_v56 = vmax.bf16 %v14571_v10, %v14181_v61  ;;  %21758 = vmatprep.subr.bf16.mxu0 %v22174_v48 }
 0x5b4   : > { %v15549_v35 = vrot.slane %v14730_v26, %v23133_v14  ;;  %v15577_v39 = vrot.slane %v14732_v53, %v23133_v14  ;;  %v15591_v22 = vrot.slane %v14733_v20, %v23133_v14  ;;  %v15528_v11 = vrot.slane %v15521_v60, %v23133_v14 }
 0x5b5   : > { %v15542_v40 = vrot.slane %v15535_v6, %v23133_v14  ;;  %v15570_v63 = vrot.slane %v15563_v36, %v23133_v14  ;;  %v15773_v57 = vunpack.c.l.b16 %v15514_v21  ;;  %v15605_v59 = vrot.slane %v14734_v56, %v23133_v14  ;;  %v15969_v21 = vld [vmem:[#allocation4 + $0x3c] sm:$0x1]  ;;  %21759 = vmatpush3.bf16.msra.mxu0 %v22174_v48 }
 0x5b6   : > { %v27163_v52 = vpop.f32.mrb[200].mxu0  ;;  %v15556_v42 = vrot.slane %v15549_v35, %v23133_v14  ;;  %v15584_v55 = vrot.slane %v15577_v39, %v23133_v14  ;;  %v15598_v51 = vrot.slane %v15591_v22, %v23133_v14  ;;  %v15774_v62 = vunpack.c.l.b16 %v15528_v11  ;;  %v22175_v6 = vld [vmem:[%s29001_s5 + $0x110] sm:$0xff]  }
 0x5b7   : > { %v27169_v7 = vpop.f32.mrb[201].mxu0  ;;  %v15775_v43 = vunpack.c.l.b16 %v15542_v40  ;;  %v15777_v61 = vunpack.c.l.b16 %v15570_v63  ;;  %v15867_v41 = vrot.slane %v15773_v57, 7  ;;  %v15612_v37 = vrot.slane %v15605_v59, %v23133_v14  ;;  %21760 = vmatprep.subr.bf16.mxu0 %v22175_v6 }
 0x5b8   : > { %v27171_v38 = vpop.f32.mrb[202].mxu0  ;;  %v15776_v25 = vunpack.c.l.b16 %v15556_v42  ;;  %v15778_v30 = vunpack.c.l.b16 %v15584_v55  ;;  %v15779_v12 = vunpack.c.l.b16 %v15598_v51  ;;  %v15868_v26 = vrot.slane %v15774_v62, 6  ;;  %v22177_v62 = vld [vmem:[%s29001_s5 + $0x118] sm:$0xff]  }
 0x5b9   : > { %v27177_v10 = vpop.f32.mrb[203].mxu0  ;;  %v15870_v53 = vrot.slane %v15775_v43, 5  ;;  %v15874_v20 = vrot.slane %v15777_v61, 3  ;;  %v14182_v60 = vcombine.high %v13830_v34, %v13830_v34  ;;  %v20901_v35 = vcombine.low %v15612_v37, %v15612_v37  ;;  %21761 = vmatpush3.bf16.msra.mxu0 %v22175_v6 }
 0x5ba   : > { %v15872_v36 = vrot.slane %v15776_v25, 4  ;;  %v15876_v29 = vrot.slane %v15778_v30, 2  ;;  %v15878_v56 = vrot.slane %v15779_v12, 1  ;;  %v15869_v39 = vsel %vm9884_vm7, %v15868_v26, %v15867_v41  ;;  %21762 = vmatprep.subr.bf16.mxu0 %v22177_v62  ;;  %v15966_v12 = vld [vmem:[#allocation4 + $0x38] sm:$0xf] }
 0x5bb   : > { %v14189_v22 = vrot.slane %v13830_v34, %v23126_v3  ;;  %v14196_v11 = vrot.slane %v14182_v60, %v23126_v3  ;;  %v13742_v40 = vmul.f32 %v26891_v0, %v13706_v31  ;;  %v15871_v63 = vsel %vm9887_vm8, %v15870_v53, %v15869_v39 }
 0x5bc   : > { %v15970_v57 = vsel %vm26955_vm4, %v20901_v35, %v15969_v21  ;;  %v13740_v42 = vmul.f32 %v26891_v0, %v13704_v45  ;;  %v27196_v55 = vadd.f32 %v27140_v46, %v27075_v28  ;;  %v15873_v34 = vsel %vm9890_vm9, %v15872_v36, %v15871_v63  ;;  %v22196_v35 = vld [vmem:[%s29001_s5 + $0x38] sm:$0xff]  }
 0x5bd   : > { %15971 = vst [vmem:[#allocation4 + $0x3c] sm:$0x1] %v15970_v57  ;;  %v14197_v9 = vcombine.high %v14189_v22, %v14189_v22  ;;  %v14198_v51 = vcombine.high %v14196_v11, %v14196_v11  ;;  %v14205_v31 = vrot.slane %v14189_v22, %v23126_v3  ;;  %v15875_v15 = vsel %vm9893_vm10, %v15874_v20, %v15873_v34 }
 0x5be   : > { %v27200_v59 = vpop.f32.mrb[204].mxu0  ;;  %v14212_v45 = vrot.slane %v14196_v11, %v23126_v3  ;;  %v27208_v28 = vadd.f32 %v26898_v13, %v13742_v40  ;;  %v27211_v46 = vadd.f32 %v26898_v13, %v13740_v42  ;;  %v15877_v61 = vsel %vm9896_vm11, %v15876_v29, %v15875_v15  ;;  %21763 = vmatpush3.bf16.msra.mxu0 %v22177_v62 }
 0x5bf   : > { %v27213_v43 = vpop.f32.mrb[205].mxu0  ;;  %v14219_v41 = vrot.slane %v14197_v9, %v23126_v3  ;;  %v14226_v48 = vrot.slane %v14198_v51, %v23126_v3  ;;  %v14227_v37 = vcombine.high %v14205_v31, %v14205_v31  ;;  %v15879_v30 = vsel %vm9899_vm12, %v15878_v56, %v15877_v61 }
 0x5c0   : > { %v27218_v25 = vpop.f32.mrb[206].mxu0  ;;  %v14228_v26 = vcombine.high %v14212_v45, %v14212_v45  ;;  %v14576_v53 = vshrl.u32 %v14205_v31, 16  ;;  %v14596_v20 = vshrl.u32 %v14212_v45, 16  ;;  %v15905_v60 = vpack.c.b16 %v15879_v30, %v15879_v30 }
 0x5c1   : > { %v27221_v21 = vpop.f32.mrb[207].mxu0  ;;  %v14229_v6 = vcombine.high %v14219_v41, %v14219_v41  ;;  %v14230_v36 = vcombine.high %v14226_v48, %v14226_v48  ;;  %v14581_v29 = vshrl.u32 %v14219_v41, 16  ;;  %v14586_v39 = vshrl.u32 %v14227_v37, 16 }
 0x5c2   : > { %v14601_v22 = vshrl.u32 %v14226_v48, 16  ;;  %v14606_v11 = vshrl.u32 %v14228_v26, 16  ;;  %v14735_v56 = vmax.bf16 %v14576_v53, %v14205_v31  ;;  %v15967_v40 = vsel %vm27225_vm13, %v15905_v60, %v15966_v12 }
 0x5c3   : > { %v14591_v63 = vshrl.u32 %v14229_v6, 16  ;;  %v14611_v57 = vshrl.u32 %v14230_v36, 16  ;;  %v14736_v42 = vmax.bf16 %v14581_v29, %v14219_v41  ;;  %15968 = vst [vmem:[#allocation4 + $0x38] sm:$0xf] %v15967_v40  ;;  %v14737_v34 = vmax.bf16 %v14586_v39, %v14227_v37  ;;  %v15975_v40 = vld [vmem:[#allocation4 + $0x44] sm:$0x1] }
 0x5c4   : > { %v14739_v9 = vmax.bf16 %v14596_v20, %v14212_v45  ;;  %v14740_v51 = vmax.bf16 %v14601_v22, %v14226_v48  ;;  %v14741_v15 = vmax.bf16 %v14606_v11, %v14228_v26  ;;  %v15619_v16 = vrot.slane %v14735_v56, %v23133_v14 }
 0x5c5   : > { %v14738_v61 = vmax.bf16 %v14591_v63, %v14229_v6  ;;  %v14742_v30 = vmax.bf16 %v14611_v57, %v14230_v36  ;;  %v15633_v27 = vrot.slane %v14736_v42, %v23133_v14  ;;  %v15647_v31 = vrot.slane %v14737_v34, %v23133_v14 }
 0x5c6   : > { %v15675_v62 = vrot.slane %v14739_v9, %v23133_v14  ;;  %v15689_v12 = vrot.slane %v14740_v51, %v23133_v14  ;;  %v15703_v53 = vrot.slane %v14741_v15, %v23133_v14  ;;  %v15626_v41 = vrot.slane %v15619_v16, %v23133_v14 }
 0x5c7   : > { %v15640_v45 = vrot.slane %v15633_v27, %v23133_v14  ;;  %v15661_v48 = vrot.slane %v14738_v61, %v23133_v14  ;;  %v15717_v37 = vrot.slane %v14742_v30, %v23133_v14  ;;  %v15654_v26 = vrot.slane %v15647_v31, %v23133_v14 }
 0x5c8   : > { %v15682_v20 = vrot.slane %v15675_v62, %v23133_v14  ;;  %v15696_v60 = vrot.slane %v15689_v12, %v23133_v14  ;;  %v15710_v6 = vrot.slane %v15703_v53, %v23133_v14  ;;  %v15781_v39 = vunpack.c.l.b16 %v15626_v41 }
 0x5c9   : > { %v15668_v36 = vrot.slane %v15661_v48, %v23133_v14  ;;  %v15724_v29 = vrot.slane %v15717_v37, %v23133_v14  ;;  %v15782_v16 = vunpack.c.l.b16 %v15640_v45  ;;  %v15783_v22 = vunpack.c.l.b16 %v15654_v26 }
 0x5ca   : > { %v15785_v27 = vunpack.c.l.b16 %v15682_v20  ;;  %v15786_v11 = vunpack.c.l.b16 %v15696_v60  ;;  %v15787_v56 = vunpack.c.l.b16 %v15710_v6  ;;  %v15880_v57 = vrot.slane %v15781_v39, 7 }
 0x5cb   : > { %v15784_v63 = vunpack.c.l.b16 %v15668_v36  ;;  %v15881_v42 = vrot.slane %v15782_v16, 6  ;;  %v20902_v34 = vcombine.low %v15724_v29, %v15724_v29  ;;  %v15883_v9 = vrot.slane %v15783_v22, 5 }
 0x5cc   : > { %v15887_v51 = vrot.slane %v15785_v27, 3  ;;  %v15889_v15 = vrot.slane %v15786_v11, 2  ;;  %v15891_v61 = vrot.slane %v15787_v56, 1  ;;  %v13808_v12 = vpack.c.bf16 %v27208_v28, %v27135_v19  ;;  %v27285_v27 = vld [vmem:[%s29000_s4 + $0x1] ss:$0 sm:$0xff] }
 0x5cd   : > { %v15882_v30 = vsel %vm9884_vm7, %v15881_v42, %v15880_v57  ;;  %v15885_v31 = vrot.slane %v15784_v63, 4  ;;  %v15976_v62 = vsel %vm26955_vm4, %v20902_v34, %v15975_v40  ;;  %v13807_v41 = vpack.c.bf16 %v27211_v46, %v27138_v44 }
 0x5ce   : > { %v15884_v53 = vsel %vm9887_vm8, %v15883_v9, %v15882_v30  ;;  %15977 = vst [vmem:[#allocation4 + $0x44] sm:$0x1] %v15976_v62  ;;  %v13709_v45 = vmax.f32 %v27196_v55, 0.0  ;;  %v13593_v48 = vadd.f32 %v27143_v18, %v27063_v2  ;;  %v13604_v26 = vadd.f32 %v27145_v23, %v27079_v49 }
 0x5cf   : > { %v15886_v37 = vsel %vm9890_vm9, %v15885_v31, %v15884_v53  ;;  %v13596_v20 = vadd.f32 %v27147_v54, %v27069_v24  ;;  %v13617_v19 = vadd.f32 %v27163_v52, %v27087_v5  ;;  %v13823_v60 = vmax.bf16 %v13808_v12, %v13807_v41 }
 0x5d0   : > { %v15888_v28 = vsel %vm9893_vm10, %v15887_v51, %v15886_v37  ;;  %v13745_v44 = vmul.f32 %v26891_v0, %v13709_v45  ;;  %v13707_v55 = vmax.f32 %v13593_v48, 0.0  ;;  %v13710_v2 = vmax.f32 %v13604_v26, 0.0 }
 0x5d1   : > { %v15890_v46 = vsel %vm9896_vm11, %v15889_v15, %v15888_v28  ;;  %v13708_v18 = vmax.f32 %v13596_v20, 0.0  ;;  %v13713_v6 = vmax.f32 %v13617_v19, 0.0  ;;  %v13839_v49 = vcombine.high %v13823_v60, %v13823_v60  ;;  %v27300_v15 = vld [vmem:[%s29000_s4 + $0x2] ss:$0 sm:$0xff] }
 0x5d2   : > { %v27269_v36 = vsel %vm9899_vm12, %v15891_v61, %v15890_v46  ;;  %v13846_v24 = vrot.slane %v13823_v60, %v23126_v3  ;;  %v27274_v5 = vadd.f32 %v26878_v4, %v26883_v1  ;;  %v13781_v23 = vadd.f32 %v26898_v13, %v13745_v44 }
 0x5d3   : > { %v13743_v54 = vmul.f32 %v26891_v0, %v13707_v55  ;;  %v13746_v52 = vmul.f32 %v26891_v0, %v13710_v2  ;;  %v13744_v29 = vmul.f32 %v26891_v0, %v13708_v18  ;;  %v13853_v39 = vrot.slane %v13839_v49, %v23126_v3 }
 0x5d4   : > { %v13854_v16 = vcombine.high %v13846_v24, %v13846_v24  ;;  %v13862_v22 = vrot.slane %v13846_v24, %v23126_v3  ;;  %v13749_v4 = vmul.f32 %v27285_v27, %v13713_v6  ;;  %v27293_v0 = vadd.f32 %v27169_v7, %v27091_v17 }
 0x5d5   : > { %v13779_v1 = vadd.f32 %v26898_v13, %v13743_v54  ;;  %v13782_v11 = vadd.f32 %v26898_v13, %v13746_v52  ;;  %v13780_v56 = vadd.f32 %v26898_v13, %v13744_v29  ;;  %v13855_v40 = vcombine.high %v13853_v39, %v13853_v39 }
 0x5d6   : > { %v13869_v63 = vrot.slane %v13853_v39, %v23126_v3  ;;  %v13876_v57 = vrot.slane %v13854_v16, %v23126_v3  ;;  %v13884_v42 = vcombine.high %v13862_v22, %v13862_v22  ;;  %v14296_v34 = vshrl.u32 %v13862_v22, 16 }
 0x5d7   : > { %v13810_v9 = vpack.c.bf16 %v13782_v11, %v13781_v23  ;;  %v13809_v51 = vpack.c.bf16 %v13780_v56, %v13779_v1  ;;  %v27303_v13 = vadd.f32 %v27300_v15, %v13749_v4  ;;  %v13883_v17 = vrot.slane %v13855_v40, %v23126_v3 }
 0x5d8   : > { %v13885_v7 = vcombine.high %v13869_v63, %v13869_v63  ;;  %v13886_v61 = vcombine.high %v13876_v57, %v13876_v57  ;;  %v14301_v30 = vshrl.u32 %v13876_v57, 16  ;;  %v14306_v31 = vshrl.u32 %v13884_v42, 16 }
 0x5d9   : > { %v14316_v62 = vshrl.u32 %v13869_v63, 16  ;;  %v14679_v12 = vmax.bf16 %v14296_v34, %v13862_v22  ;;  %v13824_v53 = vmax.bf16 %v13810_v9, %v13809_v51  ;;  %v13887_v41 = vcombine.high %v13883_v17, %v13883_v17 }
 0x5da   : > { %v14311_v45 = vshrl.u32 %v13886_v61, 16  ;;  %v14321_v48 = vshrl.u32 %v13883_v17, 16  ;;  %v14326_v37 = vshrl.u32 %v13885_v7, 16  ;;  %v14680_v26 = vmax.bf16 %v14301_v30, %v13876_v57 }
 0x5db   : > { %v14681_v20 = vmax.bf16 %v14306_v31, %v13884_v42  ;;  %v14683_v19 = vmax.bf16 %v14316_v62, %v13869_v63  ;;  %v14835_v28 = vrot.slane %v14679_v12, %v23133_v14  ;;  %v14331_v60 = vshrl.u32 %v13887_v41, 16  ;;  %v15933_v31 = vld [vmem:[#allocation4 + $0xc] sm:$0x1] }
 0x5dc   : > { %v14682_v44 = vmax.bf16 %v14311_v45, %v13886_v61  ;;  %v14684_v55 = vmax.bf16 %v14321_v48, %v13883_v17  ;;  %v14685_v46 = vmax.bf16 %v14326_v37, %v13885_v7  ;;  %v14849_v18 = vrot.slane %v14680_v26, %v23133_v14 }
 0x5dd   : > { %v14842_v2 = vrot.slane %v14835_v28, %v23133_v14  ;;  %v14863_v6 = vrot.slane %v14681_v20, %v23133_v14  ;;  %v14891_v49 = vrot.slane %v14683_v19, %v23133_v14  ;;  %v14686_v24 = vmax.bf16 %v14331_v60, %v13887_v41 }
 0x5de   : > { %v14877_v23 = vrot.slane %v14682_v44, %v23133_v14  ;;  %v14905_v54 = vrot.slane %v14684_v55, %v23133_v14  ;;  %v14919_v52 = vrot.slane %v14685_v46, %v23133_v14  ;;  %v14856_v29 = vrot.slane %v14849_v18, %v23133_v14 }
 0x5df   : > { %v14870_v39 = vrot.slane %v14863_v6, %v23133_v14  ;;  %v14898_v16 = vrot.slane %v14891_v49, %v23133_v14  ;;  %v15725_v22 = vunpack.c.l.b16 %v14842_v2  ;;  %v14933_v56 = vrot.slane %v14686_v24, %v23133_v14 }
 0x5e0   : > { %v14884_v4 = vrot.slane %v14877_v23, %v23133_v14  ;;  %v14912_v1 = vrot.slane %v14905_v54, %v23133_v14  ;;  %v14926_v11 = vrot.slane %v14919_v52, %v23133_v14  ;;  %v15726_v40 = vunpack.c.l.b16 %v14856_v29  ;;  %v22181_v23 = vld [vmem:[%s29001_s5 + $0x40] sm:$0xff]   ;;  %v22183_v52 = vld [vmem:[%s29001_s5 + $0x48] sm:$0xff]  }
 0x5e1   : > { %v15727_v63 = vunpack.c.l.b16 %v14870_v39  ;;  %v15729_v57 = vunpack.c.l.b16 %v14898_v16  ;;  %v15789_v42 = vrot.slane %v15725_v22, 7  ;;  %v14940_v34 = vrot.slane %v14933_v56, %v23133_v14  ;;  %v22182_v54 = vld [vmem:[%s29001_s5] sm:$0xff]   ;;  %21478 = vmatprep.subr.bf16.mxu1 %v22181_v23 }
 0x5e2   : > { %v15728_v9 = vunpack.c.l.b16 %v14884_v4  ;;  %v15730_v51 = vunpack.c.l.b16 %v14912_v1  ;;  %v15731_v17 = vunpack.c.l.b16 %v14926_v11  ;;  %v15790_v7 = vrot.slane %v15726_v40, 6  ;;  %v15928_v39 = vld [vmem:[#allocation4 + $0x8] sm:$0xf]  ;;  %v15978_v1 = vld [vmem:[#allocation4] sm:$0xf]  ;;  %21479 = vmatpush3.bf16.msra.mxu1 %v22182_v54 }
 0x5e3   : > { %v15792_v61 = vrot.slane %v15727_v63, 5  ;;  %v15796_v30 = vrot.slane %v15729_v57, 3  ;;  %v13888_v62 = vcombine.high %v13824_v53, %v13824_v53  ;;  %v20895_v48 = vcombine.low %v14940_v34, %v14940_v34  ;;  %15986 = vst.msk [vmem:[#allocation5] sm:$0xf] %vm14743_vm0, %v15978_v1  ;;  %21480 = vmatprep.subr.bf16.mxu1 %v22183_v52 }
 0x5e4   : > { %v15794_v12 = vrot.slane %v15728_v9, 4  ;;  %v15798_v41 = vrot.slane %v15730_v51, 2  ;;  %v15800_v45 = vrot.slane %v15731_v17, 1  ;;  %v15791_v37 = vsel %vm9884_vm7, %v15790_v7, %v15789_v42 }
 0x5e5   : > { %v13895_v26 = vrot.slane %v13824_v53, %v23126_v3  ;;  %v13902_v20 = vrot.slane %v13888_v62, %v23126_v3  ;;  %v13711_v19 = vmax.f32 %v27293_v0, 0.0  ;;  %v15793_v28 = vsel %vm9887_vm8, %v15792_v61, %v15791_v37 }
 0x5e6   : > { %v15934_v60 = vsel %vm26955_vm4, %v20895_v48, %v15933_v31  ;;  %v27331_v44 = vadd.f32 %v27171_v38, %v27100_v33  ;;  %v27335_v55 = vadd.f32 %v27177_v10, %v27095_v8  ;;  %v15795_v46 = vsel %vm9890_vm9, %v15794_v12, %v15793_v28 }
 0x5e7   : > { %15935 = vst [vmem:[#allocation4 + $0xc] sm:$0x1] %v15934_v60  ;;  %v13903_v53 = vcombine.high %v13895_v26, %v13895_v26  ;;  %v13904_v2 = vcombine.high %v13902_v20, %v13902_v20  ;;  %v13911_v0 = vrot.slane %v13895_v26, %v23126_v3  ;;  %v15797_v18 = vsel %vm9893_vm10, %v15796_v30, %v15795_v46 }
 0x5e8   : > { %v13918_v6 = vrot.slane %v13902_v20, %v23126_v3  ;;  %v27342_v49 = vmul.f32 %v27285_v27, %v13711_v19  ;;  %v13714_v33 = vmax.f32 %v27331_v44, 0.0  ;;  %v15799_v38 = vsel %vm9896_vm11, %v15798_v41, %v15797_v18 }
 0x5e9   : > { %v13925_v8 = vrot.slane %v13903_v53, %v23126_v3  ;;  %v13932_v10 = vrot.slane %v13904_v2, %v23126_v3  ;;  %v13933_v24 = vcombine.high %v13911_v0, %v13911_v0  ;;  %v15801_v29 = vsel %vm9899_vm12, %v15800_v45, %v15799_v38 }
 0x5ea   : > { %v13934_v16 = vcombine.high %v13918_v6, %v13918_v6  ;;  %v14336_v22 = vshrl.u32 %v13911_v0, 16  ;;  %v14356_v4 = vshrl.u32 %v13918_v6, 16  ;;  %v15893_v11 = vpack.c.b16 %v15801_v29, %v15801_v29 }
 0x5eb   : > { %v13935_v56 = vcombine.high %v13925_v8, %v13925_v8  ;;  %v13936_v40 = vcombine.high %v13932_v10, %v13932_v10  ;;  %v14341_v63 = vshrl.u32 %v13925_v8, 16  ;;  %v14346_v57 = vshrl.u32 %v13933_v24, 16 }
 0x5ec   : > { %v14361_v42 = vshrl.u32 %v13932_v10, 16  ;;  %v14366_v34 = vshrl.u32 %v13934_v16, 16  ;;  %v14687_v9 = vmax.bf16 %v14336_v22, %v13911_v0  ;;  %v15929_v51 = vsel %vm27225_vm13, %v15893_v11, %v15928_v39 }
 0x5ed   : > { %v14351_v17 = vshrl.u32 %v13935_v56, 16  ;;  %v14371_v7 = vshrl.u32 %v13936_v40, 16  ;;  %v14688_v61 = vmax.bf16 %v14341_v63, %v13925_v8  ;;  %15930 = vst [vmem:[#allocation4 + $0x8] sm:$0xf] %v15929_v51  ;;  %v14689_v30 = vmax.bf16 %v14346_v57, %v13933_v24 }
 0x5ee   : > { %v14691_v31 = vmax.bf16 %v14356_v4, %v13918_v6  ;;  %v14692_v62 = vmax.bf16 %v14361_v42, %v13932_v10  ;;  %v14693_v12 = vmax.bf16 %v14366_v34, %v13934_v16  ;;  %v14947_v48 = vrot.slane %v14687_v9, %v23133_v14  ;;  %v15939_v16 = vld [vmem:[#allocation4 + $0x14] sm:$0x1] }
 0x5ef   : > { %v14690_v41 = vmax.bf16 %v14351_v17, %v13935_v56  ;;  %v14694_v45 = vmax.bf16 %v14371_v7, %v13936_v40  ;;  %v14961_v37 = vrot.slane %v14688_v61, %v23133_v14  ;;  %v14975_v26 = vrot.slane %v14689_v30, %v23133_v14 }
 0x5f0   : > { %v15003_v20 = vrot.slane %v14691_v31, %v23133_v14  ;;  %v15017_v19 = vrot.slane %v14692_v62, %v23133_v14  ;;  %v15031_v28 = vrot.slane %v14693_v12, %v23133_v14  ;;  %v14954_v60 = vrot.slane %v14947_v48, %v23133_v14 }
 0x5f1   : > { %v14968_v46 = vrot.slane %v14961_v37, %v23133_v14  ;;  %v14989_v53 = vrot.slane %v14690_v41, %v23133_v14  ;;  %v15045_v2 = vrot.slane %v14694_v45, %v23133_v14  ;;  %v14982_v0 = vrot.slane %v14975_v26, %v23133_v14 }
 0x5f2   : > { %v15010_v18 = vrot.slane %v15003_v20, %v23133_v14  ;;  %v15024_v6 = vrot.slane %v15017_v19, %v23133_v14  ;;  %v15038_v38 = vrot.slane %v15031_v28, %v23133_v14  ;;  %v15733_v24 = vunpack.c.l.b16 %v14954_v60  ;;  %v15994_v19 = vld [vmem:[#allocation4] sm:$0xf]  ;;  %v29188_v28 = vld [vmem:[#allocation17_spill] sm:$0xff] }
 0x5f3   : > { %v14996_v8 = vrot.slane %v14989_v53, %v23133_v14  ;;  %v15052_v10 = vrot.slane %v15045_v2, %v23133_v14  ;;  %v15734_v23 = vunpack.c.l.b16 %v14968_v46  ;;  %v15735_v54 = vunpack.c.l.b16 %v14982_v0 }
 0x5f4   : > { %v15737_v52 = vunpack.c.l.b16 %v15010_v18  ;;  %v15738_v29 = vunpack.c.l.b16 %v15024_v6  ;;  %v15739_v39 = vunpack.c.l.b16 %v15038_v38  ;;  %v15802_v4 = vrot.slane %v15733_v24, 7  ;;  %v15996_v2 = vld [vmem:[#allocation4 + $0x8] sm:$0xf]  ;;  %v29189_v38 = vld [vmem:[#allocation18_spill] sm:$0xff] }
 0x5f5   : > { %v15736_v22 = vunpack.c.l.b16 %v14996_v8  ;;  %v15803_v1 = vrot.slane %v15734_v23, 6  ;;  %v20896_v11 = vcombine.low %v15052_v10, %v15052_v10  ;;  %v15805_v56 = vrot.slane %v15735_v54, 5  ;;  %v27417_v10 = vld [vmem:[#allocation4 + $0x4] sm:$0x1] }
 0x5f6   : > { %v15809_v40 = vrot.slane %v15737_v52, 3  ;;  %v15811_v63 = vrot.slane %v15738_v29, 2  ;;  %v15813_v57 = vrot.slane %v15739_v39, 1  ;;  %v13783_v51 = vadd.f32 %v27300_v15, %v27342_v49 }
 0x5f7   : > { %v15804_v42 = vsel %vm9884_vm7, %v15803_v1, %v15802_v4  ;;  %v15807_v34 = vrot.slane %v15736_v22, 4  ;;  %v15940_v9 = vsel %vm26955_vm4, %v20896_v11, %v15939_v16  ;;  %v13750_v7 = vmul.f32 %v27285_v27, %v13714_v33 }
 0x5f8   : > { %v15806_v17 = vsel %vm9887_vm8, %v15805_v56, %v15804_v42  ;;  %15941 = vst [vmem:[#allocation4 + $0x14] sm:$0x1] %v15940_v9  ;;  %v13712_v61 = vmax.f32 %v27335_v55, 0.0  ;;  %v13633_v30 = vadd.f32 %v27200_v59, %v27116_v58  ;;  %v13625_v62 = vadd.f32 %v27213_v43, %v27107_v47  ;;  %v15936_v43 = vld [vmem:[#allocation4 + $0x10] sm:$0xf] }
 0x5f9   : > { %v15808_v31 = vsel %vm9890_vm9, %v15807_v34, %v15806_v17  ;;  %v13636_v49 = vadd.f32 %v27218_v25, %v27274_v5  ;;  %v13628_v12 = vadd.f32 %v27221_v21, %v27111_v50  ;;  %v13786_v33 = vadd.f32 %v27300_v15, %v13750_v7 }
 0x5fa   : > { %v15810_v44 = vsel %vm9893_vm10, %v15809_v40, %v15808_v31  ;;  %v13748_v55 = vmul.f32 %v27285_v27, %v13712_v61  ;;  %v13717_v41 = vmax.f32 %v13633_v30, 0.0  ;;  %v13715_v59 = vmax.f32 %v13625_v62, 0.0 }
 0x5fb   : > { %v15812_v58 = vsel %vm9896_vm11, %v15811_v63, %v15810_v44  ;;  %v13718_v45 = vmax.f32 %v13636_v49, 0.0  ;;  %v13716_v48 = vmax.f32 %v13628_v12, 0.0  ;;  %v13812_v25 = vpack.c.bf16 %v13786_v33, %v27303_v13 }
 0x5fc   : > { %v15814_v47 = vsel %vm9899_vm12, %v15813_v57, %v15812_v58  ;;  %v13784_v5 = vadd.f32 %v27300_v15, %v13748_v55  ;;  %v13753_v50 = vmul.f32 %v27285_v27, %v13717_v41  ;;  %v13751_v37 = vmul.f32 %v27285_v27, %v13715_v59 }
 0x5fd   : > { %v15895_v21 = vpack.c.b16 %v15814_v47, %v15814_v47  ;;  %v13754_v26 = vmul.f32 %v27285_v27, %v13718_v45  ;;  %v13752_v20 = vmul.f32 %v27285_v27, %v13716_v48  ;;  %v15901_v60 = vpack.c.b16 %v29188_v28, %v29188_v28 }
 0x5fe   : > { %v13811_v46 = vpack.c.bf16 %v13784_v5, %v13783_v51  ;;  %v13789_v53 = vadd.f32 %v27300_v15, %v13753_v50  ;;  %v13787_v0 = vadd.f32 %v27300_v15, %v13751_v37  ;;  %v15903_v27 = vpack.c.b16 %v29189_v38, %v29189_v38 }
 0x5ff   : > { %v15937_v13 = vsel %vm27225_vm13, %v15895_v21, %v15936_v43  ;;  %v13790_v18 = vadd.f32 %v27300_v15, %v13754_v26  ;;  %v13788_v6 = vadd.f32 %v27300_v15, %v13752_v20  ;;  %v16014_v24 = vshrl.u32 %v15994_v19, 16  ;;  %v27424_v15 = vld [vmem:[#allocation4 + $0xc] sm:$0x1] }
 0x600   : > { %15938 = vst [vmem:[#allocation4 + $0x10] sm:$0xf] %v15937_v13  ;;  %v13825_v8 = vmax.bf16 %v13812_v25, %v13811_v46  ;;  %v16017_v23 = vshll.u32 %v15994_v19, 16  ;;  %v16028_v29 = vshrl.u32 %v15996_v2, 16  ;;  %v16031_v39 = vshll.u32 %v15996_v2, 16 }
 0x601   : > { %v13814_v54 = vpack.c.bf16 %v13790_v18, %v13789_v53  ;;  %v13813_v52 = vpack.c.bf16 %v13788_v6, %v13787_v0  ;;  %v27420_v4 = vrot.slane %v16014_v24, 4  ;;  %v16023_v56 = vshll.u32 %v27417_v10, 16 }
 0x602   : > { %v13937_v16 = vcombine.high %v13825_v8, %v13825_v8  ;;  %v13944_v22 = vrot.slane %v13825_v8, %v23126_v3  ;;  %v27422_v1 = vrot.slane %v16017_v23, 5  ;;  %v27427_v40 = vrot.slane %v16028_v29, 4 }
 0x603   : > { %v13826_v11 = vmax.bf16 %v13814_v54, %v13813_v52  ;;  %v27429_v63 = vrot.slane %v16031_v39, 5  ;;  %v16037_v61 = vshll.u32 %v27424_v15, 16  ;;  %v22191_v15 = vld [vmem:[%s29001_s5 + $0x68] sm:$0xff]   ;;  %v15907_v28 = vpack.c.b16 %v27269_v36, %v27269_v36 }
 0x604   : > { %v13951_v57 = vrot.slane %v13937_v16, %v23126_v3  ;;  %v13952_v42 = vcombine.high %v13944_v22, %v13944_v22  ;;  %v13960_v34 = vrot.slane %v13944_v22, %v23126_v3  ;;  %v16020_v9 = vor.u32 %v27422_v1, %v27420_v4 }
 0x605   : > { %v13986_v51 = vcombine.high %v13826_v11, %v13826_v11  ;;  %v27436_v17 = vrot.slane %v13826_v11, %v23126_v3  ;;  %v16034_v7 = vor.u32 %v27429_v63, %v27427_v40  ;;  %v16039_v4 = vrot.slane %v16037_v61, 5  ;;  %v15948_v61 = vld [vmem:[#allocation4 + $0x20] sm:$0xf] }
 0x606   : > { %v13953_v30 = vcombine.high %v13951_v57, %v13951_v57  ;;  %v13967_v31 = vrot.slane %v13951_v57, %v23126_v3  ;;  %v13974_v62 = vrot.slane %v13952_v42, %v23126_v3  ;;  %v13982_v49 = vcombine.high %v13960_v34, %v13960_v34 }
 0x607   : > { %v14376_v12 = vshrl.u32 %v13960_v34, 16  ;;  %v14000_v44 = vrot.slane %v13986_v51, %v23126_v3  ;;  %v14001_v33 = vcombine.high %v27436_v17, %v27436_v17  ;;  %v27448_v55 = vrot.slane %v27436_v17, %v23126_v3  ;;  %v16242_v41 = vld [vmem:[#allocation4 + $0x10] sm:$0xf] }
 0x608   : > { %v13981_v58 = vrot.slane %v13953_v30, %v23126_v3  ;;  %v13983_v59 = vcombine.high %v13967_v31, %v13967_v31  ;;  %v13984_v45 = vcombine.high %v13974_v62, %v13974_v62  ;;  %v14381_v48 = vshrl.u32 %v13974_v62, 16  ;;  %16259 = vrot.lane.b32.xlu1 %v16242_v41, %s22726_s15  ;;  %v16706_v40 = vld [vmem:[#allocation4 + $0x10] sm:$0xe] }
 0x609   : > { %v14386_v47 = vshrl.u32 %v13982_v49, 16  ;;  %v14396_v43 = vshrl.u32 %v13967_v31, 16  ;;  %v14695_v25 = vmax.bf16 %v14376_v12, %v13960_v34  ;;  %v14002_v5 = vcombine.high %v14000_v44, %v14000_v44 }
 0x60a   : > { %v13985_v50 = vcombine.high %v13981_v58, %v13981_v58  ;;  %v14391_v21 = vshrl.u32 %v13984_v45, 16  ;;  %v14401_v37 = vshrl.u32 %v13981_v58, 16  ;;  %v14406_v26 = vshrl.u32 %v13983_v59, 16 }
 0x60b   : > { %v14696_v20 = vmax.bf16 %v14381_v48, %v13974_v62  ;;  %v14697_v19 = vmax.bf16 %v14386_v47, %v13982_v49  ;;  %v14699_v46 = vmax.bf16 %v14396_v43, %v13967_v31  ;;  %v15059_v53 = vrot.slane %v14695_v25, %v23133_v14  ;;  %v15945_v43 = vld [vmem:[#allocation4 + $0x1c] sm:$0x1] }
 0x60c   : > { %v14411_v2 = vshrl.u32 %v13985_v50, 16  ;;  %v14698_v13 = vmax.bf16 %v14391_v21, %v13984_v45  ;;  %v14700_v0 = vmax.bf16 %v14401_v37, %v13981_v58  ;;  %v14701_v18 = vmax.bf16 %v14406_v26, %v13983_v59 }
 0x60d   : > { %v15066_v6 = vrot.slane %v15059_v53, %v23133_v14  ;;  %v15073_v8 = vrot.slane %v14696_v20, %v23133_v14  ;;  %v15087_v24 = vrot.slane %v14697_v19, %v23133_v14  ;;  %v15115_v23 = vrot.slane %v14699_v46, %v23133_v14 }
 0x60e   : > { %v14702_v54 = vmax.bf16 %v14411_v2, %v13985_v50  ;;  %v15101_v52 = vrot.slane %v14698_v13, %v23133_v14  ;;  %v15129_v29 = vrot.slane %v14700_v0, %v23133_v14  ;;  %v15143_v39 = vrot.slane %v14701_v18, %v23133_v14 }
 0x60f   : > { %v15080_v16 = vrot.slane %v15073_v8, %v23133_v14  ;;  %v15094_v22 = vrot.slane %v15087_v24, %v23133_v14  ;;  %v15122_v11 = vrot.slane %v15115_v23, %v23133_v14  ;;  %v15741_v57 = vunpack.c.l.b16 %v15066_v6 }
 0x610   : > { %v15108_v42 = vrot.slane %v15101_v52, %v23133_v14  ;;  %v15136_v34 = vrot.slane %v15129_v29, %v23133_v14  ;;  %v15150_v51 = vrot.slane %v15143_v39, %v23133_v14  ;;  %v15157_v17 = vrot.slane %v14702_v54, %v23133_v14 }
 0x611   : > { %v15742_v30 = vunpack.c.l.b16 %v15080_v16  ;;  %v15743_v31 = vunpack.c.l.b16 %v15094_v22  ;;  %v15745_v62 = vunpack.c.l.b16 %v15122_v11  ;;  %v15815_v49 = vrot.slane %v15741_v57, 7  ;;  %v15942_v11 = vld [vmem:[#allocation4 + $0x18] sm:$0xf] }
 0x612   : > { %v15164_v12 = vrot.slane %v15157_v17, %v23133_v14  ;;  %v15744_v41 = vunpack.c.l.b16 %v15108_v42  ;;  %v15746_v58 = vunpack.c.l.b16 %v15136_v34  ;;  %v15747_v59 = vunpack.c.l.b16 %v15150_v51  ;;  %v22184_v51 = vld [vmem:[%s29001_s5 + $0x8] sm:$0xff]   ;;  %v22185_v17 = vld [vmem:[%s29001_s5 + $0x50] sm:$0xff]  }
 0x613   : > { %v15816_v45 = vrot.slane %v15742_v30, 6  ;;  %v15818_v48 = vrot.slane %v15743_v31, 5  ;;  %v15822_v47 = vrot.slane %v15745_v62, 3  ;;  %v14016_v25 = vrot.slane %v14000_v44, %v23126_v3  ;;  %21481 = vmatpush3.bf16.msra.mxu1 %v22184_v51 }
 0x614   : > { %v15820_v50 = vrot.slane %v15744_v41, 4  ;;  %v15824_v21 = vrot.slane %v15746_v58, 2  ;;  %v15826_v37 = vrot.slane %v15747_v59, 1  ;;  %v20897_v26 = vcombine.low %v15164_v12, %v15164_v12  ;;  %21482 = vmatprep.subr.bf16.mxu1 %v22185_v17 }
 0x615   : > { %v15817_v20 = vsel %vm9884_vm7, %v15816_v45, %v15815_v49  ;;  %v14023_v19 = vrot.slane %v14001_v33, %v23126_v3  ;;  %v14030_v46 = vrot.slane %v14002_v5, %v23126_v3  ;;  %v14031_v53 = vcombine.high %v27448_v55, %v27448_v55 }
 0x616   : > { %v15819_v2 = vsel %vm9887_vm8, %v15818_v48, %v15817_v20  ;;  %v15946_v13 = vsel %vm26955_vm4, %v20897_v26, %v15945_v43  ;;  %v14032_v0 = vcombine.high %v14016_v25, %v14016_v25  ;;  %v14416_v44 = vshrl.u32 %v27448_v55, 16 }
 0x617   : > { %v15821_v18 = vsel %vm9890_vm9, %v15820_v50, %v15819_v2  ;;  %15947 = vst [vmem:[#allocation4 + $0x1c] sm:$0x1] %v15946_v13  ;;  %v14033_v6 = vcombine.high %v14023_v19, %v14023_v19  ;;  %v14034_v8 = vcombine.high %v14030_v46, %v14030_v46  ;;  %v14421_v24 = vshrl.u32 %v14023_v19, 16 }
 0x618   : > { %v15823_v33 = vsel %vm9893_vm10, %v15822_v47, %v15821_v18  ;;  %v14426_v5 = vshrl.u32 %v14031_v53, 16  ;;  %v14436_v23 = vshrl.u32 %v14016_v25, 16  ;;  %v14441_v54 = vshrl.u32 %v14030_v46, 16 }
 0x619   : > { %v15825_v52 = vsel %vm9896_vm11, %v15824_v21, %v15823_v33  ;;  %v14431_v29 = vshrl.u32 %v14033_v6, 16  ;;  %v14446_v39 = vshrl.u32 %v14032_v0, 16  ;;  %v14451_v16 = vshrl.u32 %v14034_v8, 16  ;;  %v15951_v33 = vld [vmem:[#allocation4 + $0x24] sm:$0x1] }
 0x61a   : > { %v15827_v22 = vsel %vm9899_vm12, %v15826_v37, %v15825_v52  ;;  %v14703_v57 = vmax.bf16 %v14416_v44, %v27448_v55  ;;  %v14704_v42 = vmax.bf16 %v14421_v24, %v14023_v19  ;;  %v14705_v34 = vmax.bf16 %v14426_v5, %v14031_v53  ;;  %v22187_v53 = vld [vmem:[%s29001_s5 + $0x58] sm:$0xff]  }
 0x61b   : > { %v15897_v30 = vpack.c.b16 %v15827_v22, %v15827_v22  ;;  %v14706_v31 = vmax.bf16 %v14431_v29, %v14033_v6  ;;  %v14707_v62 = vmax.bf16 %v14436_v23, %v14016_v25  ;;  %v14708_v49 = vmax.bf16 %v14441_v54, %v14030_v46  ;;  %v22186_v46 = vld [vmem:[%s29001_s5 + $0x10] sm:$0xff]   ;;  %v22188_v5 = vld [vmem:[%s29001_s5 + $0x18] sm:$0xff]  }
 0x61c   : > { %v14709_v12 = vmax.bf16 %v14446_v39, %v14032_v0  ;;  %v14710_v41 = vmax.bf16 %v14451_v16, %v14034_v8  ;;  %v15171_v55 = vrot.slane %v14703_v57, %v23133_v14  ;;  %v15185_v58 = vrot.slane %v14704_v42, %v23133_v14  ;;  %21483 = vmatpush3.bf16.msra.mxu1 %v22186_v46  ;;  %v15979_v39 = vld [vmem:[#allocation4 + $0x8] sm:$0xf]  ;;  %v15998_v42 = vld [vmem:[#allocation4 + $0x10] sm:$0xf] }
 0x61d   : > { %v15943_v59 = vsel %vm27225_vm13, %v15897_v30, %v15942_v11  ;;  %v15199_v45 = vrot.slane %v14705_v34, %v23133_v14  ;;  %v15213_v48 = vrot.slane %v14706_v31, %v23133_v14  ;;  %v15227_v47 = vrot.slane %v14707_v62, %v23133_v14  ;;  %21484 = vmatprep.subr.bf16.mxu1 %v22187_v53  ;;  %v15954_v34 = vld [vmem:[#allocation4 + $0x28] sm:$0xf] }
 0x61e   : > { %15944 = vst [vmem:[#allocation4 + $0x18] sm:$0xf] %v15943_v59  ;;  %v15178_v43 = vrot.slane %v15171_v55, %v23133_v14  ;;  %v15192_v25 = vrot.slane %v15185_v58, %v23133_v14  ;;  %v15241_v50 = vrot.slane %v14708_v49, %v23133_v14  ;;  %v15255_v21 = vrot.slane %v14709_v12, %v23133_v14  ;;  %v16241_v55 = vld [vmem:[#allocation4 + $0x8] sm:$0xf]  ;;  %v16709_v36 = vld [vmem:[#allocation4 + $0x1c] sm:$0x1] }
 0x61f   : > { %v15206_v37 = vrot.slane %v15199_v45, %v23133_v14  ;;  %v15220_v26 = vrot.slane %v15213_v48, %v23133_v14  ;;  %v15234_v20 = vrot.slane %v15227_v47, %v23133_v14  ;;  %v15269_v19 = vrot.slane %v14710_v41, %v23133_v14  ;;  %15987 = vst.msk [vmem:[#allocation5 + $0x14] sm:$0xf] %vm14743_vm0, %v15979_v39  ;;  %v16001_v47 = vld [vmem:[#allocation4 + $0x1c] sm:$0x1]  ;;  %v22201_v49 = vld [vmem:[%s29001_s5 + $0x80] sm:$0xff]  }
 0x620   : > { %v15248_v2 = vrot.slane %v15241_v50, %v23133_v14  ;;  %v15262_v13 = vrot.slane %v15255_v21, %v23133_v14  ;;  %v15749_v0 = vunpack.c.l.b16 %v15178_v43  ;;  %v15750_v44 = vunpack.c.l.b16 %v15192_v25  ;;  %21485 = vmatpush3.bf16.msra.mxu1 %v22188_v5  ;;  %v16707_v43 = vld [vmem:[#allocation4 + $0x14] sm:$0x1]  ;;  %v15980_v25 = vld [vmem:[#allocation4 + $0x10] sm:$0xf] }
 0x621   : > { %v15276_v18 = vrot.slane %v15269_v19, %v23133_v14  ;;  %v15751_v6 = vunpack.c.l.b16 %v15206_v37  ;;  %v15752_v8 = vunpack.c.l.b16 %v15220_v26  ;;  %v15753_v24 = vunpack.c.l.b16 %v15234_v20  ;;  %v22189_v14 = vld [vmem:[%s29001_s5 + $0x60] sm:$0xff]   ;;  %15988 = vst.msk [vmem:[#allocation5 + $0x28] sm:$0xf] %vm14743_vm0, %v15980_v25  ;;  %v15985_v20 = vld [vmem:[#allocation4 + $0x38] sm:$0xf] }
 0x622   : > { %v15754_v23 = vunpack.c.l.b16 %v15248_v2  ;;  %v15828_v54 = vrot.slane %v15749_v0, 7  ;;  %v15829_v52 = vrot.slane %v15750_v44, 6  ;;  %v16025_v29 = vrot.slane %v16023_v56, 5  ;;  %v27526_v56 = vld [vmem:[#allocation4 + $0x14] sm:$0x1]  ;;  %21486 = vmatprep.subr.bf16.mxu1 %v22189_v14 }
 0x623   : > { %v15755_v16 = vunpack.c.l.b16 %v15262_v13  ;;  %v15831_v22 = vrot.slane %v15751_v6, 5  ;;  %v15833_v11 = vrot.slane %v15752_v8, 4  ;;  %v20898_v57 = vcombine.low %v15276_v18, %v15276_v18  ;;  %v27567_v2 = vld [vmem:[#allocation4 + $0x2c] sm:$0x1]  ;;  %v15960_v13 = vld [vmem:[#allocation4 + $0x30] sm:$0xf] }
 0x624   : > { %v15830_v51 = vsel %vm9884_vm7, %v15829_v52, %v15828_v54  ;;  %v15835_v17 = vrot.slane %v15753_v24, 3  ;;  %v15837_v30 = vrot.slane %v15754_v23, 2  ;;  %v16021_v10 = vrot.slane %v16020_v9, 4  ;;  %21487 = vmatpush3.bf16.msra.mxu1 %v22190_v32  ;;  %v22192_v0 = vld [vmem:[%s29001_s5 + $0x28] sm:$0xff]   ;;  %15993 = vst.msk [vmem:[#allocation5 + $0x8c] sm:$0xf] %vm14743_vm0, %v15985_v20 }
 0x625   : > { %v15832_v31 = vsel %vm9887_vm8, %v15831_v22, %v15830_v51  ;;  %v15952_v62 = vsel %vm26955_vm4, %v20898_v57, %v15951_v33  ;;  %v16035_v12 = vrot.slane %v16034_v7, 4  ;;  %v16000_v1 = vld [vmem:[#allocation4 + $0x18] sm:$0xf]  ;;  %v16042_v58 = vshrl.u32 %v15998_v42, 16  ;;  %v15972_v8 = vld [vmem:[#allocation4 + $0x40] sm:$0xf]  ;;  %21488 = vmatprep.subr.bf16.mxu1 %v22191_v15 }
 0x626   : > { %v15834_v9 = vsel %vm9890_vm9, %v15833_v11, %v15832_v31  ;;  %15953 = vst [vmem:[#allocation4 + $0x24] sm:$0x1] %v15952_v62  ;;  %v16026_v41 = vsel %vm27533_vm1, %v16021_v10, %v16025_v29  ;;  %v16045_v59 = vshll.u32 %v15998_v42, 16  ;;  %v15839_v7 = vrot.slane %v15755_v16, 1  ;;  %v16708_v53 = vld [vmem:[#allocation4 + $0x18] sm:$0xe] }
 0x627   : > { %v15836_v63 = vsel %vm9893_vm10, %v15835_v17, %v15834_v9  ;;  %16125 = vrot.lane.b32.xlu0 %v16026_v41, %s22726_s15  ;;  %v16040_v45 = vsel %vm27533_vm1, %v16035_v12, %v16039_v4  ;;  %v15955_v48 = vsel %vm27225_vm13, %v15901_v60, %v15954_v34  ;;  %v16044_v21 = vrot.slane %v16042_v58, 4  ;;  %v22193_v24 = vld [vmem:[%s29001_s5 + $0x70] sm:$0xff]   ;;  %v16713_v22 = vld [vmem:[#allocation4 + $0x2c] sm:$0x1]  ;;  %v22195_v12 = vld [vmem:[%s29001_s5 + $0x78] sm:$0xff]  }
 0x628   : > { %v15838_v50 = vsel %vm9896_vm11, %v15837_v30, %v15836_v63  ;;  %16127 = vrot.lane.b32.xlu1 %v16040_v45, %s22726_s15  ;;  %v16047_v37 = vrot.slane %v16045_v59, 5  ;;  %15956 = vst [vmem:[#allocation4 + $0x28] sm:$0xf] %v15955_v48  ;;  %v16056_v26 = vshrl.u32 %v16000_v1, 16  ;;  %v16051_v60 = vshll.u32 %v27526_v56, 16  ;;  %21489 = vmatpush3.bf16.msra.mxu1 %v22192_v0  ;;  %v22194_v51 = vld [vmem:[%s29001_s5 + $0x30] sm:$0xff]  }
 0x629   : > { %v15840_v19 = vsel %vm9899_vm12, %v15839_v7, %v15838_v50  ;;  %v16059_v46 = vshll.u32 %v16000_v1, 16  ;;  %vm16190_vm9 = vcmask 1042432   ;;  %v16065_v5 = vshll.u32 %v16001_v47, 16  ;;  %v15981_v54 = vld [vmem:[#allocation4 + $0x18] sm:$0xf]  ;;  %21490 = vmatprep.subr.bf16.mxu1 %v22193_v24  ;;  %v22200_v50 = vld [vmem:[%s29001_s5 + $0xc0] sm:$0xff]  }
 0x62a   : > { %v15899_v44 = vpack.c.b16 %v15840_v19, %v15840_v19  ;;  %v16048_v18 = vor.u32 %v16047_v37, %v16044_v21  ;;  %v16058_v6 = vrot.slane %v16056_v26, 4  ;;  %vm16191_vm10 = vcmask 1046532   ;;  %v16243_v29 = vld [vmem:[#allocation4 + $0x18] sm:$0xf]  ;;  %15989 = vst.msk [vmem:[#allocation5 + $0x3c] sm:$0xf] %vm14743_vm0, %v15981_v54 }
 0x62b   : > { %16257 = vrot.lane.b32.xlu0 %v16241_v55, %s22726_s15  ;;  %v16061_v33 = vrot.slane %v16059_v46, 5  ;;  %v20919_v23 = vrot.slane %v16706_v40, 9  ;;  %v16740_v39 = vrot.slane %v16707_v43, 5  ;;  %v20920_v16 = vrot.slane %v16708_v53, 9  ;;  %vm27581_vm11 = vmor %vm16190_vm9, %vm16191_vm10  ;;  %v16716_v34 = vld [vmem:[#allocation4 + $0x38] sm:$0xe] }
 0x62c   : > { %v15949_v52 = vsel %vm27225_vm13, %v15899_v44, %v15948_v61  ;;  %v16049_v14 = vrot.slane %v16048_v18, 4  ;;  %v16744_v42 = vrot.slane %v16709_v36, 5  ;;  %v16053_v17 = vrot.slane %v16051_v60, 5  ;;  %v16717_v62 = vld [vmem:[#allocation4 + $0x3c] sm:$0x1]  ;;  %21491 = vmatpush3.bf16.msra.mxu1 %v22194_v51 }
 0x62d   : > { %15950 = vst [vmem:[#allocation4 + $0x20] sm:$0xf] %v15949_v52  ;;  %v16062_v11 = vor.u32 %v16061_v33, %v16058_v6  ;;  %v16741_v30 = vsel %vm27581_vm11, %v20919_v23, %v16740_v39  ;;  %v16093_v10 = vshll.u32 %v27567_v2, 16  ;;  %v27591_v56 = vld [vmem:[#allocation4 + $0x24] sm:$0x1]  ;;  %v15961_v31 = vsel %vm27225_vm13, %v15903_v27, %v15960_v13  ;;  %21492 = vmatprep.subr.bf16.mxu1 %v22195_v12 }
 0x62e   : > { %v27602_v4 = vrot.slane %v16065_v5, 5  ;;  %v16745_v1 = vsel %vm27581_vm11, %v20920_v16, %v16744_v42  ;;  %16778 = vst.msk [vmem:[#allocation5 + $0x10] sm:$0xf] %vm14743_vm0, %v16741_v30  ;;  %vm17205_vm12 = vcmask 523264   ;;  %15962 = vst [vmem:[#allocation4 + $0x30] sm:$0xf] %v15961_v31  ;;  %v15973_v27 = vsel %vm27225_vm13, %v15907_v28, %v15972_v8 }
 0x62f   : > { %16261 = vrot.lane.b32.xlu0 %v16243_v29, %s22726_s15  ;;  %v16004_v38 = vld [vmem:[#allocation4 + $0x28] sm:$0xf]  ;;  %v27607_v32 = vld [vmem:[#allocation4 + $0x38] sm:$0xf]  ;;  %v16054_v9 = vsel %vm27533_vm1, %v16049_v14, %v16053_v17  ;;  %16779 = vst.msk [vmem:[#allocation5 + $0x24] sm:$0xf] %vm14743_vm0, %v16745_v1 }
 0x630   : > { %v16084_v41 = vshrl.u32 %v16004_v38, 16  ;;  %v16087_v55 = vshll.u32 %v16004_v38, 16  ;;  %v16711_v58 = vld [vmem:[#allocation4 + $0x24] sm:$0x1]  ;;  %v16712_v59 = vld [vmem:[#allocation4 + $0x28] sm:$0xe]  ;;  %21493 = vmatpush3.bf16.msra.mxu1 %v22196_v35 }
 0x631   : > { %15974 = vst [vmem:[#allocation4 + $0x40] sm:$0xf] %v15973_v27  ;;  %v16063_v40 = vrot.slane %v16062_v11, 4  ;;  %v16079_v15 = vshll.u32 %v27591_v56, 16  ;;  %v20922_v63 = vrot.slane %v16712_v59, 9  ;;  %v16752_v7 = vrot.slane %v16713_v22, 5  ;;  %21518 = vmatprep.subr.bf16.mxu1 %v22200_v50 }
 0x632   : > { %v27615_v61 = vld [vmem:[#allocation4 + $0x34] sm:$0x1]  ;;  %v16086_v48 = vrot.slane %v16084_v41, 4  ;;  %v16089_v47 = vrot.slane %v16087_v55, 5  ;;  %v27622_v43 = vrot.slane %v16093_v10, 5  ;;  %v20924_v25 = vrot.slane %v16716_v34, 9 }
 0x633   : > { %v27617_v45 = vld [vmem:[#allocation4 + $0x34] sm:$0x1]  ;;  %16129 = vrot.lane.b32.xlu0 %v16054_v9, %s22726_s15  ;;  %v16748_v21 = vrot.slane %v16711_v58, 5  ;;  %v16753_v37 = vsel %vm27581_vm11, %v20922_v63, %v16752_v7  ;;  %v16760_v26 = vrot.slane %v16717_v62, 5  ;;  %v27630_v20 = vld [vmem:[#allocation4 + $0x3c] sm:$0x1]  ;;  %v16068_v39 = vsel %vm27533_vm1, %v16063_v40, %v27602_v4 }
 0x634   : > { %v16112_v28 = vshrl.u32 %v27607_v32, 16  ;;  %v16244_v19 = vld [vmem:[#allocation4 + $0x20] sm:$0xf]  ;;  %v16090_v60 = vor.u32 %v16089_v47, %v16086_v48  ;;  %16781 = vst.msk [vmem:[#allocation5 + $0x4c] sm:$0xf] %vm14743_vm0, %v16753_v37  ;;  %v16107_v8 = vshll.u32 %v27615_v61, 16 }
 0x635   : > { %v16002_v46 = vld [vmem:[#allocation4 + $0x20] sm:$0xf]  ;;  %v16245_v2 = vld [vmem:[#allocation4 + $0x28] sm:$0xf]  ;;  %16263 = vrot.lane.b32.xlu1 %v16244_v19, %s22726_s15  ;;  %v16761_v18 = vsel %vm27581_vm11, %v20924_v25, %v16760_v26  ;;  %v16756_v24 = vrot.slane %v27617_v45, 5  ;;  %v16115_v11 = vshll.u32 %v27607_v32, 16 }
 0x636   : > { %v16710_v53 = vld [vmem:[#allocation4 + $0x20] sm:$0xe]  ;;  %v16070_v13 = vshrl.u32 %v16002_v46, 16  ;;  %v16073_v0 = vshll.u32 %v16002_v46, 16  ;;  %v16720_v6 = vld [vmem:[#allocation4 + $0x48] sm:$0xe] }
 0x637   : > { %v20921_v44 = vrot.slane %v16710_v53, 9  ;;  %v16091_v36 = vrot.slane %v16090_v60, 4  ;;  %16783 = vst.msk [vmem:[#allocation5 + $0x74] sm:$0xf] %vm14743_vm0, %v16761_v18  ;;  %v16114_v33 = vrot.slane %v16112_v28, 4  ;;  %16265 = vrot.lane.b32.xlu0 %v16245_v2, %s22726_s15  ;;  %v16121_v42 = vshll.u32 %v27630_v20, 16 }
 0x638   : > { %v22176_v5 = vld [vmem:[#allocation5 + $0x10] ss:$20 sps:$4 sm:$0xff]   ;;  %v16072_v23 = vrot.slane %v16070_v13, 4  ;;  %v16075_v54 = vrot.slane %v16073_v0, 5  ;;  %v16719_v29 = vld [vmem:[#allocation4 + $0x44] sm:$0x1] }
 0x639   : > { %v16749_v52 = vsel %vm27581_vm11, %v20921_v44, %v16748_v21  ;;  %v16721_v14 = vld [vmem:[#allocation4 + $0x4c] sm:$0x1]  ;;  %v16006_v16 = vld [vmem:[#allocation4 + $0x30] sm:$0xf]  ;;  %16131 = vrot.lane.b32.xlu1 %v16068_v39, %s22726_s15  ;;  %21764 = vmatprep.mubr.msk.bf16.mxu0 %vm17205_vm12, %v22176_v5  ;;  %v27651_v10 = vld [vmem:[#allocation4 + $0x8] sm:$0xe]  ;;  %v16096_v31 = vsel %vm27533_vm1, %v16091_v36, %v27622_v43 }
 0x63a   : > { %16780 = vst.msk [vmem:[#allocation5 + $0x38] sm:$0xf] %vm14743_vm0, %v16749_v52  ;;  %v16714_v22 = vld [vmem:[#allocation4 + $0x30] sm:$0xe]  ;;  %v16076_v34 = vor.u32 %v16075_v54, %v16072_v23  ;;  %v16098_v51 = vshrl.u32 %v16006_v16, 16  ;;  %v16101_v17 = vshll.u32 %v16006_v16, 16 }
 0x63b   : > { %v20923_v30 = vrot.slane %v16714_v22, 9  ;;  %v27653_v56 = vld [vmem:[#allocation4 + $0xc] sm:$0x1]  ;;  %v16081_v62 = vrot.slane %v16079_v15, 5  ;;  %v16117_v12 = vrot.slane %v16115_v11, 5  ;;  %v20926_v1 = vrot.slane %v16720_v6, 9 }
 0x63c   : > { %v16718_v4 = vld [vmem:[#allocation4 + $0x40] sm:$0xe]  ;;  %v16077_v38 = vrot.slane %v16076_v34, 4  ;;  %v16100_v32 = vrot.slane %v16098_v51, 4  ;;  %v16103_v27 = vrot.slane %v16101_v17, 5  ;;  %v16764_v40 = vrot.slane %v16719_v29, 5 }
 0x63d   : > { %v16757_v9 = vsel %vm27581_vm11, %v20923_v30, %v16756_v24  ;;  %v27660_v41 = vld [vmem:[#allocation4 + $0x10] sm:$0xe]  ;;  %v16547_v55 = vld [vmem:[#allocation4 + $0x14] sm:$0x1]  ;;  %v16118_v58 = vor.u32 %v16117_v12, %v16114_v33  ;;  %v20925_v59 = vrot.slane %v16718_v4, 9  ;;  %v16768_v63 = vrot.slane %v16721_v14, 5  ;;  %16135 = vrot.lane.b32.xlu1 %v16096_v31, %s22726_s15 }
 0x63e   : > { %16782 = vst.msk [vmem:[#allocation5 + $0x60] sm:$0xf] %vm14743_vm0, %v16757_v9  ;;  %v16546_v7 = vld [vmem:[#allocation4 + $0x10] sm:$0xf]  ;;  %v16082_v15 = vsel %vm27533_vm1, %v16077_v38, %v16081_v62  ;;  %v16104_v61 = vor.u32 %v16103_v27, %v16100_v32  ;;  %v16109_v45 = vrot.slane %v16107_v8, 5  ;;  %v16123_v35 = vrot.slane %v16121_v42, 5 }
 0x63f   : > { %v27666_v48 = vld [vmem:[#allocation4 + $0x14] sm:$0x1]  ;;  %v16549_v47 = vld [vmem:[#allocation4 + $0x1c] sm:$0x1]  ;;  %16133 = vrot.lane.b32.xlu0 %v16082_v15, %s22726_s15  ;;  %v16765_v43 = vsel %vm27581_vm11, %v20925_v59, %v16764_v40  ;;  %v16769_v25 = vsel %vm27581_vm11, %v20926_v1, %v16768_v63  ;;  %v20911_v50 = vrot.slane %v27651_v10, 9  ;;  %v16467_v21 = vrot.slane %v27653_v56, 5 }
 0x640   : > { %v16548_v37 = vld [vmem:[#allocation4 + $0x18] sm:$0xf]  ;;  %v16105_v28 = vrot.slane %v16104_v61, 4  ;;  %16784 = vst.msk [vmem:[#allocation5 + $0x88] sm:$0xf] %vm14743_vm0, %v16765_v43  ;;  %v16563_v19 = vshrl.u32 %v16546_v7, 16 }
 0x641   : > { %v16437_v26 = vld [vmem:[#allocation4 + $0x18] sm:$0xe]  ;;  %v22178_v20 = vld [vmem:[#allocation5 + $0x38] ss:$20 sps:$4 sm:$0xff]   ;;  %16785 = vst.msk [vmem:[#allocation5 + $0x9c] sm:$0xf] %vm14743_vm0, %v16769_v25  ;;  %v16468_v32 = vsel %vm27581_vm11, %v20911_v50, %v16467_v21 }
 0x642   : > { %v16438_v60 = vld [vmem:[#allocation4 + $0x1c] sm:$0x1]  ;;  %v16246_v46 = vld [vmem:[#allocation4 + $0x30] sm:$0xf]  ;;  %v16119_v53 = vrot.slane %v16118_v58, 4  ;;  %v20912_v2 = vrot.slane %v27660_v41, 9  ;;  %21765 = vmatmul.mubr.msk.bf16.vlgmr.msra.gmra.mrb[208].mxu0 %vm17205_vm12, %v22178_v20  ;;  %v16110_v18 = vsel %vm27533_vm1, %v16105_v28, %v16109_v45 }
 0x643   : > { %v16566_v13 = vshll.u32 %v16546_v7, 16  ;;  %v16572_v0 = vshll.u32 %v16547_v55, 16  ;;  %v16439_v44 = vld [vmem:[#allocation4 + $0x20] sm:$0xe]  ;;  %16267 = vrot.lane.b32.xlu1 %v16246_v46, %s22726_s15  ;;  %v16565_v6 = vrot.slane %v16563_v19, 4  ;;  %v16577_v36 = vshrl.u32 %v16548_v37, 16  ;;  %16137 = vrot.lane.b32.xlu0 %v16110_v18, %s22726_s15 }
 0x644   : > { %v16580_v8 = vshll.u32 %v16548_v37, 16  ;;  %v16440_v24 = vld [vmem:[#allocation4 + $0x24] sm:$0x1]  ;;  %v16550_v33 = vld [vmem:[#allocation4 + $0x20] sm:$0xf]  ;;  %v16471_v5 = vrot.slane %v27666_v48, 5  ;;  %v16124_v42 = vsel %vm27533_vm1, %v16119_v53, %v16123_v35 }
 0x645   : > { %v16568_v23 = vrot.slane %v16566_v13, 5  ;;  %v16586_v54 = vshll.u32 %v16549_v47, 16  ;;  %v20913_v52 = vrot.slane %v16437_v26, 9  ;;  %v15983_v29 = vld [vmem:[#allocation4 + $0x28] sm:$0xf]  ;;  %v16579_v16 = vrot.slane %v16577_v36, 4 }
 0x646   : > { %v22179_v14 = vld [vmem:[#allocation5 + $0x60] ss:$20 sps:$4 sm:$0xff]   ;;  %v16247_v39 = vld [vmem:[#allocation4 + $0x38] sm:$0xf]  ;;  %v16582_v22 = vrot.slane %v16580_v8, 5  ;;  %v27687_v51 = vrot.slane %v16572_v0, 5  ;;  %v16472_v59 = vsel %vm27581_vm11, %v20912_v2, %v16471_v5 }
 0x647   : > { %v16551_v11 = vld [vmem:[#allocation4 + $0x24] sm:$0x1]  ;;  %15991 = vst.msk [vmem:[#allocation5 + $0x64] sm:$0xf] %vm14743_vm0, %v15983_v29  ;;  %v16569_v34 = vor.u32 %v16568_v23, %v16565_v6  ;;  %v16475_v17 = vrot.slane %v16438_v60, 5  ;;  %21768 = vmatprep.mubr.msk.bf16.mxu0 %vm17205_vm12, %v22179_v14  ;;  %16139 = vrot.lane.b32.xlu1 %v16124_v42, %s22726_s15  ;;  %v20914_v62 = vrot.slane %v16439_v44, 9 }
 0x648   : > { %v16552_v30 = vld [vmem:[#allocation4 + $0x28] sm:$0xf]  ;;  %v16553_v10 = vld [vmem:[#allocation4 + $0x2c] sm:$0x1]  ;;  %v15982_v56 = vld [vmem:[#allocation4 + $0x20] sm:$0xf]  ;;  %v16583_v31 = vor.u32 %v16582_v22, %v16579_v16  ;;  %16269 = vrot.lane.b32.xlu0 %v16247_v39, %s22726_s15 }
 0x649   : > { %v16591_v12 = vshrl.u32 %v16550_v33, 16  ;;  %v16594_v4 = vshll.u32 %v16550_v33, 16  ;;  %v16441_v1 = vld [vmem:[#allocation4 + $0x28] sm:$0xe]  ;;  %15990 = vst.msk [vmem:[#allocation5 + $0x50] sm:$0xf] %vm14743_vm0, %v15982_v56  ;;  %v27701_v63 = vsel %vm27581_vm11, %v20913_v52, %v16475_v17 }
 0x64a   : > { %v16248_v38 = vld [vmem:[#allocation4 + $0x40] sm:$0xf]  ;;  %v27695_v27 = vrot.slane %v16586_v54, 5  ;;  %v16479_v9 = vrot.slane %v16440_v24, 5  ;;  %v16442_v41 = vld [vmem:[#allocation4 + $0x2c] sm:$0x1] }
 0x64b   : > { %v16444_v55 = vld [vmem:[#allocation4 + $0x34] sm:$0x1]  ;;  %v22180_v58 = vld [vmem:[#allocation5 + $0x88] ss:$20 sps:$4 sm:$0xff]   ;;  %v16570_v40 = vrot.slane %v16569_v34, 4  ;;  %v16593_v7 = vrot.slane %v16591_v12, 4  ;;  %16271 = vrot.lane.b32.xlu1 %v16248_v38, %s22726_s15 }
 0x64c   : > { %v15984_v15 = vld [vmem:[#allocation4 + $0x30] sm:$0xf]  ;;  %v16596_v61 = vrot.slane %v16594_v4, 5  ;;  %v16600_v45 = vshll.u32 %v16551_v11, 16  ;;  %v16605_v35 = vshrl.u32 %v16552_v30, 16  ;;  %v16608_v48 = vshll.u32 %v16552_v30, 16  ;;  %21769 = vmatmul.mubr.msk.bf16.gmra.mrb[212].mxu0 %vm17205_vm12, %v22180_v58  ;;  %16497 = vrot.lane.b32.xlu0 %v16468_v32, %s22726_s15 }
 0x64d   : > { %v16443_v47 = vld [vmem:[#allocation4 + $0x30] sm:$0xe]  ;;  %v16555_v43 = vld [vmem:[#allocation4 + $0x34] sm:$0x1]  ;;  %v16556_v25 = vld [vmem:[#allocation4 + $0x38] sm:$0xf]  ;;  %v27708_v21 = vsel %vm27581_vm11, %v20914_v62, %v16479_v9  ;;  %v16575_v5 = vsel %vm27533_vm1, %v16570_v40, %v27687_v51 }
 0x64e   : > { %15992 = vst.msk [vmem:[#allocation5 + $0x78] sm:$0xf] %vm14743_vm0, %v15984_v15  ;;  %v16584_v50 = vrot.slane %v16583_v31, 4  ;;  %v16614_v37 = vshll.u32 %v16553_v10, 16  ;;  %v20915_v26 = vrot.slane %v16441_v1, 9  ;;  %v16597_v28 = vor.u32 %v16596_v61, %v16593_v7 }
 0x64f   : > { %v16554_v20 = vld [vmem:[#allocation4 + $0x30] sm:$0xf]  ;;  %v27711_v19 = vrot.slane %v16600_v45, 5  ;;  %v16607_v60 = vrot.slane %v16605_v35, 4  ;;  %v16610_v46 = vrot.slane %v16608_v48, 5  ;;  %v16483_v13 = vrot.slane %v16442_v41, 5  ;;  %16499 = vrot.lane.b32.xlu1 %v16472_v59, %s22726_s15 }
 0x650   : > { %v16557_v53 = vld [vmem:[#allocation4 + $0x3c] sm:$0x1]  ;;  %v27713_v2 = vrot.slane %v16614_v37, 5  ;;  %v20916_v0 = vrot.slane %v16443_v47, 9  ;;  %v16487_v44 = vrot.slane %v16444_v55, 5  ;;  %v27715_v6 = vrot.slane %v16597_v28, 4  ;;  %16674 = vrot.lane.b32.xlu0 %v16575_v5, %s22726_s15 }
 0x651   : > { %v16445_v18 = vld [vmem:[#allocation4 + $0x38] sm:$0xe]  ;;  %v16611_v36 = vor.u32 %v16610_v46, %v16607_v60  ;;  %v16619_v8 = vshrl.u32 %v16554_v20, 16  ;;  %v16622_v24 = vshll.u32 %v16554_v20, 16  ;;  %v16446_v33 = vld [vmem:[#allocation4 + $0x3c] sm:$0x1]  ;;  %v16589_v23 = vsel %vm27533_vm1, %v16584_v50, %v27695_v27 }
 0x652   : > { %v16628_v54 = vshll.u32 %v16555_v43, 16  ;;  %v16633_v52 = vshrl.u32 %v16556_v25, 16  ;;  %v16530_v29 = vld [vmem:[#allocation4 + $0x10] sm:$0xf]  ;;  %v16531_v14 = vld [vmem:[#allocation4 + $0x18] sm:$0xf]  ;;  %v27729_v16 = vsel %vm27581_vm11, %v20915_v26, %v16483_v13  ;;  %v27735_v51 = vsel %vm27581_vm11, %v20916_v0, %v16487_v44 }
 0x653   : > { %v27725_v39 = vrot.slane %v16611_v36, 4  ;;  %v16621_v22 = vrot.slane %v16619_v8, 4  ;;  %v16624_v11 = vrot.slane %v16622_v24, 5  ;;  %v16447_v42 = vld [vmem:[#allocation4 + $0x40] sm:$0xe]  ;;  %v16636_v30 = vshll.u32 %v16556_v25, 16  ;;  %16676 = vrot.lane.b32.xlu1 %v16589_v23, %s22726_s15 }
 0x654   : > { %v16448_v34 = vld [vmem:[#allocation4 + $0x44] sm:$0x1]  ;;  %16538 = vst.msk [vmem:[#allocation5 + $0xc] sm:$0xf] %vm14743_vm0, %v16530_v29  ;;  %16539 = vst.msk [vmem:[#allocation5 + $0x20] sm:$0xf] %vm14743_vm0, %v16531_v14  ;;  %v16603_v31 = vsel %vm27533_vm1, %v27715_v6, %v27711_v19  ;;  %16501 = vrot.lane.b32.xlu0 %v27701_v63, %s22726_s15 }
 0x655   : > { %v16635_v17 = vrot.slane %v16633_v52, 4  ;;  %v16642_v10 = vshll.u32 %v16557_v53, 16  ;;  %v16558_v56 = vld [vmem:[#allocation4 + $0x40] sm:$0xf]  ;;  %v16625_v62 = vor.u32 %v16624_v11, %v16621_v22  ;;  %v27741_v12 = vrot.slane %v16628_v54, 5 }
 0x656   : > { %v20917_v4 = vrot.slane %v16445_v18, 9  ;;  %v16559_v1 = vld [vmem:[#allocation4 + $0x44] sm:$0x1]  ;;  %v16560_v38 = vld [vmem:[#allocation4 + $0x48] sm:$0xf]  ;;  %v16617_v32 = vsel %vm27533_vm1, %v27725_v39, %v27713_v2  ;;  %v16638_v27 = vrot.slane %v16636_v30, 5 }
 0x657   : > { %v16491_v9 = vrot.slane %v16446_v33, 5  ;;  %v20918_v41 = vrot.slane %v16447_v42, 9  ;;  %v27748_v55 = vld [vmem:[#allocation4 + $0x4c] sm:$0x1]  ;;  %v16158_v58 = vld [vmem:[#allocation4] sm:$0xe]  ;;  %16503 = vrot.lane.b32.xlu1 %v27708_v21, %s22726_s15 }
 0x658   : > { %v16532_v59 = vld [vmem:[#allocation4 + $0x20] sm:$0xf]  ;;  %v27752_v40 = vrot.slane %v16625_v62, 4  ;;  %v27754_v7 = vrot.slane %v16642_v10, 5  ;;  %v16647_v15 = vshrl.u32 %v16558_v56, 16  ;;  %v16650_v61 = vshll.u32 %v16558_v56, 16  ;;  %16678 = vrot.lane.b32.xlu0 %v16603_v31, %s22726_s15 }
 0x659   : > { %v16159_v45 = vld [vmem:[#allocation4 + $0x4] sm:$0x1]  ;;  %v16160_v35 = vld [vmem:[#allocation4 + $0x8] sm:$0xe]  ;;  %16540 = vst.msk [vmem:[#allocation5 + $0x34] sm:$0xf] %vm14743_vm0, %v16532_v59  ;;  %v16639_v47 = vor.u32 %v16638_v27, %v16635_v17  ;;  %v27760_v63 = vsel %vm27581_vm11, %v20917_v4, %v16491_v9 }
 0x65a   : > { %v16533_v48 = vld [vmem:[#allocation4 + $0x28] sm:$0xf]  ;;  %v16495_v43 = vrot.slane %v16448_v34, 5  ;;  %v16656_v25 = vshll.u32 %v16559_v1, 16  ;;  %v16661_v50 = vshrl.u32 %v16560_v38, 16  ;;  %v16649_v20 = vrot.slane %v16647_v15, 4 }
 0x65b   : > { %v16161_v37 = vld [vmem:[#allocation4 + $0xc] sm:$0x1]  ;;  %v16162_v26 = vld [vmem:[#allocation4 + $0x10] sm:$0xe]  ;;  %16541 = vst.msk [vmem:[#allocation5 + $0x48] sm:$0xf] %vm14743_vm0, %v16533_v48  ;;  %v16631_v2 = vsel %vm27533_vm1, %v27752_v40, %v27741_v12  ;;  %16680 = vrot.lane.b32.xlu1 %v16617_v32, %s22726_s15 }
 0x65c   : > { %v16652_v28 = vrot.slane %v16650_v61, 5  ;;  %v16664_v19 = vshll.u32 %v16560_v38, 16  ;;  %v16163_v60 = vld [vmem:[#allocation4 + $0x14] sm:$0x1]  ;;  %v16166_v46 = vld [vmem:[#allocation4 + $0x20] sm:$0xe]  ;;  %v27772_v0 = vsel %vm27581_vm11, %v20918_v41, %v16495_v43  ;;  %16505 = vrot.lane.b32.xlu0 %v27729_v16, %s22726_s15 }
 0x65d   : > { %v16534_v53 = vld [vmem:[#allocation4 + $0x30] sm:$0xf]  ;;  %v27768_v13 = vrot.slane %v16639_v47, 4  ;;  %v16663_v44 = vrot.slane %v16661_v50, 4  ;;  %v16167_v18 = vld [vmem:[#allocation4 + $0x24] sm:$0x1] }
 0x65e   : > { %v16164_v6 = vld [vmem:[#allocation4 + $0x18] sm:$0xe]  ;;  %16542 = vst.msk [vmem:[#allocation5 + $0x5c] sm:$0xf] %vm14743_vm0, %v16534_v53  ;;  %v16653_v21 = vor.u32 %v16652_v28, %v16649_v20  ;;  %v16666_v8 = vrot.slane %v16664_v19, 5  ;;  %v16670_v24 = vshll.u32 %v27748_v55, 16 }
 0x65f   : > { %v16535_v36 = vld [vmem:[#allocation4 + $0x38] sm:$0xf]  ;;  %v20903_v33 = vrot.slane %v16158_v58, 9  ;;  %v16165_v5 = vld [vmem:[#allocation4 + $0x1c] sm:$0x1]  ;;  %v16645_v54 = vsel %vm27533_vm1, %v27768_v13, %v27754_v7  ;;  %v27782_v52 = vrot.slane %v16656_v25, 5  ;;  %16507 = vrot.lane.b32.xlu1 %v27735_v51, %s22726_s15 }
 0x660   : > { %v16168_v23 = vld [vmem:[#allocation4 + $0x28] sm:$0xe]  ;;  %16543 = vst.msk [vmem:[#allocation5 + $0x70] sm:$0xf] %vm14743_vm0, %v16535_v36  ;;  %v16195_v29 = vrot.slane %v16159_v45, 5  ;;  %v20904_v14 = vrot.slane %v16160_v35, 9  ;;  %v16667_v34 = vor.u32 %v16666_v8, %v16663_v44  ;;  %16682 = vrot.lane.b32.xlu0 %v16631_v2, %s22726_s15 }
 0x661   : > { %v16169_v39 = vld [vmem:[#allocation4 + $0x2c] sm:$0x1]  ;;  %v16170_v22 = vld [vmem:[#allocation4 + $0x30] sm:$0xe]  ;;  %v16171_v11 = vld [vmem:[#allocation4 + $0x34] sm:$0x1] }
 0x662   : > { %v27784_v42 = vrot.slane %v16653_v21, 4  ;;  %v16199_v17 = vrot.slane %v16161_v37, 5  ;;  %v20905_v30 = vrot.slane %v16162_v26, 9  ;;  %v16172_v10 = vld [vmem:[#allocation4 + $0x38] sm:$0xe]  ;;  %v16196_v31 = vsel %vm27581_vm11, %v20903_v33, %v16195_v29 }
 0x663   : > { %v16173_v56 = vld [vmem:[#allocation4 + $0x3c] sm:$0x1]  ;;  %v16203_v62 = vrot.slane %v16163_v60, 5  ;;  %v20907_v4 = vrot.slane %v16166_v46, 9  ;;  %v16211_v1 = vrot.slane %v16167_v18, 5  ;;  %v27795_v9 = vrot.slane %v16670_v24, 5  ;;  %16684 = vrot.lane.b32.xlu1 %v16645_v54, %s22726_s15 }
 0x664   : > { %v16289_v38 = vld [vmem:[#allocation4 + $0x8] sm:$0xf]  ;;  %v16659_v27 = vsel %vm27533_vm1, %v27784_v42, %v27782_v52  ;;  %16233 = vst.msk [vmem:[#allocation5 + $0x4] sm:$0xf] %vm14743_vm0, %v16196_v31  ;;  %v16200_v32 = vsel %vm27581_vm11, %v20904_v14, %v16199_v17  ;;  %v20906_v41 = vrot.slane %v16164_v6, 9  ;;  %v16207_v15 = vrot.slane %v16165_v5, 5  ;;  %16509 = vrot.lane.b32.xlu0 %v27760_v63, %s22726_s15 }
 0x665   : > { %v16536_v55 = vld [vmem:[#allocation4 + $0x40] sm:$0xf]  ;;  %v16537_v58 = vld [vmem:[#allocation4 + $0x48] sm:$0xf]  ;;  %16234 = vst.msk [vmem:[#allocation5 + $0x18] sm:$0xf] %vm14743_vm0, %v16200_v32  ;;  %v16204_v16 = vsel %vm27581_vm11, %v20905_v30, %v16203_v62  ;;  %v16212_v59 = vsel %vm27581_vm11, %v20907_v4, %v16211_v1 }
 0x666   : > { %v20908_v61 = vrot.slane %v16168_v23, 9  ;;  %v16290_v45 = vld [vmem:[#allocation4 + $0xc] sm:$0x1]  ;;  %v16291_v35 = vld [vmem:[#allocation4 + $0x10] sm:$0xf]  ;;  %v27807_v48 = vrot.slane %v16667_v34, 4  ;;  %v16208_v37 = vsel %vm27581_vm11, %v20906_v41, %v16207_v15 }
 0x667   : > { %16544 = vst.msk [vmem:[#allocation5 + $0x84] sm:$0xf] %vm14743_vm0, %v16536_v55  ;;  %16545 = vst.msk [vmem:[#allocation5 + $0x98] sm:$0xf] %vm14743_vm0, %v16537_v58  ;;  %v16215_v47 = vrot.slane %v16169_v39, 5  ;;  %v20909_v43 = vrot.slane %v16170_v22, 9  ;;  %16511 = vrot.lane.b32.xlu1 %v27772_v0, %s22726_s15 }
 0x668   : > { %16235 = vst.msk [vmem:[#allocation5 + $0x2c] sm:$0xf] %vm14743_vm0, %v16204_v16  ;;  %16237 = vst.msk [vmem:[#allocation5 + $0x54] sm:$0xf] %vm14743_vm0, %v16212_v59  ;;  %v16219_v25 = vrot.slane %v16171_v11, 5  ;;  %v20910_v26 = vrot.slane %v16172_v10, 9  ;;  %v16673_v36 = vsel %vm27533_vm1, %v27807_v48, %v27795_v9  ;;  %16686 = vrot.lane.b32.xlu0 %v16659_v27, %s22726_s15 }
 0x669   : > { %v16292_v50 = vld [vmem:[#allocation4 + $0x14] sm:$0x1]  ;;  %v16223_v20 = vrot.slane %v16173_v56, 5  ;;  %v16306_v28 = vshrl.u32 %v16289_v38, 16  ;;  %v16293_v19 = vld [vmem:[#allocation4 + $0x18] sm:$0xf]  ;;  %v16216_v60 = vsel %vm27581_vm11, %v20908_v61, %v16215_v47 }
 0x66a   : > { %16236 = vst.msk [vmem:[#allocation5 + $0x40] sm:$0xf] %vm14743_vm0, %v16208_v37  ;;  %v16220_v51 = vsel %vm27581_vm11, %v20909_v43, %v16219_v25  ;;  %v16309_v46 = vshll.u32 %v16289_v38, 16  ;;  %v16315_v53 = vshll.u32 %v16290_v45, 16  ;;  %v16294_v44 = vld [vmem:[#allocation4 + $0x1c] sm:$0x1] }
 0x66b   : > { %16238 = vst.msk [vmem:[#allocation5 + $0x68] sm:$0xf] %vm14743_vm0, %v16216_v60  ;;  %16239 = vst.msk [vmem:[#allocation5 + $0x7c] sm:$0xf] %vm14743_vm0, %v16220_v51  ;;  %v16224_v18 = vsel %vm27581_vm11, %v20910_v26, %v16223_v20  ;;  %v16308_v12 = vrot.slane %v16306_v28, 4  ;;  %v16320_v40 = vshrl.u32 %v16291_v35, 16  ;;  %16688 = vrot.lane.b32.xlu1 %v16673_v36, %s22726_s15 }
 0x66c   : > { %v16323_v2 = vshll.u32 %v16291_v35, 16  ;;  %v16295_v6 = vld [vmem:[#allocation4 + $0x20] sm:$0xf]  ;;  %16240 = vst.msk [vmem:[#allocation5 + $0x90] sm:$0xf] %vm14743_vm0, %v16224_v18  ;;  %v16311_v21 = vrot.slane %v16309_v46, 5 }
 0x66d   : > { %v16329_v8 = vshll.u32 %v16292_v50, 16  ;;  %v16334_v24 = vshrl.u32 %v16293_v19, 16  ;;  %v16296_v33 = vld [vmem:[#allocation4 + $0x24] sm:$0x1]  ;;  %v16317_v57 = vrot.slane %v16315_v53, 5  ;;  %v16322_v5 = vrot.slane %v16320_v40, 4 }
 0x66e   : > { %v16325_v23 = vrot.slane %v16323_v2, 5  ;;  %v16337_v29 = vshll.u32 %v16293_v19, 16  ;;  %v16297_v14 = vld [vmem:[#allocation4 + $0x28] sm:$0xf]  ;;  %v16312_v39 = vor.u32 %v16311_v21, %v16308_v12  ;;  %v16343_v11 = vshll.u32 %v16294_v44, 16  ;;  %s20088_s15 = sshll.u32 %s378_s30, 4  ;;  %s28956_s15 = int_to_ptr.vmem [resolvable:$true] %s20088_s15 }
 0x66f   : > { %v16336_v22 = vrot.slane %v16334_v24, 4  ;;  %v16348_v34 = vshrl.u32 %v16295_v6, 16  ;;  %v16331_v30 = vrot.slane %v16329_v8, 5  ;;  %v16351_v56 = vshll.u32 %v16295_v6, 16  ;;  %v16298_v31 = vld [vmem:[#allocation4 + $0x2c] sm:$0x1]  ;;  %p22667_p0 = scmp.lt.s32.totalorder %s28956_s15, %s22665_s0 }
 0x670   : > { %v16326_v17 = vor.u32 %v16325_v23, %v16322_v5  ;;  %v16339_v10 = vrot.slane %v16337_v29, 5  ;;  %v16313_v62 = vrot.slane %v16312_v39, 4  ;;  %v16357_v13 = vshll.u32 %v16296_v33, 16  ;;  %v16300_v4 = vld [vmem:[#allocation4 + $0x34] sm:$0x1]  ;;  %s22660_s14 = scalar_lea.vmem %s28956_s15, 16 }
 0x671   : > { %v16350_v7 = vrot.slane %v16348_v34, 4  ;;  %v16362_v54 = vshrl.u32 %v16297_v14, 16  ;;  %v16353_v63 = vrot.slane %v16351_v56, 5  ;;  %v16365_v9 = vshll.u32 %v16297_v14, 16  ;;  %v16299_v32 = vld [vmem:[#allocation4 + $0x30] sm:$0xf]  ;;  %p22661_p11 = scmp.ne.s32.totalorder %s28956_s15, %s22660_s14  ;;  %p22668_p1 = scmp.lt.s32.totalorder %s22666_s25, %s22660_s14 }
 0x672   : > { %v16327_v1 = vrot.slane %v16326_v17, 4  ;;  %v16340_v38 = vor.u32 %v16339_v10, %v16336_v22  ;;  %v16318_v41 = vsel %vm27533_vm1, %v16313_v62, %v16317_v57  ;;  %v16345_v55 = vrot.slane %v16343_v11, 5  ;;  %v16301_v59 = vld [vmem:[#allocation4 + $0x38] sm:$0xf]  ;;  %v16302_v48 = vld [vmem:[#allocation4 + $0x3c] sm:$0x1] }
 0x673   : > { %v16364_v58 = vrot.slane %v16362_v54, 4  ;;  %v16371_v16 = vshll.u32 %v16298_v31, 16  ;;  %16425 = vst.msk [vmem:[#allocation5 + $0x8] sm:$0xf] %vm14743_vm0, %v16318_v41  ;;  %v16354_v61 = vor.u32 %v16353_v63, %v16350_v7  ;;  %v16367_v45 = vrot.slane %v16365_v9, 5  ;;  %v22202_v54 = vld [vmem:[%s29001_s5 + $0xc8] sm:$0xff]   ;;  %p22662_p12 = pnand %p22661_p11, %p22829_p5  ;;  %p22669_p2 = por %p22668_p1, %p22667_p0 }
 0x674   : > { %v16332_v0 = vsel %vm27533_vm1, %v16327_v1, %v16331_v30  ;;  %v16341_v15 = vrot.slane %v16340_v38, 4  ;;  %v16359_v35 = vrot.slane %v16357_v13, 5  ;;  %v16376_v52 = vshrl.u32 %v16299_v32, 16  ;;  %v16303_v37 = vld [vmem:[#allocation4 + $0x40] sm:$0xf]  ;;  %v22203_v38 = vld [vmem:[%s29001_s5 + $0x88] sm:$0xff]  }
 0x675   : > { %16426 = vst.msk [vmem:[#allocation5 + $0x1c] sm:$0xf] %vm14743_vm0, %v16332_v0  ;;  %v16379_v42 = vshll.u32 %v16299_v32, 16  ;;  %v16385_v27 = vshll.u32 %v16300_v4, 16  ;;  %v16355_v43 = vrot.slane %v16354_v61, 4  ;;  %v16368_v25 = vor.u32 %v16367_v45, %v16364_v58  ;;  %v22206_v63 = vld [vmem:[%s29001_s5 + $0xd0] sm:$0xff]   ;;  %p22663_p13 = pneg %p22662_p12 }
 0x676   : > { %v16346_v47 = vsel %vm27533_vm1, %v16341_v15, %v16345_v55  ;;  %v16390_v50 = vshrl.u32 %v16301_v59, 16  ;;  %v16373_v26 = vrot.slane %v16371_v16, 5  ;;  %v16378_v20 = vrot.slane %v16376_v52, 4  ;;  %v16304_v60 = vld [vmem:[#allocation4 + $0x44] sm:$0x1]  ;;  %v22208_v32 = vld [vmem:[%s29001_s5 + $0x90] sm:$0xff]  }
 0x677   : > { %16427 = vst.msk [vmem:[#allocation5 + $0x30] sm:$0xf] %vm14743_vm0, %v16346_v47  ;;  %v16381_v28 = vrot.slane %v16379_v42, 5  ;;  %v16393_v19 = vshll.u32 %v16301_v59, 16  ;;  %v16360_v51 = vsel %vm27533_vm1, %v16355_v43, %v16359_v35  ;;  %v16369_v46 = vrot.slane %v16368_v25, 4  ;;  %v22209_v41 = vld [vmem:[%s29001_s5 + $0xd8] sm:$0xff]   ;;  %p22670_p3 = pnand %p22669_p2, %p22663_p13 }
 0x678   : > { %v16392_v53 = vrot.slane %v16390_v50, 4  ;;  %v16399_v44 = vshll.u32 %v16302_v48, 16  ;;  %16428 = vst.msk [vmem:[#allocation5 + $0x44] sm:$0xf] %vm14743_vm0, %v16360_v51  ;;  %v16404_v40 = vshrl.u32 %v16303_v37, 16  ;;  %v16407_v2 = vshll.u32 %v16303_v37, 16 }
 0x679   : > { %v16382_v18 = vor.u32 %v16381_v28, %v16378_v20  ;;  %v16395_v12 = vrot.slane %v16393_v19, 5  ;;  %v16374_v6 = vsel %vm27533_vm1, %v16369_v46, %v16373_v26  ;;  %v16387_v36 = vrot.slane %v16385_v27, 5  ;;  %v22210_v16 = vld [vmem:[%s29001_s5 + $0x98] sm:$0xff]   ;;  %v22213_v59 = vld [vmem:[%s29001_s5 + $0xe0] sm:$0xff]   ;;  %v22216_v52 = vld [vmem:[%s29001_s5 + $0xe8] sm:$0xff]  }
 0x67a   : > { %v16413_v21 = vshll.u32 %v16304_v60, 16  ;;  %16429 = vst.msk [vmem:[#allocation5 + $0x58] sm:$0xf] %vm14743_vm0, %v16374_v6  ;;  %v16406_v33 = vrot.slane %v16404_v40, 4  ;;  %v16409_v57 = vrot.slane %v16407_v2, 5  ;;  %v16401_v29 = vrot.slane %v16399_v44, 5  ;;  %v16260_v17 = vpop.permute.xlu1 %16259 }
 0x67b   : > { %v16383_v8 = vrot.slane %v16382_v18, 4  ;;  %v16396_v24 = vor.u32 %v16395_v12, %v16392_v53  ;;  %16282 = vst.msk [vmem:[#allocation5 + $0x18] sm:$0xf] %vm16149_vm2, %v16260_v17  ;;  %v22215_v35 = vld [vmem:[%s29001_s5 + $0xa0] sm:$0xff]   ;;  %v22217_v48 = vld [vmem:[%s29001_s5 + $0xa8] sm:$0xff]   ;;  %v22220_v47 = vld [vmem:[%s29001_s5 + $0xf0] sm:$0xff]  }
 0x67c   : > { %v16410_v14 = vor.u32 %v16409_v57, %v16406_v33  ;;  %v16415_v11 = vrot.slane %v16413_v21, 5  ;;  %v22222_v26 = vld [vmem:[%s29001_s5 + $0xb0] sm:$0xff]   ;;  %v22223_v20 = vld [vmem:[%s29001_s5 + $0xf8] sm:$0xff]  }
 0x67d   : > { %v16388_v5 = vsel %vm27533_vm1, %v16383_v8, %v16387_v36  ;;  %v16397_v23 = vrot.slane %v16396_v24, 4  ;;  %v22224_v60 = vld [vmem:[%s29001_s5 + $0xb8] sm:$0xff]  }
 0x67e   : > { %16430 = vst.msk [vmem:[#allocation5 + $0x6c] sm:$0xf] %vm14743_vm0, %v16388_v5  ;;  %v16411_v22 = vrot.slane %v16410_v14, 4 }
 0x67f   : > { %v16402_v39 = vsel %vm27533_vm1, %v16397_v23, %v16401_v29 }
 0x680   : > { %16431 = vst.msk [vmem:[#allocation5 + $0x80] sm:$0xf] %vm14743_vm0, %v16402_v39  ;;  %v16416_v34 = vsel %vm27533_vm1, %v16411_v22, %v16415_v11 }
 0x681   : > { %16432 = vst.msk [vmem:[#allocation5 + $0x94] sm:$0xf] %vm14743_vm0, %v16416_v34  ;;  %vm29194_vm0 = vmmov %vm29180_vm3 }
 0x682   : > { %vm29195_vm3 = vmmov %vm29194_vm0 }
 0x683   : > { %vm29196_vm4 = vmmov %vm29194_vm0 }
 0x684   : > { %vm29197_vm5 = vmmov %vm29194_vm0 }
 0x685   : > { %vm29198_vm13 = vmmov %vm29194_vm0 }
 0x686   : > { %vm29199_vm14 = vmmov %vm29194_vm0 }
 0x687   : > { %vm29200_vm15 = vmmov %vm29194_vm0 }
 0x688   : > { %vm29201_vm1 = vmmov %vm29194_vm0 }
 0x689   : > { %vm29202_vm9 = vmmov %vm29194_vm0 }
 0x68a   : > { %vm29203_vm10 = vmmov %vm29194_vm0 }
 0x68b   : > { %vm29204_vm11 = vmmov %vm29194_vm0 }
 0x68c   : > { %vm29208_vm12 = vmmov %vm29194_vm0 }
 0x699   : > { %v16126_v30 = vpop.permute.xlu0 %16125 }
 0x69a   : > { %16150 = vst.msk [vmem:[#allocation5] sm:$0xf] %vm16149_vm2, %v16126_v30  ;;  %v16128_v10 = vpop.permute.xlu1 %16127 }
 0x69b   : > { %16151 = vst.msk [vmem:[#allocation5 + $0x14] sm:$0xf] %vm16149_vm2, %v16128_v10  ;;  %v22237_v10 = vld [vmem:[%s29003_s7] ss:$8 sps:$4 sm:$0xff]  }
 0x69d   : > { %v16258_v56 = vpop.permute.xlu0 %16257 }
 0x69e   : > { %16281 = vst.msk [vmem:[#allocation5 + $0x4] sm:$0xf] %vm16149_vm2, %v16258_v56  ;;  %v22239_v56 = vld [vmem:[%s29003_s7 + $0x4] ss:$8 sps:$4 sm:$0xff]  }
 0x69f   : > { %19573 = vmatprep.subr.bf16.mxu0 %v22239_v56  ;;  %v22323_v56 = vld [vmem:[%s29003_s7 + $0xe4] ss:$8 sps:$4 sm:$0xff]  }
 0x6a0   : > { %19574 = vmatpush1.bf16.msra.mxu0 %v22237_v10  ;;  %v22318_v10 = vld [vmem:[%s29003_s7 + $0x1d0] ss:$8 sps:$4 sm:$0xff]  }
 0x6a1   : > { %v16262_v31 = vpop.permute.xlu0 %16261 }
 0x6a2   : > { %16283 = vst.msk [vmem:[#allocation5 + $0x2c] sm:$0xf] %vm16149_vm2, %v16262_v31  ;;  %v22197_v7 = vld [vmem:[#allocation5] ss:$20 sps:$4 sm:$0xff]  }
 0x6a5   : > { %v16130_v62 = vpop.permute.xlu0 %16129  ;;  %v22199_v13 = vld [vmem:[#allocation5 + $0x4] ss:$20 sps:$4 sm:$0xff]  }
 0x6a6   : > { %16152 = vst.msk [vmem:[#allocation5 + $0x28] sm:$0xf] %vm16149_vm2, %v16130_v62  ;;  %17250 = vmatprep.mubr.bf16.mxu1 %v22199_v13  ;;  %v22242_v62 = vld [vmem:[%s29003_s7 + $0x104] ss:$8 sps:$4 sm:$0xff]   ;;  %v22245_v13 = vld [vmem:[%s29003_s7 + $0x14] ss:$8 sps:$4 sm:$0xff]  }
 0x6a7   : > { %v16264_v4 = vpop.permute.xlu1 %16263  ;;  %17251 = vmatmul.mubr.bf16.vlgmr.msra.gmra.mrb[16].mxu1 %v22197_v7  ;;  %19575 = vmatprep.subr.bf16.mxu0 %v22245_v13  ;;  %v22324_v13 = vld [vmem:[%s29003_s7 + $0x1e0] ss:$8 sps:$4 sm:$0xff]  }
 0x6a8   : > { %16284 = vst.msk [vmem:[#allocation5 + $0x40] sm:$0xf] %vm16149_vm2, %v16264_v4  ;;  %21519 = vmatpush3.bf16.msra.mxu1 %v22201_v49  ;;  %v22240_v49 = vld [vmem:[%s29003_s7 + $0x100] ss:$8 sps:$4 sm:$0xff]   ;;  %v22248_v4 = vld [vmem:[%s29003_s7 + $0x114] ss:$8 sps:$4 sm:$0xff]  }
 0x6a9   : > { %v16266_v1 = vpop.permute.xlu0 %16265  ;;  %21520 = vmatprep.subr.bf16.mxu1 %v22202_v54  ;;  %v22243_v54 = vld [vmem:[%s29003_s7 + $0x10] ss:$8 sps:$4 sm:$0xff]  }
 0x6aa   : > { %16285 = vst.msk [vmem:[#allocation5 + $0x54] sm:$0xf] %vm16149_vm2, %v16266_v1  ;;  %v22246_v1 = vld [vmem:[%s29003_s7 + $0x110] ss:$8 sps:$4 sm:$0xff]   ;;  %19576 = vmatpush1.bf16.msra.mxu0 %v22243_v54  ;;  %v22329_v54 = vld [vmem:[%s29003_s7 + $0xf4] ss:$8 sps:$4 sm:$0xff]  }
 0x6ab   : > { %v16132_v9 = vpop.permute.xlu1 %16131 }
 0x6ac   : > { %16153 = vst.msk [vmem:[#allocation5 + $0x3c] sm:$0xf] %vm16149_vm2, %v16132_v9  ;;  %21521 = vmatpush3.bf16.msra.mxu1 %v22203_v38  ;;  %v22249_v9 = vld [vmem:[%s29003_s7 + $0x20] ss:$8 sps:$4 sm:$0xff]  }
 0x6ad   : > { %21522 = vmatprep.subr.bf16.mxu1 %v22206_v63 }
 0x6af   : > { %v16136_v55 = vpop.permute.xlu1 %16135  ;;  %v22204_v15 = vld [vmem:[#allocation5 + $0x2c] ss:$20 sps:$4 sm:$0xff]  }
 0x6b0   : > { %16155 = vst.msk [vmem:[#allocation5 + $0x64] sm:$0xf] %vm16149_vm2, %v16136_v55  ;;  %21523 = vmatpush3.bf16.msra.mxu1 %v22208_v32  ;;  %17258 = vmatprep.mubr.bf16.mxu1 %v22204_v15  ;;  %v22251_v32 = vld [vmem:[%s29003_s7 + $0x24] ss:$8 sps:$4 sm:$0xff]   ;;  %v22252_v55 = vld [vmem:[%s29003_s7 + $0x120] ss:$8 sps:$4 sm:$0xff]  }
 0x6b1   : > { %v16134_v58 = vpop.permute.xlu0 %16133  ;;  %21524 = vmatprep.subr.bf16.mxu1 %v22209_v41  ;;  %19577 = vmatprep.subr.bf16.mxu0 %v22251_v32  ;;  %v22260_v15 = vld [vmem:[%s29003_s7 + $0x134] ss:$8 sps:$4 sm:$0xff]   ;;  %v22335_v32 = vld [vmem:[%s29003_s7 + $0x204] ss:$8 sps:$4 sm:$0xff]  }
 0x6b2   : > { %16154 = vst.msk [vmem:[#allocation5 + $0x50] sm:$0xf] %vm16149_vm2, %v16134_v58  ;;  %v22254_v58 = vld [vmem:[%s29003_s7 + $0x124] ss:$8 sps:$4 sm:$0xff]   ;;  %19578 = vmatpush1.bf16.msra.mxu0 %v22249_v9  ;;  %v22330_v9 = vld [vmem:[%s29003_s7 + $0x1f0] ss:$8 sps:$4 sm:$0xff]  }
 0x6b3   : > { %v22207_v61 = vld [vmem:[#allocation5 + $0x28] ss:$20 sps:$4 sm:$0xff]  }
 0x6b4   : > { %21525 = vmatpush3.bf16.msra.mxu1 %v22210_v16 }
 0x6b5   : > { %v16268_v0 = vpop.permute.xlu1 %16267  ;;  %v16138_v45 = vpop.permute.xlu0 %16137  ;;  %17259 = vmatmul.mubr.bf16.gmra.mrb[20].mxu1 %v22207_v61  ;;  %21526 = vmatprep.subr.bf16.mxu1 %v22213_v59  ;;  %v22257_v59 = vld [vmem:[%s29003_s7 + $0x34] ss:$8 sps:$4 sm:$0xff]   ;;  %v22258_v61 = vld [vmem:[%s29003_s7 + $0x130] ss:$8 sps:$4 sm:$0xff]  }
 0x6b6   : > { %16286 = vst.msk [vmem:[#allocation5 + $0x68] sm:$0xf] %vm16149_vm2, %v16268_v0  ;;  %16156 = vst.msk [vmem:[#allocation5 + $0x78] sm:$0xf] %vm16149_vm2, %v16138_v45  ;;  %v22255_v0 = vld [vmem:[%s29003_s7 + $0x30] ss:$8 sps:$4 sm:$0xff]   ;;  %19579 = vmatprep.subr.bf16.mxu0 %v22257_v59 }
 0x6b7   : > { %19580 = vmatpush1.bf16.msra.mxu0 %v22255_v0  ;;  %v22261_v45 = vld [vmem:[%s29003_s7 + $0x40] ss:$8 sps:$4 sm:$0xff]  }
 0x6b8   : > { %21527 = vmatpush3.bf16.msra.mxu1 %v22215_v35  ;;  %v22263_v35 = vld [vmem:[%s29003_s7 + $0x44] ss:$8 sps:$4 sm:$0xff]  }
 0x6b9   : > { %v16140_v42 = vpop.permute.xlu1 %16139  ;;  %21528 = vmatprep.subr.bf16.mxu1 %v22216_v52  ;;  %v22214_v50 = vld [vmem:[#allocation5 + $0x50] ss:$20 sps:$4 sm:$0xff]   ;;  %v22264_v52 = vld [vmem:[%s29003_s7 + $0x140] ss:$8 sps:$4 sm:$0xff]   ;;  %19581 = vmatprep.subr.bf16.mxu0 %v22263_v35 }
 0x6ba   : > { %16157 = vst.msk [vmem:[#allocation5 + $0x8c] sm:$0xf] %vm16149_vm2, %v16140_v42  ;;  %v16270_v27 = vpop.permute.xlu0 %16269  ;;  %v22266_v42 = vld [vmem:[%s29003_s7 + $0x144] ss:$8 sps:$4 sm:$0xff]  }
 0x6bb   : > { %16287 = vst.msk [vmem:[#allocation5 + $0x7c] sm:$0xf] %vm16149_vm2, %v16270_v27  ;;  %19582 = vmatpush1.bf16.msra.mxu0 %v22261_v45  ;;  %v22267_v27 = vld [vmem:[%s29003_s7 + $0x50] ss:$8 sps:$4 sm:$0xff]  }
 0x6bc   : > { %21529 = vmatpush3.bf16.msra.mxu1 %v22217_v48  ;;  %v22269_v48 = vld [vmem:[%s29003_s7 + $0x54] ss:$8 sps:$4 sm:$0xff]  }
 0x6bd   : > { %v16272_v43 = vpop.permute.xlu1 %16271  ;;  %v22211_v25 = vld [vmem:[#allocation5 + $0x54] ss:$20 sps:$4 sm:$0xff]   ;;  %21530 = vmatprep.subr.bf16.mxu1 %v22220_v47  ;;  %19583 = vmatprep.subr.bf16.mxu0 %v22269_v48 }
 0x6be   : > { %16288 = vst.msk [vmem:[#allocation5 + $0x90] sm:$0xf] %vm16149_vm2, %v16272_v43  ;;  %v16498_v37 = vpop.permute.xlu0 %16497  ;;  %17266 = vmatprep.mubr.bf16.mxu1 %v22211_v25  ;;  %v22270_v47 = vld [vmem:[%s29003_s7 + $0x150] ss:$8 sps:$4 sm:$0xff]   ;;  %v22272_v43 = vld [vmem:[%s29003_s7 + $0x154] ss:$8 sps:$4 sm:$0xff]  }
 0x6bf   : > { %16521 = vst.msk [vmem:[#allocation5 + $0x8] sm:$0xf] %vm16149_vm2, %v16498_v37  ;;  %17267 = vmatmul.mubr.bf16.gmra.mrb[24].mxu1 %v22214_v50  ;;  %v22275_v25 = vld [vmem:[%s29003_s7 + $0x64] ss:$8 sps:$4 sm:$0xff]   ;;  %19584 = vmatpush1.bf16.msra.mxu0 %v22267_v27  ;;  %v22273_v37 = vld [vmem:[%s29003_s7 + $0x60] ss:$8 sps:$4 sm:$0xff]  }
 0x6c0   : > { %21531 = vmatpush3.bf16.msra.mxu1 %v22222_v26  ;;  %v22278_v50 = vld [vmem:[%s29003_s7 + $0x164] ss:$8 sps:$4 sm:$0xff]   ;;  %19585 = vmatprep.subr.bf16.mxu0 %v22275_v25  ;;  %v22276_v26 = vld [vmem:[%s29003_s7 + $0x160] ss:$8 sps:$4 sm:$0xff]  }
 0x6c1   : > { %v16500_v28 = vpop.permute.xlu1 %16499  ;;  %21532 = vmatprep.subr.bf16.mxu1 %v22223_v20  ;;  %v22221_v53 = vld [vmem:[#allocation5 + $0x78] ss:$20 sps:$4 sm:$0xff]   ;;  %v22279_v20 = vld [vmem:[%s29003_s7 + $0x70] ss:$8 sps:$4 sm:$0xff]  }
 0x6c2   : > { %16522 = vst.msk [vmem:[#allocation5 + $0x1c] sm:$0xf] %vm16149_vm2, %v16500_v28  ;;  %v16675_v19 = vpop.permute.xlu0 %16674  ;;  %v22281_v28 = vld [vmem:[%s29003_s7 + $0x74] ss:$8 sps:$4 sm:$0xff]  }
 0x6c3   : > { %16698 = vst.msk [vmem:[#allocation5 + $0xc] sm:$0xf] %vm16149_vm2, %v16675_v19  ;;  %19586 = vmatpush1.bf16.msra.mxu0 %v22273_v37  ;;  %v22282_v19 = vld [vmem:[%s29003_s7 + $0x170] ss:$8 sps:$4 sm:$0xff]   ;;  %v20927_v37 = vld [vmem:[%s29002_s6] ss:$0 sm:$0xff] }
 0x6c4   : > { %21533 = vmatpush3.bf16.msra.mxu1 %v22224_v60  ;;  %v22284_v60 = vld [vmem:[%s29003_s7 + $0x174] ss:$8 sps:$4 sm:$0xff]   ;;  %19587 = vmatprep.subr.bf16.mxu0 %v22281_v28 }
 0x6c5   : > { %v16677_v51 = vpop.permute.xlu1 %16676  ;;  %v22218_v46 = vld [vmem:[#allocation5 + $0x7c] ss:$20 sps:$4 sm:$0xff]   ;;  %19614 = vmatprep.subr.bf16.mxu1 %v22242_v62  ;;  %v22321_v62 = vld [vmem:[%s29003_s7 + $0xe0] ss:$8 sps:$4 sm:$0xff]  }
 0x6c6   : > { %16699 = vst.msk [vmem:[#allocation5 + $0x20] sm:$0xf] %vm16149_vm2, %v16677_v51  ;;  %v16502_v44 = vpop.permute.xlu0 %16501  ;;  %17274 = vmatprep.mubr.bf16.mxu1 %v22218_v46  ;;  %v22287_v51 = vld [vmem:[%s29003_s7 + $0x84] ss:$8 sps:$4 sm:$0xff]  }
 0x6c7   : > { %16523 = vst.msk [vmem:[#allocation5 + $0x30] sm:$0xf] %vm16149_vm2, %v16502_v44  ;;  %17275 = vmatmul.mubr.bf16.gmra.mrb[28].mxu1 %v22221_v53  ;;  %v22290_v46 = vld [vmem:[%s29003_s7 + $0x184] ss:$8 sps:$4 sm:$0xff]   ;;  %19588 = vmatpush1.bf16.msra.mxu0 %v22279_v20  ;;  %v22285_v53 = vld [vmem:[%s29003_s7 + $0x80] ss:$8 sps:$4 sm:$0xff]  }
 0x6c8   : > { %19589 = vmatprep.subr.bf16.mxu0 %v22287_v51  ;;  %v22288_v44 = vld [vmem:[%s29003_s7 + $0x180] ss:$8 sps:$4 sm:$0xff]  }
 0x6c9   : > { %v16504_v18 = vpop.permute.xlu1 %16503  ;;  %v22225_v2 = vld [vmem:[#allocation5 + $0x8] ss:$20 sps:$4 sm:$0xff]  }
 0x6ca   : > { %16524 = vst.msk [vmem:[#allocation5 + $0x44] sm:$0xf] %vm16149_vm2, %v16504_v18  ;;  %v16679_v12 = vpop.permute.xlu0 %16678  ;;  %v22291_v18 = vld [vmem:[%s29003_s7 + $0x90] ss:$8 sps:$4 sm:$0xff]  }
 0x6cb   : > { %16700 = vst.msk [vmem:[#allocation5 + $0x34] sm:$0xf] %vm16149_vm2, %v16679_v12  ;;  %19590 = vmatpush1.bf16.msra.mxu0 %v22285_v53  ;;  %v22293_v12 = vld [vmem:[%s29003_s7 + $0x94] ss:$8 sps:$4 sm:$0xff]  }
 0x6cc   : > { %19591 = vmatprep.subr.bf16.mxu0 %v22293_v12 }
 0x6cd   : > { %v16681_v40 = vpop.permute.xlu1 %16680  ;;  %v22227_v6 = vld [vmem:[#allocation5 + $0xc] ss:$20 sps:$4 sm:$0xff]  }
 0x6ce   : > { %16701 = vst.msk [vmem:[#allocation5 + $0x48] sm:$0xf] %vm16149_vm2, %v16681_v40  ;;  %v16506_v36 = vpop.permute.xlu0 %16505  ;;  %17315 = vmatprep.mubr.bf16.mxu1 %v22227_v6  ;;  %v22294_v40 = vld [vmem:[%s29003_s7 + $0x190] ss:$8 sps:$4 sm:$0xff]   ;;  %v22299_v6 = vld [vmem:[%s29003_s7 + $0xa4] ss:$8 sps:$4 sm:$0xff]  }
 0x6cf   : > { %16525 = vst.msk [vmem:[#allocation5 + $0x58] sm:$0xf] %vm16149_vm2, %v16506_v36  ;;  %17316 = vmatmul.mubr.bf16.vlgmr.msra.gmra.mrb[32].mxu1 %v22225_v2  ;;  %v22296_v2 = vld [vmem:[%s29003_s7 + $0x194] ss:$8 sps:$4 sm:$0xff]   ;;  %v22302_v36 = vld [vmem:[%s29003_s7 + $0x1a4] ss:$8 sps:$4 sm:$0xff]   ;;  %19592 = vmatpush1.bf16.msra.mxu0 %v22291_v18 }
 0x6d0   : > { %19615 = vmatpush1.bf16.msra.mxu1 %v22240_v49  ;;  %19593 = vmatprep.subr.bf16.mxu0 %v22299_v6  ;;  %v22326_v49 = vld [vmem:[%s29003_s7 + $0x1e4] ss:$8 sps:$4 sm:$0xff]  }
 0x6d1   : > { %v16508_v21 = vpop.permute.xlu1 %16507  ;;  %v22230_v57 = vld [vmem:[#allocation5 + $0x30] ss:$20 sps:$4 sm:$0xff]   ;;  %19616 = vmatprep.subr.bf16.mxu1 %v22248_v4  ;;  %v22332_v4 = vld [vmem:[%s29003_s7 + $0x1f4] ss:$8 sps:$4 sm:$0xff]  }
 0x6d2   : > { %16526 = vst.msk [vmem:[#allocation5 + $0x6c] sm:$0xf] %vm16149_vm2, %v16508_v21  ;;  %v16683_v8 = vpop.permute.xlu0 %16682  ;;  %v22297_v21 = vld [vmem:[%s29003_s7 + $0xa0] ss:$8 sps:$4 sm:$0xff]  }
 0x6d3   : > { %16702 = vst.msk [vmem:[#allocation5 + $0x5c] sm:$0xf] %vm16149_vm2, %v16683_v8  ;;  %v22300_v8 = vld [vmem:[%s29003_s7 + $0x1a0] ss:$8 sps:$4 sm:$0xff]   ;;  %19594 = vmatpush1.bf16.msra.mxu0 %v22297_v21 }
 0x6d4   : > { %19617 = vmatpush1.bf16.msra.mxu1 %v22246_v1  ;;  %v22327_v1 = vld [vmem:[%s29003_s7 + $0xf0] ss:$8 sps:$4 sm:$0xff]  }
 0x6d5   : > { %v16685_v24 = vpop.permute.xlu1 %16684  ;;  %v22228_v33 = vld [vmem:[#allocation5 + $0x34] ss:$20 sps:$4 sm:$0xff]   ;;  %19618 = vmatprep.subr.bf16.mxu1 %v22254_v58 }
 0x6d6   : > { %16703 = vst.msk [vmem:[#allocation5 + $0x70] sm:$0xf] %vm16149_vm2, %v16685_v24  ;;  %v16510_v5 = vpop.permute.xlu0 %16509  ;;  %17323 = vmatprep.mubr.bf16.mxu1 %v22228_v33  ;;  %v22303_v24 = vld [vmem:[%s29003_s7 + $0xb0] ss:$8 sps:$4 sm:$0xff]   ;;  %v22305_v33 = vld [vmem:[%s29003_s7 + $0xb4] ss:$8 sps:$4 sm:$0xff]  }
 0x6d7   : > { %16527 = vst.msk [vmem:[#allocation5 + $0x80] sm:$0xf] %vm16149_vm2, %v16510_v5  ;;  %17324 = vmatmul.mubr.bf16.gmra.mrb[36].mxu1 %v22230_v57  ;;  %v22306_v57 = vld [vmem:[%s29003_s7 + $0x1b0] ss:$8 sps:$4 sm:$0xff]   ;;  %v22308_v5 = vld [vmem:[%s29003_s7 + $0x1b4] ss:$8 sps:$4 sm:$0xff]   ;;  %19595 = vmatprep.subr.bf16.mxu0 %v22305_v33 }
 0x6d8   : > { %19619 = vmatpush1.bf16.msra.mxu1 %v22252_v55  ;;  %19596 = vmatpush1.bf16.msra.mxu0 %v22303_v24 }
 0x6d9   : > { %v16512_v23 = vpop.permute.xlu1 %16511  ;;  %v22233_v22 = vld [vmem:[#allocation5 + $0x58] ss:$20 sps:$4 sm:$0xff]   ;;  %19620 = vmatprep.subr.bf16.mxu1 %v22260_v15 }
 0x6da   : > { %16528 = vst.msk [vmem:[#allocation5 + $0x94] sm:$0xf] %vm16149_vm2, %v16512_v23  ;;  %v16687_v29 = vpop.permute.xlu0 %16686  ;;  %v22311_v23 = vld [vmem:[%s29003_s7 + $0xc4] ss:$8 sps:$4 sm:$0xff]  }
 0x6db   : > { %16704 = vst.msk [vmem:[#allocation5 + $0x84] sm:$0xf] %vm16149_vm2, %v16687_v29  ;;  %v22314_v29 = vld [vmem:[%s29003_s7 + $0x1c4] ss:$8 sps:$4 sm:$0xff]   ;;  %19597 = vmatprep.subr.bf16.mxu0 %v22311_v23 }
 0x6dc   : > { %19621 = vmatpush1.bf16.msra.mxu1 %v22258_v61 }
 0x6dd   : > { %v16689_v14 = vpop.permute.xlu1 %16688  ;;  %v22231_v39 = vld [vmem:[#allocation5 + $0x5c] ss:$20 sps:$4 sm:$0xff]   ;;  %19622 = vmatprep.subr.bf16.mxu1 %v22266_v42 }
 0x6de   : > { %16705 = vst.msk [vmem:[#allocation5 + $0x98] sm:$0xf] %vm16149_vm2, %v16689_v14  ;;  %17331 = vmatprep.mubr.bf16.mxu1 %v22231_v39  ;;  %v22309_v14 = vld [vmem:[%s29003_s7 + $0xc0] ss:$8 sps:$4 sm:$0xff]   ;;  %vm29209_vm2 = vmmov %vm29194_vm0 }
 0x6df   : > { %17332 = vmatmul.mubr.bf16.gmra.mrb[40].mxu1 %v22233_v22  ;;  %v22312_v39 = vld [vmem:[%s29003_s7 + $0x1c0] ss:$8 sps:$4 sm:$0xff]   ;;  %v22317_v22 = vld [vmem:[%s29003_s7 + $0xd4] ss:$8 sps:$4 sm:$0xff]   ;;  %19598 = vmatpush1.bf16.msra.mxu0 %v22309_v14 }
 0x6e0   : > { %19623 = vmatpush1.bf16.msra.mxu1 %v22264_v52  ;;  %19599 = vmatprep.subr.bf16.mxu0 %v22317_v22  ;;  %v28175_v14 = vld [vmem:[%s29002_s6 + $0x1] ss:$0 sm:$0xff] }
 0x6e1   : > { %v22236_v34 = vld [vmem:[#allocation5 + $0x80] ss:$20 sps:$4 sm:$0xff]   ;;  %19624 = vmatprep.subr.bf16.mxu1 %v22272_v43 }
 0x6e4   : > { %19625 = vmatpush1.bf16.msra.mxu1 %v22270_v47 }
 0x6e5   : > { %v22234_v11 = vld [vmem:[#allocation5 + $0x84] ss:$20 sps:$4 sm:$0xff]   ;;  %19626 = vmatprep.subr.bf16.mxu1 %v22278_v50 }
 0x6e6   : > { %17339 = vmatprep.mubr.bf16.mxu1 %v22234_v11  ;;  %v22320_v11 = vld [vmem:[%s29003_s7 + $0x1d4] ss:$8 sps:$4 sm:$0xff]  }
 0x6e7   : > { %17340 = vmatmul.mubr.bf16.gmra.mrb[44].mxu1 %v22236_v34  ;;  %v22315_v34 = vld [vmem:[%s29003_s7 + $0xd0] ss:$8 sps:$4 sm:$0xff]  }
 0x6e8   : > { %19627 = vmatpush1.bf16.msra.mxu1 %v22276_v26  ;;  %19600 = vmatpush1.bf16.msra.mxu0 %v22315_v34 }
 0x6e9   : > { %19628 = vmatprep.subr.bf16.mxu1 %v22284_v60  ;;  %19601 = vmatprep.subr.bf16.mxu0 %v22323_v56 }
 0x6ec   : > { %19629 = vmatpush1.bf16.msra.mxu1 %v22282_v19  ;;  %19602 = vmatpush1.bf16.msra.mxu0 %v22321_v62 }
 0x6ed   : > { %19630 = vmatprep.subr.bf16.mxu1 %v22290_v46  ;;  %19603 = vmatprep.subr.bf16.mxu0 %v22329_v54 }
 0x6f0   : > { %19631 = vmatpush1.bf16.msra.mxu1 %v22288_v44  ;;  %19604 = vmatpush1.bf16.msra.mxu0 %v22327_v1 }
 0x6f1   : > { %19632 = vmatprep.subr.bf16.mxu1 %v22296_v2 }
 0x6f4   : > { %19633 = vmatpush1.bf16.msra.mxu1 %v22294_v40 }
 0x6f5   : > { %19634 = vmatprep.subr.bf16.mxu1 %v22302_v36 }
 0x6f8   : > { %19635 = vmatpush1.bf16.msra.mxu1 %v22300_v8 }
 0x6f9   : > { %19636 = vmatprep.subr.bf16.mxu1 %v22308_v5 }
 0x6fc   : > { %19637 = vmatpush1.bf16.msra.mxu1 %v22306_v57 }
 0x6fd   : > { %19638 = vmatprep.subr.bf16.mxu1 %v22314_v29 }
 0x700   : > { %19639 = vmatpush1.bf16.msra.mxu1 %v22312_v39 }
 0x701   : > { %19640 = vmatprep.subr.bf16.mxu1 %v22320_v11 }
 0x704   : > { %19641 = vmatpush1.bf16.msra.mxu1 %v22318_v10 }
 0x705   : > { %19642 = vmatprep.subr.bf16.mxu1 %v22326_v49 }
 0x708   : > { %19643 = vmatpush1.bf16.msra.mxu1 %v22324_v13 }
 0x709   : > { %19644 = vmatprep.subr.bf16.mxu1 %v22332_v4 }
 0x70c   : > { %19645 = vmatpush1.bf16.msra.mxu1 %v22330_v9 }
 0x70d   : > { %19655 = vmatprep.subr.bf16.mxu1 %v22335_v32 }
 0x715   : > { %v27953_v17 = vpop.f32.mrb[208].mxu0 }
 0x716   : > { %v27955_v30 = vpop.f32.mrb[209].mxu0 }
 0x717   : > { %v27963_v31 = vpop.f32.mrb[210].mxu0 }
 0x718   : > { %v27971_v7 = vpop.f32.mrb[211].mxu0 }
 0x71f   : > { %v27985_v38 = vpop.f32.mrb[212].mxu0 }
 0x720   : > { %v27987_v63 = vpop.f32.mrb[213].mxu0 }
 0x721   : > { %v27995_v41 = vpop.f32.mrb[214].mxu0 }
 0x722   : > { %v28003_v16 = vpop.f32.mrb[215].mxu0 }
 0x77a   : > { %v21494_v55 = vpop.f32.mrb[16].mxu1 }
 0x77b   : > { %v21495_v58 = vpop.f32.mrb[17].mxu1 }
 0x77c   : > { %v21496_v59 = vadd.f32 %v21495_v58, %v21494_v55  ;;  %v21497_v0 = vpop.f32.mrb[18].mxu1 }
 0x77d   : > { %v21498_v15 = vpop.f32.mrb[19].mxu1 }
 0x77e   : > { %v21499_v61 = vadd.f32 %v21498_v15, %v21497_v0  ;;  %v17253_v36 = vadd.f32 %v21496_v59, %v20927_v37 }
 0x780   : > { %v17256_v33 = vadd.f32 %v21499_v61, %v20927_v37 }
 0x788   : > { %v21500_v45 = vpop.f32.mrb[20].mxu1 }
 0x789   : > { %v21501_v35 = vpop.f32.mrb[21].mxu1 }
 0x78a   : > { %v21502_v52 = vadd.f32 %v21501_v35, %v21500_v45  ;;  %v21503_v42 = vpop.f32.mrb[22].mxu1 }
 0x78b   : > { %v21504_v27 = vpop.f32.mrb[23].mxu1 }
 0x78c   : > { %v21505_v48 = vadd.f32 %v21504_v27, %v21503_v42  ;;  %v17261_v10 = vadd.f32 %v21502_v52, %v20927_v37 }
 0x78e   : > { %v17264_v4 = vadd.f32 %v21505_v48, %v20927_v37 }
 0x792   : > { %v21506_v47 = vpop.f32.mrb[24].mxu1 }
 0x793   : > { %v21507_v43 = vpop.f32.mrb[25].mxu1 }
 0x794   : > { %v21508_v25 = vadd.f32 %v21507_v43, %v21506_v47  ;;  %v21509_v50 = vpop.f32.mrb[26].mxu1 }
 0x795   : > { %v21510_v26 = vpop.f32.mrb[27].mxu1 }
 0x796   : > { %v17269_v20 = vadd.f32 %v21508_v25, %v20927_v37  ;;  %v21511_v28 = vadd.f32 %v21510_v26, %v21509_v50 }
 0x798   : > { %v17272_v19 = vadd.f32 %v21511_v28, %v20927_v37 }
 0x79a   : > { %v21512_v60 = vpop.f32.mrb[28].mxu1 }
 0x79b   : > { %v21513_v51 = vpop.f32.mrb[29].mxu1 }
 0x79c   : > { %v21514_v46 = vadd.f32 %v21513_v51, %v21512_v60  ;;  %v21515_v53 = vpop.f32.mrb[30].mxu1 }
 0x79d   : > { %v21516_v44 = vpop.f32.mrb[31].mxu1 }
 0x79e   : > { %v28167_v18 = vadd.f32 %v21514_v46, %v20927_v37  ;;  %v21517_v12 = vadd.f32 %v21516_v44, %v21515_v53 }
 0x7a0   : > { %v28169_v40 = vadd.f32 %v21517_v12, %v20927_v37 }
 0x7a2   : > { %v21534_v2 = vpop.f32.mrb[32].mxu1 }
 0x7a3   : > { %v21535_v6 = vpop.f32.mrb[33].mxu1 }
 0x7a4   : > { %v21536_v21 = vadd.f32 %v21535_v6, %v21534_v2  ;;  %v21537_v8 = vpop.f32.mrb[34].mxu1 }
 0x7a5   : > { %v21538_v24 = vpop.f32.mrb[35].mxu1 }
 0x7a6   : > { %v17318_v57 = vadd.f32 %v21536_v21, %v17253_v36  ;;  %v21539_v5 = vadd.f32 %v21538_v24, %v21537_v8 }
 0x7a8   : > { %v17383_v23 = vadd.f32 %v27955_v30, %v17318_v57  ;;  %v17321_v29 = vadd.f32 %v21539_v5, %v17256_v33  ;;  %v28182_v30 = vld [vmem:[%s29002_s6 + $0x2] ss:$0 sm:$0xff] }
 0x7aa   : > { %v17413_v39 = vmax.f32 %v17383_v23, 0.0  ;;  %v17386_v22 = vadd.f32 %v27971_v7, %v17321_v29  ;;  %v21540_v11 = vpop.f32.mrb[36].mxu1 }
 0x7ab   : > { %v21541_v34 = vpop.f32.mrb[37].mxu1 }
 0x7ac   : > { %v17425_v56 = vmul.f32 %v28175_v14, %v17413_v39  ;;  %v17414_v49 = vmax.f32 %v17386_v22, 0.0  ;;  %v21542_v62 = vadd.f32 %v21541_v34, %v21540_v11  ;;  %v21543_v13 = vpop.f32.mrb[38].mxu1 }
 0x7ad   : > { %v21544_v54 = vpop.f32.mrb[39].mxu1 }
 0x7ae   : > { %v17426_v1 = vmul.f32 %v28175_v14, %v17414_v49  ;;  %v17326_v9 = vadd.f32 %v21542_v62, %v17261_v10  ;;  %v21545_v32 = vadd.f32 %v21544_v54, %v21543_v13  ;;  %v17437_v7 = vadd.f32 %v28182_v30, %v17425_v56 }
 0x7b0   : > { %v17438_v55 = vadd.f32 %v28182_v30, %v17426_v1  ;;  %v17391_v58 = vadd.f32 %v27953_v17, %v17326_v9  ;;  %v17329_v59 = vadd.f32 %v21545_v32, %v17264_v4 }
 0x7b2   : > { %v17445_v0 = vpack.c.bf16 %v17438_v55, %v17437_v7  ;;  %v17415_v15 = vmax.f32 %v17391_v58, 0.0  ;;  %v17394_v61 = vadd.f32 %v27963_v31, %v17329_v59  ;;  %v21546_v45 = vpop.f32.mrb[40].mxu1 }
 0x7b3   : > { %v21547_v35 = vpop.f32.mrb[41].mxu1 }
 0x7b4   : > { %v17453_v52 = vrot.slane %v17445_v0, 4  ;;  %v17427_v42 = vmul.f32 %v28175_v14, %v17415_v15  ;;  %v17416_v27 = vmax.f32 %v17394_v61, 0.0  ;;  %v21548_v48 = vadd.f32 %v21547_v35, %v21546_v45  ;;  %v21549_v47 = vpop.f32.mrb[42].mxu1 }
 0x7b5   : > { %v21550_v43 = vpop.f32.mrb[43].mxu1 }
 0x7b6   : > { %v17461_v25 = vmax.bf16 %v17453_v52, %v17445_v0  ;;  %v17428_v50 = vmul.f32 %v28175_v14, %v17416_v27  ;;  %v17334_v37 = vadd.f32 %v21548_v48, %v17269_v20  ;;  %v21551_v26 = vadd.f32 %v21550_v43, %v21549_v47 }
 0x7b7   : > { %v17439_v28 = vadd.f32 %v28182_v30, %v17427_v42 }
 0x7b8   : > { %v17475_v17 = vrot.slane %v17461_v25, %v23126_v3  ;;  %v17440_v31 = vadd.f32 %v28182_v30, %v17428_v50  ;;  %v17399_v60 = vadd.f32 %v27987_v63, %v17334_v37  ;;  %v17337_v51 = vadd.f32 %v21551_v26, %v17272_v19 }
 0x7ba   : > { %v17476_v46 = vcombine.high %v17475_v17, %v17475_v17  ;;  %v17483_v53 = vrot.slane %v17475_v17, %v23126_v3  ;;  %v17446_v44 = vpack.c.bf16 %v17440_v31, %v17439_v28  ;;  %v17417_v12 = vmax.f32 %v17399_v60, 0.0  ;;  %v21552_v2 = vpop.f32.mrb[44].mxu1 }
 0x7bb   : > { %v17402_v6 = vadd.f32 %v28003_v16, %v17337_v51  ;;  %v21553_v36 = vpop.f32.mrb[45].mxu1 }
 0x7bc   : > { %v17490_v20 = vrot.slane %v17476_v46, %v23126_v3  ;;  %v17491_v21 = vcombine.high %v17483_v53, %v17483_v53  ;;  %v17582_v8 = vshrl.u32 %v17483_v53, 16  ;;  %v17454_v24 = vrot.slane %v17446_v44, 4  ;;  %v21555_v33 = vpop.f32.mrb[46].mxu1 }
 0x7bd   : > { %v17429_v57 = vmul.f32 %v28175_v14, %v17417_v12  ;;  %v17418_v5 = vmax.f32 %v17402_v6, 0.0  ;;  %v21554_v63 = vadd.f32 %v21553_v36, %v21552_v2  ;;  %v21556_v19 = vpop.f32.mrb[47].mxu1 }
 0x7be   : > { %v17587_v23 = vshrl.u32 %v17490_v20, 16  ;;  %v17677_v29 = vmax.bf16 %v17582_v8, %v17483_v53  ;;  %v17462_v39 = vmax.bf16 %v17454_v24, %v17446_v44  ;;  %v21557_v22 = vadd.f32 %v21556_v19, %v21555_v33 }
 0x7bf   : > { %v17441_v11 = vadd.f32 %v28182_v30, %v17429_v57  ;;  %v17430_v16 = vmul.f32 %v28175_v14, %v17418_v5  ;;  %v17342_v34 = vadd.f32 %v21554_v63, %v28167_v18  ;;  %v17492_v10 = vcombine.high %v17490_v20, %v17490_v20 }
 0x7c0   : > { %v17499_v56 = vrot.slane %v17462_v39, %v23126_v3  ;;  %v17345_v49 = vadd.f32 %v21557_v22, %v28169_v40  ;;  %v17592_v62 = vshrl.u32 %v17491_v21, 16  ;;  %v17678_v1 = vmax.bf16 %v17587_v23, %v17490_v20 }
 0x7c1   : > { %v17442_v13 = vadd.f32 %v28182_v30, %v17430_v16  ;;  %v17407_v54 = vadd.f32 %v27985_v38, %v17342_v34  ;;  %v17597_v4 = vshrl.u32 %v17492_v10, 16  ;;  %v17715_v0 = vrot.slane %v17677_v29, %v23126_v3 }
 0x7c2   : > { %v17500_v9 = vcombine.high %v17499_v56, %v17499_v56  ;;  %v17507_v32 = vrot.slane %v17499_v56, %v23126_v3  ;;  %v17410_v7 = vadd.f32 %v27995_v41, %v17345_v49  ;;  %v17679_v55 = vmax.bf16 %v17592_v62, %v17491_v21 }
 0x7c3   : > { %v28208_v58 = vpack.c.bf16 %v17442_v13, %v17441_v11  ;;  %v17419_v18 = vmax.f32 %v17407_v54, 0.0  ;;  %v17680_v59 = vmax.bf16 %v17597_v4, %v17492_v10  ;;  %v17729_v35 = vrot.slane %v17678_v1, %v23126_v3  ;;  %v22333_v13 = vld [vmem:[%s29003_s7 + $0x200] ss:$8 sps:$4 sm:$0xff]  }
 0x7c4   : > { %v17514_v40 = vrot.slane %v17500_v9, %v23126_v3  ;;  %v17515_v15 = vcombine.high %v17507_v32, %v17507_v32  ;;  %v17420_v61 = vmax.f32 %v17410_v7, 0.0  ;;  %v17602_v45 = vshrl.u32 %v17507_v32, 16  ;;  %v22338_v9 = vld [vmem:[%s29003_s7 + $0x214] ss:$8 sps:$4 sm:$0xff]  }
 0x7c5   : > { %v17431_v38 = vmul.f32 %v28175_v14, %v17419_v18  ;;  %v17743_v52 = vrot.slane %v17679_v55, %v23126_v3  ;;  %v17757_v27 = vrot.slane %v17680_v59, %v23126_v3  ;;  %v17722_v47 = vrot.slane %v17715_v0, %v23126_v3  ;;  %v22336_v0 = vld [vmem:[%s29003_s7 + $0x210] ss:$8 sps:$4 sm:$0xff]  }
 0x7c6   : > { %v17607_v42 = vshrl.u32 %v17514_v40, 16  ;;  %v17432_v41 = vmul.f32 %v28175_v14, %v17420_v61  ;;  %v17736_v43 = vrot.slane %v17729_v35, %v23126_v3  ;;  %v17516_v26 = vcombine.high %v17514_v40, %v17514_v40  ;;  %v22341_v61 = vld [vmem:[%s29003_s7 + $0x224] ss:$8 sps:$4 sm:$0xff]  }
 0x7c7   : > { %v17443_v48 = vadd.f32 %v28182_v30, %v17431_v38  ;;  %v17750_v25 = vrot.slane %v17743_v52, %v23126_v3  ;;  %v17764_v37 = vrot.slane %v17757_v27, %v23126_v3  ;;  %v17681_v17 = vmax.bf16 %v17602_v45, %v17507_v32  ;;  %v22339_v38 = vld [vmem:[%s29003_s7 + $0x220] ss:$8 sps:$4 sm:$0xff]   ;;  %v22344_v52 = vld [vmem:[%s29003_s7 + $0x234] ss:$8 sps:$4 sm:$0xff]  }
 0x7c8   : > { %v17444_v50 = vadd.f32 %v28182_v30, %v17432_v41  ;;  %v17934_v28 = vunpack.c.l.b16 %v17736_v43  ;;  %v17612_v60 = vshrl.u32 %v17515_v15, 16  ;;  %v17617_v46 = vshrl.u32 %v17516_v26, 16  ;;  %v22347_v41 = vld [vmem:[%s29003_s7 + $0x244] ss:$8 sps:$4 sm:$0xff]   ;;  %v22345_v27 = vld [vmem:[%s29003_s7 + $0x240] ss:$8 sps:$4 sm:$0xff]  }
 0x7c9   : > { %v17935_v31 = vunpack.c.l.b16 %v17750_v25  ;;  %v17936_v51 = vunpack.c.l.b16 %v17764_v37  ;;  %v17682_v53 = vmax.bf16 %v17607_v42, %v17514_v40  ;;  %v17933_v44 = vunpack.c.l.b16 %v17722_v47  ;;  %v22342_v42 = vld [vmem:[%s29003_s7 + $0x230] ss:$8 sps:$4 sm:$0xff]   ;;  %v22353_v43 = vld [vmem:[%s29003_s7 + $0x264] ss:$8 sps:$4 sm:$0xff]   ;;  %v22351_v25 = vld [vmem:[%s29003_s7 + $0x260] ss:$8 sps:$4 sm:$0xff]  }
 0x7ca   : > { %v28223_v14 = vpack.c.bf16 %v17444_v50, %v17443_v48  ;;  %v17949_v12 = vrot.slane %v17934_v28, 7  ;;  %v17683_v36 = vmax.bf16 %v17612_v60, %v17515_v15  ;;  %v17684_v30 = vmax.bf16 %v17617_v46, %v17516_v26  ;;  %v22350_v48 = vld [vmem:[%s29003_s7 + $0x254] ss:$8 sps:$4 sm:$0xff]   ;;  %v22348_v47 = vld [vmem:[%s29003_s7 + $0x250] ss:$8 sps:$4 sm:$0xff]  }
 0x7cb   : > { %v17951_v2 = vrot.slane %v17935_v31, 6  ;;  %v17953_v6 = vrot.slane %v17936_v51, 5  ;;  %v17771_v8 = vrot.slane %v17681_v17, %v23126_v3  ;;  %v17785_v24 = vrot.slane %v17682_v53, %v23126_v3  ;;  %v22356_v50 = vld [vmem:[%s29003_s7 + $0x274] ss:$8 sps:$4 sm:$0xff]   ;;  %v22354_v37 = vld [vmem:[%s29003_s7 + $0x270] ss:$8 sps:$4 sm:$0xff]  }
 0x7cc   : > { %v17950_v20 = vsel %vm9902_vm6, %v17949_v12, %v17933_v44  ;;  %v17799_v57 = vrot.slane %v17683_v36, %v23126_v3  ;;  %v17813_v23 = vrot.slane %v17684_v30, %v23126_v3  ;;  %v22359_v26 = vld [vmem:[%s29003_s7 + $0x284] ss:$8 sps:$4 sm:$0xff]   ;;  %v22357_v17 = vld [vmem:[%s29003_s7 + $0x280] ss:$8 sps:$4 sm:$0xff]   ;;  %v22362_v28 = vld [vmem:[%s29003_s7 + $0x294] ss:$8 sps:$4 sm:$0xff]  }
 0x7cd   : > { %v17952_v21 = vsel %vm9884_vm7, %v17951_v2, %v17950_v20  ;;  %v17792_v63 = vrot.slane %v17785_v24, %v23126_v3  ;;  %v17778_v39 = vrot.slane %v17771_v8, %v23126_v3  ;;  %v22360_v31 = vld [vmem:[%s29003_s7 + $0x290] ss:$8 sps:$4 sm:$0xff]   ;;  %v22365_v60 = vld [vmem:[%s29003_s7 + $0x2a4] ss:$8 sps:$4 sm:$0xff]   ;;  %v22363_v51 = vld [vmem:[%s29003_s7 + $0x2a0] ss:$8 sps:$4 sm:$0xff]  }
 0x7ce   : > { %v17954_v33 = vsel %vm9887_vm8, %v17953_v6, %v17952_v21  ;;  %v17806_v19 = vrot.slane %v17799_v57, %v23126_v3  ;;  %v17820_v11 = vrot.slane %v17813_v23, %v23126_v3  ;;  %v22368_v46 = vld [vmem:[%s29003_s7 + $0x2b4] ss:$8 sps:$4 sm:$0xff]   ;;  %v22366_v53 = vld [vmem:[%s29003_s7 + $0x2b0] ss:$8 sps:$4 sm:$0xff]   ;;  %v22371_v44 = vld [vmem:[%s29003_s7 + $0x2c4] ss:$8 sps:$4 sm:$0xff]  }
 0x7cf   : > { %v17973_v5 = vpack.c.b16 %v17954_v33, %v17954_v33  ;;  %v17938_v16 = vunpack.c.l.b16 %v17792_v63  ;;  %v17937_v54 = vunpack.c.l.b16 %v17778_v39  ;;  %v22369_v12 = vld [vmem:[%s29003_s7 + $0x2c0] ss:$8 sps:$4 sm:$0xff]   ;;  %v22374_v2 = vld [vmem:[%s29003_s7 + $0x2d4] ss:$8 sps:$4 sm:$0xff]   ;;  %v22372_v6 = vld [vmem:[%s29003_s7 + $0x2d0] ss:$8 sps:$4 sm:$0xff]  }
 0x7d0   : > { %v17939_v49 = vunpack.c.l.b16 %v17806_v19  ;;  %v17940_v62 = vunpack.c.l.b16 %v17820_v11  ;;  %v22377_v36 = vld [vmem:[%s29003_s7 + $0x2e4] ss:$8 sps:$4 sm:$0xff]   ;;  %v22375_v20 = vld [vmem:[%s29003_s7 + $0x2e0] ss:$8 sps:$4 sm:$0xff]   ;;  %v22380_v30 = vld [vmem:[%s29003_s7 + $0x2f4] ss:$8 sps:$4 sm:$0xff]  }
 0x7d1   : > { %v17983_v29 = vshrl.u32 %v17973_v5, 16  ;;  %v17986_v22 = vrot.slane %v17973_v5, 1  ;;  %v17981_v10 = vsel %vm29195_vm3, %v17973_v5, 0  ;;  %v17955_v4 = vrot.slane %v17938_v16, 7  ;;  %v22378_v8 = vld [vmem:[%s29003_s7 + $0x2f0] ss:$8 sps:$4 sm:$0xff]  }
 0x7d2   : > { %v17957_v32 = vrot.slane %v17939_v49, 6  ;;  %v17959_v7 = vrot.slane %v17940_v62, 5  ;;  %v22383_v24 = vld [vmem:[%s29003_s7 + $0x304] ss:$8 sps:$4 sm:$0xff]   ;;  %v22381_v57 = vld [vmem:[%s29003_s7 + $0x300] ss:$8 sps:$4 sm:$0xff]  }
 0x7d3   : > { %v17985_v34 = vsel %vm29194_vm0, %v17983_v29, 0  ;;  %v17989_v56 = vshrl.u32 %v17986_v22, 16  ;;  %v17987_v55 = vsel %vm29197_vm5, %v17986_v22, 0  ;;  %v17956_v18 = vsel %vm9902_vm6, %v17955_v4, %v17937_v54  ;;  %v22386_v5 = vld [vmem:[%s29003_s7 + $0x314] ss:$8 sps:$4 sm:$0xff]  }
 0x7d4   : > { %19605 = vmatprep.mubr.bf16.mxu0 %v17985_v34  ;;  %v17958_v59 = vsel %vm9884_vm7, %v17957_v32, %v17956_v18  ;;  %v22384_v23 = vld [vmem:[%s29003_s7 + $0x310] ss:$8 sps:$4 sm:$0xff]   ;;  %v22389_v29 = vld [vmem:[%s29003_s7 + $0x324] ss:$8 sps:$4 sm:$0xff]   ;;  %v17455_v39 = vrot.slane %v28208_v58, 4 }
 0x7d5   : > { %19606 = vmatmul.mubr.bf16.vlgmr.msra.gmra.mrb[216].mxu0 %v17981_v10  ;;  %v17991_v1 = vsel %vm29196_vm4, %v17989_v56, 0  ;;  %v17960_v40 = vsel %vm9887_vm8, %v17959_v7, %v17958_v59  ;;  %v22387_v22 = vld [vmem:[%s29003_s7 + $0x320] ss:$8 sps:$4 sm:$0xff]   ;;  %v22392_v11 = vld [vmem:[%s29003_s7 + $0x334] ss:$8 sps:$4 sm:$0xff]  }
 0x7d6   : > { %19646 = vmatprep.mubr.bf16.mxu1 %v17991_v1  ;;  %v28252_v15 = vpack.c.b16 %v17960_v40, %v17960_v40  ;;  %v17463_v16 = vmax.bf16 %v17455_v39, %v28208_v58  ;;  %v22390_v34 = vld [vmem:[%s29003_s7 + $0x330] ss:$8 sps:$4 sm:$0xff]   ;;  %v22395_v10 = vld [vmem:[%s29003_s7 + $0x344] ss:$8 sps:$4 sm:$0xff]   ;;  %v22393_v49 = vld [vmem:[%s29003_s7 + $0x340] ss:$8 sps:$4 sm:$0xff]  }
 0x7d7   : > { %19647 = vmatmul.mubr.bf16.vlgmr.msra.gmra.mrb[48].mxu1 %v17987_v55  ;;  %v22398_v58 = vld [vmem:[%s29003_s7 + $0x354] ss:$8 sps:$4 sm:$0xff]   ;;  %v22401_v4 = vld [vmem:[%s29003_s7 + $0x364] ss:$8 sps:$4 sm:$0xff]   ;;  %v22402_v18 = vld [vmem:[%s29003_s7 + $0x370] ss:$8 sps:$4 sm:$0xff]  }
 0x7d8   : > { %19656 = vmatpush1.bf16.msra.mxu1 %v22333_v13  ;;  %v17994_v45 = vshrl.u32 %v28252_v15, 16  ;;  %v17997_v21 = vrot.slane %v28252_v15, 1  ;;  %v17992_v63 = vsel %vm29199_vm14, %v28252_v15, 0  ;;  %v17523_v56 = vrot.slane %v17463_v16, %v23126_v3  ;;  %v22396_v13 = vld [vmem:[%s29003_s7 + $0x350] ss:$8 sps:$4 sm:$0xff]  }
 0x7d9   : > { %19657 = vmatprep.subr.bf16.mxu1 %v22338_v9  ;;  %v22399_v9 = vld [vmem:[%s29003_s7 + $0x360] ss:$8 sps:$4 sm:$0xff]   ;;  %v22404_v7 = vld [vmem:[%s29003_s7 + $0x374] ss:$8 sps:$4 sm:$0xff]  }
 0x7da   : > { %v17996_v35 = vsel %vm29198_vm13, %v17994_v45, 0  ;;  %v18000_v33 = vshrl.u32 %v17997_v21, 16  ;;  %v17524_v62 = vcombine.high %v17523_v56, %v17523_v56  ;;  %v17531_v54 = vrot.slane %v17523_v56, %v23126_v3  ;;  %v22435_v15 = vld [vmem:[%s29003_s7 + $0x420] ss:$8 sps:$4 sm:$0xff]  }
 0x7db   : > { %19687 = vmatprep.mubr.bf16.mxu1 %v17996_v35  ;;  %v17998_v56 = vsel %vm29201_vm1, %v17997_v21, 0  ;;  %v22440_v21 = vld [vmem:[%s29003_s7 + $0x434] ss:$8 sps:$4 sm:$0xff]  }
 0x7dc   : > { %19658 = vmatpush1.bf16.msra.mxu1 %v22336_v0  ;;  %v18002_v19 = vsel %vm29200_vm15, %v18000_v33, 0  ;;  %v17538_v1 = vrot.slane %v17524_v62, %v23126_v3  ;;  %v17539_v32 = vcombine.high %v17531_v54, %v17531_v54  ;;  %v22407_v0 = vld [vmem:[%s29003_s7 + $0x384] ss:$8 sps:$4 sm:$0xff]   ;;  %v17622_v45 = vshrl.u32 %v17531_v54, 16  ;;  %v22420_v33 = vld [vmem:[%s29003_s7 + $0x3d0] ss:$8 sps:$4 sm:$0xff]  }
 0x7dd   : > { %19659 = vmatprep.subr.bf16.mxu1 %v22341_v61  ;;  %v22437_v62 = vld [vmem:[%s29003_s7 + $0x424] ss:$8 sps:$4 sm:$0xff]  }
 0x7de   : > { %v17627_v55 = vshrl.u32 %v17538_v1, 16  ;;  %v17540_v59 = vcombine.high %v17538_v1, %v17538_v1  ;;  %v17632_v40 = vshrl.u32 %v17539_v32, 16 }
 0x7e0   : > { %19660 = vmatpush1.bf16.msra.mxu1 %v22339_v38  ;;  %v17686_v61 = vmax.bf16 %v17627_v55, %v17538_v1  ;;  %v22405_v38 = vld [vmem:[%s29003_s7 + $0x380] ss:$8 sps:$4 sm:$0xff]   ;;  %v17637_v35 = vshrl.u32 %v17540_v59, 16  ;;  %v22446_v1 = vld [vmem:[%s29003_s7 + $0x454] ss:$8 sps:$4 sm:$0xff]  }
 0x7e1   : > { %19661 = vmatprep.subr.bf16.mxu1 %v22344_v52  ;;  %v22410_v52 = vld [vmem:[%s29003_s7 + $0x394] ss:$8 sps:$4 sm:$0xff]  }
 0x7e2   : > { %v22452_v55 = vld [vmem:[%s29003_s7 + $0x474] ss:$8 sps:$4 sm:$0xff]  }
 0x7e4   : > { %19662 = vmatpush1.bf16.msra.mxu1 %v22342_v42  ;;  %v17687_v42 = vmax.bf16 %v17632_v40, %v17539_v32  ;;  %v22449_v32 = vld [vmem:[%s29003_s7 + $0x464] ss:$8 sps:$4 sm:$0xff]   ;;  %v22458_v40 = vld [vmem:[%s29003_s7 + $0x494] ss:$8 sps:$4 sm:$0xff]  }
 0x7e5   : > { %19663 = vmatprep.subr.bf16.mxu1 %v22347_v41  ;;  %v17841_v41 = vrot.slane %v17686_v61, %v23126_v3  ;;  %v22456_v61 = vld [vmem:[%s29003_s7 + $0x490] ss:$8 sps:$4 sm:$0xff]  }
 0x7e8   : > { %19664 = vmatpush1.bf16.msra.mxu1 %v22345_v27  ;;  %v17685_v27 = vmax.bf16 %v17622_v45, %v17531_v54  ;;  %v22443_v54 = vld [vmem:[%s29003_s7 + $0x444] ss:$8 sps:$4 sm:$0xff]  }
 0x7e9   : > { %19665 = vmatprep.subr.bf16.mxu1 %v22350_v48  ;;  %v22408_v48 = vld [vmem:[%s29003_s7 + $0x390] ss:$8 sps:$4 sm:$0xff]   ;;  %v22461_v45 = vld [vmem:[%s29003_s7 + $0x4a4] ss:$8 sps:$4 sm:$0xff]  }
 0x7ec   : > { %19666 = vmatpush1.bf16.msra.mxu1 %v22348_v47  ;;  %v17688_v47 = vmax.bf16 %v17637_v35, %v17540_v59  ;;  %v22455_v59 = vld [vmem:[%s29003_s7 + $0x484] ss:$8 sps:$4 sm:$0xff]   ;;  %v22464_v35 = vld [vmem:[%s29003_s7 + $0x4b4] ss:$8 sps:$4 sm:$0xff]  }
 0x7ed   : > { %19667 = vmatprep.subr.bf16.mxu1 %v22353_v43  ;;  %v22413_v43 = vld [vmem:[%s29003_s7 + $0x3a4] ss:$8 sps:$4 sm:$0xff]  }
 0x7f0   : > { %19668 = vmatpush1.bf16.msra.mxu1 %v22351_v25  ;;  %v17855_v25 = vrot.slane %v17687_v42, %v23126_v3  ;;  %v22467_v42 = vld [vmem:[%s29003_s7 + $0x4c4] ss:$8 sps:$4 sm:$0xff]  }
 0x7f1   : > { %19669 = vmatprep.subr.bf16.mxu1 %v22356_v50  ;;  %v17848_v50 = vrot.slane %v17841_v41, %v23126_v3  ;;  %v22465_v41 = vld [vmem:[%s29003_s7 + $0x4c0] ss:$8 sps:$4 sm:$0xff]  }
 0x7f4   : > { %19670 = vmatpush1.bf16.msra.mxu1 %v22354_v37  ;;  %v22411_v37 = vld [vmem:[%s29003_s7 + $0x3a0] ss:$8 sps:$4 sm:$0xff]  }
 0x7f5   : > { %19671 = vmatprep.subr.bf16.mxu1 %v22359_v26  ;;  %v17827_v26 = vrot.slane %v17685_v27, %v23126_v3  ;;  %v22470_v27 = vld [vmem:[%s29003_s7 + $0x4d4] ss:$8 sps:$4 sm:$0xff]  }
 0x7f8   : > { %19672 = vmatpush1.bf16.msra.mxu1 %v22357_v17  ;;  %v17869_v17 = vrot.slane %v17688_v47, %v23126_v3  ;;  %v22473_v47 = vld [vmem:[%s29003_s7 + $0x4e4] ss:$8 sps:$4 sm:$0xff]  }
 0x7f9   : > { %19673 = vmatprep.subr.bf16.mxu1 %v22362_v28  ;;  %v22416_v28 = vld [vmem:[%s29003_s7 + $0x3b4] ss:$8 sps:$4 sm:$0xff]  }
 0x7fc   : > { %19674 = vmatpush1.bf16.msra.mxu1 %v22360_v31  ;;  %v17862_v31 = vrot.slane %v17855_v25, %v23126_v3  ;;  %v22476_v25 = vld [vmem:[%s29003_s7 + $0x4f4] ss:$8 sps:$4 sm:$0xff]  }
 0x7fd   : > { %19675 = vmatprep.subr.bf16.mxu1 %v22365_v60  ;;  %v17942_v60 = vunpack.c.l.b16 %v17848_v50 }
 0x800   : > { %19676 = vmatpush1.bf16.msra.mxu1 %v22363_v51  ;;  %v22414_v51 = vld [vmem:[%s29003_s7 + $0x3b0] ss:$8 sps:$4 sm:$0xff]  }
 0x801   : > { %19677 = vmatprep.subr.bf16.mxu1 %v22368_v46  ;;  %v17834_v46 = vrot.slane %v17827_v26, %v23126_v3  ;;  %v22479_v26 = vld [vmem:[%s29003_s7 + $0x504] ss:$8 sps:$4 sm:$0xff]  }
 0x804   : > { %19678 = vmatpush1.bf16.msra.mxu1 %v22366_v53  ;;  %v17876_v53 = vrot.slane %v17869_v17, %v23126_v3 }
 0x805   : > { %19679 = vmatprep.subr.bf16.mxu1 %v22371_v44  ;;  %v22419_v44 = vld [vmem:[%s29003_s7 + $0x3c4] ss:$8 sps:$4 sm:$0xff]  }
 0x808   : > { %19680 = vmatpush1.bf16.msra.mxu1 %v22369_v12  ;;  %v17943_v12 = vunpack.c.l.b16 %v17862_v31  ;;  %v22482_v31 = vld [vmem:[%s29003_s7 + $0x514] ss:$8 sps:$4 sm:$0xff]  }
 0x809   : > { %19681 = vmatprep.subr.bf16.mxu1 %v22374_v2  ;;  %v17961_v2 = vrot.slane %v17942_v60, 7 }
 0x80c   : > { %19682 = vmatpush1.bf16.msra.mxu1 %v22372_v6  ;;  %v22417_v6 = vld [vmem:[%s29003_s7 + $0x3c0] ss:$8 sps:$4 sm:$0xff]  }
 0x80d   : > { %19683 = vmatprep.subr.bf16.mxu1 %v22377_v36  ;;  %v17941_v36 = vunpack.c.l.b16 %v17834_v46  ;;  %v22480_v46 = vld [vmem:[%s29003_s7 + $0x510] ss:$8 sps:$4 sm:$0xff]  }
 0x810   : > { %19684 = vmatpush1.bf16.msra.mxu1 %v22375_v20  ;;  %v17944_v20 = vunpack.c.l.b16 %v17876_v53  ;;  %v22485_v53 = vld [vmem:[%s29003_s7 + $0x524] ss:$8 sps:$4 sm:$0xff]  }
 0x811   : > { %19685 = vmatprep.subr.bf16.mxu1 %v22380_v30  ;;  %v22422_v30 = vld [vmem:[%s29003_s7 + $0x3d4] ss:$8 sps:$4 sm:$0xff]  }
 0x814   : > { %19686 = vmatpush1.bf16.msra.mxu1 %v22378_v8  ;;  %v17963_v8 = vrot.slane %v17943_v12, 6  ;;  %v22483_v12 = vld [vmem:[%s29003_s7 + $0x520] ss:$8 sps:$4 sm:$0xff]  }
 0x815   : > { %19696 = vmatprep.subr.bf16.mxu1 %v22383_v24  ;;  %v17962_v24 = vsel %vm9902_vm6, %v17961_v2, %v17941_v36  ;;  %v22488_v2 = vld [vmem:[%s29003_s7 + $0x534] ss:$8 sps:$4 sm:$0xff]   ;;  %v22486_v36 = vld [vmem:[%s29003_s7 + $0x530] ss:$8 sps:$4 sm:$0xff]  }
 0x817   : > { %19688 = vmatmul.mubr.bf16.vlgmr.msra.gmra.mrb[48].mxu1 %v17992_v63  ;;  %v17964_v63 = vsel %vm9884_vm7, %v17963_v8, %v17962_v24  ;;  %v22489_v8 = vld [vmem:[%s29003_s7 + $0x540] ss:$8 sps:$4 sm:$0xff]  }
 0x818   : > { %19697 = vmatpush1.bf16.msra.mxu1 %v22381_v57  ;;  %19728 = vmatprep.mubr.bf16.mxu1 %v18002_v19  ;;  %v17965_v57 = vrot.slane %v17944_v20, 5  ;;  %v22423_v19 = vld [vmem:[%s29003_s7 + $0x3e0] ss:$8 sps:$4 sm:$0xff]   ;;  %v22491_v20 = vld [vmem:[%s29003_s7 + $0x544] ss:$8 sps:$4 sm:$0xff]  }
 0x819   : > { %19698 = vmatprep.subr.bf16.mxu1 %v22386_v5  ;;  %v22425_v5 = vld [vmem:[%s29003_s7 + $0x3e4] ss:$8 sps:$4 sm:$0xff]  }
 0x81c   : > { %19699 = vmatpush1.bf16.msra.mxu1 %v22384_v23  ;;  %v17966_v23 = vsel %vm9887_vm8, %v17965_v57, %v17964_v63 }
 0x81d   : > { %19700 = vmatprep.subr.bf16.mxu1 %v22389_v29  ;;  %v22428_v29 = vld [vmem:[%s29003_s7 + $0x3f4] ss:$8 sps:$4 sm:$0xff]   ;;  %v28455_v39 = vpack.c.b16 %v17966_v23, %v17966_v23  ;;  %v22497_v23 = vld [vmem:[%s29003_s7 + $0x564] ss:$8 sps:$4 sm:$0xff]  }
 0x81f   : > { %v18005_v16 = vshrl.u32 %v28455_v39, 16  ;;  %v18008_v50 = vrot.slane %v28455_v39, 1  ;;  %v18003_v60 = vsel %vm29203_vm10, %v28455_v39, 0  ;;  %v22528_v39 = vld [vmem:[%s29003_s7 + $0x610] ss:$8 sps:$4 sm:$0xff]  }
 0x820   : > { %19701 = vmatpush1.bf16.msra.mxu1 %v22387_v22  ;;  %v22426_v22 = vld [vmem:[%s29003_s7 + $0x3f0] ss:$8 sps:$4 sm:$0xff]  }
 0x821   : > { %19702 = vmatprep.subr.bf16.mxu1 %v22392_v11  ;;  %v22431_v11 = vld [vmem:[%s29003_s7 + $0x404] ss:$8 sps:$4 sm:$0xff]   ;;  %v18011_v17 = vshrl.u32 %v18008_v50, 16 }
 0x824   : > { %19703 = vmatpush1.bf16.msra.mxu1 %v22390_v34  ;;  %v22429_v34 = vld [vmem:[%s29003_s7 + $0x400] ss:$8 sps:$4 sm:$0xff]  }
 0x825   : > { %19704 = vmatprep.subr.bf16.mxu1 %v22395_v10  ;;  %v22434_v10 = vld [vmem:[%s29003_s7 + $0x414] ss:$8 sps:$4 sm:$0xff]  }
 0x828   : > { %19705 = vmatpush1.bf16.msra.mxu1 %v22393_v49  ;;  %v18007_v49 = vsel %vm29202_vm9, %v18005_v16, 0 }
 0x829   : > { %19706 = vmatprep.subr.bf16.mxu1 %v22398_v58  ;;  %v22432_v58 = vld [vmem:[%s29003_s7 + $0x410] ss:$8 sps:$4 sm:$0xff]  }
 0x82c   : > { %19707 = vmatpush1.bf16.msra.mxu1 %v22396_v13  ;;  %v22438_v13 = vld [vmem:[%s29003_s7 + $0x430] ss:$8 sps:$4 sm:$0xff]  }
 0x82d   : > { %19708 = vmatprep.subr.bf16.mxu1 %v22401_v4  ;;  %v22441_v4 = vld [vmem:[%s29003_s7 + $0x440] ss:$8 sps:$4 sm:$0xff]  }
 0x830   : > { %19709 = vmatpush1.bf16.msra.mxu1 %v22399_v9  ;;  %v22444_v9 = vld [vmem:[%s29003_s7 + $0x450] ss:$8 sps:$4 sm:$0xff]  }
 0x831   : > { %19710 = vmatprep.subr.bf16.mxu1 %v22404_v7  ;;  %v22447_v7 = vld [vmem:[%s29003_s7 + $0x460] ss:$8 sps:$4 sm:$0xff]  }
 0x834   : > { %19711 = vmatpush1.bf16.msra.mxu1 %v22402_v18  ;;  %v22450_v18 = vld [vmem:[%s29003_s7 + $0x470] ss:$8 sps:$4 sm:$0xff]  }
 0x835   : > { %19712 = vmatprep.subr.bf16.mxu1 %v22407_v0  ;;  %v22453_v0 = vld [vmem:[%s29003_s7 + $0x480] ss:$8 sps:$4 sm:$0xff]  }
 0x838   : > { %19713 = vmatpush1.bf16.msra.mxu1 %v22405_v38  ;;  %v22459_v38 = vld [vmem:[%s29003_s7 + $0x4a0] ss:$8 sps:$4 sm:$0xff]  }
 0x839   : > { %19714 = vmatprep.subr.bf16.mxu1 %v22410_v52  ;;  %v22462_v52 = vld [vmem:[%s29003_s7 + $0x4b0] ss:$8 sps:$4 sm:$0xff]  }
 0x83c   : > { %19715 = vmatpush1.bf16.msra.mxu1 %v22408_v48  ;;  %v22468_v48 = vld [vmem:[%s29003_s7 + $0x4d0] ss:$8 sps:$4 sm:$0xff]  }
 0x83d   : > { %19716 = vmatprep.subr.bf16.mxu1 %v22413_v43  ;;  %v22471_v43 = vld [vmem:[%s29003_s7 + $0x4e0] ss:$8 sps:$4 sm:$0xff]  }
 0x840   : > { %19717 = vmatpush1.bf16.msra.mxu1 %v22411_v37  ;;  %v22474_v37 = vld [vmem:[%s29003_s7 + $0x4f0] ss:$8 sps:$4 sm:$0xff]  }
 0x841   : > { %19718 = vmatprep.subr.bf16.mxu1 %v22416_v28  ;;  %v22477_v28 = vld [vmem:[%s29003_s7 + $0x500] ss:$8 sps:$4 sm:$0xff]  }
 0x844   : > { %19719 = vmatpush1.bf16.msra.mxu1 %v22414_v51  ;;  %v18013_v51 = vsel %vm29204_vm11, %v18011_v17, 0  ;;  %v22518_v17 = vld [vmem:[%s29003_s7 + $0x5d4] ss:$8 sps:$4 sm:$0xff]  }
 0x845   : > { %19720 = vmatprep.subr.bf16.mxu1 %v22419_v44  ;;  %v17456_v44 = vrot.slane %v28223_v14, 4 }
 0x848   : > { %19721 = vmatpush1.bf16.msra.mxu1 %v22417_v6  ;;  %v17464_v6 = vmax.bf16 %v17456_v44, %v28223_v14  ;;  %v22494_v14 = vld [vmem:[%s29003_s7 + $0x554] ss:$8 sps:$4 sm:$0xff]  }
 0x849   : > { %19722 = vmatprep.subr.bf16.mxu1 %v22422_v30 }
 0x84a   : > { %v17547_v30 = vrot.slane %v17464_v6, %v23126_v3  ;;  %v22522_v6 = vld [vmem:[%s29003_s7 + $0x5f0] ss:$8 sps:$4 sm:$0xff]  }
 0x84c   : > { %19723 = vmatpush1.bf16.msra.mxu1 %v22420_v33  ;;  %v17548_v24 = vcombine.high %v17547_v30, %v17547_v30  ;;  %v17555_v63 = vrot.slane %v17547_v30, %v23126_v3  ;;  %v22525_v30 = vld [vmem:[%s29003_s7 + $0x600] ss:$8 sps:$4 sm:$0xff]  }
 0x84d   : > { %19724 = vmatprep.subr.bf16.mxu1 %v22425_v5  ;;  %v22492_v5 = vld [vmem:[%s29003_s7 + $0x550] ss:$8 sps:$4 sm:$0xff]  }
 0x84e   : > { %v17563_v16 = vcombine.high %v17555_v63, %v17555_v63 }
 0x850   : > { %19725 = vmatpush1.bf16.msra.mxu1 %v22423_v19 }
 0x851   : > { %19726 = vmatprep.subr.bf16.mxu1 %v22428_v29  ;;  %v17562_v29 = vrot.slane %v17548_v24, %v23126_v3 }
 0x854   : > { %19727 = vmatpush1.bf16.msra.mxu1 %v22426_v22 }
 0x855   : > { %19737 = vmatprep.subr.bf16.mxu1 %v22431_v11  ;;  %v22495_v11 = vld [vmem:[%s29003_s7 + $0x560] ss:$8 sps:$4 sm:$0xff]  }
 0x857   : > { %19729 = vmatmul.mubr.bf16.vlgmr.msra.gmra.mrb[48].mxu1 %v17998_v56  ;;  %v22498_v56 = vld [vmem:[%s29003_s7 + $0x570] ss:$8 sps:$4 sm:$0xff]  }
 0x858   : > { %19738 = vmatpush1.bf16.msra.mxu1 %v22429_v34  ;;  %19769 = vmatprep.mubr.bf16.mxu1 %v18007_v49  ;;  %v22500_v34 = vld [vmem:[%s29003_s7 + $0x574] ss:$8 sps:$4 sm:$0xff]   ;;  %v17564_v49 = vcombine.high %v17562_v29, %v17562_v29 }
 0x859   : > { %19739 = vmatprep.subr.bf16.mxu1 %v22434_v10  ;;  %v17647_v10 = vshrl.u32 %v17562_v29, 16 }
 0x85c   : > { %19740 = vmatpush1.bf16.msra.mxu1 %v22432_v58  ;;  %v22503_v58 = vld [vmem:[%s29003_s7 + $0x584] ss:$8 sps:$4 sm:$0xff]  }
 0x85d   : > { %19741 = vmatprep.subr.bf16.mxu1 %v22437_v62  ;;  %v17652_v62 = vshrl.u32 %v17563_v16, 16 }
 0x860   : > { %19742 = vmatpush1.bf16.msra.mxu1 %v22435_v15  ;;  %v17690_v15 = vmax.bf16 %v17647_v10, %v17562_v29  ;;  %v22625_v29 = vld [vmem:[%s29005_s9 + $0x50] sm:$0xff]  }
 0x861   : > { %19743 = vmatprep.subr.bf16.mxu1 %v22440_v21  ;;  %v17642_v21 = vshrl.u32 %v17555_v63, 16  ;;  %v22534_v10 = vld [vmem:[%s29003_s7 + $0x630] ss:$8 sps:$4 sm:$0xff]  }
 0x864   : > { %19744 = vmatpush1.bf16.msra.mxu1 %v22438_v13  ;;  %v22501_v13 = vld [vmem:[%s29003_s7 + $0x580] ss:$8 sps:$4 sm:$0xff]  }
 0x865   : > { %19745 = vmatprep.subr.bf16.mxu1 %v22443_v54  ;;  %v17657_v54 = vshrl.u32 %v17564_v49, 16 }
 0x868   : > { %19746 = vmatpush1.bf16.msra.mxu1 %v22441_v4  ;;  %v22506_v4 = vld [vmem:[%s29003_s7 + $0x594] ss:$8 sps:$4 sm:$0xff]  }
 0x869   : > { %19747 = vmatprep.subr.bf16.mxu1 %v22446_v1  ;;  %v17691_v1 = vmax.bf16 %v17652_v62, %v17563_v16  ;;  %v22626_v16 = vld [vmem:[%s29005_s9 + $0x10] sm:$0xff]   ;;  %v22537_v62 = vld [vmem:[%s29003_s7 + $0x640] ss:$8 sps:$4 sm:$0xff]  }
 0x86c   : > { %19748 = vmatpush1.bf16.msra.mxu1 %v22444_v9  ;;  %v17897_v9 = vrot.slane %v17690_v15, %v23126_v3  ;;  %v22542_v15 = vld [vmem:[%s29003_s7 + $0x654] ss:$8 sps:$4 sm:$0xff]  }
 0x86d   : > { %19749 = vmatprep.subr.bf16.mxu1 %v22449_v32  ;;  %v17689_v32 = vmax.bf16 %v17642_v21, %v17555_v63  ;;  %v22622_v63 = vld [vmem:[%s29005_s9] sm:$0xff]  }
 0x86e   : > { %v22630_v21 = vld [vmem:[%s29005_s9 + $0x20] sm:$0xff]  }
 0x870   : > { %19750 = vmatpush1.bf16.msra.mxu1 %v22447_v7  ;;  %v22504_v7 = vld [vmem:[%s29003_s7 + $0x590] ss:$8 sps:$4 sm:$0xff]  }
 0x871   : > { %19751 = vmatprep.subr.bf16.mxu1 %v22452_v55  ;;  %v17692_v55 = vmax.bf16 %v17657_v54, %v17564_v49  ;;  %v22628_v49 = vld [vmem:[%s29005_s9 + $0x18] sm:$0xff]  }
 0x872   : > { %v22540_v54 = vld [vmem:[%s29003_s7 + $0x650] ss:$8 sps:$4 sm:$0xff]  }
 0x874   : > { %19752 = vmatpush1.bf16.msra.mxu1 %v22450_v18  ;;  %v22509_v18 = vld [vmem:[%s29003_s7 + $0x5a4] ss:$8 sps:$4 sm:$0xff]  }
 0x875   : > { %19753 = vmatprep.subr.bf16.mxu1 %v22455_v59  ;;  %v17911_v59 = vrot.slane %v17691_v1, %v23126_v3  ;;  %v22632_v1 = vld [vmem:[%s29005_s9 + $0x28] sm:$0xff]  }
 0x878   : > { %19754 = vmatpush1.bf16.msra.mxu1 %v22453_v0  ;;  %v17904_v0 = vrot.slane %v17897_v9, %v23126_v3  ;;  %v22543_v9 = vld [vmem:[%s29003_s7 + $0x660] ss:$8 sps:$4 sm:$0xff]  }
 0x879   : > { %19755 = vmatprep.subr.bf16.mxu1 %v22458_v40  ;;  %v22507_v40 = vld [vmem:[%s29003_s7 + $0x5a0] ss:$8 sps:$4 sm:$0xff]  }
 0x87c   : > { %19756 = vmatpush1.bf16.msra.mxu1 %v22456_v61  ;;  %v17883_v61 = vrot.slane %v17689_v32, %v23126_v3  ;;  %v22548_v32 = vld [vmem:[%s29003_s7 + $0x674] ss:$8 sps:$4 sm:$0xff]  }
 0x87d   : > { %19757 = vmatprep.subr.bf16.mxu1 %v22461_v45  ;;  %v17925_v45 = vrot.slane %v17692_v55, %v23126_v3  ;;  %v22551_v55 = vld [vmem:[%s29003_s7 + $0x684] ss:$8 sps:$4 sm:$0xff]  }
 0x880   : > { %19758 = vmatpush1.bf16.msra.mxu1 %v22459_v38  ;;  %v22512_v38 = vld [vmem:[%s29003_s7 + $0x5b4] ss:$8 sps:$4 sm:$0xff]  }
 0x881   : > { %19759 = vmatprep.subr.bf16.mxu1 %v22464_v35  ;;  %v17918_v35 = vrot.slane %v17911_v59, %v23126_v3  ;;  %v22554_v59 = vld [vmem:[%s29003_s7 + $0x694] ss:$8 sps:$4 sm:$0xff]  }
 0x884   : > { %19760 = vmatpush1.bf16.msra.mxu1 %v22462_v52  ;;  %v17946_v52 = vunpack.c.l.b16 %v17904_v0  ;;  %v22552_v0 = vld [vmem:[%s29003_s7 + $0x690] ss:$8 sps:$4 sm:$0xff]  }
 0x885   : > { %19761 = vmatprep.subr.bf16.mxu1 %v22467_v42  ;;  %v22510_v42 = vld [vmem:[%s29003_s7 + $0x5b0] ss:$8 sps:$4 sm:$0xff]  }
 0x888   : > { %19762 = vmatpush1.bf16.msra.mxu1 %v22465_v41  ;;  %v17890_v41 = vrot.slane %v17883_v61, %v23126_v3  ;;  %v22555_v61 = vld [vmem:[%s29003_s7 + $0x6a0] ss:$8 sps:$4 sm:$0xff]  }
 0x889   : > { %19763 = vmatprep.subr.bf16.mxu1 %v22470_v27  ;;  %v17932_v27 = vrot.slane %v17925_v45, %v23126_v3  ;;  %v22560_v45 = vld [vmem:[%s29003_s7 + $0x6b4] ss:$8 sps:$4 sm:$0xff]  }
 0x88c   : > { %19764 = vmatpush1.bf16.msra.mxu1 %v22468_v48  ;;  %v22515_v48 = vld [vmem:[%s29003_s7 + $0x5c4] ss:$8 sps:$4 sm:$0xff]  }
 0x88d   : > { %19765 = vmatprep.subr.bf16.mxu1 %v22473_v47  ;;  %v17947_v47 = vunpack.c.l.b16 %v17918_v35  ;;  %v22563_v35 = vld [vmem:[%s29003_s7 + $0x6c4] ss:$8 sps:$4 sm:$0xff]  }
 0x88f   : > { %v17969_v3 = vrot.slane %v17947_v47, 6  ;;  %v22572_v47 = vld [vmem:[%s29003_s7 + $0x6f4] ss:$8 sps:$4 sm:$0xff]  }
 0x890   : > { %19766 = vmatpush1.bf16.msra.mxu1 %v22471_v43  ;;  %v17967_v43 = vrot.slane %v17946_v52, 7  ;;  %v22561_v52 = vld [vmem:[%s29003_s7 + $0x6c0] ss:$8 sps:$4 sm:$0xff]  }
 0x891   : > { %19767 = vmatprep.subr.bf16.mxu1 %v22476_v25  ;;  %v22513_v25 = vld [vmem:[%s29003_s7 + $0x5c0] ss:$8 sps:$4 sm:$0xff]  }
 0x894   : > { %19768 = vmatpush1.bf16.msra.mxu1 %v22474_v37  ;;  %v17945_v37 = vunpack.c.l.b16 %v17890_v41  ;;  %v22564_v41 = vld [vmem:[%s29003_s7 + $0x6d0] ss:$8 sps:$4 sm:$0xff]  }
 0x895   : > { %19778 = vmatprep.subr.bf16.mxu1 %v22479_v26  ;;  %v17948_v26 = vunpack.c.l.b16 %v17932_v27  ;;  %v22569_v27 = vld [vmem:[%s29003_s7 + $0x6e4] ss:$8 sps:$4 sm:$0xff]  }
 0x897   : > { %19770 = vmatmul.mubr.bf16.vlgmr.msra.gmra.mrb[48].mxu1 %v18003_v60  ;;  %v17971_v60 = vrot.slane %v17948_v26, 5 }
 0x898   : > { %19779 = vmatpush1.bf16.msra.mxu1 %v22477_v28  ;;  %19810 = vmatprep.mubr.bf16.mxu1 %v18013_v51  ;;  %v17968_v28 = vsel %vm9902_vm6, %v17967_v43, %v17945_v37  ;;  %v22521_v51 = vld [vmem:[%s29003_s7 + $0x5e4] ss:$8 sps:$4 sm:$0xff]   ;;  %vm29205_vm6 = vmmov %vm29194_vm0 }
 0x899   : > { %19780 = vmatprep.subr.bf16.mxu1 %v22482_v31  ;;  %v22516_v31 = vld [vmem:[%s29003_s7 + $0x5d0] ss:$8 sps:$4 sm:$0xff]   ;;  %v22575_v37 = vld [vmem:[%s29003_s7 + $0x704] ss:$8 sps:$4 sm:$0xff]  }
 0x89c   : > { %19781 = vmatpush1.bf16.msra.mxu1 %v22480_v46  ;;  %v17970_v46 = vsel %vm9884_vm7, %v17969_v3, %v17968_v28  ;;  %vm29206_vm7 = vmmov %vm29194_vm0  ;;  %v22578_v3 = vld [vmem:[%s29003_s7 + $0x714] ss:$8 sps:$4 sm:$0xff]  }
 0x89d   : > { %19782 = vmatprep.subr.bf16.mxu1 %v22485_v53  ;;  %v22519_v53 = vld [vmem:[%s29003_s7 + $0x5e0] ss:$8 sps:$4 sm:$0xff]   ;;  %v17972_v44 = vsel %vm9887_vm8, %v17971_v60, %v17970_v46  ;;  %vm29207_vm8 = vmmov %vm29194_vm0  ;;  %v22576_v60 = vld [vmem:[%s29003_s7 + $0x710] ss:$8 sps:$4 sm:$0xff]  }
 0x89e   : > { %v22579_v46 = vld [vmem:[%s29003_s7 + $0x720] ss:$8 sps:$4 sm:$0xff]  }
 0x8a0   : > { %19783 = vmatpush1.bf16.msra.mxu1 %v22483_v12  ;;  %v22524_v12 = vld [vmem:[%s29003_s7 + $0x5f4] ss:$8 sps:$4 sm:$0xff]  }
 0x8a1   : > { %19784 = vmatprep.subr.bf16.mxu1 %v22488_v2  ;;  %v28680_v2 = vpack.c.b16 %v17972_v44, %v17972_v44  ;;  %v22582_v44 = vld [vmem:[%s29003_s7 + $0x730] ss:$8 sps:$4 sm:$0xff]  }
 0x8a3   : > { %v18019_v43 = vrot.slane %v28680_v2, 1  ;;  %v18014_v28 = vsel %vm29207_vm8, %v28680_v2, 0 }
 0x8a4   : > { %19785 = vmatpush1.bf16.msra.mxu1 %v22486_v36  ;;  %v22527_v36 = vld [vmem:[%s29003_s7 + $0x604] ss:$8 sps:$4 sm:$0xff]  }
 0x8a5   : > { %19786 = vmatprep.subr.bf16.mxu1 %v22491_v20  ;;  %v18016_v20 = vshrl.u32 %v28680_v2, 16  ;;  %v18022_v26 = vshrl.u32 %v18019_v43, 16  ;;  %v22636_v2 = vld [vmem:[%s29005_s9 + $0x38] sm:$0xff]  }
 0x8a7   : > { %v18018_v24 = vsel %vm29206_vm7, %v18016_v20, 0  ;;  %v22588_v20 = vld [vmem:[%s29003_s7 + $0x750] ss:$8 sps:$4 sm:$0xff]  }
 0x8a8   : > { %v28603_v33 = vpop.f32.mrb[216].mxu0  ;;  %19787 = vmatpush1.bf16.msra.mxu1 %v22489_v8  ;;  %v22530_v8 = vld [vmem:[%s29003_s7 + $0x614] ss:$8 sps:$4 sm:$0xff]  }
 0x8a9   : > { %v28605_v57 = vpop.f32.mrb[217].mxu0  ;;  %19788 = vmatprep.subr.bf16.mxu1 %v22494_v14  ;;  %v18009_v14 = vsel %vm29205_vm6, %v18008_v50, 0  ;;  %v22533_v50 = vld [vmem:[%s29003_s7 + $0x624] ss:$8 sps:$4 sm:$0xff]  }
 0x8aa   : > { %v19611_v19 = vpop.f32.mrb[218].mxu0 }
 0x8ab   : > { %v19612_v22 = vpop.f32.mrb[219].mxu0  ;;  %v22623_v19 = vld [vmem:[%s29005_s9 + $0x48] sm:$0xff]  }
 0x8ac   : > { %19789 = vmatpush1.bf16.msra.mxu1 %v22492_v5  ;;  %v22621_v5 = vld [vmem:[%s29005_s9 + $0x40] sm:$0xff]  }
 0x8ad   : > { %19790 = vmatprep.subr.bf16.mxu1 %v22497_v23  ;;  %21566 = vmatprep.subr.bf16.mxu0 %v22621_v5  ;;  %v22624_v23 = vld [vmem:[%s29005_s9 + $0x8] sm:$0xff]  }
 0x8ae   : > { %21567 = vmatpush3.bf16.msra.mxu0 %v22622_v63  ;;  %v22531_v22 = vld [vmem:[%s29003_s7 + $0x620] ss:$8 sps:$4 sm:$0xff]   ;;  %v22599_v5 = vld [vmem:[%s29003_s7 + $0x784] ss:$8 sps:$4 sm:$0xff]  }
 0x8af   : > { %21568 = vmatprep.subr.bf16.mxu0 %v22623_v19  ;;  %v22597_v63 = vld [vmem:[%s29003_s7 + $0x780] ss:$8 sps:$4 sm:$0xff]   ;;  %v22602_v19 = vld [vmem:[%s29003_s7 + $0x794] ss:$8 sps:$4 sm:$0xff]  }
 0x8b0   : > { %19791 = vmatpush1.bf16.msra.mxu1 %v22495_v11  ;;  %v22536_v11 = vld [vmem:[%s29003_s7 + $0x634] ss:$8 sps:$4 sm:$0xff]  }
 0x8b1   : > { %19792 = vmatprep.subr.bf16.mxu1 %v22500_v34  ;;  %v22627_v34 = vld [vmem:[%s29005_s9 + $0x58] sm:$0xff]  }
 0x8b2   : > { %21569 = vmatpush3.bf16.msra.mxu0 %v22624_v23  ;;  %v22603_v23 = vld [vmem:[%s29003_s7 + $0x7a0] ss:$8 sps:$4 sm:$0xff]  }
 0x8b3   : > { %21570 = vmatprep.subr.bf16.mxu0 %v22625_v29  ;;  %v22608_v29 = vld [vmem:[%s29003_s7 + $0x7b4] ss:$8 sps:$4 sm:$0xff]  }
 0x8b4   : > { %19793 = vmatpush1.bf16.msra.mxu1 %v22498_v56  ;;  %v22539_v56 = vld [vmem:[%s29003_s7 + $0x644] ss:$8 sps:$4 sm:$0xff]  }
 0x8b5   : > { %19794 = vmatprep.subr.bf16.mxu1 %v22503_v58  ;;  %v22629_v58 = vld [vmem:[%s29005_s9 + $0x60] sm:$0xff]  }
 0x8b6   : > { %21571 = vmatpush3.bf16.msra.mxu0 %v22626_v16  ;;  %v22609_v16 = vld [vmem:[%s29003_s7 + $0x7c0] ss:$8 sps:$4 sm:$0xff]  }
 0x8b7   : > { %21572 = vmatprep.subr.bf16.mxu0 %v22627_v34  ;;  %v22614_v34 = vld [vmem:[%s29003_s7 + $0x7d4] ss:$8 sps:$4 sm:$0xff]  }
 0x8b8   : > { %19795 = vmatpush1.bf16.msra.mxu1 %v22501_v13  ;;  %v22631_v13 = vld [vmem:[%s29005_s9 + $0x68] sm:$0xff]  }
 0x8b9   : > { %19796 = vmatprep.subr.bf16.mxu1 %v22506_v4  ;;  %v22545_v4 = vld [vmem:[%s29003_s7 + $0x664] ss:$8 sps:$4 sm:$0xff]  }
 0x8ba   : > { %21573 = vmatpush3.bf16.msra.mxu0 %v22628_v49  ;;  %v22615_v49 = vld [vmem:[%s29003_s7 + $0x7e0] ss:$8 sps:$4 sm:$0xff]  }
 0x8bb   : > { %21574 = vmatprep.subr.bf16.mxu0 %v22629_v58  ;;  %v22620_v58 = vld [vmem:[%s29003_s7 + $0x7f4] ss:$8 sps:$4 sm:$0xff]  }
 0x8bc   : > { %19797 = vmatpush1.bf16.msra.mxu1 %v22504_v7  ;;  %v22546_v7 = vld [vmem:[%s29003_s7 + $0x670] ss:$8 sps:$4 sm:$0xff]  }
 0x8bd   : > { %19798 = vmatprep.subr.bf16.mxu1 %v22509_v18  ;;  %v22549_v18 = vld [vmem:[%s29003_s7 + $0x680] ss:$8 sps:$4 sm:$0xff]  }
 0x8be   : > { %21575 = vmatpush3.bf16.msra.mxu0 %v22630_v21  ;;  %v22633_v21 = vld [vmem:[%s29005_s9 + $0x70] sm:$0xff]  }
 0x8bf   : > { %21576 = vmatprep.subr.bf16.mxu0 %v22631_v13  ;;  %v22634_v13 = vld [vmem:[%s29005_s9 + $0x30] sm:$0xff]  }
 0x8c0   : > { %19799 = vmatpush1.bf16.msra.mxu1 %v22507_v40  ;;  %v22557_v40 = vld [vmem:[%s29003_s7 + $0x6a4] ss:$8 sps:$4 sm:$0xff]  }
 0x8c1   : > { %19800 = vmatprep.subr.bf16.mxu1 %v22512_v38  ;;  %v22558_v38 = vld [vmem:[%s29003_s7 + $0x6b0] ss:$8 sps:$4 sm:$0xff]  }
 0x8c2   : > { %21577 = vmatpush3.bf16.msra.mxu0 %v22632_v1 }
 0x8c3   : > { %21578 = vmatprep.subr.bf16.mxu0 %v22633_v21 }
 0x8c4   : > { %19801 = vmatpush1.bf16.msra.mxu1 %v22510_v42  ;;  %v22566_v42 = vld [vmem:[%s29003_s7 + $0x6d4] ss:$8 sps:$4 sm:$0xff]  }
 0x8c5   : > { %19802 = vmatprep.subr.bf16.mxu1 %v22515_v48  ;;  %v22567_v48 = vld [vmem:[%s29003_s7 + $0x6e0] ss:$8 sps:$4 sm:$0xff]  }
 0x8c6   : > { %21579 = vmatpush3.bf16.msra.mxu0 %v22634_v13 }
 0x8c8   : > { %19803 = vmatpush1.bf16.msra.mxu1 %v22513_v25  ;;  %v22570_v25 = vld [vmem:[%s29003_s7 + $0x6f0] ss:$8 sps:$4 sm:$0xff]  }
 0x8c9   : > { %19804 = vmatprep.subr.bf16.mxu1 %v22518_v17  ;;  %v22573_v17 = vld [vmem:[%s29003_s7 + $0x700] ss:$8 sps:$4 sm:$0xff]  }
 0x8cc   : > { %19805 = vmatpush1.bf16.msra.mxu1 %v22516_v31  ;;  %v18024_v31 = vsel %vm29208_vm12, %v18022_v26, 0 }
 0x8cd   : > { %19806 = vmatprep.subr.bf16.mxu1 %v22521_v51  ;;  %v22581_v51 = vld [vmem:[%s29003_s7 + $0x724] ss:$8 sps:$4 sm:$0xff]  }
 0x8d0   : > { %19807 = vmatpush1.bf16.msra.mxu1 %v22519_v53  ;;  %v22584_v53 = vld [vmem:[%s29003_s7 + $0x734] ss:$8 sps:$4 sm:$0xff]  }
 0x8d1   : > { %19808 = vmatprep.subr.bf16.mxu1 %v22524_v12  ;;  %v22587_v12 = vld [vmem:[%s29003_s7 + $0x744] ss:$8 sps:$4 sm:$0xff]  }
 0x8d4   : > { %19809 = vmatpush1.bf16.msra.mxu1 %v22522_v6  ;;  %v22585_v6 = vld [vmem:[%s29003_s7 + $0x740] ss:$8 sps:$4 sm:$0xff]  }
 0x8d5   : > { %19819 = vmatprep.subr.bf16.mxu1 %v22527_v36  ;;  %v22590_v36 = vld [vmem:[%s29003_s7 + $0x754] ss:$8 sps:$4 sm:$0xff]  }
 0x8d7   : > { %19811 = vmatmul.mubr.bf16.vlgmr.msra.gmra.mrb[48].mxu1 %v18009_v14  ;;  %v22596_v14 = vld [vmem:[%s29003_s7 + $0x774] ss:$8 sps:$4 sm:$0xff]  }
 0x8d8   : > { %19820 = vmatpush1.bf16.msra.mxu1 %v22525_v30  ;;  %19851 = vmatprep.mubr.bf16.mxu1 %v18018_v24  ;;  %v22593_v30 = vld [vmem:[%s29003_s7 + $0x764] ss:$8 sps:$4 sm:$0xff]   ;;  %v22594_v24 = vld [vmem:[%s29003_s7 + $0x770] ss:$8 sps:$4 sm:$0xff]  }
 0x8d9   : > { %19821 = vmatprep.subr.bf16.mxu1 %v22530_v8  ;;  %v22591_v8 = vld [vmem:[%s29003_s7 + $0x760] ss:$8 sps:$4 sm:$0xff]  }
 0x8dc   : > { %19822 = vmatpush1.bf16.msra.mxu1 %v22528_v39  ;;  %v22600_v39 = vld [vmem:[%s29003_s7 + $0x790] ss:$8 sps:$4 sm:$0xff]  }
 0x8dd   : > { %19823 = vmatprep.subr.bf16.mxu1 %v22533_v50  ;;  %v22605_v50 = vld [vmem:[%s29003_s7 + $0x7a4] ss:$8 sps:$4 sm:$0xff]  }
 0x8e0   : > { %19824 = vmatpush1.bf16.msra.mxu1 %v22531_v22  ;;  %v22606_v22 = vld [vmem:[%s29003_s7 + $0x7b0] ss:$8 sps:$4 sm:$0xff]  }
 0x8e1   : > { %19825 = vmatprep.subr.bf16.mxu1 %v22536_v11  ;;  %v22611_v11 = vld [vmem:[%s29003_s7 + $0x7c4] ss:$8 sps:$4 sm:$0xff]  }
 0x8e4   : > { %19826 = vmatpush1.bf16.msra.mxu1 %v22534_v10  ;;  %v22612_v10 = vld [vmem:[%s29003_s7 + $0x7d0] ss:$8 sps:$4 sm:$0xff]  }
 0x8e5   : > { %19827 = vmatprep.subr.bf16.mxu1 %v22539_v56  ;;  %v22617_v56 = vld [vmem:[%s29003_s7 + $0x7e4] ss:$8 sps:$4 sm:$0xff]  }
 0x8e8   : > { %19828 = vmatpush1.bf16.msra.mxu1 %v22537_v62  ;;  %v22618_v62 = vld [vmem:[%s29003_s7 + $0x7f0] ss:$8 sps:$4 sm:$0xff]  }
 0x8e9   : > { %19829 = vmatprep.subr.bf16.mxu1 %v22542_v15  ;;  %v18020_v15 = vsel %vm29209_vm2, %v18019_v43, 0 }
 0x8ec   : > { %19830 = vmatpush1.bf16.msra.mxu1 %v22540_v54  ;;  %v22635_v54 = vld [vmem:[%s29005_s9 + $0x78] sm:$0xff]  }
 0x8ed   : > { %19831 = vmatprep.subr.bf16.mxu1 %v22545_v4  ;;  %21580 = vmatprep.subr.bf16.mxu0 %v22635_v54  ;;  %v29210_v4 = vld [vmem:[#allocation9_spill] sm:$0xff] }
 0x8ee   : > { %21581 = vmatpush3.bf16.msra.mxu0 %v22636_v2  ;;  %v19565_v1 = vsub.s32 0, %v29210_v4 }
 0x8f0   : > { %19832 = vmatpush1.bf16.msra.mxu1 %v22543_v9  ;;  %v18281_v9 = vld [vmem:[%s29004_s8] sm:$0x3] }
 0x8f1   : > { %19833 = vmatprep.subr.bf16.mxu1 %v22548_v32  ;;  %v19569_v32 = vsub.s32 1, %v29210_v4 }
 0x8f4   : > { %19834 = vmatpush1.bf16.msra.mxu1 %v22546_v7  ;;  %v19566_v7 = vrot.slane %v18281_v9, %v19565_v1 }
 0x8f5   : > { %19835 = vmatprep.subr.bf16.mxu1 %v22551_v55  ;;  %v19570_v55 = vrot.slane %v18281_v9, %v19569_v32 }
 0x8f8   : > { %19836 = vmatpush1.bf16.msra.mxu1 %v22549_v18  ;;  %v19608_v18 = vadd.f32 %v28603_v33, %v19566_v7  ;;  %v19937_v33 = vld [vmem:[%s29006_s10] sm:$0x1] }
 0x8f9   : > { %19837 = vmatprep.subr.bf16.mxu1 %v22554_v59  ;;  %v19610_v59 = vadd.f32 %v28605_v57, %v19570_v55 }
 0x8fc   : > { %19838 = vmatpush1.bf16.msra.mxu1 %v22552_v0 }
 0x8fd   : > { %19839 = vmatprep.subr.bf16.mxu1 %v22557_v40 }
 0x900   : > { %19840 = vmatpush1.bf16.msra.mxu1 %v22555_v61 }
 0x901   : > { %19841 = vmatprep.subr.bf16.mxu1 %v22560_v45 }
 0x904   : > { %19842 = vmatpush1.bf16.msra.mxu1 %v22558_v38 }
 0x905   : > { %19843 = vmatprep.subr.bf16.mxu1 %v22563_v35 }
 0x908   : > { %19844 = vmatpush1.bf16.msra.mxu1 %v22561_v52 }
 0x909   : > { %19845 = vmatprep.subr.bf16.mxu1 %v22566_v42 }
 0x90c   : > { %19846 = vmatpush1.bf16.msra.mxu1 %v22564_v41 }
 0x90d   : > { %19847 = vmatprep.subr.bf16.mxu1 %v22569_v27 }
 0x910   : > { %19848 = vmatpush1.bf16.msra.mxu1 %v22567_v48 }
 0x911   : > { %19849 = vmatprep.subr.bf16.mxu1 %v22572_v47 }
 0x914   : > { %19850 = vmatpush1.bf16.msra.mxu1 %v22570_v25 }
 0x915   : > { %19860 = vmatprep.subr.bf16.mxu1 %v22575_v37 }
 0x917   : > { %19852 = vmatmul.mubr.bf16.vlgmr.msra.gmra.mrb[48].mxu1 %v18014_v28 }
 0x918   : > { %19861 = vmatpush1.bf16.msra.mxu1 %v22573_v17  ;;  %19892 = vmatprep.mubr.bf16.mxu1 %v18024_v31 }
 0x919   : > { %19862 = vmatprep.subr.bf16.mxu1 %v22578_v3 }
 0x91c   : > { %19863 = vmatpush1.bf16.msra.mxu1 %v22576_v60 }
 0x91d   : > { %19864 = vmatprep.subr.bf16.mxu1 %v22581_v51 }
 0x920   : > { %19865 = vmatpush1.bf16.msra.mxu1 %v22579_v46 }
 0x921   : > { %19866 = vmatprep.subr.bf16.mxu1 %v22584_v53 }
 0x924   : > { %19867 = vmatpush1.bf16.msra.mxu1 %v22582_v44 }
 0x925   : > { %19868 = vmatprep.subr.bf16.mxu1 %v22587_v12 }
 0x928   : > { %19869 = vmatpush1.bf16.msra.mxu1 %v22585_v6 }
 0x929   : > { %19870 = vmatprep.subr.bf16.mxu1 %v22590_v36 }
 0x92c   : > { %19871 = vmatpush1.bf16.msra.mxu1 %v22588_v20 }
 0x92d   : > { %19872 = vmatprep.subr.bf16.mxu1 %v22593_v30 }
 0x930   : > { %19873 = vmatpush1.bf16.msra.mxu1 %v22591_v8 }
 0x931   : > { %19874 = vmatprep.subr.bf16.mxu1 %v22596_v14 }
 0x934   : > { %19875 = vmatpush1.bf16.msra.mxu1 %v22594_v24 }
 0x935   : > { %19876 = vmatprep.subr.bf16.mxu1 %v22599_v5 }
 0x938   : > { %19877 = vmatpush1.bf16.msra.mxu1 %v22597_v63 }
 0x939   : > { %19878 = vmatprep.subr.bf16.mxu1 %v22602_v19 }
 0x93c   : > { %19879 = vmatpush1.bf16.msra.mxu1 %v22600_v39 }
 0x93d   : > { %19880 = vmatprep.subr.bf16.mxu1 %v22605_v50 }
 0x940   : > { %19881 = vmatpush1.bf16.msra.mxu1 %v22603_v23 }
 0x941   : > { %19882 = vmatprep.subr.bf16.mxu1 %v22608_v29 }
 0x944   : > { %19883 = vmatpush1.bf16.msra.mxu1 %v22606_v22 }
 0x945   : > { %19884 = vmatprep.subr.bf16.mxu1 %v22611_v11 }
 0x948   : > { %19885 = vmatpush1.bf16.msra.mxu1 %v22609_v16 }
 0x949   : > { %19886 = vmatprep.subr.bf16.mxu1 %v22614_v34 }
 0x94c   : > { %19887 = vmatpush1.bf16.msra.mxu1 %v22612_v10 }
 0x94d   : > { %19888 = vmatprep.subr.bf16.mxu1 %v22617_v56 }
 0x950   : > { %19889 = vmatpush1.bf16.msra.mxu1 %v22615_v49 }
 0x951   : > { %19890 = vmatprep.subr.bf16.mxu1 %v22620_v58 }
 0x954   : > { %19891 = vmatpush1.bf16.msra.mxu1 %v22618_v62 }
 0x957   : > { %19893 = vmatmul.mubr.bf16.vlgmr.msra.gmra.mrb[48].mxu1 %v18020_v15 }
 0xa2a   : > { %v19894_v0 = vpop.f32.mrb[48].mxu1 }
 0xa2b   : > { %v21777_v40 = vadd.f32 %v19894_v0, %v19608_v18  ;;  %v19896_v61 = vpop.f32.mrb[49].mxu1 }
 0xa2c   : > { %v21779_v45 = vadd.f32 %v19896_v61, %v19610_v59  ;;  %v19898_v38 = vpop.f32.mrb[50].mxu1 }
 0xa2d   : > { %v19901_v35 = vmax.f32 %v21777_v40, 0.0  ;;  %v19899_v52 = vpop.f32.mrb[51].mxu1 }
 0xa2e   : > { %v19902_v42 = vmax.f32 %v21779_v45, 0.0 }
 0xa2f   : > { %v19903_v27 = vpack.c.bf16 %v19901_v35, %v19901_v35 }
 0xa30   : > { %v19904_v41 = vpack.c.bf16 %v19902_v42, %v19902_v42 }
 0xa32   : > { %20066 = vmatprep.mubr.bf16.mxu0 %v19904_v41 }
 0xa33   : > { %20067 = vmatmul.mubr.bf16.vlgmr.msra.gmra.mrb[220].mxu0 %v19903_v27 }
 0xb06   : > { %v21582_v48 = vpop.f32.mrb[220].mxu0 }
 0xb07   : > { %v21583_v57 = vpop.f32.mrb[221].mxu0 }
 0xb08   : > { %v21584_v47 = vadd.f32 %v21583_v57, %v21582_v48  ;;  %v21585_v43 = vpop.f32.mrb[222].mxu0 }
 0xb09   : > { %v21586_v25 = vpop.f32.mrb[223].mxu0 }
 0xb0a   : > { %v20069_v37 = vadd.f32 %v21584_v47, %v19937_v33 }
 0xb0c   : > { %20074 = vst [vmem:[%s378_s30] sm:$0x1] %v20069_v37 }
 0xb0d   : > { %22673 = shalt.err (!%p22670_p3)
}
 0xb0e   : > { %s22674_s16 = scalar_lea.hbm %s28954_s22, 16  ;;  %s22678_s12 = scalar_lea.hbm %s29007_s11, 32 }
 0xb0f   : > { %p22675_p4 = scmp.ne.s32.totalorder %s28954_s22, %s22674_s16  ;;  %p22679_p9 = scmp.lt.u32.totalorder %s28954_s22, %s29007_s11 }
 0xb10   : > { %p22680_p10 = scmp.lt.u32.totalorder %s22678_s12, %s22674_s16  ;;  %p22682_p12 = scmp.lt.u32.totalorder %s22674_s16, %s28954_s22 }
 0xb11   : > { %p22676_p7 = pnand %p22675_p4, %p22829_p5 }
 0xb12   : > { %p22681_p11 = por %p22680_p10, %p22679_p9 }
 0xb13   : > { %p22677_p8 = pneg %p22676_p7 }
 0xb14   : > { %p22683_p13 = por %p22682_p12, %p22681_p11 }
 0xb16   : > { %p22684_p0 = pnand %p22683_p13, %p22677_p8 }
 0xb18   : > { %22687 = shalt.err (!%p22684_p0)
}
 0xb19   : > { %21804 = dma.vmem_to_hbm [thread:$0]  (%p22829_p5), %s28956_s15, 16, %s28954_s22, %s20076_s24  }
 0xb1a PF: > { %p21810_p1 = scmp.ge.s32.totalorder %s22722_s20, 2  ;;  %s20100_s14 = sand.u32 1, %s22710_s17  }
 0xb1b   : > { %s20101_s0 = scalar_lea.sflag [#allocation7], %s20100_s14 }
 0xb1c   : > { %p21807_p2 = pnand %p21810_p1, %p22833_p6 }
 0xb1e   : > { %22705 = dma.done.wait (!%p21807_p2), %s20101_s0, 16  }
 0xb1f   : > { %22707 = vsyncadd (!%p21807_p2), %s20101_s0, 4294967280  ;;  %p21_p3 = scmp.ge.s32.totalorder %s22816_s23, 4   ;;  %s29211_s17 = smov %s22714_s18 }
 0xb20   : > { %s29212_s18 = smov %s22718_s19  ;;  %s29213_s19 = smov %s22827_s26 }
 0xb21   : > { %s29214_s20 = smov %s22816_s23  ;;  %23 = sbr.rel (!%p21_p3) target bundleno = 5 (0x5), region = 103 }
 0xb28   :  { %20105 = vsyncpa [#allocation7], 1 }
 0xb29   :  { %20107 = vsyncpa [#allocation7 + $0x1], 1 }

</bundles_post_ra>
